<compile_context>
chip_gen: v7x
topology: tpu7x:2x2x1
jax: 0.10.0
libtpu: 0.0.40
codegen_flags: <defaults>
</compile_context>

<pallas_src>
import functools

import numpy as np
import jax
import jax.numpy as jnp
from jax.experimental import pallas as pl
from jax.experimental.pallas import tpu as pltpu


# ---------------------------------------------------------------------------
# Fused whole-network Pallas kernel
# ---------------------------------------------------------------------------
def _vae_kernel(x_ref, eps_ref,
                e1r, e1g, e1b, e2r, e2g, e2b, e3r, e3g, e3b,
                mlr, mlg, mlb, dir_, dip, dib,
                d1s, d1r, d1b, d2s, d2r, d2b, d3s, d3r, d3b,
                xo_ref, mu_ref, lv_ref, *, latent_dim, lv_off):
    f32 = jnp.float32

    def enc_layer(x, r_ref, g_ref, b_ref):
        # x: (B*H, W*Cin).  One lane-dense weight matmul (4 height taps at
        # 128-aligned column offsets) + 4 tiny 0/1 selection matmuls.
        n = r_ref.shape[1] // 4
        y = jnp.dot(x, r_ref[...], preferred_element_type=f32)        # (B*H, 4N)
        acc = jnp.dot(g_ref[0], y[:, :n], preferred_element_type=f32)
        for t in range(1, 4):
            acc = acc + jnp.dot(g_ref[t], y[:, t * n:(t + 1) * n],
                                preferred_element_type=f32)
        return jnp.maximum(acc + b_ref[...], 0.0)                     # (B*Ho, Wo*Cout)

    def dec_layer(x, s_ref, r_ref, b_ref, act):
        # x: (B*h, w*Cin).  One selection matmul (4 output-row taps stacked along
        # sublanes) + 4 lane-dense weight matmuls, accumulated.
        mo = s_ref.shape[0] // 4
        zt = jnp.dot(s_ref[...], x, preferred_element_type=f32)       # (4*B*2h, w*Cin)
        acc = jnp.dot(zt[:mo], r_ref[0], preferred_element_type=f32)
        for t in range(1, 4):
            acc = acc + jnp.dot(zt[t * mo:(t + 1) * mo], r_ref[t],
                                preferred_element_type=f32)
        acc = acc + b_ref[...]
        return jnp.maximum(acc, 0.0) if act == "relu" else jax.nn.sigmoid(acc)

    # ---- encoder ----
    h = enc_layer(x_ref[...], e1r, e1g, e1b)
    h = enc_layer(h, e2r, e2g, e2b)
    h = enc_layer(h, e3r, e3g, e3b)                                   # (B*s, s*128)

    # ---- fused fc_mu | fc_logvar (single merged weight) + reparam + decoder_input
    ml = mlb[...]
    for t in range(mlg.shape[0]):
        ml = ml + jnp.dot(mlg[t],
                          jnp.dot(h, mlr[t], preferred_element_type=f32),
                          preferred_element_type=f32)                 # (B, lv_off+L)
    mu = ml[:, :latent_dim]
    logvar = ml[:, lv_off:lv_off + latent_dim]
    z = mu + eps_ref[...] * jnp.exp(0.5 * logvar)

    d = None
    for t in range(dip.shape[0]):
        part = jnp.dot(dip[t],
                       jnp.dot(z, dir_[t], preferred_element_type=f32) + dib[t],
                       preferred_element_type=f32)
        d = part if d is None else d + part                           # (B*s, s*128)

    # ---- decoder ----
    d = dec_layer(d, d1s, d1r, d1b, "relu")
    d = dec_layer(d, d2s, d2r, d2b, "relu")
    d = dec_layer(d, d3s, d3r, d3b, "sigmoid")                        # (B*HW, HW*nc)

    xo_ref[...] = d
    mu_ref[...] = mu
    lv_ref[...] = logvar


_PACKED_ORDER = ("e1_r", "e1_g", "e1_b", "e2_r", "e2_g", "e2_b",
                 "e3_r", "e3_g", "e3_b",
                 "ml_r", "ml_g", "ml_b", "di_r", "di_p", "di_b",
                 "d1_s", "d1_r", "d1_b", "d2_s", "d2_r", "d2_b",
                 "d3_s", "d3_r", "d3_b")


@functools.partial(jax.jit, static_argnames=("image_size", "latent_dim", "nc"))
def vae_forward(packed, x_nchw, eps, image_size=16, latent_dim=32, nc=3):
    B = x_nchw.shape[0]
    H = W = image_size
    lv_off = ((latent_dim + 127) // 128) * 128
    # Single boundary transform: NCHW -> row-flattened NHWC (rows = (b, y)).
    x_rows = jnp.transpose(x_nchw, (0, 2, 3, 1)).reshape(B * H, W * nc)

    out_rows, mu, logvar = pl.pallas_call(
        functools.partial(_vae_kernel, latent_dim=latent_dim, lv_off=lv_off),
        out_shape=(jax.ShapeDtypeStruct((B * H, W * nc), jnp.float32),
                   jax.ShapeDtypeStruct((B, latent_dim), jnp.float32),
                   jax.ShapeDtypeStruct((B, latent_dim), jnp.float32)),
        compiler_params=pltpu.CompilerParams(vmem_limit_bytes=32 * 1024 * 1024),
    )(x_rows, eps, *[packed[k] for k in _PACKED_ORDER])

    x_recon = out_rows.reshape(B, H, W, nc).transpose(0, 3, 1, 2)     # back to NCHW
    return x_recon, mu, logvar


# ---------------------------------------------------------------------------
# One-time packing: PyTorch-layout params -> matmul-ready matrices
# ---------------------------------------------------------------------------
def _conv_right(w, width):
    """Conv2d(k=4,s=2,p=1) width+channel matrix, 4 height taps hconcat.
    w: (Cout, Cin, 4, 4) OIHW  ->  (width*Cin, 4*(width//2)*Cout)."""
    cout, cin, _, _ = w.shape
    wo = width // 2
    n = wo * cout
    r = np.zeros((4, width * cin, n), np.float32)
    for ty in range(4):
        for xo in range(wo):
            for tx in range(4):
                u = 2 * xo + tx - 1
                if 0 <= u < width:
                    r[ty, u * cin:(u + 1) * cin, xo * cout:(xo + 1) * cout] = \
                        w[:, :, ty, tx].T
    return r.transpose(1, 0, 2).reshape(width * cin, 4 * n)


def _conv_left(batch, height):
    """0/1 height-tap row-selection matrices, (4, B*Ho, B*H)."""
    ho = height // 2
    g = np.zeros((4, batch * ho, batch * height), np.float32)
    for ty in range(4):
        for b in range(batch):
            for yo in range(ho):
                y = 2 * yo + ty - 1
                if 0 <= y < height:
                    g[ty, b * ho + yo, b * height + y] = 1.0
    return g


def _deconv_right(wt, width):
    """ConvTranspose2d(k=4,s=2,p=1) width+channel matrices, (4, width*Cin, 2*width*Cout).
    wt: (Cin, Cout, 4, 4) (PyTorch layout)."""
    cin, cout, _, _ = wt.shape
    wo = 2 * width
    r = np.zeros((4, width * cin, wo * cout), np.float32)
    for ty in range(4):
        for x in range(width):
            for xx in range(wo):
                tx = xx + 1 - 2 * x
                if 0 <= tx < 4:
                    r[ty, x * cin:(x + 1) * cin, xx * cout:(xx + 1) * cout] = \
                        wt[:, :, ty, tx]
    return r


def _deconv_left(batch, height):
    """0/1 output-row scatter matrices vstacked over the 4 height taps: (4*B*2h, B*h)."""
    ho = 2 * height
    s = np.zeros((4, batch * ho, batch * height), np.float32)
    for ty in range(4):
        for b in range(batch):
            for yy in range(ho):
                num = yy + 1 - ty
                if num % 2 == 0:
                    y = num // 2
                    if 0 <= y < height:
                        s[ty, b * ho + yy, b * height + y] = 1.0
    return s.reshape(4 * batch * ho, batch * height)


def pack_params(raw, image_size=16, batch=2):
    """Pack once into matmul-ready layouts.  The 0/1 selection matrices encode the
    batch size; re-pack if batch changes."""
    p = {}
    for name, hw in (("e1", image_size), ("e2", image_size // 2), ("e3", image_size // 4)):
        w = np.asarray(raw[name + "_w"], np.float32)
        b = np.asarray(raw[name + "_b"], np.float32)
        p[name + "_r"] = jnp.asarray(_conv_right(w, hw))
        p[name + "_g"] = jnp.asarray(_conv_left(batch, hw))
        p[name + "_b"] = jnp.asarray(np.tile(b, hw // 2).reshape(1, -1))

    s = image_size // 8
    c = np.asarray(raw["e3_w"]).shape[0]                      # 128
    lat = np.asarray(raw["fc_mu_w"]).shape[1]
    lv_off = ((lat + 127) // 128) * 128
    nml = lv_off + lat
    wmu = np.asarray(raw["fc_mu_w"], np.float32)
    wlv = np.asarray(raw["fc_lv_w"], np.float32)
    rml = np.zeros((s, s * c, nml), np.float32)
    for y in range(s):
        for x in range(s):
            for ch in range(c):
                src = ch * s * s + y * s + x                  # PyTorch NCHW flatten
                rml[y, x * c + ch, :lat] = wmu[src]
                rml[y, x * c + ch, lv_off:lv_off + lat] = wlv[src]
    bml = np.zeros((1, nml), np.float32)
    bml[0, :lat] = np.asarray(raw["fc_mu_b"])
    bml[0, lv_off:lv_off + lat] = np.asarray(raw["fc_lv_b"])
    gml = np.zeros((s, batch, batch * s), np.float32)
    for y in range(s):
        for b in range(batch):
            gml[y, b, b * s + y] = 1.0
    p["ml_r"], p["ml_g"], p["ml_b"] = map(jnp.asarray, (rml, gml, bml))

    wd = np.asarray(raw["dec_in_w"], np.float32)              # (latent, 128*s*s)
    bd = np.asarray(raw["dec_in_b"], np.float32)
    rd = np.zeros((s, lat, s * c), np.float32)
    bd2 = np.zeros((s, 1, s * c), np.float32)
    for y in range(s):
        for x in range(s):
            for ch in range(c):
                dst = ch * s * s + y * s + x
                rd[y, :, x * c + ch] = wd[:, dst]
                bd2[y, 0, x * c + ch] = bd[dst]
    pd = np.zeros((s, batch * s, batch), np.float32)
    for y in range(s):
        for b in range(batch):
            pd[y, b * s + y, b] = 1.0
    p["di_r"], p["di_p"], p["di_b"] = map(jnp.asarray, (rd, pd, bd2))

    for name, hw in (("d1", s), ("d2", 2 * s), ("d3", 4 * s)):
        wt = np.asarray(raw[name + "_w"], np.float32)
        b = np.asarray(raw[name + "_b"], np.float32)
        p[name + "_s"] = jnp.asarray(_deconv_left(batch, hw))
        p[name + "_r"] = jnp.asarray(_deconv_right(wt, hw))
        p[name + "_b"] = jnp.asarray(np.tile(b, 2 * hw).reshape(1, -1))
    return p


# ---------------------------------------------------------------------------
# Raw VAE parameters (PyTorch layouts)
# ---------------------------------------------------------------------------
def init_vae_params(key, image_size=16, latent_dim=32, nc=3):
    enc_out_dim = 128 * (image_size // 8) ** 2
    keys = jax.random.split(key, 18)
    sd = 0.05

    def w(k, shape):
        return jax.random.normal(k, shape, jnp.float32) * sd

    return {
        "e1_w": w(keys[0], (32, nc, 4, 4)),   "e1_b": w(keys[9], (32,)),
        "e2_w": w(keys[1], (64, 32, 4, 4)),   "e2_b": w(keys[10], (64,)),
        "e3_w": w(keys[2], (128, 64, 4, 4)),  "e3_b": w(keys[11], (128,)),
        "fc_mu_w": w(keys[3], (enc_out_dim, latent_dim)),
        "fc_mu_b": w(keys[12], (latent_dim,)),
        "fc_lv_w": w(keys[4], (enc_out_dim, latent_dim)),
        "fc_lv_b": w(keys[13], (latent_dim,)),
        "dec_in_w": w(keys[5], (latent_dim, enc_out_dim)),
        "dec_in_b": w(keys[14], (enc_out_dim,)),
        "d1_w": w(keys[6], (128, 64, 4, 4)),  "d1_b": w(keys[15], (64,)),
        "d2_w": w(keys[7], (64, 32, 4, 4)),   "d2_b": w(keys[16], (32,)),
        "d3_w": w(keys[8], (32, nc, 4, 4)),   "d3_b": w(keys[17], (nc,)),
    }


# ---------------------------------------------------------------------------
# Plain-XLA reference (mirrors the PyTorch module) for correctness cross-check
# ---------------------------------------------------------------------------
def vae_forward_reference(raw, x, eps, image_size=16):
    dn = ("NCHW", "OIHW", "NCHW")
    hp = jax.lax.Precision.HIGHEST

    def conv(x, w, b, stride, pad):
        y = jax.lax.conv_general_dilated(x, w, (stride, stride),
                                         ((pad, pad), (pad, pad)),
                                         dimension_numbers=dn, precision=hp)
        return y + b.reshape(1, -1, 1, 1)

    def deconv(x, wt, b, stride, pad):
        w = jnp.flip(wt, (2, 3)).transpose(1, 0, 2, 3)
        q = w.shape[2] - 1 - pad
        y = jax.lax.conv_general_dilated(x, w, (1, 1), ((q, q), (q, q)),
                                         lhs_dilation=(stride, stride),
                                         dimension_numbers=dn, precision=hp)
        return y + b.reshape(1, -1, 1, 1)

    B = x.shape[0]
    h = jax.nn.relu(conv(x, raw["e1_w"], raw["e1_b"], 2, 1))
    h = jax.nn.relu(conv(h, raw["e2_w"], raw["e2_b"], 2, 1))
    h = jax.nn.relu(conv(h, raw["e3_w"], raw["e3_b"], 2, 1))
    h = h.reshape(B, -1)
    mu = jnp.dot(h, raw["fc_mu_w"], precision=hp) + raw["fc_mu_b"]
    logvar = jnp.dot(h, raw["fc_lv_w"], precision=hp) + raw["fc_lv_b"]
    z = mu + eps * jnp.exp(0.5 * logvar)
    d = jnp.dot(z, raw["dec_in_w"], precision=hp) + raw["dec_in_b"]
    s = image_size // 8
    d = d.reshape(B, 128, s, s)
    d = jax.nn.relu(deconv(d, raw["d1_w"], raw["d1_b"], 2, 1))
    d = jax.nn.relu(deconv(d, raw["d2_w"], raw["d2_b"], 2, 1))
    x_recon = jax.nn.sigmoid(deconv(d, raw["d3_w"], raw["d3_b"], 2, 1))
    return x_recon, mu, logvar


if __name__ == "__main__":
    image_size, latent_dim, nc, batch = 16, 32, 3, 2

    key = jax.random.PRNGKey(0)
    k_params, k_x, k_eps = jax.random.split(key, 3)

    raw = init_vae_params(k_params, image_size, latent_dim, nc)
    packed = pack_params(raw, image_size=image_size, batch=batch)

    x = jax.random.normal(k_x, (batch, nc, image_size, image_size), jnp.float32)
    eps = jax.random.normal(k_eps, (batch, latent_dim), jnp.float32)

    x_recon, mu, logvar = vae_forward(packed, x, eps,
                                      image_size=image_size,
                                      latent_dim=latent_dim, nc=nc)
    jax.block_until_ready((x_recon, mu, logvar))

    assert x_recon.shape == (batch, nc, image_size, image_size)
    assert mu.shape == (batch, latent_dim)
    assert logvar.shape == (batch, latent_dim)
    assert bool(jnp.all(jnp.isfinite(x_recon)))
    assert bool(jnp.all((x_recon >= 0.0) & (x_recon <= 1.0)))  # sigmoid output

    # Cross-check the fused Pallas kernel against a plain-XLA mirror of the module.
    xr_ref, mu_ref, lv_ref = vae_forward_reference(raw, x, eps, image_size)
    assert float(jnp.max(jnp.abs(mu - mu_ref))) < 3e-2
    assert float(jnp.max(jnp.abs(logvar - lv_ref))) < 3e-2
    assert float(jnp.max(jnp.abs(x_recon - xr_ref))) < 1e-2

    print("KERNEL_OK")
</pallas_src>

<mosaic_0001>
module attributes {stable_mosaic.version = 11 : i64} {
  func.func @_vae_kernel(%arg0: memref<32x48xf32, #tpu.memory_space<vmem>>, %arg1: memref<2x32xf32, #tpu.memory_space<vmem>>, %arg2: memref<48x1024xf32, #tpu.memory_space<vmem>>, %arg3: memref<4x16x32xf32, #tpu.memory_space<vmem>>, %arg4: memref<1x256xf32, #tpu.memory_space<vmem>>, %arg5: memref<256x1024xf32, #tpu.memory_space<vmem>>, %arg6: memref<4x8x16xf32, #tpu.memory_space<vmem>>, %arg7: memref<1x256xf32, #tpu.memory_space<vmem>>, %arg8: memref<256x1024xf32, #tpu.memory_space<vmem>>, %arg9: memref<4x4x8xf32, #tpu.memory_space<vmem>>, %arg10: memref<1x256xf32, #tpu.memory_space<vmem>>, %arg11: memref<2x256x160xf32, #tpu.memory_space<vmem>>, %arg12: memref<2x2x4xf32, #tpu.memory_space<vmem>>, %arg13: memref<1x160xf32, #tpu.memory_space<vmem>>, %arg14: memref<2x32x256xf32, #tpu.memory_space<vmem>>, %arg15: memref<2x4x2xf32, #tpu.memory_space<vmem>>, %arg16: memref<2x1x256xf32, #tpu.memory_space<vmem>>, %arg17: memref<32x4xf32, #tpu.memory_space<vmem>>, %arg18: memref<4x256x256xf32, #tpu.memory_space<vmem>>, %arg19: memref<1x256xf32, #tpu.memory_space<vmem>>, %arg20: memref<64x8xf32, #tpu.memory_space<vmem>>, %arg21: memref<4x256x256xf32, #tpu.memory_space<vmem>>, %arg22: memref<1x256xf32, #tpu.memory_space<vmem>>, %arg23: memref<128x16xf32, #tpu.memory_space<vmem>>, %arg24: memref<4x256x48xf32, #tpu.memory_space<vmem>>, %arg25: memref<1x48xf32, #tpu.memory_space<vmem>>, %arg26: memref<32x48xf32, #tpu.memory_space<vmem>>, %arg27: memref<2x32xf32, #tpu.memory_space<vmem>>, %arg28: memref<2x32xf32, #tpu.memory_space<vmem>>) attributes {dimension_semantics = [], scalar_prefetch = 0 : i64, scratch_operands = 0 : i64, tpu.core_type = #tpu.core_type<tc>} {
    %c0 = arith.constant 0 : index
    %c0_0 = arith.constant 0 : index
    %0 = vector.load %arg0[%c0, %c0_0] : memref<32x48xf32, #tpu.memory_space<vmem>>, vector<32x48xf32>
    %c0_1 = arith.constant 0 : index
    %c0_2 = arith.constant 0 : index
    %1 = vector.load %arg2[%c0_1, %c0_2] : memref<48x1024xf32, #tpu.memory_space<vmem>>, vector<48x1024xf32>
    %cst = arith.constant dense<0.000000e+00> : vector<32x1024xf32>
    %2 = tpu.matmul %0, %1, %cst {dimension_numbers = #tpu.dot_dimension_numbers<[1], [0], [0], [1], [0, 0, 1, 1], [], []>} : vector<32x48xf32>, vector<48x1024xf32>, vector<32x1024xf32> -> vector<32x1024xf32>
    %c0_3 = arith.constant 0 : index
    %c0_4 = arith.constant 0 : index
    %c0_5 = arith.constant 0 : index
    %3 = vector.load %arg3[%c0_3, %c0_4, %c0_5] : memref<4x16x32xf32, #tpu.memory_space<vmem>>, vector<1x16x32xf32>
    %4 = vector.shape_cast %3 : vector<1x16x32xf32> to vector<16x32xf32>
    %5 = vector.extract_strided_slice %2 {offsets = [0, 0], sizes = [32, 256], strides = [1, 1]} : vector<32x1024xf32> to vector<32x256xf32>
    %cst_6 = arith.constant dense<0.000000e+00> : vector<16x256xf32>
    %6 = tpu.matmul %4, %5, %cst_6 {dimension_numbers = #tpu.dot_dimension_numbers<[1], [0], [0], [1], [0, 0, 1, 1], [], []>} : vector<16x32xf32>, vector<32x256xf32>, vector<16x256xf32> -> vector<16x256xf32>
    %c1 = arith.constant 1 : index
    %c0_7 = arith.constant 0 : index
    %c0_8 = arith.constant 0 : index
    %7 = vector.load %arg3[%c1, %c0_7, %c0_8] : memref<4x16x32xf32, #tpu.memory_space<vmem>>, vector<1x16x32xf32>
    %8 = vector.shape_cast %7 : vector<1x16x32xf32> to vector<16x32xf32>
    %9 = vector.extract_strided_slice %2 {offsets = [0, 256], sizes = [32, 256], strides = [1, 1]} : vector<32x1024xf32> to vector<32x256xf32>
    %cst_9 = arith.constant dense<0.000000e+00> : vector<16x256xf32>
    %10 = tpu.matmul %8, %9, %cst_9 {dimension_numbers = #tpu.dot_dimension_numbers<[1], [0], [0], [1], [0, 0, 1, 1], [], []>} : vector<16x32xf32>, vector<32x256xf32>, vector<16x256xf32> -> vector<16x256xf32>
    %11 = arith.addf %6, %10 : vector<16x256xf32>
    %c2 = arith.constant 2 : index
    %c0_10 = arith.constant 0 : index
    %c0_11 = arith.constant 0 : index
    %12 = vector.load %arg3[%c2, %c0_10, %c0_11] : memref<4x16x32xf32, #tpu.memory_space<vmem>>, vector<1x16x32xf32>
    %13 = vector.shape_cast %12 : vector<1x16x32xf32> to vector<16x32xf32>
    %14 = vector.extract_strided_slice %2 {offsets = [0, 512], sizes = [32, 256], strides = [1, 1]} : vector<32x1024xf32> to vector<32x256xf32>
    %cst_12 = arith.constant dense<0.000000e+00> : vector<16x256xf32>
    %15 = tpu.matmul %13, %14, %cst_12 {dimension_numbers = #tpu.dot_dimension_numbers<[1], [0], [0], [1], [0, 0, 1, 1], [], []>} : vector<16x32xf32>, vector<32x256xf32>, vector<16x256xf32> -> vector<16x256xf32>
    %16 = arith.addf %11, %15 : vector<16x256xf32>
    %c3 = arith.constant 3 : index
    %c0_13 = arith.constant 0 : index
    %c0_14 = arith.constant 0 : index
    %17 = vector.load %arg3[%c3, %c0_13, %c0_14] : memref<4x16x32xf32, #tpu.memory_space<vmem>>, vector<1x16x32xf32>
    %18 = vector.shape_cast %17 : vector<1x16x32xf32> to vector<16x32xf32>
    %19 = vector.extract_strided_slice %2 {offsets = [0, 768], sizes = [32, 256], strides = [1, 1]} : vector<32x1024xf32> to vector<32x256xf32>
    %cst_15 = arith.constant dense<0.000000e+00> : vector<16x256xf32>
    %20 = tpu.matmul %18, %19, %cst_15 {dimension_numbers = #tpu.dot_dimension_numbers<[1], [0], [0], [1], [0, 0, 1, 1], [], []>} : vector<16x32xf32>, vector<32x256xf32>, vector<16x256xf32> -> vector<16x256xf32>
    %21 = arith.addf %16, %20 : vector<16x256xf32>
    %c0_16 = arith.constant 0 : index
    %c0_17 = arith.constant 0 : index
    %22 = vector.load %arg4[%c0_16, %c0_17] : memref<1x256xf32, #tpu.memory_space<vmem>>, vector<1x256xf32>
    %23 = vector.broadcast %22 : vector<1x256xf32> to vector<16x256xf32>
    %24 = arith.addf %21, %23 : vector<16x256xf32>
    %cst_18 = arith.constant 0.000000e+00 : f32
    %25 = vector.broadcast %cst_18 : f32 to vector<16x256xf32>
    %26 = arith.maximumf %24, %25 : vector<16x256xf32>
    %c0_19 = arith.constant 0 : index
    %c0_20 = arith.constant 0 : index
    %27 = vector.load %arg5[%c0_19, %c0_20] : memref<256x1024xf32, #tpu.memory_space<vmem>>, vector<256x1024xf32>
    %cst_21 = arith.constant dense<0.000000e+00> : vector<16x1024xf32>
    %28 = tpu.matmul %26, %27, %cst_21 {dimension_numbers = #tpu.dot_dimension_numbers<[1], [0], [0], [1], [0, 0, 1, 1], [], []>} : vector<16x256xf32>, vector<256x1024xf32>, vector<16x1024xf32> -> vector<16x1024xf32>
    %c0_22 = arith.constant 0 : index
    %c0_23 = arith.constant 0 : index
    %c0_24 = arith.constant 0 : index
    %29 = vector.load %arg6[%c0_22, %c0_23, %c0_24] : memref<4x8x16xf32, #tpu.memory_space<vmem>>, vector<1x8x16xf32>
    %30 = vector.shape_cast %29 : vector<1x8x16xf32> to vector<8x16xf32>
    %31 = vector.extract_strided_slice %28 {offsets = [0, 0], sizes = [16, 256], strides = [1, 1]} : vector<16x1024xf32> to vector<16x256xf32>
    %cst_25 = arith.constant dense<0.000000e+00> : vector<8x256xf32>
    %32 = tpu.matmul %30, %31, %cst_25 {dimension_numbers = #tpu.dot_dimension_numbers<[1], [0], [0], [1], [0, 0, 1, 1], [], []>} : vector<8x16xf32>, vector<16x256xf32>, vector<8x256xf32> -> vector<8x256xf32>
    %c1_26 = arith.constant 1 : index
    %c0_27 = arith.constant 0 : index
    %c0_28 = arith.constant 0 : index
    %33 = vector.load %arg6[%c1_26, %c0_27, %c0_28] : memref<4x8x16xf32, #tpu.memory_space<vmem>>, vector<1x8x16xf32>
    %34 = vector.shape_cast %33 : vector<1x8x16xf32> to vector<8x16xf32>
    %35 = vector.extract_strided_slice %28 {offsets = [0, 256], sizes = [16, 256], strides = [1, 1]} : vector<16x1024xf32> to vector<16x256xf32>
    %cst_29 = arith.constant dense<0.000000e+00> : vector<8x256xf32>
    %36 = tpu.matmul %34, %35, %cst_29 {dimension_numbers = #tpu.dot_dimension_numbers<[1], [0], [0], [1], [0, 0, 1, 1], [], []>} : vector<8x16xf32>, vector<16x256xf32>, vector<8x256xf32> -> vector<8x256xf32>
    %37 = arith.addf %32, %36 : vector<8x256xf32>
    %c2_30 = arith.constant 2 : index
    %c0_31 = arith.constant 0 : index
    %c0_32 = arith.constant 0 : index
    %38 = vector.load %arg6[%c2_30, %c0_31, %c0_32] : memref<4x8x16xf32, #tpu.memory_space<vmem>>, vector<1x8x16xf32>
    %39 = vector.shape_cast %38 : vector<1x8x16xf32> to vector<8x16xf32>
    %40 = vector.extract_strided_slice %28 {offsets = [0, 512], sizes = [16, 256], strides = [1, 1]} : vector<16x1024xf32> to vector<16x256xf32>
    %cst_33 = arith.constant dense<0.000000e+00> : vector<8x256xf32>
    %41 = tpu.matmul %39, %40, %cst_33 {dimension_numbers = #tpu.dot_dimension_numbers<[1], [0], [0], [1], [0, 0, 1, 1], [], []>} : vector<8x16xf32>, vector<16x256xf32>, vector<8x256xf32> -> vector<8x256xf32>
    %42 = arith.addf %37, %41 : vector<8x256xf32>
    %c3_34 = arith.constant 3 : index
    %c0_35 = arith.constant 0 : index
    %c0_36 = arith.constant 0 : index
    %43 = vector.load %arg6[%c3_34, %c0_35, %c0_36] : memref<4x8x16xf32, #tpu.memory_space<vmem>>, vector<1x8x16xf32>
    %44 = vector.shape_cast %43 : vector<1x8x16xf32> to vector<8x16xf32>
    %45 = vector.extract_strided_slice %28 {offsets = [0, 768], sizes = [16, 256], strides = [1, 1]} : vector<16x1024xf32> to vector<16x256xf32>
    %cst_37 = arith.constant dense<0.000000e+00> : vector<8x256xf32>
    %46 = tpu.matmul %44, %45, %cst_37 {dimension_numbers = #tpu.dot_dimension_numbers<[1], [0], [0], [1], [0, 0, 1, 1], [], []>} : vector<8x16xf32>, vector<16x256xf32>, vector<8x256xf32> -> vector<8x256xf32>
    %47 = arith.addf %42, %46 : vector<8x256xf32>
    %c0_38 = arith.constant 0 : index
    %c0_39 = arith.constant 0 : index
    %48 = vector.load %arg7[%c0_38, %c0_39] : memref<1x256xf32, #tpu.memory_space<vmem>>, vector<1x256xf32>
    %49 = vector.broadcast %48 : vector<1x256xf32> to vector<8x256xf32>
    %50 = arith.addf %47, %49 : vector<8x256xf32>
    %cst_40 = arith.constant 0.000000e+00 : f32
    %51 = vector.broadcast %cst_40 : f32 to vector<8x256xf32>
    %52 = arith.maximumf %50, %51 : vector<8x256xf32>
    %c0_41 = arith.constant 0 : index
    %c0_42 = arith.constant 0 : index
    %53 = vector.load %arg8[%c0_41, %c0_42] : memref<256x1024xf32, #tpu.memory_space<vmem>>, vector<256x1024xf32>
    %cst_43 = arith.constant dense<0.000000e+00> : vector<8x1024xf32>
    %54 = tpu.matmul %52, %53, %cst_43 {dimension_numbers = #tpu.dot_dimension_numbers<[1], [0], [0], [1], [0, 0, 1, 1], [], []>} : vector<8x256xf32>, vector<256x1024xf32>, vector<8x1024xf32> -> vector<8x1024xf32>
    %c0_44 = arith.constant 0 : index
    %c0_45 = arith.constant 0 : index
    %c0_46 = arith.constant 0 : index
    %55 = vector.load %arg9[%c0_44, %c0_45, %c0_46] : memref<4x4x8xf32, #tpu.memory_space<vmem>>, vector<1x4x8xf32>
    %56 = vector.shape_cast %55 : vector<1x4x8xf32> to vector<4x8xf32>
    %57 = vector.extract_strided_slice %54 {offsets = [0, 0], sizes = [8, 256], strides = [1, 1]} : vector<8x1024xf32> to vector<8x256xf32>
    %cst_47 = arith.constant dense<0.000000e+00> : vector<4x256xf32>
    %58 = tpu.matmul %56, %57, %cst_47 {dimension_numbers = #tpu.dot_dimension_numbers<[1], [0], [0], [1], [0, 0, 1, 1], [], []>} : vector<4x8xf32>, vector<8x256xf32>, vector<4x256xf32> -> vector<4x256xf32>
    %c1_48 = arith.constant 1 : index
    %c0_49 = arith.constant 0 : index
    %c0_50 = arith.constant 0 : index
    %59 = vector.load %arg9[%c1_48, %c0_49, %c0_50] : memref<4x4x8xf32, #tpu.memory_space<vmem>>, vector<1x4x8xf32>
    %60 = vector.shape_cast %59 : vector<1x4x8xf32> to vector<4x8xf32>
    %61 = vector.extract_strided_slice %54 {offsets = [0, 256], sizes = [8, 256], strides = [1, 1]} : vector<8x1024xf32> to vector<8x256xf32>
    %cst_51 = arith.constant dense<0.000000e+00> : vector<4x256xf32>
    %62 = tpu.matmul %60, %61, %cst_51 {dimension_numbers = #tpu.dot_dimension_numbers<[1], [0], [0], [1], [0, 0, 1, 1], [], []>} : vector<4x8xf32>, vector<8x256xf32>, vector<4x256xf32> -> vector<4x256xf32>
    %63 = arith.addf %58, %62 : vector<4x256xf32>
    %c2_52 = arith.constant 2 : index
    %c0_53 = arith.constant 0 : index
    %c0_54 = arith.constant 0 : index
    %64 = vector.load %arg9[%c2_52, %c0_53, %c0_54] : memref<4x4x8xf32, #tpu.memory_space<vmem>>, vector<1x4x8xf32>
    %65 = vector.shape_cast %64 : vector<1x4x8xf32> to vector<4x8xf32>
    %66 = vector.extract_strided_slice %54 {offsets = [0, 512], sizes = [8, 256], strides = [1, 1]} : vector<8x1024xf32> to vector<8x256xf32>
    %cst_55 = arith.constant dense<0.000000e+00> : vector<4x256xf32>
    %67 = tpu.matmul %65, %66, %cst_55 {dimension_numbers = #tpu.dot_dimension_numbers<[1], [0], [0], [1], [0, 0, 1, 1], [], []>} : vector<4x8xf32>, vector<8x256xf32>, vector<4x256xf32> -> vector<4x256xf32>
    %68 = arith.addf %63, %67 : vector<4x256xf32>
    %c3_56 = arith.constant 3 : index
    %c0_57 = arith.constant 0 : index
    %c0_58 = arith.constant 0 : index
    %69 = vector.load %arg9[%c3_56, %c0_57, %c0_58] : memref<4x4x8xf32, #tpu.memory_space<vmem>>, vector<1x4x8xf32>
    %70 = vector.shape_cast %69 : vector<1x4x8xf32> to vector<4x8xf32>
    %71 = vector.extract_strided_slice %54 {offsets = [0, 768], sizes = [8, 256], strides = [1, 1]} : vector<8x1024xf32> to vector<8x256xf32>
    %cst_59 = arith.constant dense<0.000000e+00> : vector<4x256xf32>
    %72 = tpu.matmul %70, %71, %cst_59 {dimension_numbers = #tpu.dot_dimension_numbers<[1], [0], [0], [1], [0, 0, 1, 1], [], []>} : vector<4x8xf32>, vector<8x256xf32>, vector<4x256xf32> -> vector<4x256xf32>
    %73 = arith.addf %68, %72 : vector<4x256xf32>
    %c0_60 = arith.constant 0 : index
    %c0_61 = arith.constant 0 : index
    %74 = vector.load %arg10[%c0_60, %c0_61] : memref<1x256xf32, #tpu.memory_space<vmem>>, vector<1x256xf32>
    %75 = vector.broadcast %74 : vector<1x256xf32> to vector<4x256xf32>
    %76 = arith.addf %73, %75 : vector<4x256xf32>
    %cst_62 = arith.constant 0.000000e+00 : f32
    %77 = vector.broadcast %cst_62 : f32 to vector<4x256xf32>
    %78 = arith.maximumf %76, %77 : vector<4x256xf32>
    %c0_63 = arith.constant 0 : index
    %c0_64 = arith.constant 0 : index
    %79 = vector.load %arg13[%c0_63, %c0_64] : memref<1x160xf32, #tpu.memory_space<vmem>>, vector<1x160xf32>
    %c0_65 = arith.constant 0 : index
    %c0_66 = arith.constant 0 : index
    %c0_67 = arith.constant 0 : index
    %80 = vector.load %arg12[%c0_65, %c0_66, %c0_67] : memref<2x2x4xf32, #tpu.memory_space<vmem>>, vector<1x2x4xf32>
    %81 = vector.shape_cast %80 : vector<1x2x4xf32> to vector<2x4xf32>
    %c0_68 = arith.constant 0 : index
    %c0_69 = arith.constant 0 : index
    %c0_70 = arith.constant 0 : index
    %82 = vector.load %arg11[%c0_68, %c0_69, %c0_70] : memref<2x256x160xf32, #tpu.memory_space<vmem>>, vector<1x256x160xf32>
    %83 = vector.shape_cast %82 : vector<1x256x160xf32> to vector<256x160xf32>
    %cst_71 = arith.constant dense<0.000000e+00> : vector<4x160xf32>
    %84 = tpu.matmul %78, %83, %cst_71 {dimension_numbers = #tpu.dot_dimension_numbers<[1], [0], [0], [1], [0, 0, 1, 1], [], []>} : vector<4x256xf32>, vector<256x160xf32>, vector<4x160xf32> -> vector<4x160xf32>
    %cst_72 = arith.constant dense<0.000000e+00> : vector<2x160xf32>
    %85 = tpu.matmul %81, %84, %cst_72 {dimension_numbers = #tpu.dot_dimension_numbers<[1], [0], [0], [1], [0, 0, 1, 1], [], []>} : vector<2x4xf32>, vector<4x160xf32>, vector<2x160xf32> -> vector<2x160xf32>
    %86 = vector.broadcast %79 : vector<1x160xf32> to vector<2x160xf32>
    %87 = arith.addf %86, %85 : vector<2x160xf32>
    %c1_73 = arith.constant 1 : index
    %c0_74 = arith.constant 0 : index
    %c0_75 = arith.constant 0 : index
    %88 = vector.load %arg12[%c1_73, %c0_74, %c0_75] : memref<2x2x4xf32, #tpu.memory_space<vmem>>, vector<1x2x4xf32>
    %89 = vector.shape_cast %88 : vector<1x2x4xf32> to vector<2x4xf32>
    %c1_76 = arith.constant 1 : index
    %c0_77 = arith.constant 0 : index
    %c0_78 = arith.constant 0 : index
    %90 = vector.load %arg11[%c1_76, %c0_77, %c0_78] : memref<2x256x160xf32, #tpu.memory_space<vmem>>, vector<1x256x160xf32>
    %91 = vector.shape_cast %90 : vector<1x256x160xf32> to vector<256x160xf32>
    %cst_79 = arith.constant dense<0.000000e+00> : vector<4x160xf32>
    %92 = tpu.matmul %78, %91, %cst_79 {dimension_numbers = #tpu.dot_dimension_numbers<[1], [0], [0], [1], [0, 0, 1, 1], [], []>} : vector<4x256xf32>, vector<256x160xf32>, vector<4x160xf32> -> vector<4x160xf32>
    %cst_80 = arith.constant dense<0.000000e+00> : vector<2x160xf32>
    %93 = tpu.matmul %89, %92, %cst_80 {dimension_numbers = #tpu.dot_dimension_numbers<[1], [0], [0], [1], [0, 0, 1, 1], [], []>} : vector<2x4xf32>, vector<4x160xf32>, vector<2x160xf32> -> vector<2x160xf32>
    %94 = arith.addf %87, %93 : vector<2x160xf32>
    %95 = vector.extract_strided_slice %94 {offsets = [0, 0], sizes = [2, 32], strides = [1, 1]} : vector<2x160xf32> to vector<2x32xf32>
    %96 = vector.extract_strided_slice %94 {offsets = [0, 128], sizes = [2, 32], strides = [1, 1]} : vector<2x160xf32> to vector<2x32xf32>
    %c0_81 = arith.constant 0 : index
    %c0_82 = arith.constant 0 : index
    %97 = vector.load %arg1[%c0_81, %c0_82] : memref<2x32xf32, #tpu.memory_space<vmem>>, vector<2x32xf32>
    %cst_83 = arith.constant 5.000000e-01 : f32
    %98 = vector.broadcast %cst_83 : f32 to vector<2x32xf32>
    %99 = arith.mulf %98, %96 : vector<2x32xf32>
    %100 = math.exp %99 : vector<2x32xf32>
    %101 = arith.mulf %97, %100 : vector<2x32xf32>
    %102 = arith.addf %95, %101 : vector<2x32xf32>
    %c0_84 = arith.constant 0 : index
    %c0_85 = arith.constant 0 : index
    %c0_86 = arith.constant 0 : index
    %103 = vector.load %arg15[%c0_84, %c0_85, %c0_86] : memref<2x4x2xf32, #tpu.memory_space<vmem>>, vector<1x4x2xf32>
    %104 = vector.shape_cast %103 : vector<1x4x2xf32> to vector<4x2xf32>
    %c0_87 = arith.constant 0 : index
    %c0_88 = arith.constant 0 : index
    %c0_89 = arith.constant 0 : index
    %105 = vector.load %arg14[%c0_87, %c0_88, %c0_89] : memref<2x32x256xf32, #tpu.memory_space<vmem>>, vector<1x32x256xf32>
    %106 = vector.shape_cast %105 : vector<1x32x256xf32> to vector<32x256xf32>
    %cst_90 = arith.constant dense<0.000000e+00> : vector<2x256xf32>
    %107 = tpu.matmul %102, %106, %cst_90 {dimension_numbers = #tpu.dot_dimension_numbers<[1], [0], [0], [1], [0, 0, 1, 1], [], []>} : vector<2x32xf32>, vector<32x256xf32>, vector<2x256xf32> -> vector<2x256xf32>
    %c0_91 = arith.constant 0 : index
    %c0_92 = arith.constant 0 : index
    %c0_93 = arith.constant 0 : index
    %108 = vector.load %arg16[%c0_91, %c0_92, %c0_93] : memref<2x1x256xf32, #tpu.memory_space<vmem>>, vector<1x1x256xf32>
    %109 = vector.shape_cast %108 : vector<1x1x256xf32> to vector<1x256xf32>
    %110 = vector.broadcast %109 : vector<1x256xf32> to vector<2x256xf32>
    %111 = arith.addf %107, %110 : vector<2x256xf32>
    %cst_94 = arith.constant dense<0.000000e+00> : vector<4x256xf32>
    %112 = tpu.matmul %104, %111, %cst_94 {dimension_numbers = #tpu.dot_dimension_numbers<[1], [0], [0], [1], [0, 0, 1, 1], [], []>} : vector<4x2xf32>, vector<2x256xf32>, vector<4x256xf32> -> vector<4x256xf32>
    %c1_95 = arith.constant 1 : index
    %c0_96 = arith.constant 0 : index
    %c0_97 = arith.constant 0 : index
    %113 = vector.load %arg15[%c1_95, %c0_96, %c0_97] : memref<2x4x2xf32, #tpu.memory_space<vmem>>, vector<1x4x2xf32>
    %114 = vector.shape_cast %113 : vector<1x4x2xf32> to vector<4x2xf32>
    %c1_98 = arith.constant 1 : index
    %c0_99 = arith.constant 0 : index
    %c0_100 = arith.constant 0 : index
    %115 = vector.load %arg14[%c1_98, %c0_99, %c0_100] : memref<2x32x256xf32, #tpu.memory_space<vmem>>, vector<1x32x256xf32>
    %116 = vector.shape_cast %115 : vector<1x32x256xf32> to vector<32x256xf32>
    %cst_101 = arith.constant dense<0.000000e+00> : vector<2x256xf32>
    %117 = tpu.matmul %102, %116, %cst_101 {dimension_numbers = #tpu.dot_dimension_numbers<[1], [0], [0], [1], [0, 0, 1, 1], [], []>} : vector<2x32xf32>, vector<32x256xf32>, vector<2x256xf32> -> vector<2x256xf32>
    %c1_102 = arith.constant 1 : index
    %c0_103 = arith.constant 0 : index
    %c0_104 = arith.constant 0 : index
    %118 = vector.load %arg16[%c1_102, %c0_103, %c0_104] : memref<2x1x256xf32, #tpu.memory_space<vmem>>, vector<1x1x256xf32>
    %119 = vector.shape_cast %118 : vector<1x1x256xf32> to vector<1x256xf32>
    %120 = vector.broadcast %119 : vector<1x256xf32> to vector<2x256xf32>
    %121 = arith.addf %117, %120 : vector<2x256xf32>
    %cst_105 = arith.constant dense<0.000000e+00> : vector<4x256xf32>
    %122 = tpu.matmul %114, %121, %cst_105 {dimension_numbers = #tpu.dot_dimension_numbers<[1], [0], [0], [1], [0, 0, 1, 1], [], []>} : vector<4x2xf32>, vector<2x256xf32>, vector<4x256xf32> -> vector<4x256xf32>
    %123 = arith.addf %112, %122 : vector<4x256xf32>
    %c0_106 = arith.constant 0 : index
    %c0_107 = arith.constant 0 : index
    %124 = vector.load %arg17[%c0_106, %c0_107] : memref<32x4xf32, #tpu.memory_space<vmem>>, vector<32x4xf32>
    %cst_108 = arith.constant dense<0.000000e+00> : vector<32x256xf32>
    %125 = tpu.matmul %124, %123, %cst_108 {dimension_numbers = #tpu.dot_dimension_numbers<[1], [0], [0], [1], [0, 0, 1, 1], [], []>} : vector<32x4xf32>, vector<4x256xf32>, vector<32x256xf32> -> vector<32x256xf32>
    %126 = vector.extract_strided_slice %125 {offsets = [0, 0], sizes = [8, 256], strides = [1, 1]} : vector<32x256xf32> to vector<8x256xf32>
    %c0_109 = arith.constant 0 : index
    %c0_110 = arith.constant 0 : index
    %c0_111 = arith.constant 0 : index
    %127 = vector.load %arg18[%c0_109, %c0_110, %c0_111] : memref<4x256x256xf32, #tpu.memory_space<vmem>>, vector<1x256x256xf32>
    %128 = vector.shape_cast %127 : vector<1x256x256xf32> to vector<256x256xf32>
    %cst_112 = arith.constant dense<0.000000e+00> : vector<8x256xf32>
    %129 = tpu.matmul %126, %128, %cst_112 {dimension_numbers = #tpu.dot_dimension_numbers<[1], [0], [0], [1], [0, 0, 1, 1], [], []>} : vector<8x256xf32>, vector<256x256xf32>, vector<8x256xf32> -> vector<8x256xf32>
    %130 = vector.extract_strided_slice %125 {offsets = [8, 0], sizes = [8, 256], strides = [1, 1]} : vector<32x256xf32> to vector<8x256xf32>
    %c1_113 = arith.constant 1 : index
    %c0_114 = arith.constant 0 : index
    %c0_115 = arith.constant 0 : index
    %131 = vector.load %arg18[%c1_113, %c0_114, %c0_115] : memref<4x256x256xf32, #tpu.memory_space<vmem>>, vector<1x256x256xf32>
    %132 = vector.shape_cast %131 : vector<1x256x256xf32> to vector<256x256xf32>
    %cst_116 = arith.constant dense<0.000000e+00> : vector<8x256xf32>
    %133 = tpu.matmul %130, %132, %cst_116 {dimension_numbers = #tpu.dot_dimension_numbers<[1], [0], [0], [1], [0, 0, 1, 1], [], []>} : vector<8x256xf32>, vector<256x256xf32>, vector<8x256xf32> -> vector<8x256xf32>
    %134 = arith.addf %129, %133 : vector<8x256xf32>
    %135 = vector.extract_strided_slice %125 {offsets = [16, 0], sizes = [8, 256], strides = [1, 1]} : vector<32x256xf32> to vector<8x256xf32>
    %c2_117 = arith.constant 2 : index
    %c0_118 = arith.constant 0 : index
    %c0_119 = arith.constant 0 : index
    %136 = vector.load %arg18[%c2_117, %c0_118, %c0_119] : memref<4x256x256xf32, #tpu.memory_space<vmem>>, vector<1x256x256xf32>
    %137 = vector.shape_cast %136 : vector<1x256x256xf32> to vector<256x256xf32>
    %cst_120 = arith.constant dense<0.000000e+00> : vector<8x256xf32>
    %138 = tpu.matmul %135, %137, %cst_120 {dimension_numbers = #tpu.dot_dimension_numbers<[1], [0], [0], [1], [0, 0, 1, 1], [], []>} : vector<8x256xf32>, vector<256x256xf32>, vector<8x256xf32> -> vector<8x256xf32>
    %139 = arith.addf %134, %138 : vector<8x256xf32>
    %140 = vector.extract_strided_slice %125 {offsets = [24, 0], sizes = [8, 256], strides = [1, 1]} : vector<32x256xf32> to vector<8x256xf32>
    %c3_121 = arith.constant 3 : index
    %c0_122 = arith.constant 0 : index
    %c0_123 = arith.constant 0 : index
    %141 = vector.load %arg18[%c3_121, %c0_122, %c0_123] : memref<4x256x256xf32, #tpu.memory_space<vmem>>, vector<1x256x256xf32>
    %142 = vector.shape_cast %141 : vector<1x256x256xf32> to vector<256x256xf32>
    %cst_124 = arith.constant dense<0.000000e+00> : vector<8x256xf32>
    %143 = tpu.matmul %140, %142, %cst_124 {dimension_numbers = #tpu.dot_dimension_numbers<[1], [0], [0], [1], [0, 0, 1, 1], [], []>} : vector<8x256xf32>, vector<256x256xf32>, vector<8x256xf32> -> vector<8x256xf32>
    %144 = arith.addf %139, %143 : vector<8x256xf32>
    %c0_125 = arith.constant 0 : index
    %c0_126 = arith.constant 0 : index
    %145 = vector.load %arg19[%c0_125, %c0_126] : memref<1x256xf32, #tpu.memory_space<vmem>>, vector<1x256xf32>
    %146 = vector.broadcast %145 : vector<1x256xf32> to vector<8x256xf32>
    %147 = arith.addf %144, %146 : vector<8x256xf32>
    %cst_127 = arith.constant 0.000000e+00 : f32
    %148 = vector.broadcast %cst_127 : f32 to vector<8x256xf32>
    %149 = arith.maximumf %147, %148 : vector<8x256xf32>
    %c0_128 = arith.constant 0 : index
    %c0_129 = arith.constant 0 : index
    %150 = vector.load %arg20[%c0_128, %c0_129] : memref<64x8xf32, #tpu.memory_space<vmem>>, vector<64x8xf32>
    %cst_130 = arith.constant dense<0.000000e+00> : vector<64x256xf32>
    %151 = tpu.matmul %150, %149, %cst_130 {dimension_numbers = #tpu.dot_dimension_numbers<[1], [0], [0], [1], [0, 0, 1, 1], [], []>} : vector<64x8xf32>, vector<8x256xf32>, vector<64x256xf32> -> vector<64x256xf32>
    %152 = vector.extract_strided_slice %151 {offsets = [0, 0], sizes = [16, 256], strides = [1, 1]} : vector<64x256xf32> to vector<16x256xf32>
    %c0_131 = arith.constant 0 : index
    %c0_132 = arith.constant 0 : index
    %c0_133 = arith.constant 0 : index
    %153 = vector.load %arg21[%c0_131, %c0_132, %c0_133] : memref<4x256x256xf32, #tpu.memory_space<vmem>>, vector<1x256x256xf32>
    %154 = vector.shape_cast %153 : vector<1x256x256xf32> to vector<256x256xf32>
    %cst_134 = arith.constant dense<0.000000e+00> : vector<16x256xf32>
    %155 = tpu.matmul %152, %154, %cst_134 {dimension_numbers = #tpu.dot_dimension_numbers<[1], [0], [0], [1], [0, 0, 1, 1], [], []>} : vector<16x256xf32>, vector<256x256xf32>, vector<16x256xf32> -> vector<16x256xf32>
    %156 = vector.extract_strided_slice %151 {offsets = [16, 0], sizes = [16, 256], strides = [1, 1]} : vector<64x256xf32> to vector<16x256xf32>
    %c1_135 = arith.constant 1 : index
    %c0_136 = arith.constant 0 : index
    %c0_137 = arith.constant 0 : index
    %157 = vector.load %arg21[%c1_135, %c0_136, %c0_137] : memref<4x256x256xf32, #tpu.memory_space<vmem>>, vector<1x256x256xf32>
    %158 = vector.shape_cast %157 : vector<1x256x256xf32> to vector<256x256xf32>
    %cst_138 = arith.constant dense<0.000000e+00> : vector<16x256xf32>
    %159 = tpu.matmul %156, %158, %cst_138 {dimension_numbers = #tpu.dot_dimension_numbers<[1], [0], [0], [1], [0, 0, 1, 1], [], []>} : vector<16x256xf32>, vector<256x256xf32>, vector<16x256xf32> -> vector<16x256xf32>
    %160 = arith.addf %155, %159 : vector<16x256xf32>
    %161 = vector.extract_strided_slice %151 {offsets = [32, 0], sizes = [16, 256], strides = [1, 1]} : vector<64x256xf32> to vector<16x256xf32>
    %c2_139 = arith.constant 2 : index
    %c0_140 = arith.constant 0 : index
    %c0_141 = arith.constant 0 : index
    %162 = vector.load %arg21[%c2_139, %c0_140, %c0_141] : memref<4x256x256xf32, #tpu.memory_space<vmem>>, vector<1x256x256xf32>
    %163 = vector.shape_cast %162 : vector<1x256x256xf32> to vector<256x256xf32>
    %cst_142 = arith.constant dense<0.000000e+00> : vector<16x256xf32>
    %164 = tpu.matmul %161, %163, %cst_142 {dimension_numbers = #tpu.dot_dimension_numbers<[1], [0], [0], [1], [0, 0, 1, 1], [], []>} : vector<16x256xf32>, vector<256x256xf32>, vector<16x256xf32> -> vector<16x256xf32>
    %165 = arith.addf %160, %164 : vector<16x256xf32>
    %166 = vector.extract_strided_slice %151 {offsets = [48, 0], sizes = [16, 256], strides = [1, 1]} : vector<64x256xf32> to vector<16x256xf32>
    %c3_143 = arith.constant 3 : index
    %c0_144 = arith.constant 0 : index
    %c0_145 = arith.constant 0 : index
    %167 = vector.load %arg21[%c3_143, %c0_144, %c0_145] : memref<4x256x256xf32, #tpu.memory_space<vmem>>, vector<1x256x256xf32>
    %168 = vector.shape_cast %167 : vector<1x256x256xf32> to vector<256x256xf32>
    %cst_146 = arith.constant dense<0.000000e+00> : vector<16x256xf32>
    %169 = tpu.matmul %166, %168, %cst_146 {dimension_numbers = #tpu.dot_dimension_numbers<[1], [0], [0], [1], [0, 0, 1, 1], [], []>} : vector<16x256xf32>, vector<256x256xf32>, vector<16x256xf32> -> vector<16x256xf32>
    %170 = arith.addf %165, %169 : vector<16x256xf32>
    %c0_147 = arith.constant 0 : index
    %c0_148 = arith.constant 0 : index
    %171 = vector.load %arg22[%c0_147, %c0_148] : memref<1x256xf32, #tpu.memory_space<vmem>>, vector<1x256xf32>
    %172 = vector.broadcast %171 : vector<1x256xf32> to vector<16x256xf32>
    %173 = arith.addf %170, %172 : vector<16x256xf32>
    %cst_149 = arith.constant 0.000000e+00 : f32
    %174 = vector.broadcast %cst_149 : f32 to vector<16x256xf32>
    %175 = arith.maximumf %173, %174 : vector<16x256xf32>
    %c0_150 = arith.constant 0 : index
    %c0_151 = arith.constant 0 : index
    %176 = vector.load %arg23[%c0_150, %c0_151] : memref<128x16xf32, #tpu.memory_space<vmem>>, vector<128x16xf32>
    %cst_152 = arith.constant dense<0.000000e+00> : vector<128x256xf32>
    %177 = tpu.matmul %176, %175, %cst_152 {dimension_numbers = #tpu.dot_dimension_numbers<[1], [0], [0], [1], [0, 0, 1, 1], [], []>} : vector<128x16xf32>, vector<16x256xf32>, vector<128x256xf32> -> vector<128x256xf32>
    %178 = vector.extract_strided_slice %177 {offsets = [0, 0], sizes = [32, 256], strides = [1, 1]} : vector<128x256xf32> to vector<32x256xf32>
    %c0_153 = arith.constant 0 : index
    %c0_154 = arith.constant 0 : index
    %c0_155 = arith.constant 0 : index
    %179 = vector.load %arg24[%c0_153, %c0_154, %c0_155] : memref<4x256x48xf32, #tpu.memory_space<vmem>>, vector<1x256x48xf32>
    %180 = vector.shape_cast %179 : vector<1x256x48xf32> to vector<256x48xf32>
    %cst_156 = arith.constant dense<0.000000e+00> : vector<32x48xf32>
    %181 = tpu.matmul %178, %180, %cst_156 {dimension_numbers = #tpu.dot_dimension_numbers<[1], [0], [0], [1], [0, 0, 1, 1], [], []>} : vector<32x256xf32>, vector<256x48xf32>, vector<32x48xf32> -> vector<32x48xf32>
    %182 = vector.extract_strided_slice %177 {offsets = [32, 0], sizes = [32, 256], strides = [1, 1]} : vector<128x256xf32> to vector<32x256xf32>
    %c1_157 = arith.constant 1 : index
    %c0_158 = arith.constant 0 : index
    %c0_159 = arith.constant 0 : index
    %183 = vector.load %arg24[%c1_157, %c0_158, %c0_159] : memref<4x256x48xf32, #tpu.memory_space<vmem>>, vector<1x256x48xf32>
    %184 = vector.shape_cast %183 : vector<1x256x48xf32> to vector<256x48xf32>
    %cst_160 = arith.constant dense<0.000000e+00> : vector<32x48xf32>
    %185 = tpu.matmul %182, %184, %cst_160 {dimension_numbers = #tpu.dot_dimension_numbers<[1], [0], [0], [1], [0, 0, 1, 1], [], []>} : vector<32x256xf32>, vector<256x48xf32>, vector<32x48xf32> -> vector<32x48xf32>
    %186 = arith.addf %181, %185 : vector<32x48xf32>
    %187 = vector.extract_strided_slice %177 {offsets = [64, 0], sizes = [32, 256], strides = [1, 1]} : vector<128x256xf32> to vector<32x256xf32>
    %c2_161 = arith.constant 2 : index
    %c0_162 = arith.constant 0 : index
    %c0_163 = arith.constant 0 : index
    %188 = vector.load %arg24[%c2_161, %c0_162, %c0_163] : memref<4x256x48xf32, #tpu.memory_space<vmem>>, vector<1x256x48xf32>
    %189 = vector.shape_cast %188 : vector<1x256x48xf32> to vector<256x48xf32>
    %cst_164 = arith.constant dense<0.000000e+00> : vector<32x48xf32>
    %190 = tpu.matmul %187, %189, %cst_164 {dimension_numbers = #tpu.dot_dimension_numbers<[1], [0], [0], [1], [0, 0, 1, 1], [], []>} : vector<32x256xf32>, vector<256x48xf32>, vector<32x48xf32> -> vector<32x48xf32>
    %191 = arith.addf %186, %190 : vector<32x48xf32>
    %192 = vector.extract_strided_slice %177 {offsets = [96, 0], sizes = [32, 256], strides = [1, 1]} : vector<128x256xf32> to vector<32x256xf32>
    %c3_165 = arith.constant 3 : index
    %c0_166 = arith.constant 0 : index
    %c0_167 = arith.constant 0 : index
    %193 = vector.load %arg24[%c3_165, %c0_166, %c0_167] : memref<4x256x48xf32, #tpu.memory_space<vmem>>, vector<1x256x48xf32>
    %194 = vector.shape_cast %193 : vector<1x256x48xf32> to vector<256x48xf32>
    %cst_168 = arith.constant dense<0.000000e+00> : vector<32x48xf32>
    %195 = tpu.matmul %192, %194, %cst_168 {dimension_numbers = #tpu.dot_dimension_numbers<[1], [0], [0], [1], [0, 0, 1, 1], [], []>} : vector<32x256xf32>, vector<256x48xf32>, vector<32x48xf32> -> vector<32x48xf32>
    %196 = arith.addf %191, %195 : vector<32x48xf32>
    %c0_169 = arith.constant 0 : index
    %c0_170 = arith.constant 0 : index
    %197 = vector.load %arg25[%c0_169, %c0_170] : memref<1x48xf32, #tpu.memory_space<vmem>>, vector<1x48xf32>
    %198 = vector.broadcast %197 : vector<1x48xf32> to vector<32x48xf32>
    %199 = arith.addf %196, %198 : vector<32x48xf32>
    %200 = arith.negf %199 : vector<32x48xf32>
    %201 = math.exp %200 : vector<32x48xf32>
    %cst_171 = arith.constant 1.000000e+00 : f32
    %202 = vector.broadcast %cst_171 : f32 to vector<32x48xf32>
    %203 = arith.addf %202, %201 : vector<32x48xf32>
    %204 = arith.divf %202, %203 : vector<32x48xf32>
    %c0_172 = arith.constant 0 : index
    %c0_173 = arith.constant 0 : index
    %205 = vector.load %arg26[%c0_172, %c0_173] : memref<32x48xf32, #tpu.memory_space<vmem>>, vector<32x48xf32>
    tpu.vector_store %arg26[%c0_172, %c0_173], %204 {strides = array<i32>} : memref<32x48xf32, #tpu.memory_space<vmem>>, vector<32x48xf32>,
    %c0_174 = arith.constant 0 : index
    %c0_175 = arith.constant 0 : index
    %206 = vector.load %arg27[%c0_174, %c0_175] : memref<2x32xf32, #tpu.memory_space<vmem>>, vector<2x32xf32>
    tpu.vector_store %arg27[%c0_174, %c0_175], %95 {strides = array<i32>} : memref<2x32xf32, #tpu.memory_space<vmem>>, vector<2x32xf32>,
    %c0_176 = arith.constant 0 : index
    %c0_177 = arith.constant 0 : index
    %207 = vector.load %arg28[%c0_176, %c0_177] : memref<2x32xf32, #tpu.memory_space<vmem>>, vector<2x32xf32>
    tpu.vector_store %arg28[%c0_176, %c0_177], %96 {strides = array<i32>} : memref<2x32xf32, #tpu.memory_space<vmem>>, vector<2x32xf32>,
    return
  }
}

</mosaic_0001>

<bundles_post_ra>
// kernel: vae_forward.1
= control target key start
LH: loop header
LB: loop body
LE: loop exit
PB: predicated region body
PF: predicated region fallthrough
CT: control target
= control target key end

     0   :  { %s10126_s0 = inlined_call_operand.vmem [shape: f32[32,48], index: 0, kind: input, shape index: {}]   ;;  %s10127_s1 = inlined_call_operand.vmem [shape: f32[2,32], index: 1, kind: input, shape index: {}]   ;;  %s10128_s2 = inlined_call_operand.vmem [shape: f32[48,1024], index: 2, kind: input, shape index: {}]   ;;  %s10129_s3 = inlined_call_operand.vmem [shape: f32[4,16,32], index: 3, kind: input, shape index: {}]   ;;  %s10130_s4 = inlined_call_operand.vmem [shape: f32[1,256], index: 4, kind: input, shape index: {}]   ;;  %s10131_s5 = inlined_call_operand.vmem [shape: f32[256,1024], index: 5, kind: input, shape index: {}]   ;;  %s10132_s6 = inlined_call_operand.vmem [shape: f32[4,8,16], index: 6, kind: input, shape index: {}]   ;;  %s10133_s7 = inlined_call_operand.vmem [shape: f32[1,256], index: 7, kind: input, shape index: {}]   ;;  %s10134_s8 = inlined_call_operand.hbm [shape: f32[256,1024], index: 8, kind: input, shape index: {}]   ;;  %s10135_s9 = inlined_call_operand.vmem [shape: f32[4,4,8], index: 9, kind: input, shape index: {}]   ;;  %s10136_s10 = inlined_call_operand.vmem [shape: f32[1,256], index: 10, kind: input, shape index: {}]   ;;  %s10137_s11 = inlined_call_operand.vmem [shape: f32[2,256,160], index: 11, kind: input, shape index: {}]   ;;  %s10138_s12 = inlined_call_operand.vmem [shape: f32[2,2,4], index: 12, kind: input, shape index: {}]   ;;  %s10139_s13 = inlined_call_operand.vmem [shape: f32[1,160], index: 13, kind: input, shape index: {}]   ;;  %s10140_s14 = inlined_call_operand.vmem [shape: f32[2,32,256], index: 14, kind: input, shape index: {}]   ;;  %s10141_s15 = inlined_call_operand.vmem [shape: f32[2,4,2], index: 15, kind: input, shape index: {}]   ;;  %s10142_s16 = inlined_call_operand.vmem [shape: f32[2,1,256], index: 16, kind: input, shape index: {}]   ;;  %s10143_s17 = inlined_call_operand.vmem [shape: f32[32,4], index: 17, kind: input, shape index: {}]   ;;  %s10144_s18 = inlined_call_operand.hbm [shape: f32[4,256,256], index: 18, kind: input, shape index: {}]   ;;  %s10145_s19 = inlined_call_operand.vmem [shape: f32[1,256], index: 19, kind: input, shape index: {}]   ;;  %s10146_s20 = inlined_call_operand.vmem [shape: f32[64,8], index: 20, kind: input, shape index: {}]   ;;  %s10147_s21 = inlined_call_operand.hbm [shape: f32[4,256,256], index: 21, kind: input, shape index: {}]   ;;  %s10148_s22 = inlined_call_operand.vmem [shape: f32[1,256], index: 22, kind: input, shape index: {}]   ;;  %s10149_s23 = inlined_call_operand.vmem [shape: f32[128,16], index: 23, kind: input, shape index: {}]   ;;  %s10150_s24 = inlined_call_operand.vmem [shape: f32[4,256,48], index: 24, kind: input, shape index: {}]   ;;  %s10151_s25 = inlined_call_operand.vmem [shape: f32[1,48], index: 25, kind: input, shape index: {}]   ;;  %s10152_s26 = inlined_call_operand.vmem [shape: f32[32,48], index: 26, kind: output, shape index: {0}]   ;;  %s10153_s27 = inlined_call_operand.hbm [shape: f32[2,32], index: 27, kind: output, shape index: {1}]   ;;  %s10154_s28 = inlined_call_operand.hbm [shape: f32[2,32], index: 28, kind: output, shape index: {2}]  }
   0x1   :  { %10166 = sst [smem:[#allocation15_spill]] %s10126_s0 }
   0x2   :  { %10167 = sst [smem:[#allocation16_spill]] %s10127_s1 }
   0x3   :  { %10168 = sst [smem:[#allocation17_spill]] %s10128_s2 }
   0x4   :  { %10169 = sst [smem:[#allocation18_spill]] %s10129_s3 }
   0x5   :  { %10170 = sst [smem:[#allocation19_spill]] %s10130_s4 }
   0x6   :  { %10171 = sst [smem:[#allocation20_spill]] %s10131_s5 }
   0x7   :  { %10172 = sst [smem:[#allocation21_spill]] %s10132_s6 }
   0x8   :  { %10173 = sst [smem:[#allocation22_spill]] %s10133_s7 }
   0x9   :  { %10174 = sst [smem:[#allocation23_spill]] %s10134_s8 }
   0xa   :  { %10175 = sst [smem:[#allocation24_spill]] %s10135_s9 }
   0xb   :  { %10176 = sst [smem:[#allocation25_spill]] %s10136_s10 }
   0xc   :  { %10177 = sst [smem:[#allocation26_spill]] %s10137_s11 }
   0xd   :  { %10178 = sst [smem:[#allocation27_spill]] %s10138_s12 }
   0xe   :  { %10179 = sst [smem:[#allocation28_spill]] %s10152_s26 }
   0xf   :  { %34 = vsyncpa [#allocation3], 0 }
  0x10   :  { %35 = vsyncpa [#allocation6], 0 }
  0x11   :  { %36 = vsyncpa [#allocation4], 0 }
  0x12   :  { %37 = vsyncpa [#allocation10], 0  ;;  %s7710_s8 = smov [#allocation5]   ;;  %s7592_s3 = scalar_lea.hbm %s10144_s18, 32768 }
  0x13   :  { %s89_s5 = sshll.u32 %s7710_s8, 4  ;;  %p7593_p0 = scmp.ne.s32.totalorder %s10144_s18, %s7592_s3  ;;  %s90_s5 = int_to_ptr.vmem [resolvable:$true] %s89_s5 }
  0x14   :  { %p7596_p1 = scmp.lt.u32.totalorder %s7592_s3, %s10144_s18 }
  0x16   :  { %p7598_p2 = pnand %p7596_p1, %p7593_p0 }
  0x18   :  { %7601 = shalt.err (!%p7598_p2)
}
  0x19   :  { %s7602_s29 = scalar_lea.vmem %s90_s5, 32768  ;;  %p7607_p4 = scmp.lt.s32.totalorder %s90_s5, %s90_s5 }
  0x1a   :  { %p7603_p3 = scmp.ne.s32.totalorder %s90_s5, %s7602_s29  ;;  %p7608_p5 = scmp.lt.s32.totalorder %s7602_s29, %s7602_s29 }
  0x1c   :  { %p7609_p6 = por %p7608_p5, %p7607_p4 }
  0x1e   :  { %p7610_p7 = pnand %p7609_p6, %p7603_p3 }
  0x20   :  { %7613 = shalt.err (!%p7610_p7)
}
  0x21   :  { %s10165_s2 = smov 256   ;;  %s7712_s7 = smov 16  }
  0x22   :  { %95 = dma.hbm_to_vmem [thread:$0]  %s10144_s18, 32768, %s90_s5, [#allocation6], %s10165_s2, %s10165_s2, %s7712_s7  }
  0x23   :  { %s7713_s4 = smov [#allocation2]   ;;  %s10180_s3 = sld [smem:[#allocation23_spill]] }
  0x24   :  { %s59_s8 = sshll.u32 %s7713_s4, 4  ;;  %s60_s8 = int_to_ptr.vmem [resolvable:$true] %s59_s8 }
  0x29   :  { %s7614_s6 = scalar_lea.hbm %s10180_s3, 32768 }
  0x2a   :  { %p7615_p8 = scmp.ne.s32.totalorder %s10180_s3, %s7614_s6  ;;  %p7618_p9 = scmp.lt.u32.totalorder %s7614_s6, %s10180_s3 }
  0x2c   :  { %p7620_p10 = pnand %p7618_p9, %p7615_p8 }
  0x2e   :  { %7623 = shalt.err (!%p7620_p10)
}
  0x2f   :  { %s7624_s26 = scalar_lea.vmem %s60_s8, 32768  ;;  %p7629_p12 = scmp.lt.s32.totalorder %s60_s8, %s60_s8 }
  0x30   :  { %p7625_p11 = scmp.ne.s32.totalorder %s60_s8, %s7624_s26  ;;  %p7630_p13 = scmp.lt.s32.totalorder %s7624_s26, %s7624_s26 }
  0x32   :  { %p7631_p0 = por %p7630_p13, %p7629_p12 }
  0x34   :  { %p7632_p1 = pnand %p7631_p0, %p7625_p11 }
  0x36   :  { %7635 = shalt.err (!%p7632_p1)
}
  0x37   :  { %s7714_s18 = smov 1024   ;;  %s7715_s5 = smov 64  }
  0x38   :  { %65 = dma.hbm_to_vmem [thread:$0]  %s10180_s3, 32768, %s60_s8, [#allocation3], %s7714_s18, %s7714_s18, %s7715_s5  }
  0x39   :  { %s7716_s4 = smov [#allocation7]   ;;  %s7636_s10 = scalar_lea.hbm %s10147_s21, 32768 }
  0x3a   :  { %s105_s9 = sshll.u32 %s7716_s4, 4  ;;  %p7637_p2 = scmp.ne.s32.totalorder %s10147_s21, %s7636_s10  ;;  %s106_s9 = int_to_ptr.vmem [resolvable:$true] %s105_s9 }
  0x3b   :  { %p7640_p3 = scmp.lt.u32.totalorder %s7636_s10, %s10147_s21 }
  0x3d   :  { %p7642_p4 = pnand %p7640_p3, %p7637_p2 }
  0x3f   :  { %7645 = shalt.err (!%p7642_p4)
}
  0x40   :  { %s7646_s2 = scalar_lea.vmem %s106_s9, 32768  ;;  %p7651_p6 = scmp.lt.s32.totalorder %s106_s9, %s106_s9 }
  0x41   :  { %p7647_p5 = scmp.ne.s32.totalorder %s106_s9, %s7646_s2  ;;  %p7652_p7 = scmp.lt.s32.totalorder %s7646_s2, %s7646_s2 }
  0x43   :  { %p7653_p8 = por %p7652_p7, %p7651_p6 }
  0x45   :  { %p7654_p9 = pnand %p7653_p8, %p7647_p5 }
  0x47   :  { %7657 = shalt.err (!%p7654_p9)
}
  0x48   :  { %s10181_s8 = smov 256  }
  0x49   :  { %111 = dma.hbm_to_vmem [thread:$0]  %s10147_s21, 32768, %s106_s9, [#allocation6], %s10181_s8, %s10181_s8, %s7712_s7  }
  0x4a   :  { %7702 = dma.done.wait [#allocation3], 32768  }
  0x4b   :  { %7703 = vsyncadd [#allocation3], 4294934528 }
  0x4c   :  { %7704 = dma.done.wait [#allocation6], 65536  }
  0x4d   :  { %7705 = vsyncadd [#allocation6], 4294901760  ;;  %v7717_v0 = vmov 0.0   ;;  %s10182_s12 = sld [smem:[#allocation17_spill]]  ;;  %s10183_s2 = sld [smem:[#allocation15_spill]]  ;;  %vm181_vm0 = vcmask 392192  }
  0x4e   :  { %258 = vmatprep.mubr.f32.mxu0 %v7717_v0  ;;  %347 = vmatprep.mubr.f32.mxu1 %v7717_v0  ;;  %s10184_s6 = sld [smem:[#allocation20_spill]]  ;;  %s10185_s7 = sld [smem:[#allocation18_spill]]  ;;  %vm555_vm1 = vcmask 261120   ;;  %vm1489_vm2 = vcmask 130048   ;;  %vm2353_vm3 = vcmask 64512   ;;  %vm2815_vm4 = vcmask 1043456  }
  0x4f   :  { %s10186_s5 = sld [smem:[#allocation19_spill]]  ;;  %s10187_s26 = sld [smem:[#allocation21_spill]]  ;;  %vm2811_vm5 = vcmask 31744   ;;  %vm5641_vm6 = vcmask 254976   ;;  %vm3326_vm7 = vcmask 1041408   ;;  %vm3322_vm8 = vcmask 15360  }
  0x50   :  { %s10188_s4 = sld [smem:[#allocation22_spill]]  ;;  %s10189_s21 = sld [smem:[#allocation24_spill]] }
  0x51   :  { %s10190_s11 = sld [smem:[#allocation26_spill]]  ;;  %s10191_s10 = sld [smem:[#allocation25_spill]] }
  0x52   :  { %s10192_s30 = sld [smem:[#allocation27_spill]] }
  0x53   :  { %v134_v1 = vld [vmem:[%s10182_s12 + $0x8] sm:$0xff]  ;;  %v136_v3 = vld [vmem:[%s10182_s12 + $0x18] sm:$0xff]  ;;  %v133_v6 = vld [vmem:[%s10182_s12] sm:$0xff] }
  0x54   :  { %v142_v2 = vld [vmem:[%s10182_s12 + $0x48] sm:$0xff]  ;;  %v144_v5 = vld [vmem:[%s10182_s12 + $0x58] sm:$0xff]  ;;  %v141_v7 = vld [vmem:[%s10182_s12 + $0x40] sm:$0xff] }
  0x55   :  { %v6118_v4 = vpack.c.bf16 %v142_v2, %v134_v1  ;;  %v6130_v8 = vpack.c.bf16 %v144_v5, %v136_v3  ;;  %v6120_v9 = vpack.c.bf16 %v141_v7, %v133_v6  ;;  %v135_v10 = vld [vmem:[%s10182_s12 + $0x10] sm:$0xff]  ;;  %v150_v12 = vld [vmem:[%s10182_s12 + $0x88] sm:$0xff]  ;;  %v152_v15 = vld [vmem:[%s10182_s12 + $0x98] sm:$0xff] }
  0x56   :  { %v143_v11 = vld [vmem:[%s10182_s12 + $0x50] sm:$0xff]  ;;  %v158_v14 = vld [vmem:[%s10182_s12 + $0xc8] sm:$0xff]  ;;  %v160_v16 = vld [vmem:[%s10182_s12 + $0xd8] sm:$0xff] }
  0x57   :  { %6119 = vmatprep.subr.bf16.mxu0 %v6118_v4  ;;  %v6132_v13 = vpack.c.bf16 %v143_v11, %v135_v10  ;;  %6131 = vmatprep.subr.bf16.mxu1 %v6130_v8  ;;  %v6122_v17 = vpack.c.bf16 %v158_v14, %v150_v12  ;;  %v6134_v18 = vpack.c.bf16 %v160_v16, %v152_v15  ;;  %v149_v19 = vld [vmem:[%s10182_s12 + $0x80] sm:$0xff]  ;;  %v151_v21 = vld [vmem:[%s10182_s12 + $0x90] sm:$0xff]  ;;  %v166_v24 = vld [vmem:[%s10182_s12 + $0x108] sm:$0xff] }
  0x58   :  { %6121 = vmatpush1.bf16.msra.mxu0 %v6120_v9  ;;  %v157_v20 = vld [vmem:[%s10182_s12 + $0xc0] sm:$0xff]  ;;  %v159_v23 = vld [vmem:[%s10182_s12 + $0xd0] sm:$0xff]  ;;  %v174_v25 = vld [vmem:[%s10182_s12 + $0x148] sm:$0xff] }
  0x59   :  { %6133 = vmatpush1.bf16.msra.mxu1 %v6132_v13  ;;  %v6124_v22 = vpack.c.bf16 %v157_v20, %v149_v19  ;;  %6123 = vmatprep.subr.bf16.mxu0 %v6122_v17  ;;  %v6136_v26 = vpack.c.bf16 %v159_v23, %v151_v21  ;;  %v6126_v27 = vpack.c.bf16 %v174_v25, %v166_v24  ;;  %v168_v28 = vld [vmem:[%s10182_s12 + $0x118] sm:$0xff]  ;;  %v165_v30 = vld [vmem:[%s10182_s12 + $0x100] sm:$0xff]  ;;  %v167_v33 = vld [vmem:[%s10182_s12 + $0x110] sm:$0xff] }
  0x5a   :  { %6135 = vmatprep.subr.bf16.mxu1 %v6134_v18  ;;  %v176_v29 = vld [vmem:[%s10182_s12 + $0x158] sm:$0xff]  ;;  %v173_v32 = vld [vmem:[%s10182_s12 + $0x140] sm:$0xff]  ;;  %v175_v34 = vld [vmem:[%s10182_s12 + $0x150] sm:$0xff] }
  0x5b   :  { %v6138_v31 = vpack.c.bf16 %v176_v29, %v168_v28  ;;  %v6128_v35 = vpack.c.bf16 %v173_v32, %v165_v30  ;;  %v138_v36 = vld [vmem:[%s10182_s12 + $0x28] sm:$0xff]  ;;  %v6140_v37 = vpack.c.bf16 %v175_v34, %v167_v33  ;;  %v137_v39 = vld [vmem:[%s10182_s12 + $0x20] sm:$0xff]  ;;  %v140_v42 = vld [vmem:[%s10182_s12 + $0x38] sm:$0xff] }
  0x5c   :  { %6125 = vmatpush1.bf16.msra.mxu0 %v6124_v22  ;;  %v146_v38 = vld [vmem:[%s10182_s12 + $0x68] sm:$0xff]  ;;  %v145_v41 = vld [vmem:[%s10182_s12 + $0x60] sm:$0xff]  ;;  %v148_v43 = vld [vmem:[%s10182_s12 + $0x78] sm:$0xff] }
  0x5d   :  { %6137 = vmatpush1.bf16.msra.mxu1 %v6136_v26  ;;  %6127 = vmatprep.subr.bf16.mxu0 %v6126_v27  ;;  %v6142_v40 = vpack.c.bf16 %v146_v38, %v138_v36  ;;  %v6154_v44 = vpack.c.bf16 %v148_v43, %v140_v42  ;;  %v154_v45 = vld [vmem:[%s10182_s12 + $0xa8] sm:$0xff]  ;;  %v139_v47 = vld [vmem:[%s10182_s12 + $0x30] sm:$0xff]  ;;  %v129_v48 = vld [vmem:[%s10183_s2] sm:$0xff]  ;;  %v6144_v50 = vpack.c.bf16 %v145_v41, %v137_v39 }
  0x5e   :  { %6139 = vmatprep.subr.bf16.mxu1 %v6138_v31  ;;  %v162_v46 = vld [vmem:[%s10182_s12 + $0xe8] sm:$0xff]  ;;  %v147_v49 = vld [vmem:[%s10182_s12 + $0x70] sm:$0xff]  ;;  %v156_v51 = vld [vmem:[%s10182_s12 + $0xb8] sm:$0xff] }
  0x5f   :  { %v164_v52 = vld [vmem:[%s10182_s12 + $0xf8] sm:$0xff]  ;;  %v6146_v53 = vpack.c.bf16 %v162_v46, %v154_v45  ;;  %v6156_v54 = vpack.c.bf16 %v147_v49, %v139_v47  ;;  %v153_v55 = vld [vmem:[%s10182_s12 + $0xa0] sm:$0xff]  ;;  %v170_v57 = vld [vmem:[%s10182_s12 + $0x128] sm:$0xff] }
  0x60   :  { %6129 = vmatpush1.bf16.msra.mxu0 %v6128_v35  ;;  %v161_v56 = vld [vmem:[%s10182_s12 + $0xe0] sm:$0xff]  ;;  %v6158_v58 = vpack.c.bf16 %v164_v52, %v156_v51  ;;  %v178_v59 = vld [vmem:[%s10182_s12 + $0x168] sm:$0xff]  ;;  %v155_v60 = vld [vmem:[%s10182_s12 + $0xb0] sm:$0xff] }
  0x61   :  { %6141 = vmatpush1.bf16.msra.mxu1 %v6140_v37  ;;  %6143 = vmatprep.subr.bf16.mxu0 %v6142_v40  ;;  %v163_v61 = vld [vmem:[%s10182_s12 + $0xf0] sm:$0xff]  ;;  %v130_v62 = vld [vmem:[%s10183_s2 + $0x8] sm:$0xff]  ;;  %v172_v63 = vld [vmem:[%s10182_s12 + $0x138] sm:$0xff]  ;;  %v6148_v2 = vpack.c.bf16 %v161_v56, %v153_v55  ;;  %v6150_v3 = vpack.c.bf16 %v178_v59, %v170_v57 }
  0x62   :  { %6155 = vmatprep.subr.bf16.mxu1 %v6154_v44  ;;  %v180_v1 = vld [vmem:[%s10182_s12 + $0x178] sm:$0xff]  ;;  %v6160_v4 = vpack.c.bf16 %v163_v61, %v155_v60  ;;  %v169_v5 = vld [vmem:[%s10182_s12 + $0x120] sm:$0xff]  ;;  %v171_v8 = vld [vmem:[%s10182_s12 + $0x130] sm:$0xff] }
  0x63   :  { %5678 = vmatmul.mubr.msk.f32.vlgmr.msra.gmra.mrb[0].mxu0 %vm181_vm0, %v129_v48  ;;  %v177_v6 = vld [vmem:[%s10182_s12 + $0x160] sm:$0xff]  ;;  %v6162_v7 = vpack.c.bf16 %v180_v1, %v172_v63  ;;  %v179_v9 = vld [vmem:[%s10182_s12 + $0x170] sm:$0xff]  ;;  %v132_v13 = vld [vmem:[%s10183_s2 + $0x18] sm:$0xff] }
  0x64   :  { %5682 = vmatmul.mubr.msk.f32.vlgmr.msra.gmra.mrb[0].mxu1 %vm181_vm0, %v129_v48  ;;  %264 = vmatprep.mubr.f32.mxu0 %v7717_v0  ;;  %v131_v10 = vld [vmem:[%s10183_s2 + $0x10] sm:$0xff]  ;;  %v6152_v11 = vpack.c.bf16 %v177_v6, %v169_v5  ;;  %v6164_v12 = vpack.c.bf16 %v179_v9, %v171_v8  ;;  %v923_v14 = vld [vmem:[%s10184_s6 + $0x8] sm:$0xff]  ;;  %v922_v17 = vld [vmem:[%s10184_s6] sm:$0xff] }
  0x65   :  { %353 = vmatprep.mubr.f32.mxu1 %v7717_v0  ;;  %6145 = vmatpush1.bf16.msra.mxu0 %v6144_v50  ;;  %v931_v15 = vld [vmem:[%s10184_s6 + $0x48] sm:$0xff]  ;;  %v930_v18 = vld [vmem:[%s10184_s6 + $0x40] sm:$0xff] }
  0x66   :  { %6147 = vmatprep.subr.bf16.mxu0 %v6146_v53  ;;  %6157 = vmatpush1.bf16.msra.mxu1 %v6156_v54  ;;  %v6198_v16 = vpack.c.bf16 %v931_v15, %v923_v14  ;;  %v6200_v19 = vpack.c.bf16 %v930_v18, %v922_v17  ;;  %v939_v20 = vld [vmem:[%s10184_s6 + $0x88] sm:$0xff]  ;;  %v938_v23 = vld [vmem:[%s10184_s6 + $0x80] sm:$0xff] }
  0x67   :  { %5679 = vmatmul.mubr.msk.f32.gmra.mrb[2].mxu0 %vm181_vm0, %v130_v62  ;;  %6159 = vmatprep.subr.bf16.mxu1 %v6158_v58  ;;  %v947_v21 = vld [vmem:[%s10184_s6 + $0xc8] sm:$0xff]  ;;  %v946_v24 = vld [vmem:[%s10184_s6 + $0xc0] sm:$0xff] }
  0x68   :  { %5683 = vmatmul.mubr.msk.f32.gmra.mrb[2].mxu1 %vm181_vm0, %v130_v62  ;;  %270 = vmatprep.mubr.f32.mxu0 %v7717_v0  ;;  %v6202_v22 = vpack.c.bf16 %v947_v21, %v939_v20  ;;  %v6204_v25 = vpack.c.bf16 %v946_v24, %v938_v23  ;;  %v955_v26 = vld [vmem:[%s10184_s6 + $0x108] sm:$0xff]  ;;  %v954_v29 = vld [vmem:[%s10184_s6 + $0x100] sm:$0xff] }
  0x69   :  { %359 = vmatprep.mubr.f32.mxu1 %v7717_v0  ;;  %6149 = vmatpush1.bf16.msra.mxu0 %v6148_v2  ;;  %v963_v27 = vld [vmem:[%s10184_s6 + $0x148] sm:$0xff]  ;;  %v962_v30 = vld [vmem:[%s10184_s6 + $0x140] sm:$0xff] }
  0x6a   :  { %6151 = vmatprep.subr.bf16.mxu0 %v6150_v3  ;;  %6161 = vmatpush1.bf16.msra.mxu1 %v6160_v4  ;;  %v6206_v28 = vpack.c.bf16 %v963_v27, %v955_v26  ;;  %v6208_v31 = vpack.c.bf16 %v962_v30, %v954_v29  ;;  %v971_v32 = vld [vmem:[%s10184_s6 + $0x188] sm:$0xff]  ;;  %v970_v35 = vld [vmem:[%s10184_s6 + $0x180] sm:$0xff] }
  0x6b   :  { %5680 = vmatmul.mubr.msk.f32.gmra.mrb[4].mxu0 %vm181_vm0, %v131_v10  ;;  %6163 = vmatprep.subr.bf16.mxu1 %v6162_v7  ;;  %v979_v33 = vld [vmem:[%s10184_s6 + $0x1c8] sm:$0xff]  ;;  %v978_v36 = vld [vmem:[%s10184_s6 + $0x1c0] sm:$0xff] }
  0x6c   :  { %5684 = vmatmul.mubr.msk.f32.gmra.mrb[4].mxu1 %vm181_vm0, %v131_v10  ;;  %276 = vmatprep.mubr.f32.mxu0 %v7717_v0  ;;  %v6210_v34 = vpack.c.bf16 %v979_v33, %v971_v32  ;;  %v987_v37 = vld [vmem:[%s10184_s6 + $0x208] sm:$0xff]  ;;  %v6212_v39 = vpack.c.bf16 %v978_v36, %v970_v35  ;;  %v986_v41 = vld [vmem:[%s10184_s6 + $0x200] sm:$0xff] }
  0x6d   :  { %365 = vmatprep.mubr.f32.mxu1 %v7717_v0  ;;  %6153 = vmatpush1.bf16.msra.mxu0 %v6152_v11  ;;  %v995_v38 = vld [vmem:[%s10184_s6 + $0x248] sm:$0xff]  ;;  %v994_v42 = vld [vmem:[%s10184_s6 + $0x240] sm:$0xff] }
  0x6e   :  { %6165 = vmatpush1.bf16.msra.mxu1 %v6164_v12  ;;  %v6214_v40 = vpack.c.bf16 %v995_v38, %v987_v37  ;;  %v1003_v43 = vld [vmem:[%s10184_s6 + $0x288] sm:$0xff]  ;;  %v6216_v45 = vpack.c.bf16 %v994_v42, %v986_v41  ;;  %v1002_v47 = vld [vmem:[%s10184_s6 + $0x280] sm:$0xff] }
  0x6f   :  { %5681 = vmatmul.mubr.msk.f32.gmra.mrb[6].mxu0 %vm181_vm0, %v132_v13  ;;  %6199 = vmatprep.subr.bf16.mxu1 %v6198_v16  ;;  %v1011_v44 = vld [vmem:[%s10184_s6 + $0x2c8] sm:$0xff]  ;;  %v1018_v53 = vld [vmem:[%s10184_s6 + $0x300] sm:$0xff] }
  0x70   :  { %5685 = vmatmul.mubr.msk.f32.gmra.mrb[6].mxu1 %vm181_vm0, %v132_v13  ;;  %436 = vmatprep.mubr.f32.mxu0 %v7717_v0  ;;  %v6218_v46 = vpack.c.bf16 %v1011_v44, %v1003_v43  ;;  %v1019_v49 = vld [vmem:[%s10184_s6 + $0x308] sm:$0xff]  ;;  %v1026_v54 = vld [vmem:[%s10184_s6 + $0x340] sm:$0xff] }
  0x71   :  { %525 = vmatprep.mubr.f32.mxu1 %v7717_v0  ;;  %v1027_v50 = vld [vmem:[%s10184_s6 + $0x348] sm:$0xff]  ;;  %v6224_v57 = vpack.c.bf16 %v1026_v54, %v1018_v53  ;;  %v1034_v59 = vld [vmem:[%s10184_s6 + $0x380] sm:$0xff] }
  0x72   :  { %v6222_v52 = vpack.c.bf16 %v1027_v50, %v1019_v49  ;;  %v1035_v55 = vld [vmem:[%s10184_s6 + $0x388] sm:$0xff]  ;;  %v1042_v60 = vld [vmem:[%s10184_s6 + $0x3c0] sm:$0xff] }
  0x73   :  { %5686 = vmatmul.mubr.msk.f32.vlgmr.msra.gmra.mrb[8].mxu0 %vm181_vm0, %v129_v48  ;;  %v1043_v56 = vld [vmem:[%s10184_s6 + $0x3c8] sm:$0xff]  ;;  %v6228_v63 = vpack.c.bf16 %v1042_v60, %v1034_v59  ;;  %v1050_v2 = vld [vmem:[%s10184_s6 + $0x400] sm:$0xff] }
  0x74   :  { %442 = vmatprep.mubr.f32.mxu0 %v7717_v0  ;;  %5690 = vmatmul.mubr.msk.f32.vlgmr.msra.gmra.mrb[8].mxu1 %vm181_vm0, %v129_v48  ;;  %v1010_v48 = vld [vmem:[%s10184_s6 + $0x2c0] sm:$0xff]  ;;  %v6226_v58 = vpack.c.bf16 %v1043_v56, %v1035_v55  ;;  %v1051_v61 = vld [vmem:[%s10184_s6 + $0x408] sm:$0xff] }
  0x75   :  { %531 = vmatprep.mubr.f32.mxu1 %v7717_v0  ;;  %6201 = vmatpush1.bf16.msra.mxu1 %v6200_v19  ;;  %v6220_v51 = vpack.c.bf16 %v1010_v48, %v1002_v47  ;;  %v1058_v3 = vld [vmem:[%s10184_s6 + $0x440] sm:$0xff]  ;;  %v1067_v4 = vld [vmem:[%s10184_s6 + $0x488] sm:$0xff] }
  0x76   :  { %6203 = vmatprep.subr.bf16.mxu1 %v6202_v22  ;;  %v1075_v5 = vld [vmem:[%s10184_s6 + $0x4c8] sm:$0xff]  ;;  %v6232_v6 = vpack.c.bf16 %v1058_v3, %v1050_v2  ;;  %v1066_v8 = vld [vmem:[%s10184_s6 + $0x480] sm:$0xff] }
  0x77   :  { %5687 = vmatmul.mubr.msk.f32.gmra.mrb[10].mxu0 %vm181_vm0, %v130_v62  ;;  %v6234_v7 = vpack.c.bf16 %v1075_v5, %v1067_v4  ;;  %v1074_v9 = vld [vmem:[%s10184_s6 + $0x4c0] sm:$0xff]  ;;  %v1091_v11 = vld [vmem:[%s10184_s6 + $0x548] sm:$0xff]  ;;  %v5694_v5 = vld [vmem:[%s10185_s7 + $0x10] sm:$0xff] }
  0x78   :  { %448 = vmatprep.mubr.f32.mxu0 %v7717_v0  ;;  %5691 = vmatmul.mubr.msk.f32.gmra.mrb[10].mxu1 %vm181_vm0, %v130_v62  ;;  %v1059_v62 = vld [vmem:[%s10184_s6 + $0x448] sm:$0xff]  ;;  %v6236_v12 = vpack.c.bf16 %v1074_v9, %v1066_v8  ;;  %v1082_v14 = vld [vmem:[%s10184_s6 + $0x500] sm:$0xff] }
  0x79   :  { %537 = vmatprep.mubr.f32.mxu1 %v7717_v0  ;;  %6205 = vmatpush1.bf16.msra.mxu1 %v6204_v25  ;;  %v6230_v1 = vpack.c.bf16 %v1059_v62, %v1051_v61  ;;  %v1090_v15 = vld [vmem:[%s10184_s6 + $0x540] sm:$0xff]  ;;  %v1099_v16 = vld [vmem:[%s10184_s6 + $0x588] sm:$0xff] }
  0x7a   :  { %6207 = vmatprep.subr.bf16.mxu1 %v6206_v28  ;;  %v1107_v17 = vld [vmem:[%s10184_s6 + $0x5c8] sm:$0xff]  ;;  %v6240_v18 = vpack.c.bf16 %v1090_v15, %v1082_v14  ;;  %v1098_v20 = vld [vmem:[%s10184_s6 + $0x580] sm:$0xff]  ;;  %v5695_v14 = vld [vmem:[%s10185_s7 + $0x18] sm:$0xff] }
  0x7b   :  { %5688 = vmatmul.mubr.msk.f32.gmra.mrb[12].mxu0 %vm181_vm0, %v131_v10  ;;  %v6242_v19 = vpack.c.bf16 %v1107_v17, %v1099_v16  ;;  %v1106_v21 = vld [vmem:[%s10184_s6 + $0x5c0] sm:$0xff]  ;;  %v1115_v22 = vld [vmem:[%s10184_s6 + $0x608] sm:$0xff] }
  0x7c   :  { %454 = vmatprep.mubr.f32.mxu0 %v7717_v0  ;;  %5692 = vmatmul.mubr.msk.f32.gmra.mrb[12].mxu1 %vm181_vm0, %v131_v10  ;;  %v1083_v10 = vld [vmem:[%s10184_s6 + $0x508] sm:$0xff]  ;;  %v6244_v24 = vpack.c.bf16 %v1106_v21, %v1098_v20  ;;  %v1114_v26 = vld [vmem:[%s10184_s6 + $0x600] sm:$0xff] }
  0x7d   :  { %543 = vmatprep.mubr.f32.mxu1 %v7717_v0  ;;  %6209 = vmatpush1.bf16.msra.mxu1 %v6208_v31  ;;  %v1123_v23 = vld [vmem:[%s10184_s6 + $0x648] sm:$0xff]  ;;  %v1122_v27 = vld [vmem:[%s10184_s6 + $0x640] sm:$0xff] }
  0x7e   :  { %6211 = vmatprep.subr.bf16.mxu1 %v6210_v34  ;;  %v6246_v25 = vpack.c.bf16 %v1123_v23, %v1115_v22  ;;  %v1131_v28 = vld [vmem:[%s10184_s6 + $0x688] sm:$0xff]  ;;  %v6248_v30 = vpack.c.bf16 %v1122_v27, %v1114_v26  ;;  %v1130_v32 = vld [vmem:[%s10184_s6 + $0x680] sm:$0xff] }
  0x7f   :  { %5689 = vmatmul.mubr.msk.f32.gmra.mrb[14].mxu0 %vm181_vm0, %v132_v13  ;;  %v1139_v29 = vld [vmem:[%s10184_s6 + $0x6c8] sm:$0xff]  ;;  %v1138_v33 = vld [vmem:[%s10184_s6 + $0x6c0] sm:$0xff] }
  0x80   :  { %5693 = vmatmul.mubr.msk.f32.gmra.mrb[14].mxu1 %vm181_vm0, %v132_v13  ;;  %626 = vmatprep.mubr.f32.mxu0 %v7717_v0  ;;  %v6238_v13 = vpack.c.bf16 %v1091_v11, %v1083_v10  ;;  %v6250_v31 = vpack.c.bf16 %v1139_v29, %v1131_v28  ;;  %v1147_v34 = vld [vmem:[%s10184_s6 + $0x708] sm:$0xff]  ;;  %v6252_v36 = vpack.c.bf16 %v1138_v33, %v1130_v32  ;;  %v1146_v38 = vld [vmem:[%s10184_s6 + $0x700] sm:$0xff]  ;;  %v933_v32 = vld [vmem:[%s10184_s6 + $0x58] sm:$0xff] }
  0x81   :  { %6213 = vmatpush1.bf16.msra.mxu1 %v6212_v39  ;;  %v1155_v35 = vld [vmem:[%s10184_s6 + $0x748] sm:$0xff]  ;;  %v1154_v39 = vld [vmem:[%s10184_s6 + $0x740] sm:$0xff] }
  0x82   :  { %6215 = vmatprep.subr.bf16.mxu1 %v6214_v40  ;;  %v6254_v37 = vpack.c.bf16 %v1155_v35, %v1147_v34  ;;  %v6256_v40 = vpack.c.bf16 %v1154_v39, %v1146_v38  ;;  %v551_v28 = vld [vmem:[%s10185_s7 + $0x8] sm:$0xff]  ;;  %v924_v35 = vld [vmem:[%s10184_s6 + $0x10] sm:$0xff]  ;;  %v949_v38 = vld [vmem:[%s10184_s6 + $0xd8] sm:$0xff] }
  0x83   :  { %v5701_v33 = vld [vmem:[%s10185_s7 + $0x28] sm:$0xff]  ;;  %v5704_v39 = vld [vmem:[%s10185_s7 + $0x30] sm:$0xff] }
  0x85   :  { %6217 = vmatpush1.bf16.msra.mxu1 %v6216_v45 }
  0x86   :  { %6219 = vmatprep.subr.bf16.mxu1 %v6218_v46 }
  0x89   :  { %6221 = vmatpush1.bf16.msra.mxu1 %v6220_v51 }
  0x8a   :  { %6223 = vmatprep.subr.bf16.mxu1 %v6222_v52 }
  0x8d   :  { %6225 = vmatpush1.bf16.msra.mxu1 %v6224_v57 }
  0x8e   :  { %6227 = vmatprep.subr.bf16.mxu1 %v6226_v58 }
  0x91   :  { %6229 = vmatpush1.bf16.msra.mxu1 %v6228_v63 }
  0x92   :  { %6231 = vmatprep.subr.bf16.mxu1 %v6230_v1 }
  0x95   :  { %6233 = vmatpush1.bf16.msra.mxu1 %v6232_v6 }
  0x96   :  { %6235 = vmatprep.subr.bf16.mxu1 %v6234_v7 }
  0x99   :  { %6237 = vmatpush1.bf16.msra.mxu1 %v6236_v12 }
  0x9a   :  { %6239 = vmatprep.subr.bf16.mxu1 %v6238_v13 }
  0x9d   :  { %6241 = vmatpush1.bf16.msra.mxu1 %v6240_v18 }
  0x9e   :  { %6243 = vmatprep.subr.bf16.mxu1 %v6242_v19  ;;  %v550_v19 = vld [vmem:[%s10185_s7] sm:$0xff] }
  0xa1   :  { %6245 = vmatpush1.bf16.msra.mxu1 %v6244_v24 }
  0xa2   :  { %6247 = vmatprep.subr.bf16.mxu1 %v6246_v25 }
  0xa5   :  { %6249 = vmatpush1.bf16.msra.mxu1 %v6248_v30  ;;  %v5700_v30 = vld [vmem:[%s10185_s7 + $0x20] sm:$0xff] }
  0xa6   :  { %6251 = vmatprep.subr.bf16.mxu1 %v6250_v31  ;;  %v925_v31 = vld [vmem:[%s10184_s6 + $0x18] sm:$0xff] }
  0xa7   :  { %v6262_v34 = vpack.c.bf16 %v933_v32, %v925_v31  ;;  %v1093_v31 = vld [vmem:[%s10184_s6 + $0x558] sm:$0xff] }
  0xa9   :  { %6253 = vmatpush1.bf16.msra.mxu1 %v6252_v36  ;;  %v932_v36 = vld [vmem:[%s10184_s6 + $0x50] sm:$0xff] }
  0xaa   :  { %6255 = vmatprep.subr.bf16.mxu1 %v6254_v37  ;;  %v941_v37 = vld [vmem:[%s10184_s6 + $0x98] sm:$0xff] }
  0xad   :  { %6257 = vmatpush1.bf16.msra.mxu1 %v6256_v40  ;;  %v6264_v40 = vpack.c.bf16 %v932_v36, %v924_v35  ;;  %v1092_v35 = vld [vmem:[%s10184_s6 + $0x550] sm:$0xff]  ;;  %v1101_v36 = vld [vmem:[%s10184_s6 + $0x598] sm:$0xff] }
 0x136   :  { %v260_v41 = vpop.f32.mrb[0].mxu0 }
 0x137   :  { %v349_v42 = vpop.f32.mrb[0].mxu1  ;;  %v262_v43 = vpop.f32.mrb[1].mxu0 }
 0x138   :  { %v351_v44 = vpop.f32.mrb[1].mxu1 }
 0x13a   :  { %v266_v45 = vpop.f32.mrb[2].mxu0 }
 0x13b   :  { %v6176_v46 = vpack.c.bf16 %v266_v45, %v260_v41  ;;  %v355_v47 = vpop.f32.mrb[2].mxu1  ;;  %v268_v48 = vpop.f32.mrb[3].mxu0  ;;  %v6266_v41 = vpack.c.bf16 %v949_v38, %v941_v37  ;;  %v965_v45 = vld [vmem:[%s10184_s6 + $0x158] sm:$0xff] }
 0x13c   :  { %v6168_v49 = vpack.c.bf16 %v355_v47, %v349_v42  ;;  %v6174_v50 = vpack.c.bf16 %v268_v48, %v262_v43  ;;  %v357_v51 = vpop.f32.mrb[3].mxu1  ;;  %v940_v42 = vld [vmem:[%s10184_s6 + $0x90] sm:$0xff]  ;;  %v1109_v37 = vld [vmem:[%s10184_s6 + $0x5d8] sm:$0xff] }
 0x13d   :  { %v6166_v52 = vpack.c.bf16 %v357_v51, %v351_v44  ;;  %v948_v43 = vld [vmem:[%s10184_s6 + $0xd0] sm:$0xff]  ;;  %v957_v44 = vld [vmem:[%s10184_s6 + $0x118] sm:$0xff] }
 0x13e   :  { %v272_v53 = vpop.f32.mrb[4].mxu0  ;;  %v6268_v47 = vpack.c.bf16 %v948_v43, %v940_v42  ;;  %v6270_v48 = vpack.c.bf16 %v965_v45, %v957_v44  ;;  %v973_v51 = vld [vmem:[%s10184_s6 + $0x198] sm:$0xff] }
 0x13f   :  { %v361_v54 = vpop.f32.mrb[4].mxu1  ;;  %6167 = vmatprep.subr.bf16.mxu0 %v6166_v52  ;;  %v274_v55 = vpop.f32.mrb[5].mxu0  ;;  %v981_v52 = vld [vmem:[%s10184_s6 + $0x1d8] sm:$0xff] }
 0x140   :  { %v363_v56 = vpop.f32.mrb[5].mxu1  ;;  %6169 = vmatpush1.bf16.msra.mxu0 %v6168_v49  ;;  %v956_v49 = vld [vmem:[%s10184_s6 + $0x110] sm:$0xff]  ;;  %v1117_v42 = vld [vmem:[%s10184_s6 + $0x618] sm:$0xff] }
 0x141   :  { %v1125_v43 = vld [vmem:[%s10184_s6 + $0x658] sm:$0xff] }
 0x142   :  { %v278_v57 = vpop.f32.mrb[6].mxu0  ;;  %v6310_v45 = vpack.c.bf16 %v1125_v43, %v1117_v42 }
 0x143   :  { %v6180_v58 = vpack.c.bf16 %v278_v57, %v272_v53  ;;  %v367_v59 = vpop.f32.mrb[6].mxu1  ;;  %v280_v60 = vpop.f32.mrb[7].mxu0  ;;  %v989_v57 = vld [vmem:[%s10184_s6 + $0x218] sm:$0xff] }
 0x144   :  { %v6172_v61 = vpack.c.bf16 %v367_v59, %v361_v54  ;;  %v6178_v62 = vpack.c.bf16 %v280_v60, %v274_v55  ;;  %v369_v63 = vpop.f32.mrb[7].mxu1  ;;  %v6274_v54 = vpack.c.bf16 %v981_v52, %v973_v51  ;;  %v972_v55 = vld [vmem:[%s10184_s6 + $0x190] sm:$0xff] }
 0x145   :  { %v6170_v1 = vpack.c.bf16 %v369_v63, %v363_v56  ;;  %v980_v56 = vld [vmem:[%s10184_s6 + $0x1d0] sm:$0xff]  ;;  %v1005_v63 = vld [vmem:[%s10184_s6 + $0x298] sm:$0xff] }
 0x146   :  { %v438_v2 = vpop.f32.mrb[8].mxu0  ;;  %v6276_v59 = vpack.c.bf16 %v980_v56, %v972_v55  ;;  %v1132_v52 = vld [vmem:[%s10184_s6 + $0x690] sm:$0xff]  ;;  %v1157_v55 = vld [vmem:[%s10184_s6 + $0x758] sm:$0xff] }
 0x147   :  { %6171 = vmatprep.subr.bf16.mxu0 %v6170_v1  ;;  %v440_v3 = vpop.f32.mrb[9].mxu0  ;;  %v527_v4 = vpop.f32.mrb[8].mxu1  ;;  %v1013_v1 = vld [vmem:[%s10184_s6 + $0x2d8] sm:$0xff] }
 0x148   :  { %6173 = vmatpush1.bf16.msra.mxu0 %v6172_v61  ;;  %v529_v6 = vpop.f32.mrb[9].mxu1  ;;  %v988_v61 = vld [vmem:[%s10184_s6 + $0x210] sm:$0xff] }
 0x149   :  { %6175 = vmatprep.subr.bf16.mxu0 %v6174_v50  ;;  %v964_v50 = vld [vmem:[%s10184_s6 + $0x150] sm:$0xff] }
 0x14a   :  { %v444_v7 = vpop.f32.mrb[10].mxu0  ;;  %v6272_v53 = vpack.c.bf16 %v964_v50, %v956_v49  ;;  %v1141_v49 = vld [vmem:[%s10184_s6 + $0x6d8] sm:$0xff] }
 0x14b   :  { %v6184_v8 = vpack.c.bf16 %v444_v7, %v438_v2  ;;  %5696 = vmatmul.mubr.msk.f32.vlgmr.msra.gmra.mrb[16].mxu0 %vm555_vm1, %v5694_v5  ;;  %v446_v9 = vpop.f32.mrb[11].mxu0  ;;  %v533_v10 = vpop.f32.mrb[10].mxu1  ;;  %v1012_v5 = vld [vmem:[%s10184_s6 + $0x2d0] sm:$0xff]  ;;  %v1029_v7 = vld [vmem:[%s10184_s6 + $0x358] sm:$0xff] }
 0x14c   :  { %v6182_v11 = vpack.c.bf16 %v446_v9, %v440_v3  ;;  %6177 = vmatpush1.bf16.msra.mxu0 %v6176_v46  ;;  %v6192_v12 = vpack.c.bf16 %v533_v10, %v527_v4  ;;  %632 = vmatprep.mubr.f32.mxu0 %v7717_v0  ;;  %v535_v13 = vpop.f32.mrb[11].mxu1  ;;  %v5705_v46 = vld [vmem:[%s10185_s7 + $0x38] sm:$0xff]  ;;  %v6282_v3 = vpack.c.bf16 %v1013_v1, %v1005_v63  ;;  %v1004_v4 = vld [vmem:[%s10184_s6 + $0x290] sm:$0xff]  ;;  %s7719_s7 = smov [#allocation9]  }
 0x14d   :  { %6179 = vmatprep.subr.bf16.mxu0 %v6178_v62  ;;  %v6190_v15 = vpack.c.bf16 %v535_v13, %v529_v6  ;;  %v996_v62 = vld [vmem:[%s10184_s6 + $0x250] sm:$0xff]  ;;  %v1021_v6 = vld [vmem:[%s10184_s6 + $0x318] sm:$0xff] }
 0x14e   :  { %v450_v16 = vpop.f32.mrb[12].mxu0  ;;  %v6280_v2 = vpack.c.bf16 %v996_v62, %v988_v61  ;;  %v6286_v9 = vpack.c.bf16 %v1029_v7, %v1021_v6  ;;  %v1020_v10 = vld [vmem:[%s10184_s6 + $0x310] sm:$0xff]  ;;  %v1045_v13 = vld [vmem:[%s10184_s6 + $0x3d8] sm:$0xff]  ;;  %v1163_v61 = vld [vmem:[%s10184_s6 + $0x788] sm:$0xff] }
 0x14f   :  { %5697 = vmatmul.mubr.msk.f32.gmra.mrb[18].mxu0 %vm555_vm1, %v5695_v14  ;;  %v452_v17 = vpop.f32.mrb[13].mxu0  ;;  %v539_v18 = vpop.f32.mrb[12].mxu1  ;;  %v1171_v62 = vld [vmem:[%s10184_s6 + $0x7c8] sm:$0xff]  ;;  %v1165_v63 = vld [vmem:[%s10184_s6 + $0x798] sm:$0xff]  ;;  %v1164_v7 = vld [vmem:[%s10184_s6 + $0x790] sm:$0xff] }
 0x150   :  { %6181 = vmatpush1.bf16.msra.mxu0 %v6180_v58  ;;  %709 = vmatprep.mubr.f32.mxu0 %v7717_v0  ;;  %v541_v20 = vpop.f32.mrb[13].mxu1  ;;  %v997_v58 = vld [vmem:[%s10184_s6 + $0x258] sm:$0xff]  ;;  %v6258_v1 = vpack.c.bf16 %v1171_v62, %v1163_v61  ;;  %v975_v61 = vld [vmem:[%s10184_s6 + $0x1a8] sm:$0xff] }
 0x151   :  { %6183 = vmatprep.subr.bf16.mxu0 %v6182_v11  ;;  %v6278_v60 = vpack.c.bf16 %v997_v58, %v989_v57  ;;  %v1028_v11 = vld [vmem:[%s10184_s6 + $0x350] sm:$0xff] }
 0x152   :  { %v456_v21 = vpop.f32.mrb[14].mxu0  ;;  %v6288_v14 = vpack.c.bf16 %v1028_v11, %v1020_v10  ;;  %v1148_v58 = vld [vmem:[%s10184_s6 + $0x710] sm:$0xff]  ;;  %6259 = vmatprep.subr.bf16.mxu1 %v6258_v1  ;;  %v927_v10 = vld [vmem:[%s10184_s6 + $0x28] sm:$0xff] }
 0x153   :  { %v6188_v22 = vpack.c.bf16 %v456_v21, %v450_v16  ;;  %5698 = vmatmul.mubr.msk.f32.vlgmr.msra.gmra.mrb[16].mxu0 %vm555_vm1, %v550_v19  ;;  %v458_v23 = vpop.f32.mrb[15].mxu0  ;;  %v545_v24 = vpop.f32.mrb[14].mxu1  ;;  %v1036_v16 = vld [vmem:[%s10184_s6 + $0x390] sm:$0xff]  ;;  %v1061_v19 = vld [vmem:[%s10184_s6 + $0x458] sm:$0xff]  ;;  %v935_v11 = vld [vmem:[%s10184_s6 + $0x68] sm:$0xff] }
 0x154   :  { %v6186_v25 = vpack.c.bf16 %v458_v23, %v452_v17  ;;  %6185 = vmatpush1.bf16.msra.mxu0 %v6184_v8  ;;  %v6196_v26 = vpack.c.bf16 %v545_v24, %v539_v18  ;;  %715 = vmatprep.mubr.f32.mxu0 %v7717_v0  ;;  %v547_v27 = vpop.f32.mrb[15].mxu1  ;;  %v6284_v8 = vpack.c.bf16 %v1012_v5, %v1004_v4  ;;  %v1044_v17 = vld [vmem:[%s10184_s6 + $0x3d0] sm:$0xff]  ;;  %v1053_v18 = vld [vmem:[%s10184_s6 + $0x418] sm:$0xff]  ;;  %v1170_v4 = vld [vmem:[%s10184_s6 + $0x7c0] sm:$0xff] }
 0x155   :  { %v6194_v29 = vpack.c.bf16 %v547_v27, %v541_v20  ;;  %v6292_v20 = vpack.c.bf16 %v1044_v17, %v1036_v16  ;;  %v6294_v21 = vpack.c.bf16 %v1061_v19, %v1053_v18  ;;  %v1060_v23 = vld [vmem:[%s10184_s6 + $0x450] sm:$0xff]  ;;  %v1069_v24 = vld [vmem:[%s10184_s6 + $0x498] sm:$0xff]  ;;  %v904_v16 = vlaneseq  ;;  %v902_v19 = vld [vmem:[%s10186_s5] sm:$0x3] }
 0x156   :  { %6187 = vmatprep.subr.bf16.mxu0 %v6186_v25  ;;  %v1077_v25 = vld [vmem:[%s10184_s6 + $0x4d8] sm:$0xff]  ;;  %v983_v1 = vld [vmem:[%s10184_s6 + $0x1e8] sm:$0xff] }
 0x157   :  { %5699 = vmatmul.mubr.msk.f32.gmra.mrb[18].mxu0 %vm555_vm1, %v551_v28  ;;  %v6298_v27 = vpack.c.bf16 %v1077_v25, %v1069_v24  ;;  %v1068_v28 = vld [vmem:[%s10184_s6 + $0x490] sm:$0xff]  ;;  %v905_v17 = vshrl.u32 %v904_v16, 7  ;;  %v926_v24 = vld [vmem:[%s10184_s6 + $0x20] sm:$0xff] }
 0x158   :  { %6189 = vmatpush1.bf16.msra.mxu0 %v6188_v22  ;;  %795 = vmatprep.mubr.f32.mxu0 %v7717_v0  ;;  %v1052_v22 = vld [vmem:[%s10184_s6 + $0x410] sm:$0xff]  ;;  %v934_v25 = vld [vmem:[%s10184_s6 + $0x60] sm:$0xff] }
 0x159   :  { %6191 = vmatprep.subr.bf16.mxu0 %v6190_v15  ;;  %v8531_v18 = vsub.s32 0, %v905_v17 }
 0x15b   :  { %5702 = vmatmul.mubr.msk.f32.vlgmr.msra.gmra.mrb[16].mxu0 %vm555_vm1, %v5700_v30  ;;  %v1085_v30 = vld [vmem:[%s10184_s6 + $0x518] sm:$0xff] }
 0x15c   :  { %6193 = vmatpush1.bf16.msra.mxu0 %v6192_v12  ;;  %801 = vmatprep.mubr.f32.mxu0 %v7717_v0  ;;  %v1037_v12 = vld [vmem:[%s10184_s6 + $0x398] sm:$0xff] }
 0x15d   :  { %6195 = vmatprep.subr.bf16.mxu0 %v6194_v29  ;;  %v6290_v15 = vpack.c.bf16 %v1045_v13, %v1037_v12  ;;  %v1076_v29 = vld [vmem:[%s10184_s6 + $0x4d0] sm:$0xff]  ;;  %v929_v12 = vld [vmem:[%s10184_s6 + $0x38] sm:$0xff]  ;;  %v6326_v13 = vpack.c.bf16 %v935_v11, %v927_v10 }
 0x15e   :  { %v6300_v32 = vpack.c.bf16 %v1076_v29, %v1068_v28  ;;  %v928_v28 = vld [vmem:[%s10184_s6 + $0x30] sm:$0xff] }
 0x15f   :  { %5703 = vmatmul.mubr.msk.f32.gmra.mrb[18].mxu0 %vm555_vm1, %v5701_v33  ;;  %v6302_v33 = vpack.c.bf16 %v1093_v31, %v1085_v30  ;;  %v936_v29 = vld [vmem:[%s10184_s6 + $0x70] sm:$0xff]  ;;  %v943_v30 = vld [vmem:[%s10184_s6 + $0xa8] sm:$0xff] }
 0x160   :  { %6197 = vmatpush1.bf16.msra.mxu0 %v6196_v26  ;;  %885 = vmatprep.mubr.f32.mxu0 %v7717_v0  ;;  %v6296_v26 = vpack.c.bf16 %v1060_v23, %v1052_v22  ;;  %v976_v10 = vld [vmem:[%s10184_s6 + $0x1b0] sm:$0xff] }
 0x161   :  { %6263 = vmatprep.subr.bf16.mxu0 %v6262_v34  ;;  %v1084_v34 = vld [vmem:[%s10184_s6 + $0x510] sm:$0xff] }
 0x162   :  { %v6304_v38 = vpack.c.bf16 %v1092_v35, %v1084_v34  ;;  %v953_v34 = vld [vmem:[%s10184_s6 + $0xf8] sm:$0xff]  ;;  %v984_v11 = vld [vmem:[%s10184_s6 + $0x1f0] sm:$0xff] }
 0x163   :  { %5706 = vmatmul.mubr.msk.f32.vlgmr.msra.gmra.mrb[16].mxu0 %vm555_vm1, %v5704_v39  ;;  %v6306_v39 = vpack.c.bf16 %v1109_v37, %v1101_v36  ;;  %v6328_v37 = vpack.c.bf16 %v934_v25, %v926_v24  ;;  %v992_v24 = vld [vmem:[%s10184_s6 + $0x230] sm:$0xff] }
 0x164   :  { %891 = vmatprep.mubr.f32.mxu0 %v7717_v0  ;;  %6265 = vmatpush1.bf16.msra.mxu0 %v6264_v40  ;;  %v1100_v40 = vld [vmem:[%s10184_s6 + $0x590] sm:$0xff] }
 0x165   :  { %6267 = vmatprep.subr.bf16.mxu0 %v6266_v41  ;;  %v1108_v41 = vld [vmem:[%s10184_s6 + $0x5d0] sm:$0xff] }
 0x166   :  { %v6308_v44 = vpack.c.bf16 %v1108_v41, %v1100_v40  ;;  %v1000_v25 = vld [vmem:[%s10184_s6 + $0x270] sm:$0xff] }
 0x167   :  { %5707 = vmatmul.mubr.msk.f32.gmra.mrb[18].mxu0 %vm555_vm1, %v5705_v46  ;;  %v1116_v46 = vld [vmem:[%s10184_s6 + $0x610] sm:$0xff] }
 0x168   :  { %6269 = vmatpush1.bf16.msra.mxu0 %v6268_v47  ;;  %v1124_v47 = vld [vmem:[%s10184_s6 + $0x650] sm:$0xff] }
 0x169   :  { %6271 = vmatprep.subr.bf16.mxu0 %v6270_v48  ;;  %v1133_v48 = vld [vmem:[%s10184_s6 + $0x698] sm:$0xff]  ;;  %v6312_v50 = vpack.c.bf16 %v1124_v47, %v1116_v46  ;;  %v944_v46 = vld [vmem:[%s10184_s6 + $0xb0] sm:$0xff] }
 0x16a   :  { %v6314_v51 = vpack.c.bf16 %v1141_v49, %v1133_v48  ;;  %v952_v47 = vld [vmem:[%s10184_s6 + $0xf0] sm:$0xff]  ;;  %v959_v49 = vld [vmem:[%s10184_s6 + $0x128] sm:$0xff] }
 0x16c   :  { %6273 = vmatpush1.bf16.msra.mxu0 %v6272_v53  ;;  %v1140_v53 = vld [vmem:[%s10184_s6 + $0x6d0] sm:$0xff] }
 0x16d   :  { %6275 = vmatprep.subr.bf16.mxu0 %v6274_v54  ;;  %v1149_v54 = vld [vmem:[%s10184_s6 + $0x718] sm:$0xff]  ;;  %v6316_v56 = vpack.c.bf16 %v1140_v53, %v1132_v52 }
 0x16e   :  { %v6318_v57 = vpack.c.bf16 %v1157_v55, %v1149_v54  ;;  %v969_v52 = vld [vmem:[%s10184_s6 + $0x178] sm:$0xff]  ;;  %v6396_v55 = vpack.c.bf16 %v952_v47, %v944_v46  ;;  %v1030_v46 = vld [vmem:[%s10184_s6 + $0x360] sm:$0xff] }
 0x170   :  { %6277 = vmatpush1.bf16.msra.mxu0 %v6276_v59  ;;  %v1156_v59 = vld [vmem:[%s10184_s6 + $0x750] sm:$0xff] }
 0x171   :  { %6279 = vmatprep.subr.bf16.mxu0 %v6278_v60  ;;  %v6320_v60 = vpack.c.bf16 %v1156_v59, %v1148_v58  ;;  %v960_v59 = vld [vmem:[%s10184_s6 + $0x130] sm:$0xff] }
 0x174   :  { %6281 = vmatpush1.bf16.msra.mxu0 %v6280_v2  ;;  %v1173_v2 = vld [vmem:[%s10184_s6 + $0x7d8] sm:$0xff] }
 0x175   :  { %6283 = vmatprep.subr.bf16.mxu0 %v6282_v3  ;;  %v1162_v3 = vld [vmem:[%s10184_s6 + $0x780] sm:$0xff]  ;;  %v6322_v5 = vpack.c.bf16 %v1173_v2, %v1165_v63  ;;  %v977_v2 = vld [vmem:[%s10184_s6 + $0x1b8] sm:$0xff] }
 0x176   :  { %v6260_v6 = vpack.c.bf16 %v1170_v4, %v1162_v3  ;;  %v985_v3 = vld [vmem:[%s10184_s6 + $0x1f8] sm:$0xff] }
 0x178   :  { %6285 = vmatpush1.bf16.msra.mxu0 %v6284_v8  ;;  %v1172_v8 = vld [vmem:[%s10184_s6 + $0x7d0] sm:$0xff]  ;;  %6261 = vmatpush1.bf16.msra.mxu1 %v6260_v6  ;;  %v974_v6 = vld [vmem:[%s10184_s6 + $0x1a0] sm:$0xff] }
 0x179   :  { %6287 = vmatprep.subr.bf16.mxu0 %v6286_v9  ;;  %v6324_v9 = vpack.c.bf16 %v1172_v8, %v1164_v7  ;;  %6327 = vmatprep.subr.bf16.mxu1 %v6326_v13  ;;  %v982_v7 = vld [vmem:[%s10184_s6 + $0x1e0] sm:$0xff]  ;;  %v6338_v8 = vpack.c.bf16 %v983_v1, %v975_v61  ;;  %v999_v13 = vld [vmem:[%s10184_s6 + $0x268] sm:$0xff]  ;;  %v1048_v1 = vld [vmem:[%s10184_s6 + $0x3f0] sm:$0xff] }
 0x17a   :  { %v6340_v16 = vpack.c.bf16 %v982_v7, %v974_v6 }
 0x17c   :  { %6289 = vmatpush1.bf16.msra.mxu0 %v6288_v14  ;;  %v937_v14 = vld [vmem:[%s10184_s6 + $0x78] sm:$0xff] }
 0x17d   :  { %6291 = vmatprep.subr.bf16.mxu0 %v6290_v15  ;;  %v6390_v15 = vpack.c.bf16 %v937_v14, %v929_v12  ;;  %v991_v12 = vld [vmem:[%s10184_s6 + $0x228] sm:$0xff]  ;;  %v993_v14 = vld [vmem:[%s10184_s6 + $0x238] sm:$0xff] }
 0x180   :  { %6293 = vmatpush1.bf16.msra.mxu0 %v6292_v20  ;;  %v8536_v20 = vsub.s32 1, %v905_v17  ;;  %v6404_v17 = vpack.c.bf16 %v984_v11, %v976_v10 }
 0x181   :  { %6295 = vmatprep.subr.bf16.mxu0 %v6294_v21  ;;  %v907_v21 = vrot.slane %v902_v19, %v8531_v18 }
 0x182   :  { %v911_v22 = vrot.slane %v902_v19, %v8536_v20  ;;  %v990_v19 = vld [vmem:[%s10184_s6 + $0x220] sm:$0xff] }
 0x184   :  { %6297 = vmatpush1.bf16.msra.mxu0 %v6296_v26 }
 0x185   :  { %6299 = vmatprep.subr.bf16.mxu0 %v6298_v27 }
 0x188   :  { %6301 = vmatpush1.bf16.msra.mxu0 %v6300_v32  ;;  %v951_v32 = vld [vmem:[%s10184_s6 + $0xe8] sm:$0xff] }
 0x189   :  { %6303 = vmatprep.subr.bf16.mxu0 %v6302_v33  ;;  %v945_v33 = vld [vmem:[%s10184_s6 + $0xb8] sm:$0xff]  ;;  %v6330_v43 = vpack.c.bf16 %v951_v32, %v943_v30  ;;  %v1006_v32 = vld [vmem:[%s10184_s6 + $0x2a0] sm:$0xff] }
 0x18c   :  { %6305 = vmatpush1.bf16.msra.mxu0 %v6304_v38  ;;  %v6392_v38 = vpack.c.bf16 %v936_v29, %v928_v28  ;;  %v1009_v28 = vld [vmem:[%s10184_s6 + $0x2b8] sm:$0xff] }
 0x18d   :  { %6307 = vmatprep.subr.bf16.mxu0 %v6306_v39  ;;  %v942_v39 = vld [vmem:[%s10184_s6 + $0xa0] sm:$0xff]  ;;  %v1017_v29 = vld [vmem:[%s10184_s6 + $0x2f8] sm:$0xff] }
 0x190   :  { %6309 = vmatpush1.bf16.msra.mxu0 %v6308_v44  ;;  %v6394_v44 = vpack.c.bf16 %v953_v34, %v945_v33  ;;  %v1014_v33 = vld [vmem:[%s10184_s6 + $0x2e0] sm:$0xff] }
 0x191   :  { %6311 = vmatprep.subr.bf16.mxu0 %v6310_v45  ;;  %v950_v45 = vld [vmem:[%s10184_s6 + $0xe0] sm:$0xff] }
 0x192   :  { %v6332_v54 = vpack.c.bf16 %v950_v45, %v942_v39  ;;  %v1031_v39 = vld [vmem:[%s10184_s6 + $0x368] sm:$0xff]  ;;  %v1022_v45 = vld [vmem:[%s10184_s6 + $0x320] sm:$0xff] }
 0x194   :  { %6313 = vmatpush1.bf16.msra.mxu0 %v6312_v50  ;;  %v967_v50 = vld [vmem:[%s10184_s6 + $0x168] sm:$0xff] }
 0x195   :  { %6315 = vmatprep.subr.bf16.mxu0 %v6314_v51  ;;  %v961_v51 = vld [vmem:[%s10184_s6 + $0x138] sm:$0xff]  ;;  %v6334_v62 = vpack.c.bf16 %v967_v50, %v959_v49  ;;  %v1024_v49 = vld [vmem:[%s10184_s6 + $0x330] sm:$0xff] }
 0x196   :  { %v6398_v63 = vpack.c.bf16 %v969_v52, %v961_v51  ;;  %v1032_v50 = vld [vmem:[%s10184_s6 + $0x370] sm:$0xff]  ;;  %v1039_v51 = vld [vmem:[%s10184_s6 + $0x3a8] sm:$0xff] }
 0x197   :  { %v1047_v52 = vld [vmem:[%s10184_s6 + $0x3e8] sm:$0xff] }
 0x198   :  { %6317 = vmatpush1.bf16.msra.mxu0 %v6316_v56  ;;  %v958_v56 = vld [vmem:[%s10184_s6 + $0x120] sm:$0xff]  ;;  %v6354_v61 = vpack.c.bf16 %v1047_v52, %v1039_v51  ;;  %v1104_v51 = vld [vmem:[%s10184_s6 + $0x5b0] sm:$0xff] }
 0x199   :  { %6319 = vmatprep.subr.bf16.mxu0 %v6318_v57  ;;  %v966_v57 = vld [vmem:[%s10184_s6 + $0x160] sm:$0xff]  ;;  %v1112_v52 = vld [vmem:[%s10184_s6 + $0x5f0] sm:$0xff] }
 0x19a   :  { %v6336_v4 = vpack.c.bf16 %v966_v57, %v958_v56  ;;  %v6352_v56 = vpack.c.bf16 %v1030_v46, %v1022_v45  ;;  %v6416_v57 = vpack.c.bf16 %v1032_v50, %v1024_v49 }
 0x19c   :  { %6321 = vmatpush1.bf16.msra.mxu0 %v6320_v60  ;;  %v968_v60 = vld [vmem:[%s10184_s6 + $0x170] sm:$0xff] }
 0x19d   :  { %6323 = vmatprep.subr.bf16.mxu0 %v6322_v5  ;;  %v6400_v5 = vpack.c.bf16 %v968_v60, %v960_v59  ;;  %v1038_v59 = vld [vmem:[%s10184_s6 + $0x3a0] sm:$0xff] }
 0x19e   :  { %v1046_v60 = vld [vmem:[%s10184_s6 + $0x3e0] sm:$0xff] }
 0x19f   :  { %v6356_v6 = vpack.c.bf16 %v1046_v60, %v1038_v59  ;;  %v6436_v60 = vpack.c.bf16 %v1112_v52, %v1104_v51  ;;  %v1829_v51 = vld [vmem:[#allocation2 + $0x98] sm:$0xff] }
 0x1a0   :  { %6325 = vmatpush1.bf16.msra.mxu0 %v6324_v9  ;;  %v6402_v9 = vpack.c.bf16 %v985_v3, %v977_v2  ;;  %v1055_v2 = vld [vmem:[%s10184_s6 + $0x428] sm:$0xff]  ;;  %v1837_v52 = vld [vmem:[#allocation2 + $0xd8] sm:$0xff] }
 0x1a1   :  { %6391 = vmatprep.subr.bf16.mxu0 %v6390_v15  ;;  %v1001_v15 = vld [vmem:[%s10184_s6 + $0x278] sm:$0xff]  ;;  %v1063_v3 = vld [vmem:[%s10184_s6 + $0x468] sm:$0xff] }
 0x1a2   :  { %v6358_v10 = vpack.c.bf16 %v1063_v3, %v1055_v2  ;;  %v1120_v2 = vld [vmem:[%s10184_s6 + $0x630] sm:$0xff] }
 0x1a3   :  { %v1128_v3 = vld [vmem:[%s10184_s6 + $0x670] sm:$0xff] }
 0x236   :  { %v887_v23 = vpop.f32.mrb[16].mxu0 }
 0x237   :  { %v914_v26 = vadd.f32 %v907_v21, %v887_v23  ;;  %v889_v27 = vpop.f32.mrb[17].mxu0  ;;  %v6406_v23 = vpack.c.bf16 %v1001_v15, %v993_v14  ;;  %v1071_v14 = vld [vmem:[%s10184_s6 + $0x4a8] sm:$0xff] }
 0x238   :  { %v915_v31 = vadd.f32 %v911_v22, %v889_v27  ;;  %v1015_v27 = vld [vmem:[%s10184_s6 + $0x2e8] sm:$0xff] }
 0x239   :  { %v8567_v40 = vmax.f32 %v914_v26, 0.0  ;;  %v1007_v26 = vld [vmem:[%s10184_s6 + $0x2a8] sm:$0xff] }
 0x23a   :  { %v919_v35 = vmax.f32 %v915_v31, 0.0  ;;  %v893_v36 = vpop.f32.mrb[18].mxu0  ;;  %v6408_v31 = vpack.c.bf16 %v1000_v25, %v992_v24  ;;  %v6346_v34 = vpack.c.bf16 %v1015_v27, %v1007_v26  ;;  %v1079_v15 = vld [vmem:[%s10184_s6 + $0x4e8] sm:$0xff]  ;;  %v1072_v26 = vld [vmem:[%s10184_s6 + $0x4b0] sm:$0xff] }
 0x23b   :  { %v916_v41 = vadd.f32 %v907_v21, %v893_v36  ;;  %v895_v42 = vpop.f32.mrb[19].mxu0  ;;  %v998_v21 = vld [vmem:[%s10184_s6 + $0x260] sm:$0xff]  ;;  %v1008_v36 = vld [vmem:[%s10184_s6 + $0x2b0] sm:$0xff]  ;;  %v6362_v24 = vpack.c.bf16 %v1079_v15, %v1071_v14 }
 0x23c   :  { %v917_v48 = vadd.f32 %v911_v22, %v895_v42  ;;  %1242 = vmatprep.mubr.f32.mxu1 %v919_v35  ;;  %1319 = vmatprep.mubr.f32.mxu0 %v919_v35  ;;  %v6342_v22 = vpack.c.bf16 %v999_v13, %v991_v12  ;;  %v6344_v30 = vpack.c.bf16 %v998_v21, %v990_v19  ;;  %v1033_v42 = vld [vmem:[%s10184_s6 + $0x378] sm:$0xff]  ;;  %v1056_v12 = vld [vmem:[%s10184_s6 + $0x430] sm:$0xff] }
 0x23d   :  { %1243 = vmatmul.mubr.f32.vlgmr.msra.gmra.mrb[16].mxu1 %v8567_v40  ;;  %1320 = vmatmul.mubr.f32.vlgmr.msra.gmra.mrb[20].mxu0 %v8567_v40  ;;  %v8600_v58 = vmax.f32 %v916_v41, 0.0  ;;  %v1025_v41 = vld [vmem:[%s10184_s6 + $0x338] sm:$0xff]  ;;  %v1064_v13 = vld [vmem:[%s10184_s6 + $0x470] sm:$0xff] }
 0x23e   :  { %v8592_v53 = vmax.f32 %v917_v48, 0.0  ;;  %6329 = vmatpush1.bf16.msra.mxu1 %v6328_v37  ;;  %6393 = vmatpush1.bf16.msra.mxu0 %v6392_v38  ;;  %v1016_v37 = vld [vmem:[%s10184_s6 + $0x2f0] sm:$0xff]  ;;  %v1023_v38 = vld [vmem:[%s10184_s6 + $0x328] sm:$0xff]  ;;  %v6414_v48 = vpack.c.bf16 %v1033_v42, %v1025_v41  ;;  %v6424_v21 = vpack.c.bf16 %v1064_v13, %v1056_v12 }
 0x23f   :  { %6331 = vmatprep.subr.bf16.mxu1 %v6330_v43  ;;  %6395 = vmatprep.subr.bf16.mxu0 %v6394_v44  ;;  %v6348_v43 = vpack.c.bf16 %v1014_v33, %v1006_v32  ;;  %v6412_v44 = vpack.c.bf16 %v1016_v37, %v1008_v36  ;;  %v6350_v47 = vpack.c.bf16 %v1031_v39, %v1023_v38  ;;  %v1080_v27 = vld [vmem:[%s10184_s6 + $0x4f0] sm:$0xff]  ;;  %v1103_v41 = vld [vmem:[%s10184_s6 + $0x5a8] sm:$0xff] }
 0x240   :  { %1248 = vmatprep.mubr.f32.mxu1 %v8592_v53  ;;  %1325 = vmatprep.mubr.f32.mxu0 %v8592_v53  ;;  %v6428_v33 = vpack.c.bf16 %v1080_v27, %v1072_v26  ;;  %v1088_v38 = vld [vmem:[%s10184_s6 + $0x530] sm:$0xff]  ;;  %v1111_v42 = vld [vmem:[%s10184_s6 + $0x5e8] sm:$0xff] }
 0x241   :  { %1249 = vmatmul.mubr.f32.gmra.mrb[18].mxu1 %v8600_v58  ;;  %1326 = vmatmul.mubr.f32.gmra.mrb[22].mxu0 %v8600_v58  ;;  %v1096_v39 = vld [vmem:[%s10184_s6 + $0x570] sm:$0xff]  ;;  %v6370_v49 = vpack.c.bf16 %v1111_v42, %v1103_v41 }
 0x242   :  { %6333 = vmatpush1.bf16.msra.mxu1 %v6332_v54  ;;  %6397 = vmatpush1.bf16.msra.mxu0 %v6396_v55  ;;  %v1041_v54 = vld [vmem:[%s10184_s6 + $0x3b8] sm:$0xff]  ;;  %v6432_v46 = vpack.c.bf16 %v1096_v39, %v1088_v38  ;;  %v1136_v14 = vld [vmem:[%s10184_s6 + $0x6b0] sm:$0xff]  ;;  %v1174_v39 = vld [vmem:[%s10184_s6 + $0x7e0] sm:$0xff] }
 0x243   :  { %1396 = vmatprep.mubr.f32.mxu1 %v919_v35  ;;  %1473 = vmatprep.mubr.f32.mxu0 %v919_v35  ;;  %v6410_v35 = vpack.c.bf16 %v1017_v29, %v1009_v28  ;;  %v1049_v55 = vld [vmem:[%s10184_s6 + $0x3f8] sm:$0xff]  ;;  %v1087_v28 = vld [vmem:[%s10184_s6 + $0x528] sm:$0xff]  ;;  %v1144_v15 = vld [vmem:[%s10184_s6 + $0x6f0] sm:$0xff] }
 0x244   :  { %6335 = vmatprep.subr.bf16.mxu1 %v6334_v62  ;;  %6399 = vmatprep.subr.bf16.mxu0 %v6398_v63  ;;  %v6418_v62 = vpack.c.bf16 %v1049_v55, %v1041_v54  ;;  %v1040_v63 = vld [vmem:[%s10184_s6 + $0x3b0] sm:$0xff]  ;;  %v1095_v29 = vld [vmem:[%s10184_s6 + $0x568] sm:$0xff] }
 0x245   :  { %v6420_v7 = vpack.c.bf16 %v1048_v1, %v1040_v63  ;;  %v6366_v36 = vpack.c.bf16 %v1095_v29, %v1087_v28  ;;  %v1119_v54 = vld [vmem:[%s10184_s6 + $0x628] sm:$0xff]  ;;  %v1152_v28 = vld [vmem:[%s10184_s6 + $0x730] sm:$0xff] }
 0x246   :  { %6337 = vmatpush1.bf16.msra.mxu1 %v6336_v4  ;;  %6401 = vmatpush1.bf16.msra.mxu0 %v6400_v5  ;;  %v1057_v4 = vld [vmem:[%s10184_s6 + $0x438] sm:$0xff]  ;;  %v1127_v55 = vld [vmem:[%s10184_s6 + $0x668] sm:$0xff]  ;;  %v1160_v29 = vld [vmem:[%s10184_s6 + $0x770] sm:$0xff] }
 0x247   :  { %6339 = vmatprep.subr.bf16.mxu1 %v6338_v8  ;;  %6403 = vmatprep.subr.bf16.mxu0 %v6402_v9  ;;  %v1065_v5 = vld [vmem:[%s10184_s6 + $0x478] sm:$0xff]  ;;  %v1054_v8 = vld [vmem:[%s10184_s6 + $0x420] sm:$0xff]  ;;  %v6374_v63 = vpack.c.bf16 %v1127_v55, %v1119_v54  ;;  %v1168_v41 = vld [vmem:[%s10184_s6 + $0x7b0] sm:$0xff] }
 0x248   :  { %v1062_v9 = vld [vmem:[%s10184_s6 + $0x460] sm:$0xff]  ;;  %v6422_v11 = vpack.c.bf16 %v1065_v5, %v1057_v4  ;;  %v1135_v4 = vld [vmem:[%s10184_s6 + $0x6a8] sm:$0xff]  ;;  %v1176_v42 = vld [vmem:[%s10184_s6 + $0x7f0] sm:$0xff] }
 0x249   :  { %v6360_v19 = vpack.c.bf16 %v1062_v9, %v1054_v8  ;;  %v1143_v5 = vld [vmem:[%s10184_s6 + $0x6e8] sm:$0xff]  ;;  %v6440_v9 = vpack.c.bf16 %v1128_v3, %v1120_v2  ;;  %v1828_v54 = vld [vmem:[#allocation2 + $0x90] sm:$0xff] }
 0x24a   :  { %6341 = vmatpush1.bf16.msra.mxu1 %v6340_v16  ;;  %6405 = vmatpush1.bf16.msra.mxu0 %v6404_v17  ;;  %v1073_v16 = vld [vmem:[%s10184_s6 + $0x4b8] sm:$0xff]  ;;  %v6378_v12 = vpack.c.bf16 %v1143_v5, %v1135_v4  ;;  %v1836_v55 = vld [vmem:[#allocation2 + $0xd0] sm:$0xff] }
 0x24b   :  { %6343 = vmatprep.subr.bf16.mxu1 %v6342_v22  ;;  %6407 = vmatprep.subr.bf16.mxu0 %v6406_v23  ;;  %v1081_v17 = vld [vmem:[%s10184_s6 + $0x4f8] sm:$0xff]  ;;  %v1070_v22 = vld [vmem:[%s10184_s6 + $0x4a0] sm:$0xff]  ;;  %v1860_v2 = vld [vmem:[#allocation2 + $0x190] sm:$0xff] }
 0x24c   :  { %v1078_v23 = vld [vmem:[%s10184_s6 + $0x4e0] sm:$0xff]  ;;  %v6426_v25 = vpack.c.bf16 %v1081_v17, %v1073_v16  ;;  %v1151_v16 = vld [vmem:[%s10184_s6 + $0x728] sm:$0xff]  ;;  %v1868_v3 = vld [vmem:[#allocation2 + $0x1d0] sm:$0xff] }
 0x24d   :  { %v6364_v32 = vpack.c.bf16 %v1078_v23, %v1070_v22  ;;  %v1159_v17 = vld [vmem:[%s10184_s6 + $0x768] sm:$0xff]  ;;  %v6444_v23 = vpack.c.bf16 %v1144_v15, %v1136_v14  ;;  %v6548_v4 = vpack.c.bf16 %v1868_v3, %v1860_v2  ;;  %v1877_v5 = vld [vmem:[#allocation2 + $0x218] sm:$0xff]  ;;  %v1892_v14 = vld [vmem:[#allocation2 + $0x290] sm:$0xff] }
 0x24e   :  { %6345 = vmatpush1.bf16.msra.mxu1 %v6344_v30  ;;  %6409 = vmatpush1.bf16.msra.mxu0 %v6408_v31  ;;  %v1089_v30 = vld [vmem:[%s10184_s6 + $0x538] sm:$0xff]  ;;  %v6382_v26 = vpack.c.bf16 %v1159_v17, %v1151_v16  ;;  %v1900_v15 = vld [vmem:[#allocation2 + $0x2d0] sm:$0xff] }
 0x24f   :  { %6347 = vmatprep.subr.bf16.mxu1 %v6346_v34  ;;  %6411 = vmatprep.subr.bf16.mxu0 %v6410_v35  ;;  %v1097_v31 = vld [vmem:[%s10184_s6 + $0x578] sm:$0xff]  ;;  %v1086_v34 = vld [vmem:[%s10184_s6 + $0x520] sm:$0xff]  ;;  %v6556_v16 = vpack.c.bf16 %v1900_v15, %v1892_v14  ;;  %v2020_v14 = vld [vmem:[#allocation2 + $0x690] sm:$0xff] }
 0x250   :  { %v1094_v35 = vld [vmem:[%s10184_s6 + $0x560] sm:$0xff]  ;;  %v6430_v37 = vpack.c.bf16 %v1097_v31, %v1089_v30  ;;  %v1167_v30 = vld [vmem:[%s10184_s6 + $0x7a8] sm:$0xff]  ;;  %v1909_v17 = vld [vmem:[#allocation2 + $0x318] sm:$0xff] }
 0x251   :  { %v6368_v45 = vpack.c.bf16 %v1094_v35, %v1086_v34  ;;  %v1175_v31 = vld [vmem:[%s10184_s6 + $0x7e8] sm:$0xff]  ;;  %v6448_v35 = vpack.c.bf16 %v1160_v29, %v1152_v28  ;;  %v1924_v28 = vld [vmem:[#allocation2 + $0x390] sm:$0xff] }
 0x252   :  { %6349 = vmatpush1.bf16.msra.mxu1 %v6348_v43  ;;  %6413 = vmatpush1.bf16.msra.mxu0 %v6412_v44  ;;  %v1105_v43 = vld [vmem:[%s10184_s6 + $0x5b8] sm:$0xff]  ;;  %v1932_v29 = vld [vmem:[#allocation2 + $0x3d0] sm:$0xff] }
 0x253   :  { %6351 = vmatprep.subr.bf16.mxu1 %v6350_v47  ;;  %6415 = vmatprep.subr.bf16.mxu0 %v6414_v48  ;;  %v1113_v44 = vld [vmem:[%s10184_s6 + $0x5f8] sm:$0xff]  ;;  %v1102_v47 = vld [vmem:[%s10184_s6 + $0x5a0] sm:$0xff]  ;;  %v2028_v15 = vld [vmem:[#allocation2 + $0x6d0] sm:$0xff] }
 0x254   :  { %v1110_v48 = vld [vmem:[%s10184_s6 + $0x5e0] sm:$0xff]  ;;  %v6434_v50 = vpack.c.bf16 %v1113_v44, %v1105_v43  ;;  %v6452_v44 = vpack.c.bf16 %v1176_v42, %v1168_v41  ;;  %v1956_v41 = vld [vmem:[#allocation2 + $0x490] sm:$0xff] }
 0x255   :  { %v6372_v59 = vpack.c.bf16 %v1110_v48, %v1102_v47  ;;  %v1812_v48 = vld [vmem:[#allocation2 + $0x10] sm:$0xff] }
 0x256   :  { %6353 = vmatpush1.bf16.msra.mxu1 %v6352_v56  ;;  %6417 = vmatpush1.bf16.msra.mxu0 %v6416_v57  ;;  %v1121_v56 = vld [vmem:[%s10184_s6 + $0x638] sm:$0xff]  ;;  %v1964_v42 = vld [vmem:[#allocation2 + $0x4d0] sm:$0xff] }
 0x257   :  { %6355 = vmatprep.subr.bf16.mxu1 %v6354_v61  ;;  %6419 = vmatprep.subr.bf16.mxu0 %v6418_v62  ;;  %v1129_v57 = vld [vmem:[%s10184_s6 + $0x678] sm:$0xff]  ;;  %v1118_v61 = vld [vmem:[%s10184_s6 + $0x620] sm:$0xff] }
 0x258   :  { %v1126_v62 = vld [vmem:[%s10184_s6 + $0x660] sm:$0xff]  ;;  %v6438_v1 = vpack.c.bf16 %v1129_v57, %v1121_v56  ;;  %v1845_v56 = vld [vmem:[#allocation2 + $0x118] sm:$0xff] }
 0x259   :  { %v6376_v8 = vpack.c.bf16 %v1126_v62, %v1118_v61  ;;  %v1853_v57 = vld [vmem:[#allocation2 + $0x158] sm:$0xff] }
 0x25a   :  { %6357 = vmatpush1.bf16.msra.mxu1 %v6356_v6  ;;  %6421 = vmatpush1.bf16.msra.mxu0 %v6420_v7  ;;  %v1137_v6 = vld [vmem:[%s10184_s6 + $0x6b8] sm:$0xff] }
 0x25b   :  { %6359 = vmatprep.subr.bf16.mxu1 %v6358_v10  ;;  %6423 = vmatprep.subr.bf16.mxu0 %v6422_v11  ;;  %v1145_v7 = vld [vmem:[%s10184_s6 + $0x6f8] sm:$0xff]  ;;  %v1134_v10 = vld [vmem:[%s10184_s6 + $0x6a0] sm:$0xff] }
 0x25c   :  { %v1142_v11 = vld [vmem:[%s10184_s6 + $0x6e0] sm:$0xff]  ;;  %v6442_v13 = vpack.c.bf16 %v1145_v7, %v1137_v6  ;;  %v1861_v62 = vld [vmem:[#allocation2 + $0x198] sm:$0xff] }
 0x25d   :  { %v6380_v22 = vpack.c.bf16 %v1142_v11, %v1134_v10  ;;  %v1885_v6 = vld [vmem:[#allocation2 + $0x258] sm:$0xff] }
 0x25e   :  { %6361 = vmatpush1.bf16.msra.mxu1 %v6360_v19  ;;  %6425 = vmatpush1.bf16.msra.mxu0 %v6424_v21  ;;  %v1153_v19 = vld [vmem:[%s10184_s6 + $0x738] sm:$0xff]  ;;  %v6550_v7 = vpack.c.bf16 %v1885_v6, %v1877_v5  ;;  %v2004_v5 = vld [vmem:[#allocation2 + $0x610] sm:$0xff] }
 0x25f   :  { %6363 = vmatprep.subr.bf16.mxu1 %v6362_v24  ;;  %6427 = vmatprep.subr.bf16.mxu0 %v6426_v25  ;;  %v1161_v21 = vld [vmem:[%s10184_s6 + $0x778] sm:$0xff]  ;;  %v1150_v24 = vld [vmem:[%s10184_s6 + $0x720] sm:$0xff]  ;;  %v2012_v6 = vld [vmem:[#allocation2 + $0x650] sm:$0xff] }
 0x260   :  { %v1158_v25 = vld [vmem:[%s10184_s6 + $0x760] sm:$0xff]  ;;  %v6446_v27 = vpack.c.bf16 %v1161_v21, %v1153_v19  ;;  %v1893_v11 = vld [vmem:[#allocation2 + $0x298] sm:$0xff] }
 0x261   :  { %v6384_v34 = vpack.c.bf16 %v1158_v25, %v1150_v24  ;;  %v1917_v19 = vld [vmem:[#allocation2 + $0x358] sm:$0xff] }
 0x262   :  { %6365 = vmatpush1.bf16.msra.mxu1 %v6364_v32  ;;  %6429 = vmatpush1.bf16.msra.mxu0 %v6428_v33  ;;  %v1169_v32 = vld [vmem:[%s10184_s6 + $0x7b8] sm:$0xff]  ;;  %v6558_v21 = vpack.c.bf16 %v1917_v19, %v1909_v17 }
 0x263   :  { %6367 = vmatprep.subr.bf16.mxu1 %v6366_v36  ;;  %6431 = vmatprep.subr.bf16.mxu0 %v6430_v37  ;;  %v1177_v33 = vld [vmem:[%s10184_s6 + $0x7f8] sm:$0xff]  ;;  %v1166_v36 = vld [vmem:[%s10184_s6 + $0x7a0] sm:$0xff]  ;;  %v6386_v37 = vpack.c.bf16 %v1175_v31, %v1167_v30  ;;  %v6564_v30 = vpack.c.bf16 %v1932_v29, %v1924_v28 }
 0x264   :  { %v6450_v38 = vpack.c.bf16 %v1177_v33, %v1169_v32  ;;  %v6388_v43 = vpack.c.bf16 %v1174_v39, %v1166_v36  ;;  %v1925_v25 = vld [vmem:[#allocation2 + $0x398] sm:$0xff] }
 0x265   :  { %v1941_v31 = vld [vmem:[#allocation2 + $0x418] sm:$0xff] }
 0x266   :  { %6369 = vmatpush1.bf16.msra.mxu1 %v6368_v45  ;;  %6433 = vmatpush1.bf16.msra.mxu0 %v6432_v46  ;;  %v1813_v45 = vld [vmem:[#allocation2 + $0x18] sm:$0xff] }
 0x267   :  { %6371 = vmatprep.subr.bf16.mxu1 %v6370_v49  ;;  %6435 = vmatprep.subr.bf16.mxu0 %v6434_v50  ;;  %v1821_v46 = vld [vmem:[#allocation2 + $0x58] sm:$0xff]  ;;  %v1820_v49 = vld [vmem:[#allocation2 + $0x50] sm:$0xff] }
 0x268   :  { %v6534_v47 = vpack.c.bf16 %v1821_v46, %v1813_v45  ;;  %v6536_v50 = vpack.c.bf16 %v1820_v49, %v1812_v48  ;;  %v1949_v32 = vld [vmem:[#allocation2 + $0x458] sm:$0xff]  ;;  %v1980_v48 = vld [vmem:[#allocation2 + $0x550] sm:$0xff] }
 0x269   :  { %v6566_v33 = vpack.c.bf16 %v1949_v32, %v1941_v31  ;;  %v1981_v45 = vld [vmem:[#allocation2 + $0x558] sm:$0xff] }
 0x26a   :  { %6373 = vmatpush1.bf16.msra.mxu1 %v6372_v59  ;;  %6437 = vmatpush1.bf16.msra.mxu0 %v6436_v60  ;;  %v1844_v59 = vld [vmem:[#allocation2 + $0x110] sm:$0xff]  ;;  %v2037_v17 = vld [vmem:[#allocation2 + $0x718] sm:$0xff] }
 0x26b   :  { %6375 = vmatprep.subr.bf16.mxu1 %v6374_v63  ;;  %6439 = vmatprep.subr.bf16.mxu0 %v6438_v1  ;;  %v1852_v60 = vld [vmem:[#allocation2 + $0x150] sm:$0xff]  ;;  %v1869_v63 = vld [vmem:[#allocation2 + $0x1d8] sm:$0xff] }
 0x26c   :  { %v6544_v61 = vpack.c.bf16 %v1852_v60, %v1844_v59  ;;  %v6546_v1 = vpack.c.bf16 %v1869_v63, %v1861_v62  ;;  %v2005_v59 = vld [vmem:[#allocation2 + $0x618] sm:$0xff] }
 0x26d   :  { %v2013_v60 = vld [vmem:[#allocation2 + $0x658] sm:$0xff] }
 0x26e   :  { %6377 = vmatpush1.bf16.msra.mxu1 %v6376_v8  ;;  %6441 = vmatpush1.bf16.msra.mxu0 %v6440_v9  ;;  %v1876_v8 = vld [vmem:[#allocation2 + $0x210] sm:$0xff]  ;;  %v2045_v19 = vld [vmem:[#allocation2 + $0x758] sm:$0xff] }
 0x26f   :  { %6379 = vmatprep.subr.bf16.mxu1 %v6378_v12  ;;  %6443 = vmatprep.subr.bf16.mxu0 %v6442_v13  ;;  %v1884_v9 = vld [vmem:[#allocation2 + $0x250] sm:$0xff]  ;;  %v1901_v12 = vld [vmem:[#allocation2 + $0x2d8] sm:$0xff] }
 0x270   :  { %v6552_v10 = vpack.c.bf16 %v1884_v9, %v1876_v8  ;;  %v6554_v13 = vpack.c.bf16 %v1901_v12, %v1893_v11  ;;  %v6584_v9 = vpack.c.bf16 %v2012_v6, %v2004_v5  ;;  %v2029_v11 = vld [vmem:[#allocation2 + $0x6d8] sm:$0xff]  ;;  %v1882_v5 = vld [vmem:[#allocation2 + $0x240] sm:$0xff]  ;;  %v1891_v6 = vld [vmem:[#allocation2 + $0x288] sm:$0xff] }
 0x272   :  { %6381 = vmatpush1.bf16.msra.mxu1 %v6380_v22  ;;  %6445 = vmatpush1.bf16.msra.mxu0 %v6444_v23  ;;  %v1908_v22 = vld [vmem:[#allocation2 + $0x310] sm:$0xff] }
 0x273   :  { %6383 = vmatprep.subr.bf16.mxu1 %v6382_v26  ;;  %6447 = vmatprep.subr.bf16.mxu0 %v6446_v27  ;;  %v1916_v23 = vld [vmem:[#allocation2 + $0x350] sm:$0xff]  ;;  %v1933_v26 = vld [vmem:[#allocation2 + $0x3d8] sm:$0xff] }
 0x274   :  { %v6560_v24 = vpack.c.bf16 %v1916_v23, %v1908_v22  ;;  %v6562_v27 = vpack.c.bf16 %v1933_v26, %v1925_v25  ;;  %v2036_v22 = vld [vmem:[#allocation2 + $0x710] sm:$0xff]  ;;  %v1486_v25 = vld [vmem:[%s10187_s26] sm:$0xff] }
 0x275   :  { %v2044_v23 = vld [vmem:[#allocation2 + $0x750] sm:$0xff] }
 0x276   :  { %6385 = vmatpush1.bf16.msra.mxu1 %v6384_v34  ;;  %6449 = vmatpush1.bf16.msra.mxu0 %v6448_v35  ;;  %v1940_v34 = vld [vmem:[#allocation2 + $0x410] sm:$0xff] }
 0x277   :  { %6387 = vmatprep.subr.bf16.mxu1 %v6386_v37  ;;  %6451 = vmatprep.subr.bf16.mxu0 %v6450_v38  ;;  %v1948_v35 = vld [vmem:[#allocation2 + $0x450] sm:$0xff]  ;;  %v1957_v37 = vld [vmem:[#allocation2 + $0x498] sm:$0xff] }
 0x278   :  { %v6568_v36 = vpack.c.bf16 %v1948_v35, %v1940_v34  ;;  %v1965_v38 = vld [vmem:[#allocation2 + $0x4d8] sm:$0xff] }
 0x279   :  { %v6570_v39 = vpack.c.bf16 %v1965_v38, %v1957_v37  ;;  %v1811_v38 = vld [vmem:[#allocation2 + $0x8] sm:$0xff] }
 0x27a   :  { %6389 = vmatpush1.bf16.msra.mxu1 %v6388_v43  ;;  %6453 = vmatpush1.bf16.msra.mxu0 %v6452_v44  ;;  %v6572_v43 = vpack.c.bf16 %v1964_v42, %v1956_v41  ;;  %v1973_v44 = vld [vmem:[#allocation2 + $0x518] sm:$0xff]  ;;  %v5711_v41 = vld [vmem:[%s10187_s26 + $0x10] sm:$0xff] }
 0x27b   :  { %6535 = vmatprep.subr.bf16.mxu0 %v6534_v47  ;;  %v6574_v46 = vpack.c.bf16 %v1981_v45, %v1973_v44  ;;  %v1972_v47 = vld [vmem:[#allocation2 + $0x510] sm:$0xff]  ;;  %v1818_v44 = vld [vmem:[#allocation2 + $0x40] sm:$0xff]  ;;  %v1827_v45 = vld [vmem:[#allocation2 + $0x88] sm:$0xff] }
 0x27c   :  { %v6576_v49 = vpack.c.bf16 %v1980_v48, %v1972_v47  ;;  %v5713_v47 = vld [vmem:[%s10187_s26 + $0x18] sm:$0xff] }
 0x27d   :  { %1397 = vmatmul.mubr.f32.vlgmr.msra.gmra.mrb[20].mxu1 %v8567_v40  ;;  %1474 = vmatmul.mubr.f32.vlgmr.msra.gmra.mrb[24].mxu0 %v8567_v40  ;;  %v6538_v40 = vpack.c.bf16 %v1837_v52, %v1829_v51  ;;  %v1997_v51 = vld [vmem:[#allocation2 + $0x5d8] sm:$0xff] }
 0x27e   :  { %1402 = vmatprep.mubr.f32.mxu1 %v8592_v53  ;;  %1479 = vmatprep.mubr.f32.mxu0 %v8592_v53  ;;  %v6540_v53 = vpack.c.bf16 %v1836_v55, %v1828_v54 }
 0x27f   :  { %6537 = vmatpush1.bf16.msra.mxu0 %v6536_v50  ;;  %v1989_v50 = vld [vmem:[#allocation2 + $0x598] sm:$0xff] }
 0x280   :  { %6539 = vmatprep.subr.bf16.mxu0 %v6538_v40  ;;  %v6578_v52 = vpack.c.bf16 %v1997_v51, %v1989_v50  ;;  %v1826_v50 = vld [vmem:[#allocation2 + $0x80] sm:$0xff] }
 0x281   :  { %1403 = vmatmul.mubr.f32.gmra.mrb[22].mxu1 %v8600_v58  ;;  %1480 = vmatmul.mubr.f32.gmra.mrb[26].mxu0 %v8600_v58  ;;  %v6542_v58 = vpack.c.bf16 %v1853_v57, %v1845_v56  ;;  %v1988_v56 = vld [vmem:[#allocation2 + $0x590] sm:$0xff]  ;;  %v1834_v51 = vld [vmem:[#allocation2 + $0xc0] sm:$0xff] }
 0x282   :  { %1557 = vmatprep.mubr.f32.mxu1 %v7717_v0  ;;  %v1996_v57 = vld [vmem:[#allocation2 + $0x5d0] sm:$0xff] }
 0x283   :  { %6541 = vmatpush1.bf16.msra.mxu0 %v6540_v53 }
 0x284   :  { %6543 = vmatprep.subr.bf16.mxu0 %v6542_v58  ;;  %v6580_v58 = vpack.c.bf16 %v1996_v57, %v1988_v56  ;;  %v1850_v56 = vld [vmem:[#allocation2 + $0x140] sm:$0xff]  ;;  %v1859_v57 = vld [vmem:[#allocation2 + $0x188] sm:$0xff] }
 0x287   :  { %6545 = vmatpush1.bf16.msra.mxu0 %v6544_v61  ;;  %v6582_v61 = vpack.c.bf16 %v2013_v60, %v2005_v59 }
 0x288   :  { %6547 = vmatprep.subr.bf16.mxu0 %v6546_v1 }
 0x28b   :  { %6549 = vmatpush1.bf16.msra.mxu0 %v6548_v4 }
 0x28c   :  { %6551 = vmatprep.subr.bf16.mxu0 %v6550_v7 }
 0x28f   :  { %6553 = vmatpush1.bf16.msra.mxu0 %v6552_v10  ;;  %v2021_v10 = vld [vmem:[#allocation2 + $0x698] sm:$0xff] }
 0x290   :  { %6555 = vmatprep.subr.bf16.mxu0 %v6554_v13  ;;  %v6586_v12 = vpack.c.bf16 %v2029_v11, %v2021_v10  ;;  %v5708_v13 = vld [vmem:[%s10187_s26 + $0x8] sm:$0xff]  ;;  %v1890_v10 = vld [vmem:[#allocation2 + $0x280] sm:$0xff] }
 0x291   :  { %v1898_v11 = vld [vmem:[#allocation2 + $0x2c0] sm:$0xff] }
 0x293   :  { %6557 = vmatpush1.bf16.msra.mxu0 %v6556_v16  ;;  %v6588_v16 = vpack.c.bf16 %v2028_v15, %v2020_v14  ;;  %v6492_v14 = vpack.c.bf16 %v1898_v11, %v1890_v10  ;;  %v2061_v10 = vld [vmem:[#allocation2 + $0x7d8] sm:$0xff]  ;;  %v2050_v11 = vld [vmem:[#allocation2 + $0x780] sm:$0xff] }
 0x294   :  { %6559 = vmatprep.subr.bf16.mxu0 %v6558_v21  ;;  %v6590_v21 = vpack.c.bf16 %v2045_v19, %v2037_v17  ;;  %v1914_v17 = vld [vmem:[#allocation2 + $0x340] sm:$0xff]  ;;  %v1923_v19 = vld [vmem:[#allocation2 + $0x388] sm:$0xff] }
 0x297   :  { %6561 = vmatpush1.bf16.msra.mxu0 %v6560_v24  ;;  %v6592_v24 = vpack.c.bf16 %v2044_v23, %v2036_v22 }
 0x298   :  { %6563 = vmatprep.subr.bf16.mxu0 %v6562_v27 }
 0x29b   :  { %6565 = vmatpush1.bf16.msra.mxu0 %v6564_v30 }
 0x29c   :  { %6567 = vmatprep.subr.bf16.mxu0 %v6566_v33 }
 0x29f   :  { %6569 = vmatpush1.bf16.msra.mxu0 %v6568_v36 }
 0x2a0   :  { %6571 = vmatprep.subr.bf16.mxu0 %v6570_v39  ;;  %v1819_v39 = vld [vmem:[#allocation2 + $0x48] sm:$0xff] }
 0x2a1   :  { %v6470_v42 = vpack.c.bf16 %v1819_v39, %v1811_v38  ;;  %v1971_v38 = vld [vmem:[#allocation2 + $0x508] sm:$0xff] }
 0x2a2   :  { %v1979_v39 = vld [vmem:[#allocation2 + $0x548] sm:$0xff] }
 0x2a3   :  { %6573 = vmatpush1.bf16.msra.mxu0 %v6572_v43  ;;  %v1810_v43 = vld [vmem:[#allocation2] sm:$0xff] }
 0x2a4   :  { %6575 = vmatprep.subr.bf16.mxu0 %v6574_v46  ;;  %v1835_v46 = vld [vmem:[#allocation2 + $0xc8] sm:$0xff]  ;;  %v6472_v48 = vpack.c.bf16 %v1818_v44, %v1810_v43  ;;  %v1970_v43 = vld [vmem:[#allocation2 + $0x500] sm:$0xff] }
 0x2a5   :  { %v1978_v44 = vld [vmem:[#allocation2 + $0x540] sm:$0xff] }
 0x2a7   :  { %6577 = vmatpush1.bf16.msra.mxu0 %v6576_v49  ;;  %v6474_v49 = vpack.c.bf16 %v1835_v46, %v1827_v45  ;;  %v1987_v45 = vld [vmem:[#allocation2 + $0x588] sm:$0xff] }
 0x2a8   :  { %6579 = vmatprep.subr.bf16.mxu0 %v6578_v52  ;;  %v1843_v52 = vld [vmem:[#allocation2 + $0x108] sm:$0xff] }
 0x2a9   :  { %v1995_v46 = vld [vmem:[#allocation2 + $0x5c8] sm:$0xff] }
 0x2ab   :  { %6581 = vmatpush1.bf16.msra.mxu0 %v6580_v58  ;;  %v1867_v58 = vld [vmem:[#allocation2 + $0x1c8] sm:$0xff] }
 0x2ac   :  { %6583 = vmatprep.subr.bf16.mxu0 %v6582_v61  ;;  %v6482_v60 = vpack.c.bf16 %v1867_v58, %v1859_v57  ;;  %v1858_v61 = vld [vmem:[#allocation2 + $0x180] sm:$0xff]  ;;  %v2027_v57 = vld [vmem:[#allocation2 + $0x6c8] sm:$0xff] }
 0x2af   :  { %6585 = vmatpush1.bf16.msra.mxu0 %v6584_v9 }
 0x2b0   :  { %6587 = vmatprep.subr.bf16.mxu0 %v6586_v12  ;;  %v1907_v12 = vld [vmem:[#allocation2 + $0x308] sm:$0xff] }
 0x2b3   :  { %6589 = vmatpush1.bf16.msra.mxu0 %v6588_v16  ;;  %v1906_v16 = vld [vmem:[#allocation2 + $0x300] sm:$0xff] }
 0x2b4   :  { %6591 = vmatprep.subr.bf16.mxu0 %v6590_v21  ;;  %v1931_v21 = vld [vmem:[#allocation2 + $0x3c8] sm:$0xff]  ;;  %v6496_v22 = vpack.c.bf16 %v1914_v17, %v1906_v16  ;;  %v2060_v16 = vld [vmem:[#allocation2 + $0x7d0] sm:$0xff] }
 0x2b5   :  { %v6498_v23 = vpack.c.bf16 %v1931_v21, %v1923_v19  ;;  %v1815_v19 = vld [vmem:[#allocation2 + $0x28] sm:$0xff] }
 0x2b6   :  { %v1823_v21 = vld [vmem:[#allocation2 + $0x68] sm:$0xff] }
 0x2b7   :  { %6593 = vmatpush1.bf16.msra.mxu0 %v6592_v24  ;;  %v1922_v24 = vld [vmem:[#allocation2 + $0x380] sm:$0xff] }
 0x310   :  { %v1244_v40 = vpop.f32.mrb[16].mxu1  ;;  %v1321_v54 = vpop.f32.mrb[20].mxu0 }
 0x311   :  { %v1246_v55 = vpop.f32.mrb[17].mxu1  ;;  %v1323_v53 = vpop.f32.mrb[21].mxu0 }
 0x314   :  { %v1250_v62 = vpop.f32.mrb[18].mxu1  ;;  %v1327_v63 = vpop.f32.mrb[22].mxu0 }
 0x315   :  { %v6460_v1 = vpack.c.bf16 %v1250_v62, %v1244_v40  ;;  %v6456_v2 = vpack.c.bf16 %v1327_v63, %v1321_v54  ;;  %v1252_v3 = vpop.f32.mrb[19].mxu1  ;;  %v1329_v4 = vpop.f32.mrb[23].mxu0  ;;  %v1851_v40 = vld [vmem:[#allocation2 + $0x148] sm:$0xff]  ;;  %v6476_v54 = vpack.c.bf16 %v1834_v51, %v1826_v50  ;;  %v1866_v62 = vld [vmem:[#allocation2 + $0x1c0] sm:$0xff] }
 0x316   :  { %v6458_v7 = vpack.c.bf16 %v1252_v3, %v1246_v55  ;;  %v6454_v8 = vpack.c.bf16 %v1329_v4, %v1323_v53  ;;  %v6478_v55 = vpack.c.bf16 %v1851_v40, %v1843_v52  ;;  %v1842_v53 = vld [vmem:[#allocation2 + $0x100] sm:$0xff]  ;;  %v1875_v63 = vld [vmem:[#allocation2 + $0x208] sm:$0xff] }
 0x317   :  { %v6480_v59 = vpack.c.bf16 %v1850_v56, %v1842_v53  ;;  %v1874_v4 = vld [vmem:[#allocation2 + $0x200] sm:$0xff]  ;;  %v2003_v51 = vld [vmem:[#allocation2 + $0x608] sm:$0xff] }
 0x318   :  { %6455 = vmatprep.subr.bf16.mxu1 %v6454_v8  ;;  %v6488_v8 = vpack.c.bf16 %v1882_v5, %v1874_v4  ;;  %v1994_v50 = vld [vmem:[#allocation2 + $0x5c0] sm:$0xff]  ;;  %v2011_v52 = vld [vmem:[#allocation2 + $0x648] sm:$0xff] }
 0x319   :  { %6457 = vmatpush1.bf16.msra.mxu1 %v6456_v2  ;;  %v6484_v2 = vpack.c.bf16 %v1866_v62, %v1858_v61  ;;  %v2010_v53 = vld [vmem:[#allocation2 + $0x640] sm:$0xff]  ;;  %v2019_v56 = vld [vmem:[#allocation2 + $0x688] sm:$0xff] }
 0x31a   :  { %6459 = vmatprep.subr.bf16.mxu1 %v6458_v7  ;;  %v1899_v7 = vld [vmem:[#allocation2 + $0x2c8] sm:$0xff]  ;;  %v2026_v61 = vld [vmem:[#allocation2 + $0x6c0] sm:$0xff] }
 0x31b   :  { %v6490_v9 = vpack.c.bf16 %v1899_v7, %v1891_v6  ;;  %v2035_v62 = vld [vmem:[#allocation2 + $0x708] sm:$0xff]  ;;  %v2042_v4 = vld [vmem:[#allocation2 + $0x740] sm:$0xff] }
 0x31c   :  { %5709 = vmatmul.mubr.msk.f32.vlgmr.msra.gmra.mrb[24].mxu1 %vm1489_vm2, %v5708_v13  ;;  %v1915_v13 = vld [vmem:[#allocation2 + $0x348] sm:$0xff] }
 0x31d   :  { %6461 = vmatpush1.bf16.msra.mxu1 %v6460_v1  ;;  %1631 = vmatprep.mubr.f32.mxu1 %v7717_v0  ;;  %v1883_v1 = vld [vmem:[#allocation2 + $0x248] sm:$0xff]  ;;  %v6494_v15 = vpack.c.bf16 %v1915_v13, %v1907_v12  ;;  %v2058_v12 = vld [vmem:[#allocation2 + $0x7c0] sm:$0xff] }
 0x31e   :  { %v6486_v3 = vpack.c.bf16 %v1883_v1, %v1875_v63  ;;  %v2043_v63 = vld [vmem:[#allocation2 + $0x748] sm:$0xff] }
 0x31f   :  { %v2051_v6 = vld [vmem:[#allocation2 + $0x788] sm:$0xff] }
 0x320   :  { %v2059_v7 = vld [vmem:[#allocation2 + $0x7c8] sm:$0xff] }
 0x324   :  { %5710 = vmatmul.mubr.msk.f32.vlgmr.msra.gmra.mrb[24].mxu1 %vm1489_vm2, %v1486_v25  ;;  %v1930_v25 = vld [vmem:[#allocation2 + $0x3c0] sm:$0xff] }
 0x325   :  { %1707 = vmatprep.mubr.f32.mxu1 %v7717_v0 }
 0x350   :  { %v1398_v26 = vpop.f32.mrb[20].mxu1  ;;  %v1475_v27 = vpop.f32.mrb[24].mxu0 }
 0x351   :  { %v1400_v28 = vpop.f32.mrb[21].mxu1  ;;  %v1477_v29 = vpop.f32.mrb[25].mxu0 }
 0x354   :  { %v1404_v30 = vpop.f32.mrb[22].mxu1  ;;  %v1481_v31 = vpop.f32.mrb[26].mxu0 }
 0x355   :  { %v6464_v32 = vpack.c.bf16 %v1404_v30, %v1398_v26  ;;  %v6468_v33 = vpack.c.bf16 %v1481_v31, %v1475_v27  ;;  %v1406_v34 = vpop.f32.mrb[23].mxu1  ;;  %v1483_v35 = vpop.f32.mrb[27].mxu0  ;;  %v1939_v26 = vld [vmem:[#allocation2 + $0x408] sm:$0xff]  ;;  %v1938_v30 = vld [vmem:[#allocation2 + $0x400] sm:$0xff] }
 0x356   :  { %v6462_v36 = vpack.c.bf16 %v1406_v34, %v1400_v28  ;;  %v6466_v37 = vpack.c.bf16 %v1483_v35, %v1477_v29  ;;  %v1947_v27 = vld [vmem:[#allocation2 + $0x448] sm:$0xff]  ;;  %v6500_v28 = vpack.c.bf16 %v1930_v25, %v1922_v24  ;;  %v1946_v31 = vld [vmem:[#allocation2 + $0x440] sm:$0xff]  ;;  %v1825_v24 = vld [vmem:[#allocation2 + $0x78] sm:$0xff] }
 0x357   :  { %v6502_v29 = vpack.c.bf16 %v1947_v27, %v1939_v26  ;;  %v6504_v34 = vpack.c.bf16 %v1946_v31, %v1938_v30  ;;  %v1794_v26 = vld [vmem:[%s10188_s4] sm:$0x3] }
 0x358   :  { %6463 = vmatprep.subr.bf16.mxu1 %v6462_v36  ;;  %v1954_v36 = vld [vmem:[#allocation2 + $0x480] sm:$0xff]  ;;  %v1799_v27 = vrot.slane %v1794_v26, %v8531_v18 }
 0x359   :  { %6465 = vmatpush1.bf16.msra.mxu1 %v6464_v32  ;;  %v1955_v32 = vld [vmem:[#allocation2 + $0x488] sm:$0xff]  ;;  %v1814_v30 = vld [vmem:[#allocation2 + $0x20] sm:$0xff] }
 0x35a   :  { %6467 = vmatprep.subr.bf16.mxu1 %v6466_v37  ;;  %v1962_v37 = vld [vmem:[#allocation2 + $0x4c0] sm:$0xff] }
 0x35c   :  { %5712 = vmatmul.mubr.msk.f32.vlgmr.msra.gmra.mrb[24].mxu1 %vm1489_vm2, %v5711_v41  ;;  %v6508_v41 = vpack.c.bf16 %v1962_v37, %v1954_v36  ;;  %v1831_v37 = vld [vmem:[#allocation2 + $0xa8] sm:$0xff] }
 0x35d   :  { %6469 = vmatpush1.bf16.msra.mxu1 %v6468_v33  ;;  %1785 = vmatprep.mubr.f32.mxu1 %v7717_v0  ;;  %v1963_v33 = vld [vmem:[#allocation2 + $0x4c8] sm:$0xff] }
 0x35e   :  { %6471 = vmatprep.subr.bf16.mxu1 %v6470_v42  ;;  %v6506_v35 = vpack.c.bf16 %v1963_v33, %v1955_v32  ;;  %v6510_v42 = vpack.c.bf16 %v1979_v39, %v1971_v38  ;;  %v1822_v33 = vld [vmem:[#allocation2 + $0x60] sm:$0xff]  ;;  %v1839_v38 = vld [vmem:[#allocation2 + $0xe8] sm:$0xff]  ;;  %v1833_v39 = vld [vmem:[#allocation2 + $0xb8] sm:$0xff] }
 0x364   :  { %5714 = vmatmul.mubr.msk.f32.vlgmr.msra.gmra.mrb[24].mxu1 %vm1489_vm2, %v5713_v47  ;;  %v6512_v47 = vpack.c.bf16 %v1978_v44, %v1970_v43  ;;  %v6600_v43 = vpack.c.bf16 %v1822_v33, %v1814_v30  ;;  %v1902_v33 = vld [vmem:[#allocation2 + $0x2e0] sm:$0xff] }
 0x365   :  { %6473 = vmatpush1.bf16.msra.mxu1 %v6472_v48  ;;  %v6514_v48 = vpack.c.bf16 %v1995_v46, %v1987_v45  ;;  %v1830_v45 = vld [vmem:[#allocation2 + $0xa0] sm:$0xff] }
 0x366   :  { %6475 = vmatprep.subr.bf16.mxu1 %v6474_v49  ;;  %v1986_v49 = vld [vmem:[#allocation2 + $0x580] sm:$0xff] }
 0x367   :  { %v6516_v40 = vpack.c.bf16 %v1994_v50, %v1986_v49  ;;  %v1838_v46 = vld [vmem:[#allocation2 + $0xe0] sm:$0xff]  ;;  %v1840_v49 = vld [vmem:[#allocation2 + $0xf0] sm:$0xff]  ;;  %v1847_v50 = vld [vmem:[#allocation2 + $0x128] sm:$0xff] }
 0x369   :  { %6477 = vmatpush1.bf16.msra.mxu1 %v6476_v54  ;;  %v6518_v54 = vpack.c.bf16 %v2011_v52, %v2003_v51  ;;  %v6602_v51 = vpack.c.bf16 %v1839_v38, %v1831_v37  ;;  %v1904_v37 = vld [vmem:[#allocation2 + $0x2f0] sm:$0xff]  ;;  %v1911_v38 = vld [vmem:[#allocation2 + $0x328] sm:$0xff] }
 0x36a   :  { %6479 = vmatprep.subr.bf16.mxu1 %v6478_v55  ;;  %v2002_v55 = vld [vmem:[#allocation2 + $0x600] sm:$0xff] }
 0x36b   :  { %v6520_v58 = vpack.c.bf16 %v2010_v53, %v2002_v55  ;;  %v1857_v55 = vld [vmem:[#allocation2 + $0x178] sm:$0xff]  ;;  %v6604_v53 = vpack.c.bf16 %v1838_v46, %v1830_v45  ;;  %v1910_v45 = vld [vmem:[#allocation2 + $0x320] sm:$0xff] }
 0x36c   :  { %v1918_v46 = vld [vmem:[#allocation2 + $0x360] sm:$0xff] }
 0x36d   :  { %6481 = vmatpush1.bf16.msra.mxu1 %v6480_v59  ;;  %v6522_v59 = vpack.c.bf16 %v2027_v57, %v2019_v56  ;;  %v1846_v57 = vld [vmem:[#allocation2 + $0x120] sm:$0xff] }
 0x36e   :  { %6483 = vmatprep.subr.bf16.mxu1 %v6482_v60  ;;  %v2018_v60 = vld [vmem:[#allocation2 + $0x680] sm:$0xff] }
 0x36f   :  { %v6524_v1 = vpack.c.bf16 %v2026_v61, %v2018_v60  ;;  %v1848_v61 = vld [vmem:[#allocation2 + $0x130] sm:$0xff] }
 0x371   :  { %6485 = vmatpush1.bf16.msra.mxu1 %v6484_v2  ;;  %v6526_v2 = vpack.c.bf16 %v2043_v63, %v2035_v62  ;;  %v1856_v62 = vld [vmem:[#allocation2 + $0x170] sm:$0xff]  ;;  %v1863_v63 = vld [vmem:[#allocation2 + $0x1a8] sm:$0xff] }
 0x372   :  { %6487 = vmatprep.subr.bf16.mxu1 %v6486_v3  ;;  %v2034_v3 = vld [vmem:[#allocation2 + $0x700] sm:$0xff] }
 0x373   :  { %v6528_v5 = vpack.c.bf16 %v2042_v4, %v2034_v3  ;;  %v1873_v3 = vld [vmem:[#allocation2 + $0x1f8] sm:$0xff] }
 0x375   :  { %6489 = vmatpush1.bf16.msra.mxu1 %v6488_v8  ;;  %v2053_v8 = vld [vmem:[#allocation2 + $0x798] sm:$0xff] }
 0x376   :  { %6491 = vmatprep.subr.bf16.mxu1 %v6490_v9  ;;  %v6530_v9 = vpack.c.bf16 %v2059_v7, %v2051_v6  ;;  %v6594_v13 = vpack.c.bf16 %v2061_v10, %v2053_v8  ;;  %v1862_v6 = vld [vmem:[#allocation2 + $0x1a0] sm:$0xff]  ;;  %v1864_v10 = vld [vmem:[#allocation2 + $0x1b0] sm:$0xff] }
 0x377   :  { %v1870_v7 = vld [vmem:[#allocation2 + $0x1e0] sm:$0xff] }
 0x378   :  { %6595 = vmatprep.subr.bf16.mxu0 %v6594_v13  ;;  %v1887_v13 = vld [vmem:[#allocation2 + $0x268] sm:$0xff] }
 0x379   :  { %6493 = vmatpush1.bf16.msra.mxu1 %v6492_v14  ;;  %v6532_v14 = vpack.c.bf16 %v2058_v12, %v2050_v11  ;;  %v1872_v11 = vld [vmem:[#allocation2 + $0x1f0] sm:$0xff]  ;;  %v1879_v12 = vld [vmem:[#allocation2 + $0x228] sm:$0xff] }
 0x37a   :  { %6495 = vmatprep.subr.bf16.mxu1 %v6494_v15  ;;  %v2052_v15 = vld [vmem:[#allocation2 + $0x790] sm:$0xff] }
 0x37b   :  { %v6596_v17 = vpack.c.bf16 %v2060_v16, %v2052_v15  ;;  %v1889_v15 = vld [vmem:[#allocation2 + $0x278] sm:$0xff]  ;;  %v6612_v16 = vpack.c.bf16 %v1870_v7, %v1862_v6  ;;  %v1942_v6 = vld [vmem:[#allocation2 + $0x420] sm:$0xff] }
 0x37c   :  { %v1950_v7 = vld [vmem:[#allocation2 + $0x460] sm:$0xff] }
 0x37d   :  { %6497 = vmatpush1.bf16.msra.mxu1 %v6496_v22  ;;  %v1817_v22 = vld [vmem:[#allocation2 + $0x38] sm:$0xff]  ;;  %6597 = vmatpush1.bf16.msra.mxu0 %v6596_v17  ;;  %v6676_v17 = vpack.c.bf16 %v1872_v11, %v1864_v10  ;;  %v1944_v10 = vld [vmem:[#allocation2 + $0x430] sm:$0xff] }
 0x37e   :  { %6499 = vmatprep.subr.bf16.mxu1 %v6498_v23  ;;  %v6598_v23 = vpack.c.bf16 %v1823_v21, %v1815_v19  ;;  %v6662_v25 = vpack.c.bf16 %v1825_v24, %v1817_v22  ;;  %v1878_v19 = vld [vmem:[#allocation2 + $0x220] sm:$0xff]  ;;  %v6614_v22 = vpack.c.bf16 %v1887_v13, %v1879_v12  ;;  %v1880_v24 = vld [vmem:[#allocation2 + $0x230] sm:$0xff]  ;;  %v1959_v12 = vld [vmem:[#allocation2 + $0x4a8] sm:$0xff] }
 0x37f   :  { %v1886_v21 = vld [vmem:[#allocation2 + $0x260] sm:$0xff]  ;;  %v1952_v11 = vld [vmem:[#allocation2 + $0x470] sm:$0xff]  ;;  %v1967_v13 = vld [vmem:[#allocation2 + $0x4e8] sm:$0xff] }
 0x380   :  { %6663 = vmatprep.subr.bf16.mxu0 %v6662_v25  ;;  %v1888_v25 = vld [vmem:[#allocation2 + $0x270] sm:$0xff]  ;;  %v6616_v30 = vpack.c.bf16 %v1886_v21, %v1878_v19  ;;  %v1958_v19 = vld [vmem:[#allocation2 + $0x4a0] sm:$0xff] }
 0x381   :  { %6501 = vmatpush1.bf16.msra.mxu1 %v6500_v28  ;;  %v1803_v28 = vrot.slane %v1794_v26, %v8536_v20  ;;  %v1895_v26 = vld [vmem:[#allocation2 + $0x2a8] sm:$0xff]  ;;  %v1966_v21 = vld [vmem:[#allocation2 + $0x4e0] sm:$0xff] }
 0x382   :  { %6503 = vmatprep.subr.bf16.mxu1 %v6502_v29 }
 0x385   :  { %6505 = vmatpush1.bf16.msra.mxu1 %v6504_v34  ;;  %v1816_v34 = vld [vmem:[#allocation2 + $0x30] sm:$0xff] }
 0x386   :  { %6507 = vmatprep.subr.bf16.mxu1 %v6506_v35  ;;  %v1824_v35 = vld [vmem:[#allocation2 + $0x70] sm:$0xff] }
 0x387   :  { %v6664_v44 = vpack.c.bf16 %v1824_v35, %v1816_v34 }
 0x389   :  { %6509 = vmatpush1.bf16.msra.mxu1 %v6508_v41  ;;  %v1841_v41 = vld [vmem:[#allocation2 + $0xf8] sm:$0xff] }
 0x38a   :  { %6511 = vmatprep.subr.bf16.mxu1 %v6510_v42  ;;  %v6666_v52 = vpack.c.bf16 %v1841_v41, %v1833_v39  ;;  %v1919_v39 = vld [vmem:[#allocation2 + $0x368] sm:$0xff]  ;;  %v1913_v41 = vld [vmem:[#allocation2 + $0x338] sm:$0xff] }
 0x38d   :  { %6513 = vmatpush1.bf16.msra.mxu1 %v6512_v47 }
 0x38e   :  { %6515 = vmatprep.subr.bf16.mxu1 %v6514_v48  ;;  %v1832_v48 = vld [vmem:[#allocation2 + $0xb0] sm:$0xff] }
 0x38f   :  { %v6668_v56 = vpack.c.bf16 %v1840_v49, %v1832_v48  ;;  %v6622_v48 = vpack.c.bf16 %v1919_v39, %v1911_v38  ;;  %v1991_v38 = vld [vmem:[#allocation2 + $0x5a8] sm:$0xff] }
 0x390   :  { %v1999_v39 = vld [vmem:[#allocation2 + $0x5e8] sm:$0xff] }
 0x391   :  { %6517 = vmatpush1.bf16.msra.mxu1 %v6516_v40  ;;  %v1855_v40 = vld [vmem:[#allocation2 + $0x168] sm:$0xff] }
 0x392   :  { %6519 = vmatprep.subr.bf16.mxu1 %v6518_v54  ;;  %v1849_v54 = vld [vmem:[#allocation2 + $0x138] sm:$0xff] }
 0x393   :  { %v6670_v60 = vpack.c.bf16 %v1857_v55, %v1849_v54  ;;  %v1929_v54 = vld [vmem:[#allocation2 + $0x3b8] sm:$0xff] }
 0x394   :  { %v1937_v55 = vld [vmem:[#allocation2 + $0x3f8] sm:$0xff] }
 0x395   :  { %6521 = vmatpush1.bf16.msra.mxu1 %v6520_v58  ;;  %v1854_v58 = vld [vmem:[#allocation2 + $0x160] sm:$0xff] }
 0x396   :  { %6523 = vmatprep.subr.bf16.mxu1 %v6522_v59  ;;  %v6606_v59 = vpack.c.bf16 %v1855_v40, %v1847_v50  ;;  %v6608_v4 = vpack.c.bf16 %v1854_v58, %v1846_v57  ;;  %v1912_v50 = vld [vmem:[#allocation2 + $0x330] sm:$0xff]  ;;  %v1935_v40 = vld [vmem:[#allocation2 + $0x3e8] sm:$0xff]  ;;  %v1926_v57 = vld [vmem:[#allocation2 + $0x3a0] sm:$0xff] }
 0x397   :  { %v1934_v58 = vld [vmem:[#allocation2 + $0x3e0] sm:$0xff] }
 0x399   :  { %6525 = vmatpush1.bf16.msra.mxu1 %v6524_v1  ;;  %v1871_v1 = vld [vmem:[#allocation2 + $0x1e8] sm:$0xff] }
 0x39a   :  { %6527 = vmatprep.subr.bf16.mxu1 %v6526_v2  ;;  %v1865_v2 = vld [vmem:[#allocation2 + $0x1b8] sm:$0xff]  ;;  %v6610_v8 = vpack.c.bf16 %v1871_v1, %v1863_v63  ;;  %v1943_v63 = vld [vmem:[#allocation2 + $0x428] sm:$0xff] }
 0x39b   :  { %v1951_v1 = vld [vmem:[#allocation2 + $0x468] sm:$0xff] }
 0x39d   :  { %6529 = vmatpush1.bf16.msra.mxu1 %v6528_v5  ;;  %v6672_v5 = vpack.c.bf16 %v1856_v62, %v1848_v61  ;;  %v1928_v61 = vld [vmem:[#allocation2 + $0x3b0] sm:$0xff] }
 0x39e   :  { %6531 = vmatprep.subr.bf16.mxu1 %v6530_v9  ;;  %v6674_v9 = vpack.c.bf16 %v1873_v3, %v1865_v2  ;;  %v1936_v62 = vld [vmem:[#allocation2 + $0x3f0] sm:$0xff]  ;;  %v1945_v2 = vld [vmem:[#allocation2 + $0x438] sm:$0xff] }
 0x39f   :  { %v1953_v3 = vld [vmem:[#allocation2 + $0x478] sm:$0xff] }
 0x3a1   :  { %6533 = vmatpush1.bf16.msra.mxu1 %v6532_v14  ;;  %v1881_v14 = vld [vmem:[#allocation2 + $0x238] sm:$0xff] }
 0x3a2   :  { %6599 = vmatprep.subr.bf16.mxu1 %v6598_v23  ;;  %v6678_v23 = vpack.c.bf16 %v1889_v15, %v1881_v14  ;;  %v1961_v14 = vld [vmem:[#allocation2 + $0x4b8] sm:$0xff] }
 0x3a3   :  { %v1969_v15 = vld [vmem:[#allocation2 + $0x4f8] sm:$0xff] }
 0x437   :  { %v1787_v29 = vpop.f32.mrb[24].mxu1 }
 0x438   :  { %v1806_v31 = vadd.f32 %v1799_v27, %v1787_v29  ;;  %v1789_v32 = vpop.f32.mrb[25].mxu1  ;;  %v1903_v27 = vld [vmem:[#allocation2 + $0x2e8] sm:$0xff]  ;;  %v1905_v29 = vld [vmem:[#allocation2 + $0x2f8] sm:$0xff] }
 0x439   :  { %v1807_v36 = vadd.f32 %v1803_v28, %v1789_v32  ;;  %v1897_v28 = vld [vmem:[#allocation2 + $0x2b8] sm:$0xff]  ;;  %v1894_v32 = vld [vmem:[#allocation2 + $0x2a0] sm:$0xff]  ;;  %v6618_v34 = vpack.c.bf16 %v1903_v27, %v1895_v26  ;;  %v1975_v26 = vld [vmem:[#allocation2 + $0x528] sm:$0xff] }
 0x43a   :  { %v8955_v47 = vmax.f32 %v1806_v31, 0.0  ;;  %v6680_v31 = vpack.c.bf16 %v1888_v25, %v1880_v24  ;;  %v6682_v35 = vpack.c.bf16 %v1905_v29, %v1897_v28  ;;  %v1960_v24 = vld [vmem:[#allocation2 + $0x4b0] sm:$0xff]  ;;  %v1983_v27 = vld [vmem:[#allocation2 + $0x568] sm:$0xff]  ;;  %v1977_v28 = vld [vmem:[#allocation2 + $0x538] sm:$0xff] }
 0x43b   :  { %v1809_v42 = vmax.f32 %v1807_v36, 0.0  ;;  %v1896_v36 = vld [vmem:[#allocation2 + $0x2b0] sm:$0xff]  ;;  %v1985_v29 = vld [vmem:[#allocation2 + $0x578] sm:$0xff] }
 0x43c   :  { %v1968_v25 = vld [vmem:[#allocation2 + $0x4f0] sm:$0xff] }
 0x43d   :  { %2130 = vmatprep.mubr.f32.mxu1 %v1809_v42  ;;  %2201 = vmatprep.mubr.f32.mxu0 %v1809_v42 }
 0x43e   :  { %2131 = vmatmul.mubr.f32.vlgmr.msra.gmra.mrb[26].mxu1 %v8955_v47  ;;  %2202 = vmatmul.mubr.f32.vlgmr.msra.gmra.mrb[28].mxu0 %v8955_v47 }
 0x43f   :  { %6601 = vmatpush1.bf16.msra.mxu1 %v6600_v43  ;;  %6665 = vmatpush1.bf16.msra.mxu0 %v6664_v44  ;;  %v6620_v43 = vpack.c.bf16 %v1902_v33, %v1894_v32  ;;  %v6684_v44 = vpack.c.bf16 %v1904_v37, %v1896_v36  ;;  %v1974_v32 = vld [vmem:[#allocation2 + $0x520] sm:$0xff]  ;;  %v1976_v36 = vld [vmem:[#allocation2 + $0x530] sm:$0xff] }
 0x440   :  { %2272 = vmatprep.mubr.f32.mxu1 %v1809_v42  ;;  %2343 = vmatprep.mubr.f32.mxu0 %v1809_v42  ;;  %v1921_v42 = vld [vmem:[#allocation2 + $0x378] sm:$0xff]  ;;  %v1982_v33 = vld [vmem:[#allocation2 + $0x560] sm:$0xff]  ;;  %v1984_v37 = vld [vmem:[#allocation2 + $0x570] sm:$0xff] }
 0x441   :  { %6603 = vmatprep.subr.bf16.mxu1 %v6602_v51  ;;  %6667 = vmatprep.subr.bf16.mxu0 %v6666_v52  ;;  %v6686_v49 = vpack.c.bf16 %v1921_v42, %v1913_v41  ;;  %v1920_v51 = vld [vmem:[#allocation2 + $0x370] sm:$0xff]  ;;  %v1927_v52 = vld [vmem:[#allocation2 + $0x3a8] sm:$0xff]  ;;  %v1993_v41 = vld [vmem:[#allocation2 + $0x5b8] sm:$0xff] }
 0x442   :  { %v2001_v42 = vld [vmem:[#allocation2 + $0x5f8] sm:$0xff] }
 0x443   :  { %6605 = vmatpush1.bf16.msra.mxu1 %v6604_v53  ;;  %6669 = vmatpush1.bf16.msra.mxu0 %v6668_v56  ;;  %v6624_v53 = vpack.c.bf16 %v1918_v46, %v1910_v45  ;;  %v6688_v56 = vpack.c.bf16 %v1920_v51, %v1912_v50  ;;  %v1990_v45 = vld [vmem:[#allocation2 + $0x5a0] sm:$0xff]  ;;  %v1992_v50 = vld [vmem:[#allocation2 + $0x5b0] sm:$0xff] }
 0x444   :  { %6607 = vmatprep.subr.bf16.mxu1 %v6606_v59  ;;  %6671 = vmatprep.subr.bf16.mxu0 %v6670_v60  ;;  %v6626_v59 = vpack.c.bf16 %v1935_v40, %v1927_v52  ;;  %v6690_v60 = vpack.c.bf16 %v1937_v55, %v1929_v54  ;;  %v1998_v46 = vld [vmem:[#allocation2 + $0x5e0] sm:$0xff]  ;;  %v2000_v51 = vld [vmem:[#allocation2 + $0x5f0] sm:$0xff]  ;;  %v2007_v52 = vld [vmem:[#allocation2 + $0x628] sm:$0xff] }
 0x445   :  { %v2015_v40 = vld [vmem:[#allocation2 + $0x668] sm:$0xff]  ;;  %v2009_v54 = vld [vmem:[#allocation2 + $0x638] sm:$0xff] }
 0x446   :  { %v2017_v55 = vld [vmem:[#allocation2 + $0x678] sm:$0xff] }
 0x447   :  { %6609 = vmatpush1.bf16.msra.mxu1 %v6608_v4  ;;  %6673 = vmatpush1.bf16.msra.mxu0 %v6672_v5  ;;  %v6628_v4 = vpack.c.bf16 %v1934_v58, %v1926_v57  ;;  %v6692_v5 = vpack.c.bf16 %v1936_v62, %v1928_v61  ;;  %v2006_v57 = vld [vmem:[#allocation2 + $0x620] sm:$0xff]  ;;  %v2008_v61 = vld [vmem:[#allocation2 + $0x630] sm:$0xff] }
 0x448   :  { %6611 = vmatprep.subr.bf16.mxu1 %v6610_v8  ;;  %6675 = vmatprep.subr.bf16.mxu0 %v6674_v9  ;;  %v6630_v8 = vpack.c.bf16 %v1951_v1, %v1943_v63  ;;  %v6694_v9 = vpack.c.bf16 %v1953_v3, %v1945_v2  ;;  %v2014_v58 = vld [vmem:[#allocation2 + $0x660] sm:$0xff]  ;;  %v2016_v62 = vld [vmem:[#allocation2 + $0x670] sm:$0xff]  ;;  %v2023_v63 = vld [vmem:[#allocation2 + $0x6a8] sm:$0xff] }
 0x449   :  { %v2031_v1 = vld [vmem:[#allocation2 + $0x6e8] sm:$0xff]  ;;  %v2025_v2 = vld [vmem:[#allocation2 + $0x6b8] sm:$0xff] }
 0x44a   :  { %v2033_v3 = vld [vmem:[#allocation2 + $0x6f8] sm:$0xff] }
 0x44b   :  { %6613 = vmatpush1.bf16.msra.mxu1 %v6612_v16  ;;  %6677 = vmatpush1.bf16.msra.mxu0 %v6676_v17  ;;  %v6632_v16 = vpack.c.bf16 %v1950_v7, %v1942_v6  ;;  %v6696_v17 = vpack.c.bf16 %v1952_v11, %v1944_v10  ;;  %v2022_v6 = vld [vmem:[#allocation2 + $0x6a0] sm:$0xff]  ;;  %v2024_v10 = vld [vmem:[#allocation2 + $0x6b0] sm:$0xff] }
 0x44c   :  { %6615 = vmatprep.subr.bf16.mxu1 %v6614_v22  ;;  %6679 = vmatprep.subr.bf16.mxu0 %v6678_v23  ;;  %v6634_v22 = vpack.c.bf16 %v1967_v13, %v1959_v12  ;;  %v6698_v23 = vpack.c.bf16 %v1969_v15, %v1961_v14  ;;  %v2030_v7 = vld [vmem:[#allocation2 + $0x6e0] sm:$0xff]  ;;  %v2032_v11 = vld [vmem:[#allocation2 + $0x6f0] sm:$0xff]  ;;  %v2039_v12 = vld [vmem:[#allocation2 + $0x728] sm:$0xff] }
 0x44d   :  { %v2047_v13 = vld [vmem:[#allocation2 + $0x768] sm:$0xff]  ;;  %v2041_v14 = vld [vmem:[#allocation2 + $0x738] sm:$0xff] }
 0x44e   :  { %v2049_v15 = vld [vmem:[#allocation2 + $0x778] sm:$0xff] }
 0x44f   :  { %6617 = vmatpush1.bf16.msra.mxu1 %v6616_v30  ;;  %6681 = vmatpush1.bf16.msra.mxu0 %v6680_v31  ;;  %v6636_v30 = vpack.c.bf16 %v1966_v21, %v1958_v19  ;;  %v6700_v31 = vpack.c.bf16 %v1968_v25, %v1960_v24  ;;  %v2038_v19 = vld [vmem:[#allocation2 + $0x720] sm:$0xff]  ;;  %v2040_v24 = vld [vmem:[#allocation2 + $0x730] sm:$0xff] }
 0x450   :  { %6619 = vmatprep.subr.bf16.mxu1 %v6618_v34  ;;  %6683 = vmatprep.subr.bf16.mxu0 %v6682_v35  ;;  %v6638_v34 = vpack.c.bf16 %v1983_v27, %v1975_v26  ;;  %v6702_v35 = vpack.c.bf16 %v1985_v29, %v1977_v28  ;;  %v2046_v21 = vld [vmem:[#allocation2 + $0x760] sm:$0xff]  ;;  %v2048_v25 = vld [vmem:[#allocation2 + $0x770] sm:$0xff]  ;;  %v2055_v26 = vld [vmem:[#allocation2 + $0x7a8] sm:$0xff] }
 0x451   :  { %v2063_v27 = vld [vmem:[#allocation2 + $0x7e8] sm:$0xff]  ;;  %v2057_v28 = vld [vmem:[#allocation2 + $0x7b8] sm:$0xff] }
 0x452   :  { %v2065_v29 = vld [vmem:[#allocation2 + $0x7f8] sm:$0xff] }
 0x453   :  { %6621 = vmatpush1.bf16.msra.mxu1 %v6620_v43  ;;  %6685 = vmatpush1.bf16.msra.mxu0 %v6684_v44  ;;  %v6640_v43 = vpack.c.bf16 %v1982_v33, %v1974_v32  ;;  %v6704_v44 = vpack.c.bf16 %v1984_v37, %v1976_v36  ;;  %v2054_v32 = vld [vmem:[#allocation2 + $0x7a0] sm:$0xff]  ;;  %v6658_v33 = vpack.c.bf16 %v2063_v27, %v2055_v26  ;;  %v2056_v36 = vld [vmem:[#allocation2 + $0x7b0] sm:$0xff]  ;;  %v2701_v26 = vld [vmem:[%s10190_s11 + $0xc8] sm:$0xff] }
 0x454   :  { %6623 = vmatprep.subr.bf16.mxu1 %v6622_v48  ;;  %6687 = vmatprep.subr.bf16.mxu0 %v6686_v49  ;;  %v6642_v48 = vpack.c.bf16 %v1999_v39, %v1991_v38  ;;  %v6706_v49 = vpack.c.bf16 %v2001_v42, %v1993_v41  ;;  %v2064_v37 = vld [vmem:[#allocation2 + $0x7f0] sm:$0xff]  ;;  %v2703_v27 = vld [vmem:[%s10190_s11 + $0xd8] sm:$0xff] }
 0x455   :  { %v6724_v39 = vpack.c.bf16 %v2064_v37, %v2056_v36  ;;  %v2704_v36 = vld [vmem:[%s10190_s11 + $0xe0] sm:$0xff]  ;;  %v2706_v37 = vld [vmem:[%s10190_s11 + $0xf0] sm:$0xff] }
 0x457   :  { %6625 = vmatpush1.bf16.msra.mxu1 %v6624_v53  ;;  %6689 = vmatpush1.bf16.msra.mxu0 %v6688_v56  ;;  %v6644_v53 = vpack.c.bf16 %v1998_v46, %v1990_v45  ;;  %v6708_v56 = vpack.c.bf16 %v2000_v51, %v1992_v50  ;;  %v5715_v45 = vld [vmem:[%s10189_s21 + $0x4] sm:$0xf]  ;;  %v2677_v46 = vld [vmem:[%s10190_s11 + $0x8] sm:$0xff] }
 0x458   :  { %6627 = vmatprep.subr.bf16.mxu1 %v6626_v59  ;;  %6691 = vmatprep.subr.bf16.mxu0 %v6690_v60  ;;  %v6646_v59 = vpack.c.bf16 %v2015_v40, %v2007_v52  ;;  %v6710_v60 = vpack.c.bf16 %v2017_v55, %v2009_v54  ;;  %v5718_v40 = vld [vmem:[%s10189_s21 + $0x8] sm:$0xf]  ;;  %v2676_v55 = vld [vmem:[%s10190_s11] sm:$0xff] }
 0x45b   :  { %6629 = vmatpush1.bf16.msra.mxu1 %v6628_v4  ;;  %6693 = vmatpush1.bf16.msra.mxu0 %v6692_v5  ;;  %v6648_v4 = vpack.c.bf16 %v2014_v58, %v2006_v57  ;;  %v6712_v5 = vpack.c.bf16 %v2016_v62, %v2008_v61  ;;  %v2683_v57 = vld [vmem:[%s10190_s11 + $0x38] sm:$0xff]  ;;  %v5720_v58 = vld [vmem:[%s10189_s21 + $0xc] sm:$0xf]  ;;  %v2680_v61 = vld [vmem:[%s10190_s11 + $0x20] sm:$0xff] }
 0x45c   :  { %6631 = vmatprep.subr.bf16.mxu1 %v6630_v8  ;;  %6695 = vmatprep.subr.bf16.mxu0 %v6694_v9  ;;  %v6650_v8 = vpack.c.bf16 %v2031_v1, %v2023_v63  ;;  %v6714_v9 = vpack.c.bf16 %v2033_v3, %v2025_v2  ;;  %v2682_v62 = vld [vmem:[%s10190_s11 + $0x30] sm:$0xff]  ;;  %v2685_v63 = vld [vmem:[%s10190_s11 + $0x48] sm:$0xff]  ;;  %v2687_v1 = vld [vmem:[%s10190_s11 + $0x58] sm:$0xff] }
 0x45d   :  { %v6732_v2 = vpack.c.bf16 %v2682_v62, %v2680_v61  ;;  %v6734_v3 = vpack.c.bf16 %v2687_v1, %v2685_v63  ;;  %v2722_v61 = vld [vmem:[%s10190_s11 + $0x170] sm:$0xff]  ;;  %v2725_v62 = vld [vmem:[%s10190_s11 + $0x188] sm:$0xff]  ;;  %v2727_v63 = vld [vmem:[%s10190_s11 + $0x198] sm:$0xff] }
 0x45f   :  { %6633 = vmatpush1.bf16.msra.mxu1 %v6632_v16  ;;  %6697 = vmatpush1.bf16.msra.mxu0 %v6696_v17  ;;  %v6652_v16 = vpack.c.bf16 %v2030_v7, %v2022_v6  ;;  %v6716_v17 = vpack.c.bf16 %v2032_v11, %v2024_v10  ;;  %v2689_v6 = vld [vmem:[%s10190_s11 + $0x68] sm:$0xff]  ;;  %v2691_v7 = vld [vmem:[%s10190_s11 + $0x78] sm:$0xff]  ;;  %v2688_v10 = vld [vmem:[%s10190_s11 + $0x60] sm:$0xff] }
 0x460   :  { %6635 = vmatprep.subr.bf16.mxu1 %v6634_v22  ;;  %6699 = vmatprep.subr.bf16.mxu0 %v6698_v23  ;;  %v6654_v22 = vpack.c.bf16 %v2047_v13, %v2039_v12  ;;  %v6718_v23 = vpack.c.bf16 %v2049_v15, %v2041_v14  ;;  %v2690_v11 = vld [vmem:[%s10190_s11 + $0x70] sm:$0xff]  ;;  %v2693_v12 = vld [vmem:[%s10190_s11 + $0x88] sm:$0xff]  ;;  %v2695_v13 = vld [vmem:[%s10190_s11 + $0x98] sm:$0xff] }
 0x461   :  { %v6740_v14 = vpack.c.bf16 %v2690_v11, %v2688_v10  ;;  %v6742_v15 = vpack.c.bf16 %v2695_v13, %v2693_v12  ;;  %v2730_v10 = vld [vmem:[%s10190_s11 + $0x1b0] sm:$0xff]  ;;  %v2733_v11 = vld [vmem:[%s10190_s11 + $0x1c8] sm:$0xff]  ;;  %v2735_v12 = vld [vmem:[%s10190_s11 + $0x1d8] sm:$0xff] }
 0x463   :  { %6637 = vmatpush1.bf16.msra.mxu1 %v6636_v30  ;;  %6701 = vmatpush1.bf16.msra.mxu0 %v6700_v31  ;;  %v6656_v30 = vpack.c.bf16 %v2046_v21, %v2038_v19  ;;  %v6720_v31 = vpack.c.bf16 %v2048_v25, %v2040_v24  ;;  %v2697_v19 = vld [vmem:[%s10190_s11 + $0xa8] sm:$0xff]  ;;  %v2699_v21 = vld [vmem:[%s10190_s11 + $0xb8] sm:$0xff]  ;;  %v2696_v24 = vld [vmem:[%s10190_s11 + $0xa0] sm:$0xff] }
 0x464   :  { %6639 = vmatprep.subr.bf16.mxu1 %v6638_v34  ;;  %6703 = vmatprep.subr.bf16.mxu0 %v6702_v35  ;;  %v6722_v34 = vpack.c.bf16 %v2065_v29, %v2057_v28  ;;  %v2062_v35 = vld [vmem:[#allocation2 + $0x7e0] sm:$0xff]  ;;  %v2698_v25 = vld [vmem:[%s10190_s11 + $0xb0] sm:$0xff]  ;;  %v6750_v29 = vpack.c.bf16 %v2703_v27, %v2701_v26 }
 0x465   :  { %v6660_v38 = vpack.c.bf16 %v2062_v35, %v2054_v32  ;;  %v6748_v28 = vpack.c.bf16 %v2698_v25, %v2696_v24  ;;  %v2705_v32 = vld [vmem:[%s10190_s11 + $0xe8] sm:$0xff]  ;;  %v2738_v24 = vld [vmem:[%s10190_s11 + $0x1f0] sm:$0xff]  ;;  %v2658_v26 = vld [vmem:[%s10191_s10] sm:$0x3] }
 0x466   :  { %v2663_v27 = vrot.slane %v2658_v26, %v8531_v18 }
 0x467   :  { %6641 = vmatpush1.bf16.msra.mxu1 %v6640_v43  ;;  %6705 = vmatpush1.bf16.msra.mxu0 %v6704_v44 }
 0x468   :  { %6643 = vmatprep.subr.bf16.mxu1 %v6642_v48  ;;  %6707 = vmatprep.subr.bf16.mxu0 %v6706_v49  ;;  %v2679_v48 = vld [vmem:[%s10190_s11 + $0x18] sm:$0xff] }
 0x469   :  { %v6726_v54 = vpack.c.bf16 %v2679_v48, %v2677_v46 }
 0x46b   :  { %6645 = vmatpush1.bf16.msra.mxu1 %v6644_v53  ;;  %6709 = vmatpush1.bf16.msra.mxu0 %v6708_v56  ;;  %v2678_v53 = vld [vmem:[%s10190_s11 + $0x10] sm:$0xff]  ;;  %v2681_v56 = vld [vmem:[%s10190_s11 + $0x28] sm:$0xff] }
 0x46c   :  { %6647 = vmatprep.subr.bf16.mxu1 %v6646_v59  ;;  %6711 = vmatprep.subr.bf16.mxu0 %v6710_v60  ;;  %v6728_v59 = vpack.c.bf16 %v2678_v53, %v2676_v55  ;;  %v6730_v60 = vpack.c.bf16 %v2683_v57, %v2681_v56  ;;  %v2716_v55 = vld [vmem:[%s10190_s11 + $0x140] sm:$0xff]  ;;  %v2718_v53 = vld [vmem:[%s10190_s11 + $0x150] sm:$0xff]  ;;  %v2721_v56 = vld [vmem:[%s10190_s11 + $0x168] sm:$0xff] }
 0x46d   :  { %v2723_v57 = vld [vmem:[%s10190_s11 + $0x178] sm:$0xff] }
 0x46f   :  { %6649 = vmatpush1.bf16.msra.mxu1 %v6648_v4  ;;  %6713 = vmatpush1.bf16.msra.mxu0 %v6712_v5  ;;  %v2684_v4 = vld [vmem:[%s10190_s11 + $0x40] sm:$0xff]  ;;  %v2686_v5 = vld [vmem:[%s10190_s11 + $0x50] sm:$0xff] }
 0x470   :  { %6651 = vmatprep.subr.bf16.mxu1 %v6650_v8  ;;  %6715 = vmatprep.subr.bf16.mxu0 %v6714_v9  ;;  %v6736_v8 = vpack.c.bf16 %v2686_v5, %v2684_v4  ;;  %v6738_v9 = vpack.c.bf16 %v2691_v7, %v2689_v6  ;;  %v2726_v4 = vld [vmem:[%s10190_s11 + $0x190] sm:$0xff]  ;;  %v2729_v5 = vld [vmem:[%s10190_s11 + $0x1a8] sm:$0xff]  ;;  %v2731_v6 = vld [vmem:[%s10190_s11 + $0x1b8] sm:$0xff] }
 0x473   :  { %6653 = vmatpush1.bf16.msra.mxu1 %v6652_v16  ;;  %6717 = vmatpush1.bf16.msra.mxu0 %v6716_v17  ;;  %v2692_v16 = vld [vmem:[%s10190_s11 + $0x80] sm:$0xff]  ;;  %v2694_v17 = vld [vmem:[%s10190_s11 + $0x90] sm:$0xff] }
 0x474   :  { %6655 = vmatprep.subr.bf16.mxu1 %v6654_v22  ;;  %6719 = vmatprep.subr.bf16.mxu0 %v6718_v23  ;;  %v6744_v22 = vpack.c.bf16 %v2694_v17, %v2692_v16  ;;  %v6746_v23 = vpack.c.bf16 %v2699_v21, %v2697_v19  ;;  %v2734_v16 = vld [vmem:[%s10190_s11 + $0x1d0] sm:$0xff]  ;;  %v2737_v19 = vld [vmem:[%s10190_s11 + $0x1e8] sm:$0xff]  ;;  %v2739_v21 = vld [vmem:[%s10190_s11 + $0x1f8] sm:$0xff] }
 0x477   :  { %6657 = vmatpush1.bf16.msra.mxu1 %v6656_v30  ;;  %6721 = vmatpush1.bf16.msra.mxu0 %v6720_v31  ;;  %v2700_v30 = vld [vmem:[%s10190_s11 + $0xc0] sm:$0xff]  ;;  %v2702_v31 = vld [vmem:[%s10190_s11 + $0xd0] sm:$0xff] }
 0x478   :  { %6659 = vmatprep.subr.bf16.mxu1 %v6658_v33  ;;  %6723 = vmatprep.subr.bf16.mxu0 %v6722_v34  ;;  %v2707_v33 = vld [vmem:[%s10190_s11 + $0xf8] sm:$0xff]  ;;  %v6752_v34 = vpack.c.bf16 %v2702_v31, %v2700_v30 }
 0x479   :  { %v6754_v35 = vpack.c.bf16 %v2707_v33, %v2705_v32 }
 0x47b   :  { %6661 = vmatpush1.bf16.msra.mxu1 %v6660_v38  ;;  %6725 = vmatpush1.bf16.msra.mxu0 %v6724_v39  ;;  %v2709_v38 = vld [vmem:[%s10190_s11 + $0x108] sm:$0xff]  ;;  %v2711_v39 = vld [vmem:[%s10190_s11 + $0x118] sm:$0xff] }
 0x47e   :  { %2273 = vmatmul.mubr.f32.vlgmr.msra.gmra.mrb[28].mxu1 %v8955_v47  ;;  %2344 = vmatmul.mubr.f32.vlgmr.msra.gmra.mrb[30].mxu0 %v8955_v47  ;;  %v2350_v47 = vld [vmem:[%s10189_s21] sm:$0xf] }
 0x47f   :  { %2421 = vmatprep.mubr.f32.mxu1 %v7717_v0  ;;  %2886 = vmatprep.mubr.f32.mxu0 %v7717_v0 }
 0x511   :  { %v2132_v41 = vpop.f32.mrb[26].mxu1  ;;  %v2203_v42 = vpop.f32.mrb[28].mxu0 }
 0x512   :  { %v2134_v43 = vpop.f32.mrb[27].mxu1  ;;  %v2205_v44 = vpop.f32.mrb[29].mxu0 }
 0x513   :  { %2357 = vmatprep.subr.mxu1 %v2205_v44  ;;  %v2710_v44 = vld [vmem:[%s10190_s11 + $0x110] sm:$0xff] }
 0x514   :  { %2358 = vmatpush1.msra.mxu1 %v2203_v42  ;;  %v6758_v42 = vpack.c.bf16 %v2711_v39, %v2709_v38  ;;  %v5728_v38 = vld [vmem:[%s10190_s11 + $0x210] sm:$0xff]  ;;  %v5731_v39 = vld [vmem:[%s10190_s11 + $0x228] sm:$0xff] }
 0x515   :  { %2431 = vmatprep.subr.mxu1 %v2134_v43  ;;  %5716 = vmatmul.mubr.msk.f32.vlgmr.msra.gmra.mrb[30].mxu1 %vm2353_vm3, %v5715_v45  ;;  %v2708_v43 = vld [vmem:[%s10190_s11 + $0x100] sm:$0xff]  ;;  %v2713_v45 = vld [vmem:[%s10190_s11 + $0x128] sm:$0xff] }
 0x516   :  { %2432 = vmatpush1.msra.mxu1 %v2132_v41  ;;  %2495 = vmatprep.mubr.f32.mxu1 %v7717_v0  ;;  %v6756_v41 = vpack.c.bf16 %v2706_v37, %v2704_v36  ;;  %v6760_v46 = vpack.c.bf16 %v2710_v44, %v2708_v43  ;;  %v5729_v36 = vld [vmem:[%s10190_s11 + $0x218] sm:$0xff]  ;;  %v5726_v37 = vld [vmem:[%s10190_s11 + $0x200] sm:$0xff] }
 0x51d   :  { %5717 = vmatmul.mubr.msk.f32.vlgmr.msra.gmra.mrb[30].mxu1 %vm2353_vm3, %v2350_v47  ;;  %v2715_v47 = vld [vmem:[%s10190_s11 + $0x138] sm:$0xff] }
 0x51e   :  { %2571 = vmatprep.mubr.f32.mxu1 %v7717_v0  ;;  %v6762_v48 = vpack.c.bf16 %v2715_v47, %v2713_v45  ;;  %v2675_v45 = vld [vmem:[%s10192_s30] sm:$0x3]  ;;  %v6792_v47 = vpack.c.bf16 %v5728_v38, %v5726_v37  ;;  %v5764_v37 = vld [vmem:[%s10190_s11 + $0x330] sm:$0xff]  ;;  %v5767_v38 = vld [vmem:[%s10190_s11 + $0x348] sm:$0xff] }
 0x551   :  { %v2274_v49 = vpop.f32.mrb[28].mxu1  ;;  %v2345_v50 = vpop.f32.mrb[30].mxu0 }
 0x552   :  { %v2276_v51 = vpop.f32.mrb[29].mxu1  ;;  %v2347_v52 = vpop.f32.mrb[31].mxu0 }
 0x553   :  { %2507 = vmatprep.subr.mxu1 %v2276_v51  ;;  %v2717_v51 = vld [vmem:[%s10190_s11 + $0x148] sm:$0xff] }
 0x554   :  { %2508 = vmatpush1.msra.mxu1 %v2274_v49  ;;  %v2712_v49 = vld [vmem:[%s10190_s11 + $0x120] sm:$0xff] }
 0x555   :  { %5719 = vmatmul.mubr.msk.f32.vlgmr.msra.gmra.mrb[30].mxu1 %vm2353_vm3, %v5718_v40  ;;  %2585 = vmatprep.subr.mxu1 %v2347_v52  ;;  %v2719_v52 = vld [vmem:[%s10190_s11 + $0x158] sm:$0xff] }
 0x556   :  { %2586 = vmatpush1.msra.mxu1 %v2345_v50  ;;  %2649 = vmatprep.mubr.f32.mxu1 %v7717_v0  ;;  %v2714_v50 = vld [vmem:[%s10190_s11 + $0x130] sm:$0xff] }
 0x557   :  { %6727 = vmatprep.subr.bf16.mxu1 %v6726_v54  ;;  %v6764_v40 = vpack.c.bf16 %v2714_v50, %v2712_v49  ;;  %v6766_v54 = vpack.c.bf16 %v2719_v52, %v2717_v51  ;;  %v5732_v49 = vld [vmem:[%s10190_s11 + $0x230] sm:$0xff]  ;;  %v5735_v50 = vld [vmem:[%s10190_s11 + $0x248] sm:$0xff]  ;;  %v5737_v51 = vld [vmem:[%s10190_s11 + $0x258] sm:$0xff] }
 0x55d   :  { %5721 = vmatmul.mubr.msk.f32.vlgmr.msra.gmra.mrb[30].mxu1 %vm2353_vm3, %v5720_v58  ;;  %v6768_v58 = vpack.c.bf16 %v2718_v53, %v2716_v55  ;;  %v5736_v55 = vld [vmem:[%s10190_s11 + $0x250] sm:$0xff]  ;;  %v5739_v53 = vld [vmem:[%s10190_s11 + $0x268] sm:$0xff] }
 0x55e   :  { %6729 = vmatpush1.bf16.msra.mxu1 %v6728_v59  ;;  %v6770_v59 = vpack.c.bf16 %v2723_v57, %v2721_v56  ;;  %v5741_v56 = vld [vmem:[%s10190_s11 + $0x278] sm:$0xff] }
 0x55f   :  { %6731 = vmatprep.subr.bf16.mxu1 %v6730_v60  ;;  %v2720_v60 = vld [vmem:[%s10190_s11 + $0x160] sm:$0xff] }
 0x560   :  { %v6772_v1 = vpack.c.bf16 %v2722_v61, %v2720_v60  ;;  %v5740_v60 = vld [vmem:[%s10190_s11 + $0x270] sm:$0xff]  ;;  %v5743_v61 = vld [vmem:[%s10190_s11 + $0x288] sm:$0xff] }
 0x562   :  { %6733 = vmatpush1.bf16.msra.mxu1 %v6732_v2  ;;  %v6774_v2 = vpack.c.bf16 %v2727_v63, %v2725_v62  ;;  %v5745_v62 = vld [vmem:[%s10190_s11 + $0x298] sm:$0xff] }
 0x563   :  { %6735 = vmatprep.subr.bf16.mxu1 %v6734_v3  ;;  %v2724_v3 = vld [vmem:[%s10190_s11 + $0x180] sm:$0xff] }
 0x564   :  { %v6776_v7 = vpack.c.bf16 %v2726_v4, %v2724_v3  ;;  %v5744_v3 = vld [vmem:[%s10190_s11 + $0x290] sm:$0xff]  ;;  %v5747_v4 = vld [vmem:[%s10190_s11 + $0x2a8] sm:$0xff] }
 0x566   :  { %6737 = vmatpush1.bf16.msra.mxu1 %v6736_v8  ;;  %v6778_v8 = vpack.c.bf16 %v2731_v6, %v2729_v5  ;;  %v5749_v5 = vld [vmem:[%s10190_s11 + $0x2b8] sm:$0xff] }
 0x567   :  { %6739 = vmatprep.subr.bf16.mxu1 %v6738_v9  ;;  %v2728_v9 = vld [vmem:[%s10190_s11 + $0x1a0] sm:$0xff] }
 0x568   :  { %v6780_v13 = vpack.c.bf16 %v2730_v10, %v2728_v9  ;;  %v5748_v9 = vld [vmem:[%s10190_s11 + $0x2b0] sm:$0xff]  ;;  %v5751_v10 = vld [vmem:[%s10190_s11 + $0x2c8] sm:$0xff] }
 0x56a   :  { %6741 = vmatpush1.bf16.msra.mxu1 %v6740_v14  ;;  %v6782_v14 = vpack.c.bf16 %v2735_v12, %v2733_v11  ;;  %v5753_v11 = vld [vmem:[%s10190_s11 + $0x2d8] sm:$0xff] }
 0x56b   :  { %6743 = vmatprep.subr.bf16.mxu1 %v6742_v15  ;;  %v2732_v15 = vld [vmem:[%s10190_s11 + $0x1c0] sm:$0xff] }
 0x56c   :  { %v6784_v17 = vpack.c.bf16 %v2734_v16, %v2732_v15  ;;  %v5752_v15 = vld [vmem:[%s10190_s11 + $0x2d0] sm:$0xff]  ;;  %v5755_v16 = vld [vmem:[%s10190_s11 + $0x2e8] sm:$0xff] }
 0x56e   :  { %6745 = vmatpush1.bf16.msra.mxu1 %v6744_v22  ;;  %v6786_v22 = vpack.c.bf16 %v2739_v21, %v2737_v19 }
 0x56f   :  { %6747 = vmatprep.subr.bf16.mxu1 %v6746_v23  ;;  %v2736_v23 = vld [vmem:[%s10190_s11 + $0x1e0] sm:$0xff] }
 0x570   :  { %v6788_v25 = vpack.c.bf16 %v2738_v24, %v2736_v23  ;;  %v5756_v23 = vld [vmem:[%s10190_s11 + $0x2f0] sm:$0xff]  ;;  %v5759_v24 = vld [vmem:[%s10190_s11 + $0x308] sm:$0xff] }
 0x572   :  { %6749 = vmatpush1.bf16.msra.mxu1 %v6748_v28  ;;  %v2667_v28 = vrot.slane %v2658_v26, %v8536_v20 }
 0x573   :  { %6751 = vmatprep.subr.bf16.mxu1 %v6750_v29 }
 0x576   :  { %6753 = vmatpush1.bf16.msra.mxu1 %v6752_v34 }
 0x577   :  { %6755 = vmatprep.subr.bf16.mxu1 %v6754_v35  ;;  %v5727_v35 = vld [vmem:[%s10190_s11 + $0x208] sm:$0xff] }
 0x578   :  { %v6790_v43 = vpack.c.bf16 %v5729_v36, %v5727_v35  ;;  %v5762_v36 = vld [vmem:[%s10190_s11 + $0x320] sm:$0xff] }
 0x57a   :  { %6757 = vmatpush1.bf16.msra.mxu1 %v6756_v41  ;;  %v5733_v41 = vld [vmem:[%s10190_s11 + $0x238] sm:$0xff] }
 0x57b   :  { %6759 = vmatprep.subr.bf16.mxu1 %v6758_v42 }
 0x57e   :  { %6761 = vmatpush1.bf16.msra.mxu1 %v6760_v46  ;;  %v6794_v46 = vpack.c.bf16 %v5733_v41, %v5731_v39  ;;  %v5769_v39 = vld [vmem:[%s10190_s11 + $0x358] sm:$0xff]  ;;  %v6828_v41 = vpack.c.bf16 %v5764_v37, %v5762_v36 }
 0x57f   :  { %6763 = vmatprep.subr.bf16.mxu1 %v6762_v48  ;;  %v5730_v48 = vld [vmem:[%s10190_s11 + $0x220] sm:$0xff] }
 0x580   :  { %v6796_v52 = vpack.c.bf16 %v5732_v49, %v5730_v48  ;;  %v5770_v49 = vld [vmem:[%s10190_s11 + $0x360] sm:$0xff] }
 0x582   :  { %6765 = vmatpush1.bf16.msra.mxu1 %v6764_v40  ;;  %v6798_v40 = vpack.c.bf16 %v5737_v51, %v5735_v50  ;;  %v5772_v50 = vld [vmem:[%s10190_s11 + $0x370] sm:$0xff]  ;;  %v5775_v51 = vld [vmem:[%s10190_s11 + $0x388] sm:$0xff] }
 0x583   :  { %6767 = vmatprep.subr.bf16.mxu1 %v6766_v54  ;;  %v5734_v54 = vld [vmem:[%s10190_s11 + $0x240] sm:$0xff] }
 0x584   :  { %v6800_v57 = vpack.c.bf16 %v5736_v55, %v5734_v54  ;;  %v5774_v55 = vld [vmem:[%s10190_s11 + $0x380] sm:$0xff] }
 0x586   :  { %6769 = vmatpush1.bf16.msra.mxu1 %v6768_v58  ;;  %v6802_v58 = vpack.c.bf16 %v5741_v56, %v5739_v53  ;;  %v5776_v53 = vld [vmem:[%s10190_s11 + $0x390] sm:$0xff]  ;;  %v5779_v56 = vld [vmem:[%s10190_s11 + $0x3a8] sm:$0xff] }
 0x587   :  { %6771 = vmatprep.subr.bf16.mxu1 %v6770_v59  ;;  %v5738_v59 = vld [vmem:[%s10190_s11 + $0x260] sm:$0xff] }
 0x588   :  { %v6804_v63 = vpack.c.bf16 %v5740_v60, %v5738_v59  ;;  %v5778_v60 = vld [vmem:[%s10190_s11 + $0x3a0] sm:$0xff] }
 0x58a   :  { %6773 = vmatpush1.bf16.msra.mxu1 %v6772_v1  ;;  %v6806_v1 = vpack.c.bf16 %v5745_v62, %v5743_v61  ;;  %v5780_v61 = vld [vmem:[%s10190_s11 + $0x3b0] sm:$0xff]  ;;  %v5783_v62 = vld [vmem:[%s10190_s11 + $0x3c8] sm:$0xff] }
 0x58b   :  { %6775 = vmatprep.subr.bf16.mxu1 %v6774_v2  ;;  %v5742_v2 = vld [vmem:[%s10190_s11 + $0x280] sm:$0xff] }
 0x58c   :  { %v6808_v6 = vpack.c.bf16 %v5744_v3, %v5742_v2  ;;  %v5782_v3 = vld [vmem:[%s10190_s11 + $0x3c0] sm:$0xff] }
 0x58e   :  { %6777 = vmatpush1.bf16.msra.mxu1 %v6776_v7  ;;  %v6810_v7 = vpack.c.bf16 %v5749_v5, %v5747_v4  ;;  %v5784_v4 = vld [vmem:[%s10190_s11 + $0x3d0] sm:$0xff]  ;;  %v5787_v5 = vld [vmem:[%s10190_s11 + $0x3e8] sm:$0xff] }
 0x58f   :  { %6779 = vmatprep.subr.bf16.mxu1 %v6778_v8  ;;  %v5746_v8 = vld [vmem:[%s10190_s11 + $0x2a0] sm:$0xff] }
 0x590   :  { %v6812_v12 = vpack.c.bf16 %v5748_v9, %v5746_v8  ;;  %v5786_v9 = vld [vmem:[%s10190_s11 + $0x3e0] sm:$0xff] }
 0x592   :  { %6781 = vmatpush1.bf16.msra.mxu1 %v6780_v13  ;;  %v6814_v13 = vpack.c.bf16 %v5753_v11, %v5751_v10  ;;  %v5788_v10 = vld [vmem:[%s10190_s11 + $0x3f0] sm:$0xff] }
 0x593   :  { %6783 = vmatprep.subr.bf16.mxu1 %v6782_v14  ;;  %v5750_v14 = vld [vmem:[%s10190_s11 + $0x2c0] sm:$0xff]  ;;  %v6852_v11 = vpack.c.bf16 %v5788_v10, %v5786_v9  ;;  %v3662_v10 = vld [vmem:[#allocation5 + $0x210] sm:$0xff] }
 0x594   :  { %v6816_v19 = vpack.c.bf16 %v5752_v15, %v5750_v14  ;;  %v5725_v14 = vld [vmem:[%s10192_s30 + $0x2] sm:$0x3]  ;;  %s10193_s30 = sld [smem:[#allocation16_spill]] }
 0x595   :  { %v3133_v15 = vld [vmem:[%s10140_s14] sm:$0xff] }
 0x596   :  { %6785 = vmatpush1.bf16.msra.mxu1 %v6784_v17  ;;  %v5757_v17 = vld [vmem:[%s10190_s11 + $0x2f8] sm:$0xff]  ;;  %v3660_v9 = vld [vmem:[#allocation5 + $0x200] sm:$0xff] }
 0x597   :  { %6787 = vmatprep.subr.bf16.mxu1 %v6786_v22  ;;  %v6818_v21 = vpack.c.bf16 %v5757_v17, %v5755_v16  ;;  %v5754_v22 = vld [vmem:[%s10190_s11 + $0x2e0] sm:$0xff]  ;;  %v3135_v17 = vld [vmem:[%s10140_s14 + $0x10] sm:$0xff] }
 0x598   :  { %v6820_v26 = vpack.c.bf16 %v5756_v23, %v5754_v22  ;;  %v6856_v22 = vpack.c.bf16 %v3135_v17, %v3133_v15  ;;  %v6872_v15 = vpack.c.bf16 %v3662_v10, %v3660_v9  ;;  %v3664_v17 = vld [vmem:[#allocation5 + $0x220] sm:$0xff]  ;;  %v3698_v10 = vld [vmem:[#allocation5 + $0x330] sm:$0xff] }
 0x599   :  { %v3696_v9 = vld [vmem:[#allocation5 + $0x320] sm:$0xff] }
 0x59a   :  { %6789 = vmatpush1.bf16.msra.mxu1 %v6788_v25  ;;  %v5761_v25 = vld [vmem:[%s10190_s11 + $0x318] sm:$0xff] }
 0x630   :  { %v2651_v29 = vpop.f32.mrb[30].mxu1 }
 0x631   :  { %v9179_v30 = vadd.f32 %v2663_v27, %v2651_v29  ;;  %v2653_v31 = vpop.f32.mrb[31].mxu1  ;;  %v6822_v27 = vpack.c.bf16 %v5761_v25, %v5759_v24  ;;  %v5760_v29 = vld [vmem:[%s10190_s11 + $0x310] sm:$0xff]  ;;  %v3137_v24 = vld [vmem:[%s10140_s14 + $0x20] sm:$0xff] }
 0x632   :  { %v2671_v32 = vadd.f32 %v2667_v28, %v2653_v31  ;;  %v5758_v28 = vld [vmem:[%s10190_s11 + $0x300] sm:$0xff]  ;;  %v5763_v31 = vld [vmem:[%s10190_s11 + $0x328] sm:$0xff]  ;;  %v3139_v25 = vld [vmem:[%s10140_s14 + $0x30] sm:$0xff] }
 0x633   :  { %v2672_v34 = vmax.f32 %v9179_v30, 0.0  ;;  %v3134_v30 = vld [vmem:[%s10140_s14 + $0x8] sm:$0xff] }
 0x634   :  { %v2673_v33 = vmax.f32 %v2671_v32, 0.0  ;;  %v5765_v32 = vld [vmem:[%s10190_s11 + $0x338] sm:$0xff] }
 0x635   :  { %v6826_v35 = vpack.c.bf16 %v5765_v32, %v5763_v31  ;;  %v2674_v31 = vld [vmem:[%s10139_s13] sm:$0x3] }
 0x636   :  { %2804 = vmatprep.mubr.f32.mxu1 %v2673_v33  ;;  %v2897_v32 = vrot.slane %v2674_v31, %v8531_v18 }
 0x637   :  { %2805 = vmatmul.mubr.f32.vlgmr.msra.gmra.mrb[32].mxu1 %v2672_v34 }
 0x638   :  { %3220 = vmatprep.mubr.f32.mxu1 %v7717_v0 }
 0x70a   :  { %v2806_v42 = vpop.f32.mrb[32].mxu1 }
 0x70b   :  { %v2808_v44 = vpop.f32.mrb[33].mxu1 }
 0x70c   :  { %5722 = vmatprep.subr.msk.mxu0 %vm2815_vm4, %v2808_v44  ;;  %v5768_v44 = vld [vmem:[%s10190_s11 + $0x350] sm:$0xff] }
 0x70d   :  { %5723 = vmatpush1.msk.msra.mxu0 %vm2815_vm4, %v2806_v42  ;;  %v6830_v42 = vpack.c.bf16 %v5769_v39, %v5767_v38 }
 0x70e   :  { %5724 = vmatmul.mubr.msk.f32.vlgmr.msra.gmra.mrb[32].mxu0 %vm2811_vm5, %v2675_v45  ;;  %6791 = vmatprep.subr.bf16.mxu0 %v6790_v43  ;;  %v5766_v43 = vld [vmem:[%s10190_s11 + $0x340] sm:$0xff]  ;;  %v5771_v45 = vld [vmem:[%s10190_s11 + $0x368] sm:$0xff] }
 0x70f   :  { %6793 = vmatpush1.bf16.msra.mxu0 %v6792_v47  ;;  %3037 = vmatprep.mubr.f32.mxu0 %v2673_v33  ;;  %v6824_v33 = vpack.c.bf16 %v5760_v29, %v5758_v28  ;;  %v5773_v47 = vld [vmem:[%s10190_s11 + $0x378] sm:$0xff]  ;;  %v6860_v28 = vpack.c.bf16 %v3139_v25, %v3137_v24 }
 0x710   :  { %6795 = vmatprep.subr.bf16.mxu0 %v6794_v46  ;;  %v6832_v46 = vpack.c.bf16 %v5768_v44, %v5766_v43  ;;  %v6834_v48 = vpack.c.bf16 %v5773_v47, %v5771_v45  ;;  %v5795_v43 = vld [vmem:[%s10140_s14 + $0x40] sm:$0xff]  ;;  %v5797_v44 = vld [vmem:[%s10140_s14 + $0x50] sm:$0xff]  ;;  %v5800_v47 = vld [vmem:[%s10140_s14 + $0x68] sm:$0xff] }
 0x713   :  { %6797 = vmatpush1.bf16.msra.mxu0 %v6796_v52  ;;  %v5777_v52 = vld [vmem:[%s10190_s11 + $0x398] sm:$0xff] }
 0x714   :  { %6799 = vmatprep.subr.bf16.mxu0 %v6798_v40  ;;  %v6836_v40 = vpack.c.bf16 %v5772_v50, %v5770_v49  ;;  %v6838_v54 = vpack.c.bf16 %v5777_v52, %v5775_v51  ;;  %v6864_v49 = vpack.c.bf16 %v5797_v44, %v5795_v43  ;;  %v5799_v52 = vld [vmem:[%s10140_s14 + $0x60] sm:$0xff]  ;;  %v3678_v44 = vld [vmem:[#allocation5 + $0x290] sm:$0xff] }
 0x715   :  { %v3676_v43 = vld [vmem:[#allocation5 + $0x280] sm:$0xff] }
 0x717   :  { %6801 = vmatpush1.bf16.msra.mxu0 %v6800_v57  ;;  %v5781_v57 = vld [vmem:[%s10190_s11 + $0x3b8] sm:$0xff] }
 0x718   :  { %6803 = vmatprep.subr.bf16.mxu0 %v6802_v58  ;;  %v6840_v58 = vpack.c.bf16 %v5776_v53, %v5774_v55  ;;  %v6842_v59 = vpack.c.bf16 %v5781_v57, %v5779_v56  ;;  %v5803_v56 = vld [vmem:[%s10142_s16 + $0x2] sm:$0x3]  ;;  %v3141_v57 = vld [vmem:[%s10142_s16] sm:$0x3] }
 0x71b   :  { %6805 = vmatpush1.bf16.msra.mxu0 %v6804_v63  ;;  %v5785_v63 = vld [vmem:[%s10190_s11 + $0x3d8] sm:$0xff] }
 0x71c   :  { %6807 = vmatprep.subr.bf16.mxu0 %v6806_v1  ;;  %v6844_v1 = vpack.c.bf16 %v5780_v61, %v5778_v60  ;;  %v6846_v2 = vpack.c.bf16 %v5785_v63, %v5783_v62  ;;  %v3150_v60 = vrot.slane %v3141_v57, %v8536_v20  ;;  %v3146_v62 = vrot.slane %v3141_v57, %v8531_v18  ;;  %v3691_v57 = vld [vmem:[#allocation5 + $0x2f8] sm:$0xff] }
 0x71f   :  { %6809 = vmatpush1.bf16.msra.mxu0 %v6808_v6  ;;  %v5789_v6 = vld [vmem:[%s10190_s11 + $0x3f8] sm:$0xff] }
 0x720   :  { %6811 = vmatprep.subr.bf16.mxu0 %v6810_v7  ;;  %v6848_v7 = vpack.c.bf16 %v5784_v4, %v5782_v3  ;;  %v6850_v8 = vpack.c.bf16 %v5789_v6, %v5787_v5  ;;  %v5794_v3 = vld [vmem:[%s10141_s15 + $0x4] sm:$0xf]  ;;  %v3132_v6 = vld [vmem:[%s10141_s15] sm:$0xf] }
 0x723   :  { %6813 = vmatpush1.bf16.msra.mxu0 %v6812_v12 }
 0x724   :  { %6815 = vmatprep.subr.bf16.mxu0 %v6814_v13 }
 0x727   :  { %6817 = vmatpush1.bf16.msra.mxu0 %v6816_v19  ;;  %v3138_v19 = vld [vmem:[%s10140_s14 + $0x28] sm:$0xff] }
 0x728   :  { %6819 = vmatprep.subr.bf16.mxu0 %v6818_v21  ;;  %v3140_v21 = vld [vmem:[%s10140_s14 + $0x38] sm:$0xff] }
 0x729   :  { %v6858_v23 = vpack.c.bf16 %v3140_v21, %v3138_v19  ;;  %v3666_v19 = vld [vmem:[#allocation5 + $0x230] sm:$0xff]  ;;  %v3669_v21 = vld [vmem:[#allocation5 + $0x248] sm:$0xff] }
 0x72a   :  { %v6876_v24 = vpack.c.bf16 %v3666_v19, %v3664_v17 }
 0x72b   :  { %6821 = vmatpush1.bf16.msra.mxu0 %v6820_v26  ;;  %v5796_v26 = vld [vmem:[%s10140_s14 + $0x48] sm:$0xff] }
 0x72c   :  { %6823 = vmatprep.subr.bf16.mxu0 %v6822_v27  ;;  %v5798_v27 = vld [vmem:[%s10140_s14 + $0x58] sm:$0xff] }
 0x72d   :  { %v6862_v29 = vpack.c.bf16 %v5798_v27, %v5796_v26  ;;  %v3668_v26 = vld [vmem:[#allocation5 + $0x240] sm:$0xff]  ;;  %v3670_v27 = vld [vmem:[#allocation5 + $0x250] sm:$0xff] }
 0x72f   :  { %6825 = vmatpush1.bf16.msra.mxu0 %v6824_v33  ;;  %v2901_v33 = vrot.slane %v2674_v31, %v8536_v20  ;;  %v3486_v31 = vld [vmem:[%s10143_s17 + $0x10] sm:$0xff] }
 0x730   :  { %6827 = vmatprep.subr.bf16.mxu0 %v6826_v35 }
 0x733   :  { %6829 = vmatpush1.bf16.msra.mxu0 %v6828_v41 }
 0x734   :  { %6831 = vmatprep.subr.bf16.mxu0 %v6830_v42  ;;  %v3126_v42 = vld [vmem:[%s10193_s30] sm:$0x3] }
 0x737   :  { %6833 = vmatpush1.bf16.msra.mxu0 %v6832_v46  ;;  %v5802_v46 = vld [vmem:[%s10140_s14 + $0x78] sm:$0xff] }
 0x738   :  { %6835 = vmatprep.subr.bf16.mxu0 %v6834_v48  ;;  %v6866_v51 = vpack.c.bf16 %v5802_v46, %v5800_v47  ;;  %v3683_v47 = vld [vmem:[#allocation5 + $0x2b8] sm:$0xff]  ;;  %v6888_v46 = vpack.c.bf16 %v3678_v44, %v3676_v43  ;;  %v3718_v43 = vld [vmem:[#allocation5 + $0x3d0] sm:$0xff] }
 0x73b   :  { %6837 = vmatpush1.bf16.msra.mxu0 %v6836_v40  ;;  %v5801_v40 = vld [vmem:[%s10140_s14 + $0x70] sm:$0xff] }
 0x73c   :  { %6839 = vmatprep.subr.bf16.mxu0 %v6838_v54  ;;  %v6868_v54 = vpack.c.bf16 %v5801_v40, %v5799_v52  ;;  %v3687_v52 = vld [vmem:[#allocation5 + $0x2d8] sm:$0xff] }
 0x73f   :  { %6841 = vmatpush1.bf16.msra.mxu0 %v6840_v58  ;;  %v3248_v58 = vrot.slane %v5803_v56, %v8536_v20 }
 0x740   :  { %6843 = vmatprep.subr.bf16.mxu0 %v6842_v59  ;;  %v3244_v59 = vrot.slane %v5803_v56, %v8531_v18  ;;  %v3689_v56 = vld [vmem:[#allocation5 + $0x2e8] sm:$0xff] }
 0x743   :  { %6845 = vmatpush1.bf16.msra.mxu0 %v6844_v1 }
 0x744   :  { %6847 = vmatprep.subr.bf16.mxu0 %v6846_v2 }
 0x747   :  { %6849 = vmatpush1.bf16.msra.mxu0 %v6848_v7  ;;  %v3661_v7 = vld [vmem:[#allocation5 + $0x208] sm:$0xff] }
 0x748   :  { %6851 = vmatprep.subr.bf16.mxu0 %v6850_v8  ;;  %v3663_v8 = vld [vmem:[#allocation5 + $0x218] sm:$0xff] }
 0x74b   :  { %6853 = vmatpush1.bf16.msra.mxu0 %v6852_v11  ;;  %v3665_v11 = vld [vmem:[#allocation5 + $0x228] sm:$0xff] }
 0x74e   :  { %3038 = vmatmul.mubr.f32.vlgmr.msra.gmra.mrb[34].mxu0 %v2672_v34  ;;  %v3136_v34 = vld [vmem:[%s10140_s14 + $0x18] sm:$0xff] }
 0x74f   :  { %3117 = vmatprep.mubr.f32.mxu0 %v7717_v0  ;;  %v6854_v16 = vpack.c.bf16 %v3136_v34, %v3134_v30  ;;  %v3484_v34 = vld [vmem:[%s10143_s17] sm:$0xff] }
 0x751   :  { %6855 = vmatprep.subr.bf16.mxu1 %v6854_v16 }
 0x752   :  { %6857 = vmatpush1.bf16.msra.mxu1 %v6856_v22  ;;  %v3671_v22 = vld [vmem:[#allocation5 + $0x258] sm:$0xff] }
 0x753   :  { %6859 = vmatprep.subr.bf16.mxu1 %v6858_v23  ;;  %v3485_v23 = vld [vmem:[%s10143_s17 + $0x8] sm:$0xff]  ;;  %v6878_v25 = vpack.c.bf16 %v3671_v22, %v3669_v21  ;;  %v3704_v21 = vld [vmem:[#allocation5 + $0x360] sm:$0xff]  ;;  %v3706_v22 = vld [vmem:[#allocation5 + $0x370] sm:$0xff] }
 0x756   :  { %6861 = vmatpush1.bf16.msra.mxu1 %v6860_v28  ;;  %v3673_v28 = vld [vmem:[#allocation5 + $0x268] sm:$0xff] }
 0x757   :  { %6863 = vmatprep.subr.bf16.mxu1 %v6862_v29  ;;  %v3675_v29 = vld [vmem:[#allocation5 + $0x278] sm:$0xff] }
 0x821   :  { %v3039_v12 = vpop.f32.mrb[34].mxu0 }
 0x822   :  { %v3041_v13 = vpop.f32.mrb[35].mxu0 }
 0x823   :  { %5790 = vmatprep.subr.msk.mxu0 %vm2815_vm4, %v3041_v13 }
 0x824   :  { %5791 = vmatpush1.msk.msra.mxu0 %vm2815_vm4, %v3039_v12  ;;  %v3667_v12 = vld [vmem:[#allocation5 + $0x238] sm:$0xff] }
 0x825   :  { %5792 = vmatmul.mubr.msk.f32.vlgmr.msra.gmra.mrb[32].mxu0 %vm2811_vm5, %v5725_v14  ;;  %v6870_v14 = vpack.c.bf16 %v3663_v8, %v3661_v7  ;;  %v6874_v16 = vpack.c.bf16 %v3667_v12, %v3665_v11  ;;  %v3701_v11 = vld [vmem:[#allocation5 + $0x348] sm:$0xff]  ;;  %v3703_v12 = vld [vmem:[#allocation5 + $0x358] sm:$0xff] }
 0x826   :  { %3397 = vmatprep.mubr.f32.mxu0 %v7717_v0 }
 0x8f8   :  { %v3119_v35 = vpop.f32.mrb[32].mxu0 }
 0x8f9   :  { %v7516_v36 = vadd.f32 %v3119_v35, %v2897_v32  ;;  %v3121_v37 = vpop.f32.mrb[33].mxu0  ;;  %v6880_v32 = vpack.c.bf16 %v3670_v27, %v3668_v26  ;;  %v3672_v35 = vld [vmem:[#allocation5 + $0x260] sm:$0xff] }
 0x8fa   :  { %v7517_v38 = vadd.f32 %v3121_v37, %v2901_v33  ;;  %v6882_v33 = vpack.c.bf16 %v3675_v29, %v3673_v28  ;;  %v3677_v37 = vld [vmem:[#allocation5 + $0x288] sm:$0xff]  ;;  %v3708_v27 = vld [vmem:[#allocation5 + $0x380] sm:$0xff]  ;;  %v3710_v28 = vld [vmem:[#allocation5 + $0x390] sm:$0xff] }
 0x8fb   :  { %5642 = vst.msk [vmem:[#allocation8] sm:$0x3] %vm5641_vm6, %v7516_v36  ;;  %v3713_v29 = vld [vmem:[#allocation5 + $0x3a8] sm:$0xff] }
 0x8fc   :  { %v3127_v39 = vmul.f32 0.5, %v7517_v38  ;;  %5643 = vst.msk [vmem:[#allocation9] sm:$0x3] %vm5641_vm6, %v7517_v38  ;;  %v3679_v38 = vld [vmem:[#allocation5 + $0x298] sm:$0xff] }
 0x8fe   :  { %v3128_v41 = vmul.f32 1.442695, %v3127_v39 }
 0x900   :  { %7574 = vpow2.f32 %v3128_v41  ;;  %v3487_v41 = vld [vmem:[%s10143_s17 + $0x18] sm:$0xff] }
 0x90a   :  { %v7575_v45 = vpop.eup %7574 }
 0x90b   :  { %v3130_v48 = vmul.f32 %v7575_v45, %v3126_v42  ;;  %v6886_v42 = vpack.c.bf16 %v3679_v38, %v3677_v37  ;;  %v3681_v45 = vld [vmem:[#allocation5 + $0x2a8] sm:$0xff]  ;;  %v3719_v38 = vld [vmem:[#allocation5 + $0x3d8] sm:$0xff] }
 0x90c   :  { %v3717_v37 = vld [vmem:[#allocation5 + $0x3c8] sm:$0xff] }
 0x90d   :  { %v3131_v50 = vadd.f32 %v7516_v36, %v3130_v48  ;;  %v3674_v36 = vld [vmem:[#allocation5 + $0x270] sm:$0xff]  ;;  %v6890_v48 = vpack.c.bf16 %v3683_v47, %v3681_v45  ;;  %v3721_v45 = vld [vmem:[#allocation5 + $0x3e8] sm:$0xff]  ;;  %v3723_v47 = vld [vmem:[#allocation5 + $0x3f8] sm:$0xff] }
 0x90e   :  { %v6884_v39 = vpack.c.bf16 %v3674_v36, %v3672_v35  ;;  %v3712_v35 = vld [vmem:[#allocation5 + $0x3a0] sm:$0xff]  ;;  %v3714_v36 = vld [vmem:[#allocation5 + $0x3b0] sm:$0xff] }
 0x90f   :  { %5793 = vmatmul.mubr.msk.f32.vlgmr.msra.gmra.mrb[34].mxu1 %vm555_vm1, %v3131_v50 }
 0x910   :  { %6865 = vmatpush1.bf16.msra.mxu1 %v6864_v49  ;;  %3315 = vmatprep.mubr.f32.mxu1 %v7717_v0  ;;  %v3680_v49 = vld [vmem:[#allocation5 + $0x2a0] sm:$0xff] }
 0x911   :  { %6867 = vmatprep.subr.bf16.mxu1 %v6866_v51  ;;  %v3685_v51 = vld [vmem:[#allocation5 + $0x2c8] sm:$0xff] }
 0x914   :  { %6869 = vmatpush1.bf16.msra.mxu1 %v6868_v54  ;;  %v6894_v54 = vpack.c.bf16 %v3687_v52, %v3685_v51  ;;  %v3596_v51 = vld [vmem:[#allocation5 + $0x8] sm:$0xff]  ;;  %v3598_v52 = vld [vmem:[#allocation5 + $0x18] sm:$0xff] }
 0x917   :  { %5804 = vmatmul.mubr.msk.f32.vlgmr.msra.gmra.mrb[36].mxu1 %vm555_vm1, %v3131_v50  ;;  %v3682_v50 = vld [vmem:[#allocation5 + $0x2b0] sm:$0xff] }
 0x918   :  { %4254 = vmatprep.mubr.f32.mxu1 %v7717_v0  ;;  %v6892_v40 = vpack.c.bf16 %v3682_v50, %v3680_v49  ;;  %v3722_v49 = vld [vmem:[#allocation5 + $0x3f0] sm:$0xff] }
 0x9e2   :  { %v3222_v55 = vpop.f32.mrb[34].mxu1 }
 0x9e3   :  { %v3224_v53 = vpop.f32.mrb[35].mxu1  ;;  %v3223_v5 = vadd.f32 %v3222_v55, %v3146_v62  ;;  %v3684_v55 = vld [vmem:[#allocation5 + $0x2c0] sm:$0xff]  ;;  %v3693_v62 = vld [vmem:[#allocation5 + $0x308] sm:$0xff] }
 0x9e4   :  { %v3225_v4 = vadd.f32 %v3224_v53, %v3150_v60  ;;  %v3686_v53 = vld [vmem:[#allocation5 + $0x2d0] sm:$0xff]  ;;  %v3688_v60 = vld [vmem:[#allocation5 + $0x2e0] sm:$0xff] }
 0x9ea   :  { %v3317_v61 = vpop.f32.mrb[36].mxu1 }
 0x9eb   :  { %v3319_v63 = vpop.f32.mrb[37].mxu1  ;;  %v3318_v2 = vadd.f32 %v3317_v61, %v3244_v59  ;;  %v6898_v59 = vpack.c.bf16 %v3691_v57, %v3689_v56  ;;  %v3690_v61 = vld [vmem:[#allocation5 + $0x2f0] sm:$0xff]  ;;  %v3600_v57 = vld [vmem:[#allocation5 + $0x28] sm:$0xff] }
 0x9ec   :  { %v3320_v1 = vadd.f32 %v3319_v63, %v3248_v58  ;;  %v6896_v58 = vpack.c.bf16 %v3686_v53, %v3684_v55  ;;  %v3695_v63 = vld [vmem:[#allocation5 + $0x318] sm:$0xff]  ;;  %v3595_v53 = vld [vmem:[#allocation5] sm:$0xff]  ;;  %v3597_v56 = vld [vmem:[#allocation5 + $0x10] sm:$0xff] }
 0x9ee   :  { %5805 = vmatprep.subr.msk.mxu0 %vm3326_vm7, %v3320_v1  ;;  %v6900_v1 = vpack.c.bf16 %v3690_v61, %v3688_v60  ;;  %v6936_v60 = vpack.c.bf16 %v3597_v56, %v3595_v53  ;;  %v3636_v53 = vld [vmem:[#allocation5 + $0x148] sm:$0xff]  ;;  %v3638_v56 = vld [vmem:[#allocation5 + $0x158] sm:$0xff] }
 0x9ef   :  { %5806 = vmatpush1.msk.msra.mxu0 %vm3326_vm7, %v3318_v2  ;;  %v6902_v2 = vpack.c.bf16 %v3695_v63, %v3693_v62  ;;  %v3599_v63 = vld [vmem:[#allocation5 + $0x20] sm:$0xff] }
 0x9f0   :  { %5807 = vmatmul.mubr.msk.f32.vlgmr.msra.gmra.mrb[36].mxu0 %vm3322_vm8, %v5794_v3  ;;  %5808 = vmatprep.subr.msk.mxu0 %vm3326_vm7, %v3225_v4  ;;  %v3692_v3 = vld [vmem:[#allocation5 + $0x300] sm:$0xff]  ;;  %v3694_v4 = vld [vmem:[#allocation5 + $0x310] sm:$0xff] }
 0x9f1   :  { %5809 = vmatpush1.msk.msra.mxu0 %vm3326_vm7, %v3223_v5  ;;  %3477 = vmatprep.mubr.f32.mxu0 %v7717_v0  ;;  %v3697_v5 = vld [vmem:[#allocation5 + $0x328] sm:$0xff]  ;;  %v6904_v7 = vpack.c.bf16 %v3694_v4, %v3692_v3  ;;  %v3606_v3 = vld [vmem:[#allocation5 + $0x58] sm:$0xff] }
 0x9f8   :  { %5810 = vmatmul.mubr.msk.f32.vlgmr.msra.gmra.mrb[36].mxu0 %vm3322_vm8, %v3132_v6  ;;  %v3699_v6 = vld [vmem:[#allocation5 + $0x338] sm:$0xff] }
 0x9f9   :  { %3570 = vmatprep.mubr.f32.mxu0 %v7717_v0  ;;  %v6906_v8 = vpack.c.bf16 %v3699_v6, %v3697_v5 }
 0xacb   :  { %v3479_v13 = vpop.f32.mrb[36].mxu0 }
 0xacc   :  { %v3481_v30 = vpop.f32.mrb[37].mxu0 }
 0xacd   :  { %5811 = vmatprep.subr.msk.mxu0 %vm2815_vm4, %v3481_v30  ;;  %v3700_v30 = vld [vmem:[#allocation5 + $0x340] sm:$0xff] }
 0xace   :  { %5812 = vmatpush1.msk.msra.mxu0 %vm2815_vm4, %v3479_v13  ;;  %v6908_v13 = vpack.c.bf16 %v3698_v10, %v3696_v9  ;;  %v3608_v10 = vld [vmem:[#allocation5 + $0x68] sm:$0xff] }
 0xacf   :  { %5813 = vmatmul.mubr.msk.f32.vlgmr.msra.gmra.mrb[38].mxu0 %vm2811_vm5, %v3484_v34  ;;  %6871 = vmatprep.subr.bf16.mxu0 %v6870_v14  ;;  %v6910_v14 = vpack.c.bf16 %v3703_v12, %v3701_v11  ;;  %v3702_v34 = vld [vmem:[#allocation5 + $0x350] sm:$0xff]  ;;  %v3610_v11 = vld [vmem:[#allocation5 + $0x78] sm:$0xff] }
 0xad0   :  { %3576 = vmatprep.mubr.f32.mxu0 %v7717_v0  ;;  %6873 = vmatpush1.bf16.msra.mxu0 %v6872_v15  ;;  %v3705_v15 = vld [vmem:[#allocation5 + $0x368] sm:$0xff]  ;;  %v6912_v17 = vpack.c.bf16 %v3702_v34, %v3700_v30  ;;  %v3609_v30 = vld [vmem:[#allocation5 + $0x70] sm:$0xff] }
 0xad1   :  { %6875 = vmatprep.subr.bf16.mxu0 %v6874_v16  ;;  %v3707_v16 = vld [vmem:[#allocation5 + $0x378] sm:$0xff]  ;;  %v3612_v34 = vld [vmem:[#allocation5 + $0x88] sm:$0xff] }
 0xad2   :  { %v6914_v19 = vpack.c.bf16 %v3707_v16, %v3705_v15  ;;  %v3614_v15 = vld [vmem:[#allocation5 + $0x98] sm:$0xff] }
 0xad3   :  { %5814 = vmatmul.mubr.msk.f32.gmra.mrb[40].mxu0 %vm2811_vm5, %v3485_v23  ;;  %v3709_v23 = vld [vmem:[#allocation5 + $0x388] sm:$0xff] }
 0xad4   :  { %3582 = vmatprep.mubr.f32.mxu0 %v7717_v0  ;;  %6877 = vmatpush1.bf16.msra.mxu0 %v6876_v24  ;;  %v3711_v24 = vld [vmem:[#allocation5 + $0x398] sm:$0xff] }
 0xad5   :  { %6879 = vmatprep.subr.bf16.mxu0 %v6878_v25  ;;  %v6916_v25 = vpack.c.bf16 %v3706_v22, %v3704_v21  ;;  %v6918_v26 = vpack.c.bf16 %v3711_v24, %v3709_v23  ;;  %v3613_v21 = vld [vmem:[#allocation5 + $0x90] sm:$0xff]  ;;  %v3616_v22 = vld [vmem:[#allocation5 + $0xa8] sm:$0xff]  ;;  %v3618_v23 = vld [vmem:[#allocation5 + $0xb8] sm:$0xff] }
 0xad7   :  { %5815 = vmatmul.mubr.msk.f32.gmra.mrb[42].mxu0 %vm2811_vm5, %v3486_v31  ;;  %v3715_v31 = vld [vmem:[#allocation5 + $0x3b8] sm:$0xff] }
 0xad8   :  { %6881 = vmatpush1.bf16.msra.mxu0 %v6880_v32  ;;  %3588 = vmatprep.mubr.f32.mxu0 %v7717_v0  ;;  %v6920_v32 = vpack.c.bf16 %v3710_v28, %v3708_v27  ;;  %v3617_v27 = vld [vmem:[#allocation5 + $0xb0] sm:$0xff]  ;;  %v3620_v28 = vld [vmem:[#allocation5 + $0xc8] sm:$0xff] }
 0xad9   :  { %6883 = vmatprep.subr.bf16.mxu0 %v6882_v33  ;;  %v6922_v33 = vpack.c.bf16 %v3715_v31, %v3713_v29  ;;  %v3622_v29 = vld [vmem:[#allocation5 + $0xd8] sm:$0xff] }
 0xadb   :  { %5816 = vmatmul.mubr.msk.f32.gmra.mrb[44].mxu0 %vm2811_vm5, %v3487_v41  ;;  %v6926_v41 = vpack.c.bf16 %v3719_v38, %v3717_v37  ;;  %v3626_v37 = vld [vmem:[#allocation5 + $0xf8] sm:$0xff] }
 0xadc   :  { %6885 = vmatpush1.bf16.msra.mxu0 %v6884_v39  ;;  %v6924_v39 = vpack.c.bf16 %v3714_v36, %v3712_v35  ;;  %v3621_v35 = vld [vmem:[#allocation5 + $0xd0] sm:$0xff]  ;;  %v3624_v36 = vld [vmem:[#allocation5 + $0xe8] sm:$0xff] }
 0xadd   :  { %6887 = vmatprep.subr.bf16.mxu0 %v6886_v42  ;;  %v3716_v42 = vld [vmem:[#allocation5 + $0x3c0] sm:$0xff] }
 0xade   :  { %v6928_v44 = vpack.c.bf16 %v3718_v43, %v3716_v42  ;;  %v3625_v42 = vld [vmem:[#allocation5 + $0xf0] sm:$0xff]  ;;  %v3628_v43 = vld [vmem:[#allocation5 + $0x108] sm:$0xff] }
 0xae0   :  { %6889 = vmatpush1.bf16.msra.mxu0 %v6888_v46  ;;  %v6930_v46 = vpack.c.bf16 %v3723_v47, %v3721_v45 }
 0xae1   :  { %6891 = vmatprep.subr.bf16.mxu0 %v6890_v48  ;;  %v3720_v48 = vld [vmem:[#allocation5 + $0x3e0] sm:$0xff] }
 0xae2   :  { %v6932_v50 = vpack.c.bf16 %v3722_v49, %v3720_v48  ;;  %v3629_v48 = vld [vmem:[#allocation5 + $0x110] sm:$0xff]  ;;  %v3632_v49 = vld [vmem:[#allocation5 + $0x128] sm:$0xff] }
 0xae4   :  { %6893 = vmatpush1.bf16.msra.mxu0 %v6892_v40  ;;  %v6934_v40 = vpack.c.bf16 %v3598_v52, %v3596_v51 }
 0xae5   :  { %6895 = vmatprep.subr.bf16.mxu0 %v6894_v54 }
 0xae8   :  { %6897 = vmatpush1.bf16.msra.mxu0 %v6896_v58  ;;  %v3602_v58 = vld [vmem:[#allocation5 + $0x38] sm:$0xff] }
 0xae9   :  { %6899 = vmatprep.subr.bf16.mxu0 %v6898_v59  ;;  %v6938_v62 = vpack.c.bf16 %v3602_v58, %v3600_v57  ;;  %v6974_v58 = vpack.c.bf16 %v3638_v56, %v3636_v53 }
 0xaec   :  { %6901 = vmatpush1.bf16.msra.mxu0 %v6900_v1  ;;  %v3601_v1 = vld [vmem:[#allocation5 + $0x30] sm:$0xff] }
 0xaed   :  { %6903 = vmatprep.subr.bf16.mxu0 %v6902_v2  ;;  %v3604_v2 = vld [vmem:[#allocation5 + $0x48] sm:$0xff]  ;;  %v6940_v4 = vpack.c.bf16 %v3601_v1, %v3599_v63 }
 0xaee   :  { %v6942_v6 = vpack.c.bf16 %v3606_v3, %v3604_v2  ;;  %v3639_v2 = vld [vmem:[#allocation5 + $0x160] sm:$0xff]  ;;  %v3641_v3 = vld [vmem:[#allocation5 + $0x170] sm:$0xff] }
 0xaf0   :  { %6905 = vmatpush1.bf16.msra.mxu0 %v6904_v7  ;;  %v3603_v7 = vld [vmem:[#allocation5 + $0x40] sm:$0xff] }
 0xaf1   :  { %6907 = vmatprep.subr.bf16.mxu0 %v6906_v8  ;;  %v3605_v8 = vld [vmem:[#allocation5 + $0x50] sm:$0xff] }
 0xaf2   :  { %v6944_v12 = vpack.c.bf16 %v3605_v8, %v3603_v7  ;;  %v6980_v7 = vpack.c.bf16 %v3641_v3, %v3639_v2 }
 0xaf4   :  { %6909 = vmatpush1.bf16.msra.mxu0 %v6908_v13  ;;  %v6946_v13 = vpack.c.bf16 %v3610_v11, %v3608_v10  ;;  %v3643_v10 = vld [vmem:[#allocation5 + $0x180] sm:$0xff]  ;;  %v3645_v11 = vld [vmem:[#allocation5 + $0x190] sm:$0xff] }
 0xaf5   :  { %6911 = vmatprep.subr.bf16.mxu0 %v6910_v14  ;;  %v3607_v14 = vld [vmem:[#allocation5 + $0x60] sm:$0xff] }
 0xaf6   :  { %v6948_v16 = vpack.c.bf16 %v3609_v30, %v3607_v14  ;;  %v6984_v14 = vpack.c.bf16 %v3645_v11, %v3643_v10 }
 0xaf8   :  { %6913 = vmatpush1.bf16.msra.mxu0 %v6912_v17  ;;  %v6950_v17 = vpack.c.bf16 %v3614_v15, %v3612_v34  ;;  %v3647_v34 = vld [vmem:[#allocation5 + $0x1a0] sm:$0xff]  ;;  %v3649_v15 = vld [vmem:[#allocation5 + $0x1b0] sm:$0xff] }
 0xaf9   :  { %6915 = vmatprep.subr.bf16.mxu0 %v6914_v19  ;;  %v3611_v19 = vld [vmem:[#allocation5 + $0x80] sm:$0xff] }
 0xafa   :  { %v6952_v24 = vpack.c.bf16 %v3613_v21, %v3611_v19  ;;  %v6988_v19 = vpack.c.bf16 %v3649_v15, %v3647_v34 }
 0xafc   :  { %6917 = vmatpush1.bf16.msra.mxu0 %v6916_v25  ;;  %v6954_v25 = vpack.c.bf16 %v3618_v23, %v3616_v22  ;;  %v3651_v22 = vld [vmem:[#allocation5 + $0x1c0] sm:$0xff]  ;;  %v3653_v23 = vld [vmem:[#allocation5 + $0x1d0] sm:$0xff] }
 0xafd   :  { %6919 = vmatprep.subr.bf16.mxu0 %v6918_v26  ;;  %v3615_v26 = vld [vmem:[#allocation5 + $0xa0] sm:$0xff] }
 0xafe   :  { %v6956_v31 = vpack.c.bf16 %v3617_v27, %v3615_v26  ;;  %v6992_v26 = vpack.c.bf16 %v3653_v23, %v3651_v22 }
 0xb00   :  { %6921 = vmatpush1.bf16.msra.mxu0 %v6920_v32  ;;  %v6958_v32 = vpack.c.bf16 %v3622_v29, %v3620_v28  ;;  %v3655_v28 = vld [vmem:[#allocation5 + $0x1e0] sm:$0xff]  ;;  %v3657_v29 = vld [vmem:[#allocation5 + $0x1f0] sm:$0xff] }
 0xb01   :  { %6923 = vmatprep.subr.bf16.mxu0 %v6922_v33  ;;  %v3619_v33 = vld [vmem:[#allocation5 + $0xc0] sm:$0xff] }
 0xb02   :  { %v6960_v38 = vpack.c.bf16 %v3621_v35, %v3619_v33  ;;  %v6996_v33 = vpack.c.bf16 %v3657_v29, %v3655_v28 }
 0xb04   :  { %6925 = vmatpush1.bf16.msra.mxu0 %v6924_v39  ;;  %v6962_v39 = vpack.c.bf16 %v3626_v37, %v3624_v36  ;;  %v3867_v36 = vld [vmem:[#allocation5 + $0x400] sm:$0xff]  ;;  %v3869_v37 = vld [vmem:[#allocation5 + $0x410] sm:$0xff] }
 0xb05   :  { %6927 = vmatprep.subr.bf16.mxu0 %v6926_v41  ;;  %v3623_v41 = vld [vmem:[#allocation5 + $0xe0] sm:$0xff] }
 0xb06   :  { %v6964_v45 = vpack.c.bf16 %v3625_v42, %v3623_v41  ;;  %v3874_v41 = vld [vmem:[#allocation5 + $0x438] sm:$0xff]  ;;  %v7000_v42 = vpack.c.bf16 %v3869_v37, %v3867_v36 }
 0xb08   :  { %6929 = vmatpush1.bf16.msra.mxu0 %v6928_v44  ;;  %v3630_v44 = vld [vmem:[#allocation5 + $0x118] sm:$0xff] }
 0xb09   :  { %6931 = vmatprep.subr.bf16.mxu0 %v6930_v46  ;;  %v6966_v47 = vpack.c.bf16 %v3630_v44, %v3628_v43  ;;  %v3627_v46 = vld [vmem:[#allocation5 + $0x100] sm:$0xff] }
 0xb0a   :  { %v6968_v51 = vpack.c.bf16 %v3629_v48, %v3627_v46  ;;  %v3876_v46 = vld [vmem:[#allocation5 + $0x448] sm:$0xff]  ;;  %v3878_v48 = vld [vmem:[#allocation5 + $0x458] sm:$0xff] }
 0xb0c   :  { %6933 = vmatpush1.bf16.msra.mxu0 %v6932_v50  ;;  %v3634_v50 = vld [vmem:[#allocation5 + $0x138] sm:$0xff] }
 0xb0d   :  { %6935 = vmatprep.subr.bf16.mxu0 %v6934_v40  ;;  %v6970_v52 = vpack.c.bf16 %v3634_v50, %v3632_v49  ;;  %v3631_v40 = vld [vmem:[#allocation5 + $0x120] sm:$0xff]  ;;  %v7006_v50 = vpack.c.bf16 %v3878_v48, %v3876_v46  ;;  %v3913_v48 = vld [vmem:[#allocation5 + $0x570] sm:$0xff] }
 0xb0e   :  { %v3911_v46 = vld [vmem:[#allocation5 + $0x560] sm:$0xff] }
 0xba2   :  { %v9492_v54 = vpop.f32.mrb[38].mxu0 }
 0xba3   :  { %v3574_v55 = vpop.f32.mrb[39].mxu0 }
 0xba6   :  { %v3578_v59 = vpop.f32.mrb[40].mxu0 }
 0xba7   :  { %v3580_v61 = vpop.f32.mrb[41].mxu0 }
 0xba8   :  { %3788 = vmatprep.mubr.f32.mxu0 %v3580_v61  ;;  %v3640_v61 = vld [vmem:[#allocation5 + $0x168] sm:$0xff] }
 0xba9   :  { %3789 = vmatmul.mubr.f32.vlgmr.msra.gmra.mrb[46].mxu0 %v3578_v59  ;;  %v3635_v59 = vld [vmem:[#allocation5 + $0x140] sm:$0xff] }
 0xbaa   :  { %6937 = vmatpush1.bf16.msra.mxu0 %v6936_v60  ;;  %3859 = vmatprep.mubr.f32.mxu0 %v3574_v55  ;;  %v9494_v5 = vpop.f32.mrb[42].mxu0  ;;  %v3633_v55 = vld [vmem:[#allocation5 + $0x130] sm:$0xff] }
 0xbab   :  { %6939 = vmatprep.subr.bf16.mxu0 %v6938_v62  ;;  %v9496_v9 = vpop.f32.mrb[43].mxu0  ;;  %v6972_v57 = vpack.c.bf16 %v3633_v55, %v3631_v40  ;;  %v3637_v60 = vld [vmem:[#allocation5 + $0x150] sm:$0xff]  ;;  %v3642_v62 = vld [vmem:[#allocation5 + $0x178] sm:$0xff]  ;;  %v3880_v40 = vld [vmem:[#allocation5 + $0x468] sm:$0xff] }
 0xbac   :  { %v6976_v63 = vpack.c.bf16 %v3637_v60, %v3635_v59  ;;  %v6978_v1 = vpack.c.bf16 %v3642_v62, %v3640_v61  ;;  %v3882_v55 = vld [vmem:[#allocation5 + $0x478] sm:$0xff]  ;;  %v3884_v59 = vld [vmem:[#allocation5 + $0x488] sm:$0xff]  ;;  %v3883_v62 = vld [vmem:[#allocation5 + $0x480] sm:$0xff] }
 0xbad   :  { %v7010_v56 = vpack.c.bf16 %v3882_v55, %v3880_v40  ;;  %v3886_v60 = vld [vmem:[#allocation5 + $0x498] sm:$0xff]  ;;  %v3915_v40 = vld [vmem:[#allocation5 + $0x580] sm:$0xff]  ;;  %v3917_v55 = vld [vmem:[#allocation5 + $0x590] sm:$0xff] }
 0xbae   :  { %6941 = vmatpush1.bf16.msra.mxu0 %v6940_v4  ;;  %v3644_v4 = vld [vmem:[#allocation5 + $0x188] sm:$0xff]  ;;  %v7014_v61 = vpack.c.bf16 %v3886_v60, %v3884_v59  ;;  %v3919_v59 = vld [vmem:[#allocation5 + $0x5a0] sm:$0xff]  ;;  %v3921_v60 = vld [vmem:[#allocation5 + $0x5b0] sm:$0xff] }
 0xbaf   :  { %6943 = vmatprep.subr.bf16.mxu0 %v6942_v6  ;;  %v3646_v6 = vld [vmem:[#allocation5 + $0x198] sm:$0xff] }
 0xbb0   :  { %v6982_v8 = vpack.c.bf16 %v3646_v6, %v3644_v4  ;;  %v3887_v4 = vld [vmem:[#allocation5 + $0x4a0] sm:$0xff]  ;;  %v3889_v6 = vld [vmem:[#allocation5 + $0x4b0] sm:$0xff] }
 0xbb1   :  { %v7020_v10 = vpack.c.bf16 %v3889_v6, %v3887_v4 }
 0xbb2   :  { %6945 = vmatpush1.bf16.msra.mxu0 %v6944_v12  ;;  %v3648_v12 = vld [vmem:[#allocation5 + $0x1a8] sm:$0xff] }
 0xbb3   :  { %6947 = vmatprep.subr.bf16.mxu0 %v6946_v13  ;;  %v3650_v13 = vld [vmem:[#allocation5 + $0x1b8] sm:$0xff] }
 0xbb4   :  { %v6986_v30 = vpack.c.bf16 %v3650_v13, %v3648_v12  ;;  %v3891_v12 = vld [vmem:[#allocation5 + $0x4c0] sm:$0xff]  ;;  %v3893_v13 = vld [vmem:[#allocation5 + $0x4d0] sm:$0xff] }
 0xbb5   :  { %v7024_v34 = vpack.c.bf16 %v3893_v13, %v3891_v12 }
 0xbb6   :  { %6949 = vmatpush1.bf16.msra.mxu0 %v6948_v16  ;;  %v3652_v16 = vld [vmem:[#allocation5 + $0x1c8] sm:$0xff] }
 0xbb7   :  { %6951 = vmatprep.subr.bf16.mxu0 %v6950_v17  ;;  %v3654_v17 = vld [vmem:[#allocation5 + $0x1d8] sm:$0xff] }
 0xbb8   :  { %v6990_v21 = vpack.c.bf16 %v3654_v17, %v3652_v16  ;;  %v3895_v16 = vld [vmem:[#allocation5 + $0x4e0] sm:$0xff]  ;;  %v3897_v17 = vld [vmem:[#allocation5 + $0x4f0] sm:$0xff] }
 0xbb9   :  { %v7028_v22 = vpack.c.bf16 %v3897_v17, %v3895_v16 }
 0xbba   :  { %6953 = vmatpush1.bf16.msra.mxu0 %v6952_v24  ;;  %v3656_v24 = vld [vmem:[#allocation5 + $0x1e8] sm:$0xff] }
 0xbbb   :  { %6955 = vmatprep.subr.bf16.mxu0 %v6954_v25  ;;  %v3658_v25 = vld [vmem:[#allocation5 + $0x1f8] sm:$0xff] }
 0xbbc   :  { %v6994_v27 = vpack.c.bf16 %v3658_v25, %v3656_v24  ;;  %v3899_v24 = vld [vmem:[#allocation5 + $0x500] sm:$0xff]  ;;  %v3901_v25 = vld [vmem:[#allocation5 + $0x510] sm:$0xff] }
 0xbbd   :  { %v7032_v28 = vpack.c.bf16 %v3901_v25, %v3899_v24 }
 0xbbe   :  { %6957 = vmatpush1.bf16.msra.mxu0 %v6956_v31  ;;  %v3868_v31 = vld [vmem:[#allocation5 + $0x408] sm:$0xff] }
 0xbbf   :  { %6959 = vmatprep.subr.bf16.mxu0 %v6958_v32  ;;  %v3870_v32 = vld [vmem:[#allocation5 + $0x418] sm:$0xff] }
 0xbc0   :  { %v6998_v35 = vpack.c.bf16 %v3870_v32, %v3868_v31  ;;  %v3903_v31 = vld [vmem:[#allocation5 + $0x520] sm:$0xff]  ;;  %v3905_v32 = vld [vmem:[#allocation5 + $0x530] sm:$0xff] }
 0xbc1   :  { %v7036_v36 = vpack.c.bf16 %v3905_v32, %v3903_v31 }
 0xbc2   :  { %6961 = vmatpush1.bf16.msra.mxu0 %v6960_v38  ;;  %v9498_v38 = vpop.f32.mrb[44].mxu0 }
 0xbc3   :  { %6963 = vmatprep.subr.bf16.mxu0 %v6962_v39  ;;  %v3872_v39 = vld [vmem:[#allocation5 + $0x428] sm:$0xff]  ;;  %v9500_v43 = vpop.f32.mrb[45].mxu0 }
 0xbc4   :  { %v7002_v44 = vpack.c.bf16 %v3874_v41, %v3872_v39  ;;  %v3907_v39 = vld [vmem:[#allocation5 + $0x540] sm:$0xff]  ;;  %v3909_v41 = vld [vmem:[#allocation5 + $0x550] sm:$0xff] }
 0xbc6   :  { %6965 = vmatpush1.bf16.msra.mxu0 %v6964_v45  ;;  %v3871_v45 = vld [vmem:[#allocation5 + $0x420] sm:$0xff] }
 0xbc7   :  { %6967 = vmatprep.subr.bf16.mxu0 %v6966_v47  ;;  %v3873_v47 = vld [vmem:[#allocation5 + $0x430] sm:$0xff] }
 0xbc8   :  { %v7004_v49 = vpack.c.bf16 %v3873_v47, %v3871_v45  ;;  %v7040_v45 = vpack.c.bf16 %v3909_v41, %v3907_v39  ;;  %v4021_v41 = vld [vmem:[#allocation5 + $0x680] sm:$0xff] }
 0xbca   :  { %6969 = vmatpush1.bf16.msra.mxu0 %v6968_v51  ;;  %v3875_v51 = vld [vmem:[#allocation5 + $0x440] sm:$0xff] }
 0xbcb   :  { %6971 = vmatprep.subr.bf16.mxu0 %v6970_v52  ;;  %v3877_v52 = vld [vmem:[#allocation5 + $0x450] sm:$0xff] }
 0xbcc   :  { %v7008_v53 = vpack.c.bf16 %v3877_v52, %v3875_v51  ;;  %v7044_v51 = vpack.c.bf16 %v3913_v48, %v3911_v46  ;;  %v4025_v46 = vld [vmem:[#allocation5 + $0x6a0] sm:$0xff]  ;;  %v4027_v48 = vld [vmem:[#allocation5 + $0x6b0] sm:$0xff] }
 0xbce   :  { %6973 = vmatpush1.bf16.msra.mxu0 %v6972_v57  ;;  %v3879_v57 = vld [vmem:[#allocation5 + $0x460] sm:$0xff] }
 0xbcf   :  { %6975 = vmatprep.subr.bf16.mxu0 %v6974_v58  ;;  %v3881_v58 = vld [vmem:[#allocation5 + $0x470] sm:$0xff] }
 0xbd2   :  { %6977 = vmatpush1.bf16.msra.mxu0 %v6976_v63  ;;  %v3888_v63 = vld [vmem:[#allocation5 + $0x4a8] sm:$0xff] }
 0xbd3   :  { %6979 = vmatprep.subr.bf16.mxu0 %v6978_v1  ;;  %v3890_v1 = vld [vmem:[#allocation5 + $0x4b8] sm:$0xff] }
 0xbd4   :  { %v7018_v3 = vpack.c.bf16 %v3890_v1, %v3888_v63  ;;  %v3923_v63 = vld [vmem:[#allocation5 + $0x5c0] sm:$0xff]  ;;  %v3925_v1 = vld [vmem:[#allocation5 + $0x5d0] sm:$0xff] }
 0xbd5   :  { %v7056_v4 = vpack.c.bf16 %v3925_v1, %v3923_v63  ;;  %v4037_v63 = vld [vmem:[#allocation5 + $0x700] sm:$0xff]  ;;  %v4039_v1 = vld [vmem:[#allocation5 + $0x710] sm:$0xff] }
 0xbd6   :  { %6981 = vmatpush1.bf16.msra.mxu0 %v6980_v7  ;;  %v3892_v7 = vld [vmem:[#allocation5 + $0x4c8] sm:$0xff] }
 0xbd7   :  { %6983 = vmatprep.subr.bf16.mxu0 %v6982_v8  ;;  %v3894_v8 = vld [vmem:[#allocation5 + $0x4d8] sm:$0xff] }
 0xbd8   :  { %v7022_v11 = vpack.c.bf16 %v3894_v8, %v3892_v7  ;;  %v3927_v7 = vld [vmem:[#allocation5 + $0x5e0] sm:$0xff]  ;;  %v3929_v8 = vld [vmem:[#allocation5 + $0x5f0] sm:$0xff] }
 0xbd9   :  { %v7060_v12 = vpack.c.bf16 %v3929_v8, %v3927_v7  ;;  %v4041_v7 = vld [vmem:[#allocation5 + $0x720] sm:$0xff]  ;;  %v4043_v8 = vld [vmem:[#allocation5 + $0x730] sm:$0xff] }
 0xbda   :  { %6985 = vmatpush1.bf16.msra.mxu0 %v6984_v14  ;;  %v3896_v14 = vld [vmem:[#allocation5 + $0x4e8] sm:$0xff] }
 0xbdb   :  { %6987 = vmatprep.subr.bf16.mxu0 %v6986_v30  ;;  %v3898_v30 = vld [vmem:[#allocation5 + $0x4f8] sm:$0xff] }
 0xbdc   :  { %v7026_v15 = vpack.c.bf16 %v3898_v30, %v3896_v14  ;;  %v4005_v14 = vld [vmem:[#allocation5 + $0x600] sm:$0xff]  ;;  %v4007_v30 = vld [vmem:[#allocation5 + $0x610] sm:$0xff] }
 0xbdd   :  { %v7064_v16 = vpack.c.bf16 %v4007_v30, %v4005_v14  ;;  %v4045_v14 = vld [vmem:[#allocation5 + $0x740] sm:$0xff]  ;;  %v4047_v30 = vld [vmem:[#allocation5 + $0x750] sm:$0xff] }
 0xbde   :  { %6989 = vmatpush1.bf16.msra.mxu0 %v6988_v19  ;;  %v3900_v19 = vld [vmem:[#allocation5 + $0x508] sm:$0xff] }
 0xbdf   :  { %6991 = vmatprep.subr.bf16.mxu0 %v6990_v21  ;;  %v3902_v21 = vld [vmem:[#allocation5 + $0x518] sm:$0xff] }
 0xbe0   :  { %v7030_v23 = vpack.c.bf16 %v3902_v21, %v3900_v19  ;;  %v4009_v19 = vld [vmem:[#allocation5 + $0x620] sm:$0xff]  ;;  %v4011_v21 = vld [vmem:[#allocation5 + $0x630] sm:$0xff] }
 0xbe1   :  { %v7068_v24 = vpack.c.bf16 %v4011_v21, %v4009_v19  ;;  %v4049_v19 = vld [vmem:[#allocation5 + $0x760] sm:$0xff]  ;;  %v4051_v21 = vld [vmem:[#allocation5 + $0x770] sm:$0xff] }
 0xbe2   :  { %6993 = vmatpush1.bf16.msra.mxu0 %v6992_v26  ;;  %v3904_v26 = vld [vmem:[#allocation5 + $0x528] sm:$0xff] }
 0xbe3   :  { %6995 = vmatprep.subr.bf16.mxu0 %v6994_v27  ;;  %v3906_v27 = vld [vmem:[#allocation5 + $0x538] sm:$0xff] }
 0xbe4   :  { %v7034_v29 = vpack.c.bf16 %v3906_v27, %v3904_v26  ;;  %v4013_v26 = vld [vmem:[#allocation5 + $0x640] sm:$0xff]  ;;  %v4015_v27 = vld [vmem:[#allocation5 + $0x650] sm:$0xff] }
 0xbe5   :  { %v7072_v31 = vpack.c.bf16 %v4015_v27, %v4013_v26  ;;  %v4053_v26 = vld [vmem:[#allocation5 + $0x780] sm:$0xff]  ;;  %v4055_v27 = vld [vmem:[#allocation5 + $0x790] sm:$0xff] }
 0xbe6   :  { %6997 = vmatpush1.bf16.msra.mxu0 %v6996_v33  ;;  %v3908_v33 = vld [vmem:[#allocation5 + $0x548] sm:$0xff] }
 0xbe7   :  { %6999 = vmatprep.subr.bf16.mxu0 %v6998_v35  ;;  %v3910_v35 = vld [vmem:[#allocation5 + $0x558] sm:$0xff] }
 0xbe8   :  { %v7038_v37 = vpack.c.bf16 %v3910_v35, %v3908_v33  ;;  %v4017_v33 = vld [vmem:[#allocation5 + $0x660] sm:$0xff]  ;;  %v4019_v35 = vld [vmem:[#allocation5 + $0x670] sm:$0xff] }
 0xbe9   :  { %3860 = vmatmul.mubr.f32.vlgmr.msra.gmra.mrb[46].mxu0 %v9492_v54  ;;  %v7012_v54 = vpack.c.bf16 %v3881_v58, %v3879_v57  ;;  %v7048_v57 = vpack.c.bf16 %v3917_v55, %v3915_v40  ;;  %v4029_v40 = vld [vmem:[#allocation5 + $0x6c0] sm:$0xff]  ;;  %v4031_v55 = vld [vmem:[#allocation5 + $0x6d0] sm:$0xff] }
 0xbea   :  { %7001 = vmatpush1.bf16.msra.mxu0 %v7000_v42  ;;  %3995 = vmatprep.mubr.f32.mxu0 %v9496_v9  ;;  %v3885_v9 = vld [vmem:[#allocation5 + $0x490] sm:$0xff]  ;;  %v3912_v42 = vld [vmem:[#allocation5 + $0x568] sm:$0xff] }
 0xbeb   :  { %7003 = vmatprep.subr.bf16.mxu0 %v7002_v44  ;;  %v7016_v2 = vpack.c.bf16 %v3885_v9, %v3883_v62  ;;  %v3914_v44 = vld [vmem:[#allocation5 + $0x578] sm:$0xff]  ;;  %v7052_v62 = vpack.c.bf16 %v3921_v60, %v3919_v59  ;;  %v4033_v59 = vld [vmem:[#allocation5 + $0x6e0] sm:$0xff]  ;;  %v4035_v60 = vld [vmem:[#allocation5 + $0x6f0] sm:$0xff] }
 0xbec   :  { %v7042_v47 = vpack.c.bf16 %v3914_v44, %v3912_v42  ;;  %v4026_v42 = vld [vmem:[#allocation5 + $0x6a8] sm:$0xff]  ;;  %v4028_v44 = vld [vmem:[#allocation5 + $0x6b8] sm:$0xff] }
 0xbee   :  { %7005 = vmatpush1.bf16.msra.mxu0 %v7004_v49  ;;  %v3916_v49 = vld [vmem:[#allocation5 + $0x588] sm:$0xff] }
 0xbef   :  { %7007 = vmatprep.subr.bf16.mxu0 %v7006_v50  ;;  %v3918_v50 = vld [vmem:[#allocation5 + $0x598] sm:$0xff] }
 0xbf0   :  { %v7046_v52 = vpack.c.bf16 %v3918_v50, %v3916_v49  ;;  %v4030_v49 = vld [vmem:[#allocation5 + $0x6c8] sm:$0xff]  ;;  %v4032_v50 = vld [vmem:[#allocation5 + $0x6d8] sm:$0xff] }
 0xbf2   :  { %7009 = vmatpush1.bf16.msra.mxu0 %v7008_v53  ;;  %v3920_v53 = vld [vmem:[#allocation5 + $0x5a8] sm:$0xff] }
 0xbf3   :  { %7011 = vmatprep.subr.bf16.mxu0 %v7010_v56  ;;  %v3922_v56 = vld [vmem:[#allocation5 + $0x5b8] sm:$0xff] }
 0xbf4   :  { %v7050_v58 = vpack.c.bf16 %v3922_v56, %v3920_v53  ;;  %v4034_v53 = vld [vmem:[#allocation5 + $0x6e8] sm:$0xff]  ;;  %v4036_v56 = vld [vmem:[#allocation5 + $0x6f8] sm:$0xff] }
 0xbf6   :  { %7013 = vmatpush1.bf16.msra.mxu0 %v7012_v54  ;;  %v3924_v54 = vld [vmem:[#allocation5 + $0x5c8] sm:$0xff] }
 0xbf7   :  { %7015 = vmatprep.subr.bf16.mxu0 %v7014_v61  ;;  %v3926_v61 = vld [vmem:[#allocation5 + $0x5d8] sm:$0xff] }
 0xbf8   :  { %v7054_v9 = vpack.c.bf16 %v3926_v61, %v3924_v54  ;;  %v4038_v54 = vld [vmem:[#allocation5 + $0x708] sm:$0xff]  ;;  %v4040_v61 = vld [vmem:[#allocation5 + $0x718] sm:$0xff] }
 0xbfa   :  { %7017 = vmatpush1.bf16.msra.mxu0 %v7016_v2  ;;  %v3928_v2 = vld [vmem:[#allocation5 + $0x5e8] sm:$0xff] }
 0xbfb   :  { %7019 = vmatprep.subr.bf16.mxu0 %v7018_v3  ;;  %v3930_v3 = vld [vmem:[#allocation5 + $0x5f8] sm:$0xff] }
 0xbfc   :  { %v7058_v6 = vpack.c.bf16 %v3930_v3, %v3928_v2  ;;  %v4042_v2 = vld [vmem:[#allocation5 + $0x728] sm:$0xff]  ;;  %v4044_v3 = vld [vmem:[#allocation5 + $0x738] sm:$0xff] }
 0xbfe   :  { %7021 = vmatpush1.bf16.msra.mxu0 %v7020_v10  ;;  %v4006_v10 = vld [vmem:[#allocation5 + $0x608] sm:$0xff] }
 0xbff   :  { %7023 = vmatprep.subr.bf16.mxu0 %v7022_v11  ;;  %v4008_v11 = vld [vmem:[#allocation5 + $0x618] sm:$0xff] }
 0xc00   :  { %v7062_v13 = vpack.c.bf16 %v4008_v11, %v4006_v10  ;;  %v4046_v10 = vld [vmem:[#allocation5 + $0x748] sm:$0xff]  ;;  %v4048_v11 = vld [vmem:[#allocation5 + $0x758] sm:$0xff] }
 0xc02   :  { %7025 = vmatpush1.bf16.msra.mxu0 %v7024_v34  ;;  %v4010_v34 = vld [vmem:[#allocation5 + $0x628] sm:$0xff] }
 0xc03   :  { %7027 = vmatprep.subr.bf16.mxu0 %v7026_v15  ;;  %v4012_v15 = vld [vmem:[#allocation5 + $0x638] sm:$0xff] }
 0xc04   :  { %v7066_v17 = vpack.c.bf16 %v4012_v15, %v4010_v34  ;;  %v4050_v34 = vld [vmem:[#allocation5 + $0x768] sm:$0xff]  ;;  %v4052_v15 = vld [vmem:[#allocation5 + $0x778] sm:$0xff] }
 0xc06   :  { %7029 = vmatpush1.bf16.msra.mxu0 %v7028_v22  ;;  %v4014_v22 = vld [vmem:[#allocation5 + $0x648] sm:$0xff] }
 0xc07   :  { %7031 = vmatprep.subr.bf16.mxu0 %v7030_v23  ;;  %v4016_v23 = vld [vmem:[#allocation5 + $0x658] sm:$0xff] }
 0xc08   :  { %v7070_v25 = vpack.c.bf16 %v4016_v23, %v4014_v22  ;;  %v4054_v22 = vld [vmem:[#allocation5 + $0x788] sm:$0xff]  ;;  %v4056_v23 = vld [vmem:[#allocation5 + $0x798] sm:$0xff] }
 0xc0a   :  { %7033 = vmatpush1.bf16.msra.mxu0 %v7032_v28  ;;  %v4018_v28 = vld [vmem:[#allocation5 + $0x668] sm:$0xff] }
 0xc0b   :  { %7035 = vmatprep.subr.bf16.mxu0 %v7034_v29  ;;  %v4020_v29 = vld [vmem:[#allocation5 + $0x678] sm:$0xff] }
 0xc0c   :  { %v7074_v32 = vpack.c.bf16 %v4020_v29, %v4018_v28  ;;  %v4058_v28 = vld [vmem:[#allocation5 + $0x7a8] sm:$0xff]  ;;  %v4060_v29 = vld [vmem:[#allocation5 + $0x7b8] sm:$0xff] }
 0xc0e   :  { %7037 = vmatpush1.bf16.msra.mxu0 %v7036_v36  ;;  %v4022_v36 = vld [vmem:[#allocation5 + $0x688] sm:$0xff] }
 0xc0f   :  { %7039 = vmatprep.subr.bf16.mxu0 %v7038_v37  ;;  %v4024_v37 = vld [vmem:[#allocation5 + $0x698] sm:$0xff] }
 0xc10   :  { %v7078_v39 = vpack.c.bf16 %v4024_v37, %v4022_v36  ;;  %v4062_v36 = vld [vmem:[#allocation5 + $0x7c8] sm:$0xff]  ;;  %v4064_v37 = vld [vmem:[#allocation5 + $0x7d8] sm:$0xff] }
 0xc12   :  { %7041 = vmatpush1.bf16.msra.mxu0 %v7040_v45 }
 0xc13   :  { %7043 = vmatprep.subr.bf16.mxu0 %v7042_v47  ;;  %v7082_v47 = vpack.c.bf16 %v4028_v44, %v4026_v42  ;;  %v4066_v42 = vld [vmem:[#allocation5 + $0x7e8] sm:$0xff]  ;;  %v4068_v44 = vld [vmem:[#allocation5 + $0x7f8] sm:$0xff] }
 0xc16   :  { %7045 = vmatpush1.bf16.msra.mxu0 %v7044_v51  ;;  %v7084_v51 = vpack.c.bf16 %v4027_v48, %v4025_v46  ;;  %v4065_v46 = vld [vmem:[#allocation5 + $0x7e0] sm:$0xff]  ;;  %v4067_v48 = vld [vmem:[#allocation5 + $0x7f0] sm:$0xff] }
 0xc17   :  { %7047 = vmatprep.subr.bf16.mxu0 %v7046_v52  ;;  %v7086_v52 = vpack.c.bf16 %v4032_v50, %v4030_v49  ;;  %v7124_v49 = vpack.c.bf16 %v4067_v48, %v4065_v46  ;;  %v4142_v50 = vld [vmem:[%s10145_s19] sm:$0x3]  ;;  %v4164_v48 = vld [vmem:[%s10146_s20 + $0x30] sm:$0xff] }
 0xc1a   :  { %7049 = vmatpush1.bf16.msra.mxu0 %v7048_v57  ;;  %v7088_v57 = vpack.c.bf16 %v4031_v55, %v4029_v40 }
 0xc1b   :  { %7051 = vmatprep.subr.bf16.mxu0 %v7050_v58  ;;  %v7090_v58 = vpack.c.bf16 %v4036_v56, %v4034_v53  ;;  %v4369_v56 = vld [vmem:[#allocation7 + $0x208] sm:$0xff] }
 0xc1e   :  { %7053 = vmatpush1.bf16.msra.mxu0 %v7052_v62  ;;  %v7092_v62 = vpack.c.bf16 %v4035_v60, %v4033_v59  ;;  %v4368_v59 = vld [vmem:[#allocation7 + $0x200] sm:$0xff]  ;;  %v4370_v60 = vld [vmem:[#allocation7 + $0x210] sm:$0xff] }
 0xc1f   :  { %7055 = vmatprep.subr.bf16.mxu0 %v7054_v9  ;;  %v7094_v9 = vpack.c.bf16 %v4040_v61, %v4038_v54  ;;  %v4373_v54 = vld [vmem:[#allocation7 + $0x228] sm:$0xff] }
 0xc22   :  { %7057 = vmatpush1.bf16.msra.mxu0 %v7056_v4  ;;  %v7096_v4 = vpack.c.bf16 %v4039_v1, %v4037_v63  ;;  %v4158_v63 = vld [vmem:[%s10146_s20] sm:$0xff]  ;;  %v7128_v1 = vpack.c.bf16 %v4370_v60, %v4368_v59  ;;  %v4405_v59 = vld [vmem:[#allocation7 + $0x328] sm:$0xff]  ;;  %v4407_v60 = vld [vmem:[#allocation7 + $0x338] sm:$0xff] }
 0xc23   :  { %7059 = vmatprep.subr.bf16.mxu0 %v7058_v6  ;;  %v7098_v6 = vpack.c.bf16 %v4044_v3, %v4042_v2  ;;  %v4372_v3 = vld [vmem:[#allocation7 + $0x220] sm:$0xff] }
 0xc26   :  { %7061 = vmatpush1.bf16.msra.mxu0 %v7060_v12  ;;  %v7100_v12 = vpack.c.bf16 %v4043_v8, %v4041_v7  ;;  %v4379_v7 = vld [vmem:[#allocation7 + $0x258] sm:$0xff]  ;;  %v4159_v8 = vld [vmem:[%s10146_s20 + $0x8] sm:$0xff] }
 0xc27   :  { %7063 = vmatprep.subr.bf16.mxu0 %v7062_v13  ;;  %v7102_v13 = vpack.c.bf16 %v4048_v11, %v4046_v10 }
 0xc29   :  { %3996 = vmatmul.mubr.f32.vlgmr.msra.gmra.mrb[46].mxu0 %v9494_v5  ;;  %v7076_v5 = vpack.c.bf16 %v4019_v35, %v4017_v33  ;;  %v4057_v33 = vld [vmem:[#allocation5 + $0x7a0] sm:$0xff]  ;;  %v4059_v35 = vld [vmem:[#allocation5 + $0x7b0] sm:$0xff] }
 0xc2a   :  { %7065 = vmatpush1.bf16.msra.mxu0 %v7064_v16  ;;  %4133 = vmatprep.mubr.f32.mxu0 %v9500_v43  ;;  %v4023_v43 = vld [vmem:[#allocation5 + $0x690] sm:$0xff]  ;;  %v7104_v16 = vpack.c.bf16 %v4047_v30, %v4045_v14  ;;  %v4381_v14 = vld [vmem:[#allocation7 + $0x268] sm:$0xff]  ;;  %v4383_v30 = vld [vmem:[#allocation7 + $0x278] sm:$0xff] }
 0xc2b   :  { %7067 = vmatprep.subr.bf16.mxu0 %v7066_v17  ;;  %v7080_v45 = vpack.c.bf16 %v4023_v43, %v4021_v41  ;;  %v7106_v17 = vpack.c.bf16 %v4052_v15, %v4050_v34  ;;  %v4061_v41 = vld [vmem:[#allocation5 + $0x7c0] sm:$0xff]  ;;  %v4063_v43 = vld [vmem:[#allocation5 + $0x7d0] sm:$0xff] }
 0xc2c   :  { %v4160_v34 = vld [vmem:[%s10146_s20 + $0x10] sm:$0xff] }
 0xc2e   :  { %7069 = vmatpush1.bf16.msra.mxu0 %v7068_v24  ;;  %v7108_v24 = vpack.c.bf16 %v4051_v21, %v4049_v19  ;;  %v4382_v19 = vld [vmem:[#allocation7 + $0x270] sm:$0xff]  ;;  %v4385_v21 = vld [vmem:[#allocation7 + $0x288] sm:$0xff] }
 0xc2f   :  { %7071 = vmatprep.subr.bf16.mxu0 %v7070_v25  ;;  %v7110_v25 = vpack.c.bf16 %v4056_v23, %v4054_v22  ;;  %v4387_v22 = vld [vmem:[#allocation7 + $0x298] sm:$0xff] }
 0xc30   :  { %v4161_v23 = vld [vmem:[%s10146_s20 + $0x18] sm:$0xff] }
 0xc32   :  { %7073 = vmatpush1.bf16.msra.mxu0 %v7072_v31  ;;  %v7112_v31 = vpack.c.bf16 %v4055_v27, %v4053_v26  ;;  %v4384_v26 = vld [vmem:[#allocation7 + $0x280] sm:$0xff]  ;;  %v4386_v27 = vld [vmem:[#allocation7 + $0x290] sm:$0xff] }
 0xc33   :  { %7075 = vmatprep.subr.bf16.mxu0 %v7074_v32  ;;  %v7114_v32 = vpack.c.bf16 %v4060_v29, %v4058_v28  ;;  %v4389_v28 = vld [vmem:[#allocation7 + $0x2a8] sm:$0xff]  ;;  %v4391_v29 = vld [vmem:[#allocation7 + $0x2b8] sm:$0xff] }
 0xc36   :  { %7077 = vmatpush1.bf16.msra.mxu0 %v7076_v5  ;;  %v7116_v5 = vpack.c.bf16 %v4059_v35, %v4057_v33  ;;  %v7146_v33 = vpack.c.bf16 %v4391_v29, %v4389_v28  ;;  %v4388_v35 = vld [vmem:[#allocation7 + $0x2a0] sm:$0xff] }
 0xc37   :  { %7079 = vmatprep.subr.bf16.mxu0 %v7078_v39  ;;  %v7118_v39 = vpack.c.bf16 %v4064_v37, %v4062_v36  ;;  %v4390_v36 = vld [vmem:[#allocation7 + $0x2b0] sm:$0xff]  ;;  %v4393_v37 = vld [vmem:[#allocation7 + $0x2c8] sm:$0xff]  ;;  %v4424_v29 = vld [vmem:[#allocation7 + $0x3c0] sm:$0xff] }
 0xc3a   :  { %7081 = vmatpush1.bf16.msra.mxu0 %v7080_v45  ;;  %v7120_v45 = vpack.c.bf16 %v4063_v43, %v4061_v41  ;;  %v4163_v41 = vld [vmem:[%s10146_s20 + $0x28] sm:$0xff] }
 0xc3b   :  { %7083 = vmatprep.subr.bf16.mxu0 %v7082_v47  ;;  %v7122_v47 = vpack.c.bf16 %v4068_v44, %v4066_v42  ;;  %v4392_v42 = vld [vmem:[#allocation7 + $0x2c0] sm:$0xff]  ;;  %v4394_v44 = vld [vmem:[#allocation7 + $0x2d0] sm:$0xff] }
 0xc3c   :  { %v7152_v46 = vpack.c.bf16 %v4394_v44, %v4392_v42 }
 0xc3e   :  { %7085 = vmatpush1.bf16.msra.mxu0 %v7084_v51  ;;  %v4147_v51 = vrot.slane %v4142_v50, %v8531_v18 }
 0xc3f   :  { %7087 = vmatprep.subr.bf16.mxu0 %v7086_v52  ;;  %v4151_v52 = vrot.slane %v4142_v50, %v8536_v20  ;;  %v4396_v50 = vld [vmem:[#allocation7 + $0x2e0] sm:$0xff] }
 0xc42   :  { %7089 = vmatpush1.bf16.msra.mxu0 %v7088_v57  ;;  %v4371_v57 = vld [vmem:[#allocation7 + $0x218] sm:$0xff] }
 0xc43   :  { %7091 = vmatprep.subr.bf16.mxu0 %v7090_v58 }
 0xc46   :  { %7093 = vmatpush1.bf16.msra.mxu0 %v7092_v62  ;;  %v7126_v62 = vpack.c.bf16 %v4371_v57, %v4369_v56  ;;  %v4400_v57 = vld [vmem:[#allocation7 + $0x300] sm:$0xff] }
 0xc47   :  { %7095 = vmatprep.subr.bf16.mxu0 %v7094_v9 }
 0xc4a   :  { %7097 = vmatpush1.bf16.msra.mxu0 %v7096_v4  ;;  %v4374_v4 = vld [vmem:[#allocation7 + $0x230] sm:$0xff] }
 0xc4b   :  { %7099 = vmatprep.subr.bf16.mxu0 %v7098_v6  ;;  %v4377_v6 = vld [vmem:[#allocation7 + $0x248] sm:$0xff]  ;;  %v7132_v10 = vpack.c.bf16 %v4374_v4, %v4372_v3  ;;  %v4408_v3 = vld [vmem:[#allocation7 + $0x340] sm:$0xff]  ;;  %v4410_v4 = vld [vmem:[#allocation7 + $0x350] sm:$0xff] }
 0xc4c   :  { %v7134_v11 = vpack.c.bf16 %v4379_v7, %v4377_v6  ;;  %v4413_v6 = vld [vmem:[#allocation7 + $0x368] sm:$0xff]  ;;  %v4415_v7 = vld [vmem:[#allocation7 + $0x378] sm:$0xff] }
 0xc4e   :  { %7101 = vmatpush1.bf16.msra.mxu0 %v7100_v12  ;;  %v4376_v12 = vld [vmem:[#allocation7 + $0x240] sm:$0xff] }
 0xc4f   :  { %7103 = vmatprep.subr.bf16.mxu0 %v7102_v13  ;;  %v4378_v13 = vld [vmem:[#allocation7 + $0x250] sm:$0xff] }
 0xc50   :  { %v7136_v15 = vpack.c.bf16 %v4378_v13, %v4376_v12  ;;  %v4414_v12 = vld [vmem:[#allocation7 + $0x370] sm:$0xff]  ;;  %v4417_v13 = vld [vmem:[#allocation7 + $0x388] sm:$0xff] }
 0xc52   :  { %7105 = vmatpush1.bf16.msra.mxu0 %v7104_v16  ;;  %v7138_v16 = vpack.c.bf16 %v4383_v30, %v4381_v14  ;;  %v4419_v14 = vld [vmem:[#allocation7 + $0x398] sm:$0xff] }
 0xc53   :  { %7107 = vmatprep.subr.bf16.mxu0 %v7106_v17  ;;  %v4380_v17 = vld [vmem:[#allocation7 + $0x260] sm:$0xff] }
 0xc56   :  { %7109 = vmatpush1.bf16.msra.mxu0 %v7108_v24  ;;  %v7140_v24 = vpack.c.bf16 %v4382_v19, %v4380_v17  ;;  %v4421_v17 = vld [vmem:[#allocation7 + $0x3a8] sm:$0xff]  ;;  %v4423_v19 = vld [vmem:[#allocation7 + $0x3b8] sm:$0xff] }
 0xc57   :  { %7111 = vmatprep.subr.bf16.mxu0 %v7110_v25  ;;  %v7142_v25 = vpack.c.bf16 %v4387_v22, %v4385_v21  ;;  %v7178_v22 = vpack.c.bf16 %v4423_v19, %v4421_v17  ;;  %v4323_v19 = vld [vmem:[#allocation7 + $0xa0] sm:$0xff] }
 0xc5a   :  { %7113 = vmatpush1.bf16.msra.mxu0 %v7112_v31  ;;  %v4162_v31 = vld [vmem:[%s10146_s20 + $0x20] sm:$0xff] }
 0xc5b   :  { %7115 = vmatprep.subr.bf16.mxu0 %v7114_v32  ;;  %v7144_v32 = vpack.c.bf16 %v4386_v27, %v4384_v26  ;;  %v4427_v26 = vld [vmem:[#allocation7 + $0x3d8] sm:$0xff] }
 0xc5e   :  { %7117 = vmatpush1.bf16.msra.mxu0 %v7116_v5  ;;  %v4395_v5 = vld [vmem:[#allocation7 + $0x2d8] sm:$0xff] }
 0xc5f   :  { %7119 = vmatprep.subr.bf16.mxu0 %v7118_v39  ;;  %v7148_v39 = vpack.c.bf16 %v4390_v36, %v4388_v35  ;;  %v7150_v43 = vpack.c.bf16 %v4395_v5, %v4393_v37  ;;  %v4431_v35 = vld [vmem:[#allocation7 + $0x3f8] sm:$0xff]  ;;  %v4428_v37 = vld [vmem:[#allocation7 + $0x3e0] sm:$0xff]  ;;  %v4430_v5 = vld [vmem:[#allocation7 + $0x3f0] sm:$0xff] }
 0xc62   :  { %7121 = vmatpush1.bf16.msra.mxu0 %v7120_v45  ;;  %v4397_v45 = vld [vmem:[#allocation7 + $0x2e8] sm:$0xff] }
 0xc63   :  { %7123 = vmatprep.subr.bf16.mxu0 %v7122_v47  ;;  %v4399_v47 = vld [vmem:[#allocation7 + $0x2f8] sm:$0xff] }
 0xc66   :  { %7125 = vmatpush1.bf16.msra.mxu0 %v7124_v49  ;;  %v7154_v49 = vpack.c.bf16 %v4399_v47, %v4397_v45 }
 0xc69   :  { %4134 = vmatmul.mubr.f32.vlgmr.msra.gmra.mrb[46].mxu0 %v9498_v38  ;;  %v4375_v38 = vld [vmem:[#allocation7 + $0x238] sm:$0xff] }
 0xc6a   :  { %5026 = vmatprep.mubr.f32.mxu0 %v7717_v0  ;;  %v7130_v2 = vpack.c.bf16 %v4375_v38, %v4373_v54  ;;  %v7162_v38 = vpack.c.bf16 %v4407_v60, %v4405_v59  ;;  %v4314_v59 = vld [vmem:[#allocation7 + $0x58] sm:$0xff] }
 0xd3c   :  { %v4135_v40 = vpop.f32.mrb[46].mxu0 }
 0xd3d   :  { %v4154_v55 = vadd.f32 %v4147_v51, %v4135_v40  ;;  %v4137_v53 = vpop.f32.mrb[47].mxu0  ;;  %v4398_v51 = vld [vmem:[#allocation7 + $0x2f0] sm:$0xff]  ;;  %v4403_v40 = vld [vmem:[#allocation7 + $0x318] sm:$0xff] }
 0xd3e   :  { %v4155_v58 = vadd.f32 %v4151_v52, %v4137_v53  ;;  %v4401_v52 = vld [vmem:[#allocation7 + $0x308] sm:$0xff]  ;;  %v4165_v53 = vld [vmem:[%s10146_s20 + $0x38] sm:$0xff]  ;;  %s5662_s20 = sshll.u32 %s7719_s7, 4  ;;  %s5663_s20 = int_to_ptr.vmem [resolvable:$true] %s5662_s20 }
 0xd3f   :  { %v4156_v9 = vmax.f32 %v4154_v55, 0.0  ;;  %v7156_v55 = vpack.c.bf16 %v4398_v51, %v4396_v50  ;;  %v7158_v56 = vpack.c.bf16 %v4403_v40, %v4401_v52  ;;  %v4308_v50 = vld [vmem:[#allocation7 + $0x28] sm:$0xff]  ;;  %v4310_v51 = vld [vmem:[#allocation7 + $0x38] sm:$0xff] }
 0xd40   :  { %v4157_v61 = vmax.f32 %v4155_v58, 0.0  ;;  %v4402_v58 = vld [vmem:[#allocation7 + $0x310] sm:$0xff] }
 0xd41   :  { %v7160_v54 = vpack.c.bf16 %v4402_v58, %v4400_v57  ;;  %v4309_v57 = vld [vmem:[#allocation7 + $0x30] sm:$0xff]  ;;  %v4312_v58 = vld [vmem:[#allocation7 + $0x48] sm:$0xff] }
 0xd42   :  { %4190 = vmatprep.subr.mxu1 %v4157_v61  ;;  %v4404_v61 = vld [vmem:[#allocation7 + $0x320] sm:$0xff] }
 0xd43   :  { %4191 = vmatpush1.msra.mxu1 %v4156_v9  ;;  %v4409_v9 = vld [vmem:[#allocation7 + $0x348] sm:$0xff] }
 0xd44   :  { %5817 = vmatmul.mubr.msk.f32.vlgmr.msra.gmra.mrb[38].mxu1 %vm2353_vm3, %v4158_v63  ;;  %7127 = vmatprep.subr.bf16.mxu1 %v7126_v62  ;;  %v4406_v62 = vld [vmem:[#allocation7 + $0x330] sm:$0xff]  ;;  %v4411_v63 = vld [vmem:[#allocation7 + $0x358] sm:$0xff] }
 0xd45   :  { %4260 = vmatprep.mubr.f32.mxu1 %v7717_v0  ;;  %7129 = vmatpush1.bf16.msra.mxu1 %v7128_v1  ;;  %v7164_v1 = vpack.c.bf16 %v4406_v62, %v4404_v61  ;;  %v7198_v61 = vpack.c.bf16 %v4314_v59, %v4312_v58  ;;  %v4311_v62 = vld [vmem:[#allocation7 + $0x40] sm:$0xff]  ;;  %v4348_v58 = vld [vmem:[#allocation7 + $0x168] sm:$0xff]  ;;  %v4350_v59 = vld [vmem:[#allocation7 + $0x178] sm:$0xff] }
 0xd46   :  { %7131 = vmatprep.subr.bf16.mxu1 %v7130_v2  ;;  %v7166_v2 = vpack.c.bf16 %v4411_v63, %v4409_v9  ;;  %v4313_v9 = vld [vmem:[#allocation7 + $0x50] sm:$0xff]  ;;  %v4316_v63 = vld [vmem:[#allocation7 + $0x68] sm:$0xff] }
 0xd48   :  { %5818 = vmatmul.mubr.msk.f32.gmra.mrb[40].mxu1 %vm2353_vm3, %v4159_v8  ;;  %v7168_v8 = vpack.c.bf16 %v4410_v4, %v4408_v3 }
 0xd49   :  { %4266 = vmatprep.mubr.f32.mxu1 %v7717_v0  ;;  %7133 = vmatpush1.bf16.msra.mxu1 %v7132_v10  ;;  %v7170_v10 = vpack.c.bf16 %v4415_v7, %v4413_v6  ;;  %v4315_v6 = vld [vmem:[#allocation7 + $0x60] sm:$0xff]  ;;  %v4317_v7 = vld [vmem:[#allocation7 + $0x70] sm:$0xff] }
 0xd4a   :  { %7135 = vmatprep.subr.bf16.mxu1 %v7134_v11  ;;  %v4412_v11 = vld [vmem:[#allocation7 + $0x360] sm:$0xff] }
 0xd4b   :  { %v7172_v30 = vpack.c.bf16 %v4414_v12, %v4412_v11  ;;  %v4322_v11 = vld [vmem:[#allocation7 + $0x98] sm:$0xff]  ;;  %v7204_v12 = vpack.c.bf16 %v4317_v7, %v4315_v6  ;;  %v4356_v6 = vld [vmem:[#allocation7 + $0x1a8] sm:$0xff] }
 0xd4c   :  { %5819 = vmatmul.mubr.msk.f32.gmra.mrb[42].mxu1 %vm2353_vm3, %v4160_v34  ;;  %v7174_v34 = vpack.c.bf16 %v4419_v14, %v4417_v13  ;;  %v4319_v14 = vld [vmem:[#allocation7 + $0x80] sm:$0xff]  ;;  %v4358_v7 = vld [vmem:[#allocation7 + $0x1b8] sm:$0xff] }
 0xd4d   :  { %4272 = vmatprep.mubr.f32.mxu1 %v7717_v0  ;;  %7137 = vmatpush1.bf16.msra.mxu1 %v7136_v15  ;;  %v4416_v15 = vld [vmem:[#allocation7 + $0x380] sm:$0xff] }
 0xd4e   :  { %7139 = vmatprep.subr.bf16.mxu1 %v7138_v16  ;;  %v4418_v16 = vld [vmem:[#allocation7 + $0x390] sm:$0xff] }
 0xd4f   :  { %v7176_v21 = vpack.c.bf16 %v4418_v16, %v4416_v15  ;;  %v4326_v15 = vld [vmem:[#allocation7 + $0xb8] sm:$0xff] }
 0xd50   :  { %5820 = vmatmul.mubr.msk.f32.gmra.mrb[44].mxu1 %vm2353_vm3, %v4161_v23  ;;  %v4420_v23 = vld [vmem:[#allocation7 + $0x3a0] sm:$0xff] }
 0xd51   :  { %4278 = vmatprep.mubr.f32.mxu1 %v7717_v0  ;;  %7141 = vmatpush1.bf16.msra.mxu1 %v7140_v24  ;;  %v4422_v24 = vld [vmem:[#allocation7 + $0x3b0] sm:$0xff] }
 0xd52   :  { %7143 = vmatprep.subr.bf16.mxu1 %v7142_v25  ;;  %v4425_v25 = vld [vmem:[#allocation7 + $0x3c8] sm:$0xff]  ;;  %v7180_v27 = vpack.c.bf16 %v4422_v24, %v4420_v23  ;;  %v4330_v23 = vld [vmem:[#allocation7 + $0xd8] sm:$0xff] }
 0xd53   :  { %v7182_v28 = vpack.c.bf16 %v4427_v26, %v4425_v25  ;;  %v4327_v26 = vld [vmem:[#allocation7 + $0xc0] sm:$0xff] }
 0xd54   :  { %5821 = vmatmul.mubr.msk.f32.gmra.mrb[46].mxu1 %vm2353_vm3, %v4162_v31  ;;  %v4426_v31 = vld [vmem:[#allocation7 + $0x3d0] sm:$0xff] }
 0xd55   :  { %7145 = vmatpush1.bf16.msra.mxu1 %v7144_v32  ;;  %4284 = vmatprep.mubr.f32.mxu1 %v7717_v0  ;;  %v7184_v32 = vpack.c.bf16 %v4426_v31, %v4424_v29  ;;  %v4334_v29 = vld [vmem:[#allocation7 + $0xf8] sm:$0xff] }
 0xd56   :  { %7147 = vmatprep.subr.bf16.mxu1 %v7146_v33  ;;  %v4429_v33 = vld [vmem:[#allocation7 + $0x3e8] sm:$0xff] }
 0xd57   :  { %v7186_v36 = vpack.c.bf16 %v4431_v35, %v4429_v33  ;;  %v4331_v33 = vld [vmem:[#allocation7 + $0xe0] sm:$0xff]  ;;  %v4333_v35 = vld [vmem:[#allocation7 + $0xf0] sm:$0xff] }
 0xd58   :  { %5822 = vmatmul.mubr.msk.f32.gmra.mrb[48].mxu1 %vm2353_vm3, %v4163_v41  ;;  %v4304_v41 = vld [vmem:[#allocation7 + $0x8] sm:$0xff] }
 0xd59   :  { %7149 = vmatpush1.bf16.msra.mxu1 %v7148_v39  ;;  %4290 = vmatprep.mubr.f32.mxu1 %v7717_v0  ;;  %v7188_v39 = vpack.c.bf16 %v4430_v5, %v4428_v37  ;;  %v4338_v37 = vld [vmem:[#allocation7 + $0x118] sm:$0xff]  ;;  %v7220_v5 = vpack.c.bf16 %v4333_v35, %v4331_v33  ;;  %v4587_v33 = vld [vmem:[#allocation7 + $0x400] sm:$0xff]  ;;  %v4589_v35 = vld [vmem:[#allocation7 + $0x410] sm:$0xff] }
 0xd5a   :  { %7151 = vmatprep.subr.bf16.mxu1 %v7150_v43  ;;  %v4306_v43 = vld [vmem:[#allocation7 + $0x18] sm:$0xff] }
 0xd5b   :  { %v7190_v42 = vpack.c.bf16 %v4306_v43, %v4304_v41  ;;  %v4335_v41 = vld [vmem:[#allocation7 + $0x100] sm:$0xff]  ;;  %v4337_v43 = vld [vmem:[#allocation7 + $0x110] sm:$0xff] }
 0xd5c   :  { %5823 = vmatmul.mubr.msk.f32.gmra.mrb[50].mxu1 %vm2353_vm3, %v4164_v48  ;;  %v4303_v48 = vld [vmem:[#allocation7] sm:$0xff] }
 0xd5d   :  { %7153 = vmatpush1.bf16.msra.mxu1 %v7152_v46  ;;  %4296 = vmatprep.mubr.f32.mxu1 %v7717_v0 }
 0xd5e   :  { %7155 = vmatprep.subr.bf16.mxu1 %v7154_v49  ;;  %v4305_v49 = vld [vmem:[#allocation7 + $0x10] sm:$0xff] }
 0xd5f   :  { %v7192_v40 = vpack.c.bf16 %v4305_v49, %v4303_v48  ;;  %v7224_v48 = vpack.c.bf16 %v4337_v43, %v4335_v41 }
 0xd60   :  { %5824 = vmatmul.mubr.msk.f32.gmra.mrb[52].mxu1 %vm2353_vm3, %v4165_v53  ;;  %v7194_v53 = vpack.c.bf16 %v4310_v51, %v4308_v50  ;;  %v4339_v50 = vld [vmem:[#allocation7 + $0x120] sm:$0xff]  ;;  %v4341_v51 = vld [vmem:[#allocation7 + $0x130] sm:$0xff] }
 0xd61   :  { %7157 = vmatpush1.bf16.msra.mxu1 %v7156_v55 }
 0xd62   :  { %7159 = vmatprep.subr.bf16.mxu1 %v7158_v56  ;;  %v4307_v56 = vld [vmem:[#allocation7 + $0x20] sm:$0xff] }
 0xd65   :  { %7161 = vmatpush1.bf16.msra.mxu1 %v7160_v54  ;;  %v7196_v54 = vpack.c.bf16 %v4309_v57, %v4307_v56  ;;  %v4343_v56 = vld [vmem:[#allocation7 + $0x140] sm:$0xff]  ;;  %v4345_v57 = vld [vmem:[#allocation7 + $0x150] sm:$0xff] }
 0xd66   :  { %7163 = vmatprep.subr.bf16.mxu1 %v7162_v38 }
 0xd69   :  { %7165 = vmatpush1.bf16.msra.mxu1 %v7164_v1  ;;  %v4318_v1 = vld [vmem:[#allocation7 + $0x78] sm:$0xff] }
 0xd6a   :  { %7167 = vmatprep.subr.bf16.mxu1 %v7166_v2  ;;  %v7200_v2 = vpack.c.bf16 %v4313_v9, %v4311_v62  ;;  %v7202_v4 = vpack.c.bf16 %v4318_v1, %v4316_v63  ;;  %v4352_v62 = vld [vmem:[#allocation7 + $0x188] sm:$0xff]  ;;  %v4354_v9 = vld [vmem:[#allocation7 + $0x198] sm:$0xff] }
 0xd6b   :  { %v7238_v1 = vpack.c.bf16 %v4354_v9, %v4352_v62  ;;  %v4603_v62 = vld [vmem:[#allocation7 + $0x480] sm:$0xff]  ;;  %v4605_v9 = vld [vmem:[#allocation7 + $0x490] sm:$0xff] }
 0xd6d   :  { %7169 = vmatpush1.bf16.msra.mxu1 %v7168_v8 }
 0xd6e   :  { %7171 = vmatprep.subr.bf16.mxu1 %v7170_v10  ;;  %v4320_v10 = vld [vmem:[#allocation7 + $0x88] sm:$0xff] }
 0xd6f   :  { %v7206_v13 = vpack.c.bf16 %v4322_v11, %v4320_v10  ;;  %v7242_v11 = vpack.c.bf16 %v4358_v7, %v4356_v6  ;;  %v4612_v6 = vld [vmem:[#allocation7 + $0x4c8] sm:$0xff]  ;;  %v4614_v7 = vld [vmem:[#allocation7 + $0x4d8] sm:$0xff] }
 0xd71   :  { %7173 = vmatpush1.bf16.msra.mxu1 %v7172_v30  ;;  %v4321_v30 = vld [vmem:[#allocation7 + $0x90] sm:$0xff] }
 0xd72   :  { %7175 = vmatprep.subr.bf16.mxu1 %v7174_v34  ;;  %v4324_v34 = vld [vmem:[#allocation7 + $0xa8] sm:$0xff]  ;;  %v7208_v16 = vpack.c.bf16 %v4321_v30, %v4319_v14  ;;  %v4362_v30 = vld [vmem:[#allocation7 + $0x1d8] sm:$0xff] }
 0xd73   :  { %v7210_v17 = vpack.c.bf16 %v4326_v15, %v4324_v34  ;;  %v4360_v14 = vld [vmem:[#allocation7 + $0x1c8] sm:$0xff] }
 0xd74   :  { %v7246_v15 = vpack.c.bf16 %v4362_v30, %v4360_v14  ;;  %v4616_v14 = vld [vmem:[#allocation7 + $0x4e8] sm:$0xff]  ;;  %v4618_v30 = vld [vmem:[#allocation7 + $0x4f8] sm:$0xff] }
 0xd75   :  { %7177 = vmatpush1.bf16.msra.mxu1 %v7176_v21  ;;  %v4325_v21 = vld [vmem:[#allocation7 + $0xb0] sm:$0xff] }
 0xd76   :  { %7179 = vmatprep.subr.bf16.mxu1 %v7178_v22  ;;  %v4328_v22 = vld [vmem:[#allocation7 + $0xc8] sm:$0xff]  ;;  %v7212_v24 = vpack.c.bf16 %v4325_v21, %v4323_v19  ;;  %v4366_v21 = vld [vmem:[#allocation7 + $0x1f8] sm:$0xff] }
 0xd77   :  { %v7214_v25 = vpack.c.bf16 %v4330_v23, %v4328_v22  ;;  %v4364_v19 = vld [vmem:[#allocation7 + $0x1e8] sm:$0xff] }
 0xd78   :  { %v7250_v23 = vpack.c.bf16 %v4366_v21, %v4364_v19  ;;  %v4620_v19 = vld [vmem:[#allocation7 + $0x508] sm:$0xff]  ;;  %v4622_v21 = vld [vmem:[#allocation7 + $0x518] sm:$0xff] }
 0xd79   :  { %7181 = vmatpush1.bf16.msra.mxu1 %v7180_v27  ;;  %v4329_v27 = vld [vmem:[#allocation7 + $0xd0] sm:$0xff] }
 0xd7a   :  { %7183 = vmatprep.subr.bf16.mxu1 %v7182_v28  ;;  %v4332_v28 = vld [vmem:[#allocation7 + $0xe8] sm:$0xff]  ;;  %v7216_v31 = vpack.c.bf16 %v4329_v27, %v4327_v26 }
 0xd7b   :  { %v4588_v27 = vld [vmem:[#allocation7 + $0x408] sm:$0xff] }
 0xd7d   :  { %7185 = vmatpush1.bf16.msra.mxu1 %v7184_v32  ;;  %v7218_v32 = vpack.c.bf16 %v4334_v29, %v4332_v28  ;;  %v4590_v28 = vld [vmem:[#allocation7 + $0x418] sm:$0xff] }
 0xd7e   :  { %7187 = vmatprep.subr.bf16.mxu1 %v7186_v36  ;;  %v4336_v36 = vld [vmem:[#allocation7 + $0x108] sm:$0xff] }
 0xd81   :  { %7189 = vmatpush1.bf16.msra.mxu1 %v7188_v39  ;;  %v7222_v39 = vpack.c.bf16 %v4338_v37, %v4336_v36  ;;  %v4592_v37 = vld [vmem:[#allocation7 + $0x428] sm:$0xff] }
 0xd82   :  { %7191 = vmatprep.subr.bf16.mxu1 %v7190_v42  ;;  %v4340_v42 = vld [vmem:[#allocation7 + $0x128] sm:$0xff] }
 0xe17   :  { %v9552_v44 = vpop.f32.mrb[38].mxu1 }
 0xe18   :  { %v4258_v45 = vpop.f32.mrb[39].mxu1 }
 0xe1b   :  { %v9554_v47 = vpop.f32.mrb[40].mxu1 }
 0xe1c   :  { %v9556_v46 = vpop.f32.mrb[41].mxu1 }
 0xe1f   :  { %v4268_v52 = vpop.f32.mrb[42].mxu1 }
 0xe20   :  { %v4270_v55 = vpop.f32.mrb[43].mxu1 }
 0xe21   :  { %4496 = vmatprep.mubr.f32.mxu1 %v4270_v55  ;;  %v7228_v55 = vpack.c.bf16 %v4341_v51, %v4339_v50 }
 0xe22   :  { %4497 = vmatmul.mubr.f32.vlgmr.msra.gmra.mrb[54].mxu1 %v4268_v52  ;;  %v4344_v52 = vld [vmem:[#allocation7 + $0x148] sm:$0xff] }
 0xe23   :  { %7193 = vmatpush1.bf16.msra.mxu1 %v7192_v40  ;;  %v4274_v60 = vpop.f32.mrb[44].mxu1  ;;  %v4346_v40 = vld [vmem:[#allocation7 + $0x158] sm:$0xff] }
 0xe24   :  { %v4276_v38 = vpop.f32.mrb[45].mxu1  ;;  %7195 = vmatprep.subr.bf16.mxu1 %v7194_v53  ;;  %v7230_v53 = vpack.c.bf16 %v4346_v40, %v4344_v52 }
 0xe25   :  { %4502 = vmatprep.mubr.f32.mxu1 %v4276_v38  ;;  %v4347_v38 = vld [vmem:[#allocation7 + $0x160] sm:$0xff] }
 0xe26   :  { %4503 = vmatmul.mubr.f32.gmra.mrb[56].mxu1 %v4274_v60  ;;  %v7232_v60 = vpack.c.bf16 %v4345_v57, %v4343_v56  ;;  %v4600_v56 = vld [vmem:[#allocation7 + $0x468] sm:$0xff]  ;;  %v4602_v57 = vld [vmem:[#allocation7 + $0x478] sm:$0xff] }
 0xe27   :  { %7197 = vmatpush1.bf16.msra.mxu1 %v7196_v54  ;;  %4573 = vmatprep.mubr.f32.mxu1 %v4258_v45  ;;  %v9558_v3 = vpop.f32.mrb[46].mxu1  ;;  %v4342_v45 = vld [vmem:[#allocation7 + $0x138] sm:$0xff]  ;;  %v7234_v54 = vpack.c.bf16 %v4350_v59, %v4348_v58  ;;  %v4599_v59 = vld [vmem:[#allocation7 + $0x460] sm:$0xff] }
 0xe28   :  { %7199 = vmatprep.subr.bf16.mxu1 %v7198_v61  ;;  %v9560_v8 = vpop.f32.mrb[47].mxu1  ;;  %v7226_v49 = vpack.c.bf16 %v4342_v45, %v4340_v42  ;;  %v4349_v61 = vld [vmem:[#allocation7 + $0x170] sm:$0xff]  ;;  %v4591_v42 = vld [vmem:[#allocation7 + $0x420] sm:$0xff] }
 0xe29   :  { %v7236_v63 = vpack.c.bf16 %v4349_v61, %v4347_v38  ;;  %v4593_v45 = vld [vmem:[#allocation7 + $0x430] sm:$0xff] }
 0xe2a   :  { %v7260_v51 = vpack.c.bf16 %v4593_v45, %v4591_v42  ;;  %v4627_v42 = vld [vmem:[#allocation7 + $0x540] sm:$0xff]  ;;  %v4629_v45 = vld [vmem:[#allocation7 + $0x550] sm:$0xff] }
 0xe2b   :  { %7201 = vmatpush1.bf16.msra.mxu1 %v7200_v2  ;;  %v4351_v2 = vld [vmem:[#allocation7 + $0x180] sm:$0xff]  ;;  %v9562_v26 = vpop.f32.mrb[48].mxu1 }
 0xe2c   :  { %7203 = vmatprep.subr.bf16.mxu1 %v7202_v4  ;;  %v4353_v4 = vld [vmem:[#allocation7 + $0x190] sm:$0xff]  ;;  %v9564_v29 = vpop.f32.mrb[49].mxu1 }
 0xe2d   :  { %v7240_v10 = vpack.c.bf16 %v4353_v4, %v4351_v2  ;;  %v4607_v4 = vld [vmem:[#allocation7 + $0x4a0] sm:$0xff] }
 0xe2f   :  { %7205 = vmatpush1.bf16.msra.mxu1 %v7204_v12  ;;  %v4355_v12 = vld [vmem:[#allocation7 + $0x1a0] sm:$0xff]  ;;  %v9566_v36 = vpop.f32.mrb[50].mxu1 }
 0xe30   :  { %7207 = vmatprep.subr.bf16.mxu1 %v7206_v13  ;;  %v4357_v13 = vld [vmem:[#allocation7 + $0x1b0] sm:$0xff]  ;;  %v9568_v41 = vpop.f32.mrb[51].mxu1 }
 0xe31   :  { %v7244_v34 = vpack.c.bf16 %v4357_v13, %v4355_v12  ;;  %v4611_v12 = vld [vmem:[#allocation7 + $0x4c0] sm:$0xff]  ;;  %v4613_v13 = vld [vmem:[#allocation7 + $0x4d0] sm:$0xff] }
 0xe33   :  { %7209 = vmatpush1.bf16.msra.mxu1 %v7208_v16  ;;  %v4359_v16 = vld [vmem:[#allocation7 + $0x1c0] sm:$0xff]  ;;  %v9571_v50 = vpop.f32.mrb[52].mxu1 }
 0xe34   :  { %7211 = vmatprep.subr.bf16.mxu1 %v7210_v17  ;;  %v4361_v17 = vld [vmem:[#allocation7 + $0x1d0] sm:$0xff]  ;;  %v9574_v52 = vpop.f32.mrb[53].mxu1 }
 0xe35   :  { %v7248_v22 = vpack.c.bf16 %v4361_v17, %v4359_v16  ;;  %v4615_v16 = vld [vmem:[#allocation7 + $0x4e0] sm:$0xff]  ;;  %v4617_v17 = vld [vmem:[#allocation7 + $0x4f0] sm:$0xff] }
 0xe37   :  { %7213 = vmatpush1.bf16.msra.mxu1 %v7212_v24  ;;  %v4363_v24 = vld [vmem:[#allocation7 + $0x1e0] sm:$0xff] }
 0xe38   :  { %7215 = vmatprep.subr.bf16.mxu1 %v7214_v25  ;;  %v4365_v25 = vld [vmem:[#allocation7 + $0x1f0] sm:$0xff] }
 0xe3b   :  { %7217 = vmatpush1.bf16.msra.mxu1 %v7216_v31  ;;  %v7252_v31 = vpack.c.bf16 %v4365_v25, %v4363_v24  ;;  %v4619_v24 = vld [vmem:[#allocation7 + $0x500] sm:$0xff]  ;;  %v4621_v25 = vld [vmem:[#allocation7 + $0x510] sm:$0xff] }
 0xe3c   :  { %7219 = vmatprep.subr.bf16.mxu1 %v7218_v32  ;;  %v7254_v32 = vpack.c.bf16 %v4590_v28, %v4588_v27  ;;  %v4624_v27 = vld [vmem:[#allocation7 + $0x528] sm:$0xff]  ;;  %v4626_v28 = vld [vmem:[#allocation7 + $0x538] sm:$0xff] }
 0xe3f   :  { %7221 = vmatpush1.bf16.msra.mxu1 %v7220_v5  ;;  %v4594_v5 = vld [vmem:[#allocation7 + $0x438] sm:$0xff] }
 0xe40   :  { %7223 = vmatprep.subr.bf16.mxu1 %v7222_v39  ;;  %v7256_v39 = vpack.c.bf16 %v4589_v35, %v4587_v33  ;;  %v7258_v43 = vpack.c.bf16 %v4594_v5, %v4592_v37  ;;  %v4623_v33 = vld [vmem:[#allocation7 + $0x520] sm:$0xff]  ;;  %v4625_v35 = vld [vmem:[#allocation7 + $0x530] sm:$0xff]  ;;  %v4628_v37 = vld [vmem:[#allocation7 + $0x548] sm:$0xff] }
 0xe41   :  { %v4630_v5 = vld [vmem:[#allocation7 + $0x558] sm:$0xff] }
 0xe43   :  { %7225 = vmatpush1.bf16.msra.mxu1 %v7224_v48  ;;  %v4596_v48 = vld [vmem:[#allocation7 + $0x448] sm:$0xff] }
 0xe44   :  { %7227 = vmatprep.subr.bf16.mxu1 %v7226_v49  ;;  %v4598_v49 = vld [vmem:[#allocation7 + $0x458] sm:$0xff] }
 0xe45   :  { %v7262_v40 = vpack.c.bf16 %v4598_v49, %v4596_v48  ;;  %v4632_v48 = vld [vmem:[#allocation7 + $0x568] sm:$0xff]  ;;  %v4634_v49 = vld [vmem:[#allocation7 + $0x578] sm:$0xff] }
 0xe47   :  { %7229 = vmatpush1.bf16.msra.mxu1 %v7228_v55  ;;  %v4595_v55 = vld [vmem:[#allocation7 + $0x440] sm:$0xff] }
 0xe48   :  { %7231 = vmatprep.subr.bf16.mxu1 %v7230_v53  ;;  %v4597_v53 = vld [vmem:[#allocation7 + $0x450] sm:$0xff] }
 0xe49   :  { %v7264_v58 = vpack.c.bf16 %v4597_v53, %v4595_v55  ;;  %v4631_v55 = vld [vmem:[#allocation7 + $0x560] sm:$0xff]  ;;  %v4633_v53 = vld [vmem:[#allocation7 + $0x570] sm:$0xff] }
 0xe4b   :  { %7233 = vmatpush1.bf16.msra.mxu1 %v7232_v60  ;;  %v4604_v60 = vld [vmem:[#allocation7 + $0x488] sm:$0xff] }
 0xe4c   :  { %7235 = vmatprep.subr.bf16.mxu1 %v7234_v54  ;;  %v4606_v54 = vld [vmem:[#allocation7 + $0x498] sm:$0xff] }
 0xe4d   :  { %v7270_v61 = vpack.c.bf16 %v4606_v54, %v4604_v60  ;;  %v4640_v60 = vld [vmem:[#allocation7 + $0x5a8] sm:$0xff]  ;;  %v4642_v54 = vld [vmem:[#allocation7 + $0x5b8] sm:$0xff] }
 0xe4f   :  { %7237 = vmatpush1.bf16.msra.mxu1 %v7236_v63  ;;  %v4608_v63 = vld [vmem:[#allocation7 + $0x4a8] sm:$0xff] }
 0xe50   :  { %7239 = vmatprep.subr.bf16.mxu1 %v7238_v1  ;;  %v4610_v1 = vld [vmem:[#allocation7 + $0x4b8] sm:$0xff] }
 0xe51   :  { %v7274_v2 = vpack.c.bf16 %v4610_v1, %v4608_v63  ;;  %v4644_v63 = vld [vmem:[#allocation7 + $0x5c8] sm:$0xff]  ;;  %v4646_v1 = vld [vmem:[#allocation7 + $0x5d8] sm:$0xff] }
 0xe53   :  { %7241 = vmatpush1.bf16.msra.mxu1 %v7240_v10 }
 0xe54   :  { %7243 = vmatprep.subr.bf16.mxu1 %v7242_v11  ;;  %v7278_v11 = vpack.c.bf16 %v4614_v7, %v4612_v6  ;;  %v4648_v6 = vld [vmem:[#allocation7 + $0x5e8] sm:$0xff]  ;;  %v4650_v7 = vld [vmem:[#allocation7 + $0x5f8] sm:$0xff] }
 0xe57   :  { %7245 = vmatpush1.bf16.msra.mxu1 %v7244_v34  ;;  %v7280_v34 = vpack.c.bf16 %v4613_v13, %v4611_v12  ;;  %v4647_v12 = vld [vmem:[#allocation7 + $0x5e0] sm:$0xff]  ;;  %v4649_v13 = vld [vmem:[#allocation7 + $0x5f0] sm:$0xff] }
 0xe58   :  { %7247 = vmatprep.subr.bf16.mxu1 %v7246_v15  ;;  %v7282_v15 = vpack.c.bf16 %v4618_v30, %v4616_v14  ;;  %v4734_v14 = vld [vmem:[#allocation7 + $0x608] sm:$0xff]  ;;  %v4736_v30 = vld [vmem:[#allocation7 + $0x618] sm:$0xff] }
 0xe5b   :  { %7249 = vmatpush1.bf16.msra.mxu1 %v7248_v22  ;;  %v7284_v22 = vpack.c.bf16 %v4617_v17, %v4615_v16  ;;  %v4733_v16 = vld [vmem:[#allocation7 + $0x600] sm:$0xff]  ;;  %v4735_v17 = vld [vmem:[#allocation7 + $0x610] sm:$0xff] }
 0xe5c   :  { %7251 = vmatprep.subr.bf16.mxu1 %v7250_v23  ;;  %v7286_v23 = vpack.c.bf16 %v4622_v21, %v4620_v19  ;;  %v4738_v19 = vld [vmem:[#allocation7 + $0x628] sm:$0xff]  ;;  %v4740_v21 = vld [vmem:[#allocation7 + $0x638] sm:$0xff] }
 0xe5f   :  { %7253 = vmatpush1.bf16.msra.mxu1 %v7252_v31  ;;  %v7288_v31 = vpack.c.bf16 %v4621_v25, %v4619_v24  ;;  %v4737_v24 = vld [vmem:[#allocation7 + $0x620] sm:$0xff]  ;;  %v4739_v25 = vld [vmem:[#allocation7 + $0x630] sm:$0xff] }
 0xe60   :  { %7255 = vmatprep.subr.bf16.mxu1 %v7254_v32  ;;  %v7290_v32 = vpack.c.bf16 %v4626_v28, %v4624_v27  ;;  %v4742_v27 = vld [vmem:[#allocation7 + $0x648] sm:$0xff]  ;;  %v4744_v28 = vld [vmem:[#allocation7 + $0x658] sm:$0xff] }
 0xe62   :  { %4574 = vmatmul.mubr.f32.vlgmr.msra.gmra.mrb[54].mxu1 %v9552_v44  ;;  %v7266_v44 = vpack.c.bf16 %v4602_v57, %v4600_v56  ;;  %v4636_v56 = vld [vmem:[#allocation7 + $0x588] sm:$0xff]  ;;  %v4638_v57 = vld [vmem:[#allocation7 + $0x598] sm:$0xff] }
 0xe63   :  { %4579 = vmatprep.mubr.f32.mxu1 %v9556_v46  ;;  %7257 = vmatpush1.bf16.msra.mxu1 %v7256_v39  ;;  %v4601_v46 = vld [vmem:[#allocation7 + $0x470] sm:$0xff]  ;;  %v7292_v39 = vpack.c.bf16 %v4625_v35, %v4623_v33  ;;  %v4741_v33 = vld [vmem:[#allocation7 + $0x640] sm:$0xff] }
 0xe64   :  { %7259 = vmatprep.subr.bf16.mxu1 %v7258_v43  ;;  %v7268_v38 = vpack.c.bf16 %v4601_v46, %v4599_v59  ;;  %v7294_v43 = vpack.c.bf16 %v4630_v5, %v4628_v37  ;;  %v4635_v59 = vld [vmem:[#allocation7 + $0x580] sm:$0xff]  ;;  %v4637_v46 = vld [vmem:[#allocation7 + $0x590] sm:$0xff]  ;;  %v4746_v37 = vld [vmem:[#allocation7 + $0x668] sm:$0xff] }
 0xe65   :  { %v4743_v35 = vld [vmem:[#allocation7 + $0x650] sm:$0xff]  ;;  %v4748_v5 = vld [vmem:[#allocation7 + $0x678] sm:$0xff] }
 0xe66   :  { %4580 = vmatmul.mubr.f32.gmra.mrb[56].mxu1 %v9554_v47  ;;  %v7272_v47 = vpack.c.bf16 %v4605_v9, %v4603_v62  ;;  %v4639_v62 = vld [vmem:[#allocation7 + $0x5a0] sm:$0xff]  ;;  %v4641_v9 = vld [vmem:[#allocation7 + $0x5b0] sm:$0xff] }
 0xe67   :  { %7261 = vmatpush1.bf16.msra.mxu1 %v7260_v51  ;;  %4715 = vmatprep.mubr.f32.mxu1 %v9560_v8  ;;  %v4609_v8 = vld [vmem:[#allocation7 + $0x4b0] sm:$0xff]  ;;  %v7296_v51 = vpack.c.bf16 %v4629_v45, %v4627_v42  ;;  %v4745_v42 = vld [vmem:[#allocation7 + $0x660] sm:$0xff]  ;;  %v4750_v45 = vld [vmem:[#allocation7 + $0x688] sm:$0xff] }
 0xe68   :  { %7263 = vmatprep.subr.bf16.mxu1 %v7262_v40  ;;  %v7276_v10 = vpack.c.bf16 %v4609_v8, %v4607_v4  ;;  %v7298_v40 = vpack.c.bf16 %v4634_v49, %v4632_v48  ;;  %v4643_v4 = vld [vmem:[#allocation7 + $0x5c0] sm:$0xff]  ;;  %v4645_v8 = vld [vmem:[#allocation7 + $0x5d0] sm:$0xff]  ;;  %v4752_v48 = vld [vmem:[#allocation7 + $0x698] sm:$0xff] }
 0xe69   :  { %v7334_v49 = vpack.c.bf16 %v4752_v48, %v4750_v45  ;;  %v4785_v45 = vld [vmem:[#allocation7 + $0x7a0] sm:$0xff]  ;;  %v4787_v48 = vld [vmem:[#allocation7 + $0x7b0] sm:$0xff] }
 0xe6b   :  { %7265 = vmatpush1.bf16.msra.mxu1 %v7264_v58  ;;  %v7300_v58 = vpack.c.bf16 %v4633_v53, %v4631_v55  ;;  %v4754_v55 = vld [vmem:[#allocation7 + $0x6a8] sm:$0xff]  ;;  %v4756_v53 = vld [vmem:[#allocation7 + $0x6b8] sm:$0xff] }
 0xe6c   :  { %7267 = vmatprep.subr.bf16.mxu1 %v7266_v44  ;;  %v7302_v44 = vpack.c.bf16 %v4638_v57, %v4636_v56  ;;  %v7338_v56 = vpack.c.bf16 %v4756_v53, %v4754_v55  ;;  %v4753_v57 = vld [vmem:[#allocation7 + $0x6a0] sm:$0xff]  ;;  %v4791_v53 = vld [vmem:[#allocation7 + $0x7d0] sm:$0xff] }
 0xe6d   :  { %v4789_v55 = vld [vmem:[#allocation7 + $0x7c0] sm:$0xff] }
 0xe6f   :  { %7269 = vmatpush1.bf16.msra.mxu1 %v7268_v38  ;;  %v7304_v38 = vpack.c.bf16 %v4637_v46, %v4635_v59 }
 0xe70   :  { %7271 = vmatprep.subr.bf16.mxu1 %v7270_v61  ;;  %v7306_v61 = vpack.c.bf16 %v4642_v54, %v4640_v60  ;;  %v4757_v60 = vld [vmem:[#allocation7 + $0x6c0] sm:$0xff]  ;;  %v4759_v54 = vld [vmem:[#allocation7 + $0x6d0] sm:$0xff] }
 0xe73   :  { %7273 = vmatpush1.bf16.msra.mxu1 %v7272_v47  ;;  %v7308_v47 = vpack.c.bf16 %v4641_v9, %v4639_v62  ;;  %v7344_v62 = vpack.c.bf16 %v4759_v54, %v4757_v60 }
 0xe74   :  { %7275 = vmatprep.subr.bf16.mxu1 %v7274_v2  ;;  %v7310_v2 = vpack.c.bf16 %v4646_v1, %v4644_v63  ;;  %v4761_v63 = vld [vmem:[#allocation7 + $0x6e0] sm:$0xff]  ;;  %v4763_v1 = vld [vmem:[#allocation7 + $0x6f0] sm:$0xff] }
 0xe77   :  { %7277 = vmatpush1.bf16.msra.mxu1 %v7276_v10  ;;  %v7312_v10 = vpack.c.bf16 %v4645_v8, %v4643_v4  ;;  %v7348_v4 = vpack.c.bf16 %v4763_v1, %v4761_v63 }
 0xe78   :  { %7279 = vmatprep.subr.bf16.mxu1 %v7278_v11  ;;  %v7314_v11 = vpack.c.bf16 %v4650_v7, %v4648_v6  ;;  %v4765_v6 = vld [vmem:[#allocation7 + $0x700] sm:$0xff]  ;;  %v4767_v7 = vld [vmem:[#allocation7 + $0x710] sm:$0xff] }
 0xe7b   :  { %7281 = vmatpush1.bf16.msra.mxu1 %v7280_v34  ;;  %v7316_v34 = vpack.c.bf16 %v4649_v13, %v4647_v12  ;;  %v7352_v12 = vpack.c.bf16 %v4767_v7, %v4765_v6 }
 0xe7c   :  { %7283 = vmatprep.subr.bf16.mxu1 %v7282_v15  ;;  %v7318_v15 = vpack.c.bf16 %v4736_v30, %v4734_v14  ;;  %v4769_v14 = vld [vmem:[#allocation7 + $0x720] sm:$0xff]  ;;  %v4771_v30 = vld [vmem:[#allocation7 + $0x730] sm:$0xff] }
 0xe7f   :  { %7285 = vmatpush1.bf16.msra.mxu1 %v7284_v22  ;;  %v7320_v22 = vpack.c.bf16 %v4735_v17, %v4733_v16  ;;  %v7356_v16 = vpack.c.bf16 %v4771_v30, %v4769_v14  ;;  %v5141_v30 = vld [vmem:[%s10150_s24 + $0x90] sm:$0xff] }
 0xe80   :  { %7287 = vmatprep.subr.bf16.mxu1 %v7286_v23  ;;  %v7322_v23 = vpack.c.bf16 %v4740_v21, %v4738_v19  ;;  %v4773_v19 = vld [vmem:[#allocation7 + $0x740] sm:$0xff]  ;;  %v4775_v21 = vld [vmem:[#allocation7 + $0x750] sm:$0xff] }
 0xe83   :  { %7289 = vmatpush1.bf16.msra.mxu1 %v7288_v31  ;;  %v7324_v31 = vpack.c.bf16 %v4739_v25, %v4737_v24  ;;  %v7360_v24 = vpack.c.bf16 %v4775_v21, %v4773_v19  ;;  %v5860_v19 = vld [vmem:[%s10150_s24 + $0x198] sm:$0xff]  ;;  %v4898_v21 = vld [vmem:[%s10149_s23] sm:$0xff] }
 0xe84   :  { %7291 = vmatprep.subr.bf16.mxu1 %v7290_v32  ;;  %v7326_v32 = vpack.c.bf16 %v4744_v28, %v4742_v27  ;;  %v4777_v27 = vld [vmem:[#allocation7 + $0x760] sm:$0xff]  ;;  %v4779_v28 = vld [vmem:[#allocation7 + $0x770] sm:$0xff] }
 0xe87   :  { %7293 = vmatpush1.bf16.msra.mxu1 %v7292_v39  ;;  %v7328_v39 = vpack.c.bf16 %v4743_v35, %v4741_v33  ;;  %v7364_v33 = vpack.c.bf16 %v4779_v28, %v4777_v27 }
 0xe88   :  { %7295 = vmatprep.subr.bf16.mxu1 %v7294_v43  ;;  %v7330_v43 = vpack.c.bf16 %v4748_v5, %v4746_v37  ;;  %v4781_v37 = vld [vmem:[#allocation7 + $0x780] sm:$0xff]  ;;  %v4783_v5 = vld [vmem:[#allocation7 + $0x790] sm:$0xff] }
 0xe8b   :  { %7297 = vmatpush1.bf16.msra.mxu1 %v7296_v51  ;;  %v4749_v51 = vld [vmem:[#allocation7 + $0x680] sm:$0xff] }
 0xe8c   :  { %7299 = vmatprep.subr.bf16.mxu1 %v7298_v40  ;;  %v4751_v40 = vld [vmem:[#allocation7 + $0x690] sm:$0xff] }
 0xe8f   :  { %7301 = vmatpush1.bf16.msra.mxu1 %v7300_v58  ;;  %v4758_v58 = vld [vmem:[#allocation7 + $0x6c8] sm:$0xff] }
 0xe90   :  { %7303 = vmatprep.subr.bf16.mxu1 %v7302_v44  ;;  %v4760_v44 = vld [vmem:[#allocation7 + $0x6d8] sm:$0xff] }
 0xe91   :  { %v7342_v46 = vpack.c.bf16 %v4760_v44, %v4758_v58  ;;  %v4793_v58 = vld [vmem:[#allocation7 + $0x7e0] sm:$0xff]  ;;  %v4795_v44 = vld [vmem:[#allocation7 + $0x7f0] sm:$0xff] }
 0xe93   :  { %7305 = vmatpush1.bf16.msra.mxu1 %v7304_v38  ;;  %v4762_v38 = vld [vmem:[#allocation7 + $0x6e8] sm:$0xff] }
 0xe94   :  { %7307 = vmatprep.subr.bf16.mxu1 %v7306_v61  ;;  %v4764_v61 = vld [vmem:[#allocation7 + $0x6f8] sm:$0xff] }
 0xe95   :  { %v7346_v9 = vpack.c.bf16 %v4764_v61, %v4762_v38 }
 0xe97   :  { %7309 = vmatpush1.bf16.msra.mxu1 %v7308_v47  ;;  %v4766_v47 = vld [vmem:[#allocation7 + $0x708] sm:$0xff] }
 0xe98   :  { %7311 = vmatprep.subr.bf16.mxu1 %v7310_v2  ;;  %v4768_v2 = vld [vmem:[#allocation7 + $0x718] sm:$0xff] }
 0xe99   :  { %v7350_v8 = vpack.c.bf16 %v4768_v2, %v4766_v47 }
 0xe9b   :  { %7313 = vmatpush1.bf16.msra.mxu1 %v7312_v10  ;;  %v4770_v10 = vld [vmem:[#allocation7 + $0x728] sm:$0xff] }
 0xe9c   :  { %7315 = vmatprep.subr.bf16.mxu1 %v7314_v11  ;;  %v4772_v11 = vld [vmem:[#allocation7 + $0x738] sm:$0xff] }
 0xe9d   :  { %v7354_v13 = vpack.c.bf16 %v4772_v11, %v4770_v10 }
 0xe9f   :  { %7317 = vmatpush1.bf16.msra.mxu1 %v7316_v34  ;;  %v4774_v34 = vld [vmem:[#allocation7 + $0x748] sm:$0xff] }
 0xea0   :  { %7319 = vmatprep.subr.bf16.mxu1 %v7318_v15  ;;  %v4776_v15 = vld [vmem:[#allocation7 + $0x758] sm:$0xff] }
 0xea1   :  { %v7358_v17 = vpack.c.bf16 %v4776_v15, %v4774_v34  ;;  %v5841_v34 = vld [vmem:[%s10150_s24 + $0x100] sm:$0xff]  ;;  %v5842_v15 = vld [vmem:[%s10150_s24 + $0x108] sm:$0xff] }
 0xea2   :  { %4716 = vmatmul.mubr.f32.vlgmr.msra.gmra.mrb[54].mxu1 %v9558_v3  ;;  %v4747_v3 = vld [vmem:[#allocation7 + $0x670] sm:$0xff]  ;;  %v7388_v27 = vpack.c.bf16 %v5842_v15, %v5841_v34 }
 0xea3   :  { %7321 = vmatpush1.bf16.msra.mxu1 %v7320_v22  ;;  %4721 = vmatprep.mubr.f32.mxu1 %v9564_v29  ;;  %v7332_v29 = vpack.c.bf16 %v4747_v3, %v4745_v42  ;;  %v4778_v22 = vld [vmem:[#allocation7 + $0x768] sm:$0xff]  ;;  %v7368_v42 = vpack.c.bf16 %v4783_v5, %v4781_v37  ;;  %v5861_v5 = vld [vmem:[%s10150_s24 + $0x1a0] sm:$0xff]  ;;  %v5133_v15 = vld [vmem:[%s10150_s24 + $0x50] sm:$0xff] }
 0xea4   :  { %7323 = vmatprep.subr.bf16.mxu1 %v7322_v23  ;;  %v4780_v23 = vld [vmem:[#allocation7 + $0x778] sm:$0xff]  ;;  %v5144_v37 = vld [vmem:[%s10150_s24 + $0xa8] sm:$0xff] }
 0xea5   :  { %v7362_v25 = vpack.c.bf16 %v4780_v23, %v4778_v22  ;;  %v4906_v22 = vld [vmem:[%s10149_s23 + $0x40] sm:$0xff] }
 0xea6   :  { %4722 = vmatmul.mubr.f32.gmra.mrb[56].mxu1 %v9562_v26  ;;  %v7336_v26 = vpack.c.bf16 %v4751_v40, %v4749_v51  ;;  %v7372_v51 = vpack.c.bf16 %v4787_v48, %v4785_v45  ;;  %v5127_v45 = vld [vmem:[%s10150_s24 + $0x20] sm:$0xff]  ;;  %v5128_v48 = vld [vmem:[%s10150_s24 + $0x28] sm:$0xff] }
 0xea7   :  { %7325 = vmatpush1.bf16.msra.mxu1 %v7324_v31  ;;  %4861 = vmatprep.mubr.f32.mxu1 %v9568_v41  ;;  %v4755_v41 = vld [vmem:[#allocation7 + $0x6b0] sm:$0xff]  ;;  %v4782_v31 = vld [vmem:[#allocation7 + $0x788] sm:$0xff] }
 0xea8   :  { %7327 = vmatprep.subr.bf16.mxu1 %v7326_v32  ;;  %v7340_v59 = vpack.c.bf16 %v4755_v41, %v4753_v57  ;;  %v4784_v32 = vld [vmem:[#allocation7 + $0x798] sm:$0xff]  ;;  %v7376_v57 = vpack.c.bf16 %v4791_v53, %v4789_v55  ;;  %v5845_v55 = vld [vmem:[%s10150_s24 + $0x120] sm:$0xff]  ;;  %v5846_v53 = vld [vmem:[%s10150_s24 + $0x128] sm:$0xff] }
 0xea9   :  { %v7366_v35 = vpack.c.bf16 %v4784_v32, %v4782_v31  ;;  %v5143_v31 = vld [vmem:[%s10150_s24 + $0xa0] sm:$0xff] }
 0xeab   :  { %7329 = vmatpush1.bf16.msra.mxu1 %v7328_v39  ;;  %v4786_v39 = vld [vmem:[#allocation7 + $0x7a8] sm:$0xff] }
 0xeac   :  { %7331 = vmatprep.subr.bf16.mxu1 %v7330_v43  ;;  %v4788_v43 = vld [vmem:[#allocation7 + $0x7b8] sm:$0xff] }
 0xead   :  { %v7370_v3 = vpack.c.bf16 %v4788_v43, %v4786_v39  ;;  %v5862_v39 = vld [vmem:[%s10150_s24 + $0x1a8] sm:$0xff] }
 0xeae   :  { %v4899_v43 = vld [vmem:[%s10149_s23 + $0x8] sm:$0xff] }
 0xeaf   :  { %7333 = vmatpush1.bf16.msra.mxu1 %v7332_v29  ;;  %v4790_v29 = vld [vmem:[#allocation7 + $0x7c8] sm:$0xff] }
 0xeb0   :  { %7335 = vmatprep.subr.bf16.mxu1 %v7334_v49  ;;  %v4792_v49 = vld [vmem:[#allocation7 + $0x7d8] sm:$0xff] }
 0xeb1   :  { %v7374_v40 = vpack.c.bf16 %v4792_v49, %v4790_v29  ;;  %v7426_v49 = vpack.c.bf16 %v5144_v37, %v5143_v31  ;;  %v5154_v31 = vld [vmem:[%s10150_s24 + $0xf8] sm:$0xff] }
 0xeb3   :  { %7337 = vmatpush1.bf16.msra.mxu1 %v7336_v26  ;;  %v4794_v26 = vld [vmem:[#allocation7 + $0x7e8] sm:$0xff] }
 0xeb4   :  { %7339 = vmatprep.subr.bf16.mxu1 %v7338_v56  ;;  %v4796_v56 = vld [vmem:[#allocation7 + $0x7f8] sm:$0xff] }
 0xeb5   :  { %v7378_v41 = vpack.c.bf16 %v4796_v56, %v4794_v26  ;;  %v5146_v26 = vld [vmem:[%s10150_s24 + $0xb8] sm:$0xff]  ;;  %v5863_v56 = vld [vmem:[%s10150_s24 + $0x1b0] sm:$0xff] }
 0xeb7   :  { %7341 = vmatpush1.bf16.msra.mxu1 %v7340_v59  ;;  %v7380_v59 = vpack.c.bf16 %v4795_v44, %v4793_v58  ;;  %v4908_v58 = vld [vmem:[%s10149_s23 + $0x50] sm:$0xff]  ;;  %v7428_v44 = vpack.c.bf16 %v5128_v48, %v5127_v45  ;;  %v5868_v45 = vld [vmem:[%s10150_s24 + $0x1d8] sm:$0xff] }
 0xeb8   :  { %7343 = vmatprep.subr.bf16.mxu1 %v7342_v46  ;;  %v4878_v46 = vld [vmem:[%s10148_s22] sm:$0x3] }
 0xeb9   :  { %v4883_v60 = vrot.slane %v4878_v46, %v8531_v18  ;;  %v4887_v38 = vrot.slane %v4878_v46, %v8536_v20  ;;  %v5140_v18 = vld [vmem:[%s10150_s24 + $0x88] sm:$0xff]  ;;  %v5857_v20 = vld [vmem:[%s10150_s24 + $0x180] sm:$0xff]  ;;  %v5130_v46 = vld [vmem:[%s10150_s24 + $0x38] sm:$0xff] }
 0xebb   :  { %7345 = vmatpush1.bf16.msra.mxu1 %v7344_v62 }
 0xebc   :  { %7347 = vmatprep.subr.bf16.mxu1 %v7346_v9 }
 0xebf   :  { %7349 = vmatpush1.bf16.msra.mxu1 %v7348_v4  ;;  %v5858_v4 = vld [vmem:[%s10150_s24 + $0x188] sm:$0xff] }
 0xec0   :  { %7351 = vmatprep.subr.bf16.mxu1 %v7350_v8  ;;  %v7386_v14 = vpack.c.bf16 %v5858_v4, %v5857_v20  ;;  %v5132_v4 = vld [vmem:[%s10150_s24 + $0x48] sm:$0xff] }
 0xec3   :  { %7353 = vmatpush1.bf16.msra.mxu1 %v7352_v12  ;;  %v5123_v12 = vld [vmem:[%s10150_s24] sm:$0xff] }
 0xec4   :  { %7355 = vmatprep.subr.bf16.mxu1 %v7354_v13  ;;  %v5124_v13 = vld [vmem:[%s10150_s24 + $0x8] sm:$0xff] }
 0xec5   :  { %v7420_v23 = vpack.c.bf16 %v5124_v13, %v5123_v12  ;;  %v4902_v12 = vld [vmem:[%s10149_s23 + $0x20] sm:$0xff] }
 0xec6   :  { %v4910_v13 = vld [vmem:[%s10149_s23 + $0x60] sm:$0xff] }
 0xec7   :  { %7357 = vmatpush1.bf16.msra.mxu1 %v7356_v16  ;;  %v5142_v16 = vld [vmem:[%s10150_s24 + $0x98] sm:$0xff] }
 0xec8   :  { %7359 = vmatprep.subr.bf16.mxu1 %v7358_v17  ;;  %v5859_v17 = vld [vmem:[%s10150_s24 + $0x190] sm:$0xff]  ;;  %v7422_v28 = vpack.c.bf16 %v5142_v16, %v5141_v30  ;;  %v5134_v16 = vld [vmem:[%s10150_s24 + $0x58] sm:$0xff] }
 0xec9   :  { %v7390_v32 = vpack.c.bf16 %v5860_v19, %v5859_v17  ;;  %v5151_v17 = vld [vmem:[%s10150_s24 + $0xe0] sm:$0xff]  ;;  %v5152_v19 = vld [vmem:[%s10150_s24 + $0xe8] sm:$0xff] }
 0xecb   :  { %7361 = vmatpush1.bf16.msra.mxu1 %v7360_v24  ;;  %v5125_v24 = vld [vmem:[%s10150_s24 + $0x10] sm:$0xff] }
 0xecc   :  { %7363 = vmatprep.subr.bf16.mxu1 %v7362_v25  ;;  %v5126_v25 = vld [vmem:[%s10150_s24 + $0x18] sm:$0xff] }
 0xecf   :  { %7365 = vmatpush1.bf16.msra.mxu1 %v7364_v33  ;;  %v5843_v33 = vld [vmem:[%s10150_s24 + $0x110] sm:$0xff] }
 0xed0   :  { %7367 = vmatprep.subr.bf16.mxu1 %v7366_v35  ;;  %v5844_v35 = vld [vmem:[%s10150_s24 + $0x118] sm:$0xff] }
 0xed1   :  { %v7392_v29 = vpack.c.bf16 %v5844_v35, %v5843_v33  ;;  %v4912_v33 = vld [vmem:[%s10149_s23 + $0x70] sm:$0xff] }
 0xed3   :  { %7369 = vmatpush1.bf16.msra.mxu1 %v7368_v42  ;;  %v4907_v42 = vld [vmem:[%s10149_s23 + $0x48] sm:$0xff] }
 0xed4   :  { %7371 = vmatprep.subr.bf16.mxu1 %v7370_v3  ;;  %v7424_v3 = vpack.c.bf16 %v5126_v25, %v5125_v24  ;;  %v7442_v24 = vpack.c.bf16 %v5152_v19, %v5151_v17  ;;  %v5135_v25 = vld [vmem:[%s10150_s24 + $0x60] sm:$0xff]  ;;  %v5927_v19 = vld [vmem:[%s10150_s24 + $0x3b0] sm:$0xff] }
 0xed7   :  { %7373 = vmatpush1.bf16.msra.mxu1 %v7372_v51  ;;  %v5145_v51 = vld [vmem:[%s10150_s24 + $0xb0] sm:$0xff] }
 0xed8   :  { %7375 = vmatprep.subr.bf16.mxu1 %v7374_v40  ;;  %v7394_v40 = vpack.c.bf16 %v5862_v39, %v5861_v5  ;;  %v4905_v5 = vld [vmem:[%s10149_s23 + $0x38] sm:$0xff] }
 0xed9   :  { %v4913_v39 = vld [vmem:[%s10149_s23 + $0x78] sm:$0xff] }
 0xedb   :  { %7377 = vmatpush1.bf16.msra.mxu1 %v7376_v57  ;;  %v5864_v57 = vld [vmem:[%s10150_s24 + $0x1b8] sm:$0xff] }
 0xedc   :  { %7379 = vmatprep.subr.bf16.mxu1 %v7378_v41  ;;  %v4900_v41 = vld [vmem:[%s10149_s23 + $0x10] sm:$0xff] }
 0xedf   :  { %7381 = vmatpush1.bf16.msra.mxu1 %v7380_v59  ;;  %v5129_v59 = vld [vmem:[%s10150_s24 + $0x30] sm:$0xff] }
 0xee2   :  { %4862 = vmatmul.mubr.f32.vlgmr.msra.gmra.mrb[54].mxu1 %v9566_v36 }
 0xee3   :  { %4867 = vmatprep.mubr.f32.mxu1 %v9574_v52 }
 0xee6   :  { %4868 = vmatmul.mubr.f32.gmra.mrb[56].mxu1 %v9571_v50  ;;  %v5139_v50 = vld [vmem:[%s10150_s24 + $0x80] sm:$0xff] }
 0xee7   :  { %5074 = vmatprep.mubr.f32.mxu1 %v7717_v0  ;;  %v7418_v11 = vpack.c.bf16 %v5140_v18, %v5139_v50  ;;  %v4909_v50 = vld [vmem:[%s10149_s23 + $0x58] sm:$0xff] }
 0xfb5   :  { %v4863_v54 = vpop.f32.mrb[54].mxu1 }
 0xfb6   :  { %v4865_v61 = vpop.f32.mrb[55].mxu1  ;;  %v4890_v62 = vadd.f32 %v4883_v60, %v4863_v54  ;;  %v7430_v54 = vpack.c.bf16 %v5146_v26, %v5145_v51  ;;  %v5853_v26 = vld [vmem:[%s10150_s24 + $0x160] sm:$0xff] }
 0xfb7   :  { %v4891_v9 = vadd.f32 %v4887_v38, %v4865_v61  ;;  %v7398_v61 = vpack.c.bf16 %v5864_v57, %v5863_v56  ;;  %v5854_v56 = vld [vmem:[%s10150_s24 + $0x168] sm:$0xff] }
 0xfb8   :  { %v4894_v47 = vmax.f32 %v4890_v62, 0.0  ;;  %v5847_v62 = vld [vmem:[%s10150_s24 + $0x130] sm:$0xff]  ;;  %v7412_v57 = vpack.c.bf16 %v5854_v56, %v5853_v26 }
 0xfb9   :  { %v4869_v63 = vpop.f32.mrb[56].mxu1  ;;  %v4895_v8 = vmax.f32 %v4891_v9, 0.0  ;;  %v5848_v9 = vld [vmem:[%s10150_s24 + $0x138] sm:$0xff]  ;;  %v5875_v56 = vld [vmem:[%s10150_s24 + $0x210] sm:$0xff] }
 0xfba   :  { %v4892_v36 = vadd.f32 %v4883_v60, %v4869_v63  ;;  %v4871_v1 = vpop.f32.mrb[57].mxu1  ;;  %v7396_v60 = vpack.c.bf16 %v5846_v53, %v5845_v55  ;;  %v5148_v63 = vld [vmem:[%s10150_s24 + $0xc8] sm:$0xff]  ;;  %v7400_v18 = vpack.c.bf16 %v5848_v9, %v5847_v62 }
 0xfbb   :  { %v4893_v52 = vadd.f32 %v4887_v38, %v4871_v1  ;;  %v5147_v38 = vld [vmem:[%s10150_s24 + $0xc0] sm:$0xff]  ;;  %v5866_v1 = vld [vmem:[%s10150_s24 + $0x1c8] sm:$0xff] }
 0xfbc   :  { %v4896_v2 = vmax.f32 %v4892_v36, 0.0  ;;  %v5865_v36 = vld [vmem:[%s10150_s24 + $0x1c0] sm:$0xff]  ;;  %v7434_v20 = vpack.c.bf16 %v5148_v63, %v5147_v38  ;;  %v5870_v55 = vld [vmem:[%s10150_s24 + $0x1e8] sm:$0xff] }
 0xfbd   :  { %v4897_v6 = vmax.f32 %v4893_v52, 0.0  ;;  %v4901_v52 = vld [vmem:[%s10149_s23 + $0x18] sm:$0xff]  ;;  %v5890_v38 = vld [vmem:[%s10150_s24 + $0x288] sm:$0xff] }
 0xfbe   :  { %v7384_v7 = vpack.c.bf16 %v4896_v2, %v4894_v47  ;;  %v7432_v47 = vpack.c.bf16 %v5130_v46, %v5129_v59  ;;  %v5131_v2 = vld [vmem:[%s10150_s24 + $0x40] sm:$0xff]  ;;  %v5855_v59 = vld [vmem:[%s10150_s24 + $0x170] sm:$0xff]  ;;  %v5856_v46 = vld [vmem:[%s10150_s24 + $0x178] sm:$0xff] }
 0xfbf   :  { %v7382_v10 = vpack.c.bf16 %v4897_v6, %v4895_v8  ;;  %v7402_v8 = vpack.c.bf16 %v5866_v1, %v5865_v36  ;;  %v5849_v6 = vld [vmem:[%s10150_s24 + $0x140] sm:$0xff]  ;;  %v5922_v9 = vld [vmem:[%s10150_s24 + $0x388] sm:$0xff] }
 0xfc0   :  { %v5905_v36 = vld [vmem:[%s10150_s24 + $0x300] sm:$0xff]  ;;  %v5906_v1 = vld [vmem:[%s10150_s24 + $0x308] sm:$0xff] }
 0xfc1   :  { %7383 = vmatprep.subr.bf16.mxu0 %v7382_v10  ;;  %7514 = vmatprep.subr.bf16.mxu1 %v7382_v10  ;;  %v5149_v10 = vld [vmem:[%s10150_s24 + $0xd0] sm:$0xff] }
 0xfc2   :  { %7385 = vmatpush1.bf16.msra.mxu0 %v7384_v7  ;;  %7515 = vmatpush1.bf16.msra.mxu1 %v7384_v7  ;;  %v5850_v7 = vld [vmem:[%s10150_s24 + $0x148] sm:$0xff] }
 0xfc3   :  { %7419 = vmatprep.subr.bf16.mxu0 %v7418_v11  ;;  %7387 = vmatprep.subr.bf16.mxu1 %v7386_v14  ;;  %v5150_v11 = vld [vmem:[%s10150_s24 + $0xd8] sm:$0xff]  ;;  %v7436_v14 = vpack.c.bf16 %v5132_v4, %v5131_v2  ;;  %v7404_v30 = vpack.c.bf16 %v5850_v7, %v5849_v6  ;;  %v7484_v2 = vpack.c.bf16 %v5906_v1, %v5905_v36 }
 0xfc4   :  { %v7438_v34 = vpack.c.bf16 %v5150_v11, %v5149_v10  ;;  %v5908_v6 = vld [vmem:[%s10150_s24 + $0x318] sm:$0xff]  ;;  %v5925_v10 = vld [vmem:[%s10150_s24 + $0x3a0] sm:$0xff]  ;;  %v5926_v11 = vld [vmem:[%s10150_s24 + $0x3a8] sm:$0xff] }
 0xfc5   :  { %5825 = vmatmul.mubr.msk.f32.vlgmr.msra.gmra.mrb[48].mxu0 %vm1489_vm2, %v4898_v21  ;;  %5833 = vmatmul.mubr.msk.f32.vlgmr.msra.gmra.mrb[58].mxu1 %vm1489_vm2, %v4906_v22  ;;  %v4903_v21 = vld [vmem:[%s10149_s23 + $0x28] sm:$0xff] }
 0xfc6   :  { %5032 = vmatprep.mubr.f32.mxu0 %v7717_v0  ;;  %5080 = vmatprep.mubr.f32.mxu1 %v7717_v0  ;;  %v4911_v22 = vld [vmem:[%s10149_s23 + $0x68] sm:$0xff] }
 0xfc7   :  { %7421 = vmatpush3.bf16.msra.mxu0 %v7420_v23  ;;  %7389 = vmatpush3.bf16.msra.mxu1 %v7388_v27  ;;  %v7440_v23 = vpack.c.bf16 %v5134_v16, %v5133_v15  ;;  %v5136_v27 = vld [vmem:[%s10150_s24 + $0x68] sm:$0xff]  ;;  %v5909_v15 = vld [vmem:[%s10150_s24 + $0x320] sm:$0xff] }
 0xfc8   :  { %7423 = vmatprep.subr.bf16.mxu0 %v7422_v28  ;;  %7391 = vmatprep.subr.bf16.mxu1 %v7390_v32  ;;  %v5153_v28 = vld [vmem:[%s10150_s24 + $0xf0] sm:$0xff]  ;;  %v7444_v35 = vpack.c.bf16 %v5136_v27, %v5135_v25  ;;  %v5910_v16 = vld [vmem:[%s10150_s24 + $0x328] sm:$0xff] }
 0xfc9   :  { %5826 = vmatmul.mubr.msk.f32.gmra.mrb[50].mxu0 %vm1489_vm2, %v4899_v43  ;;  %5834 = vmatmul.mubr.msk.f32.gmra.mrb[60].mxu1 %vm1489_vm2, %v4907_v42  ;;  %v4904_v32 = vld [vmem:[%s10149_s23 + $0x30] sm:$0xff]  ;;  %v7446_v37 = vpack.c.bf16 %v5154_v31, %v5153_v28  ;;  %v5138_v42 = vld [vmem:[%s10150_s24 + $0x78] sm:$0xff] }
 0xfca   :  { %5038 = vmatprep.mubr.f32.mxu0 %v7717_v0  ;;  %5086 = vmatprep.mubr.f32.mxu1 %v7717_v0  ;;  %v5137_v43 = vld [vmem:[%s10150_s24 + $0x70] sm:$0xff]  ;;  %v5912_v31 = vld [vmem:[%s10150_s24 + $0x338] sm:$0xff] }
 0xfcb   :  { %7425 = vmatpush3.bf16.msra.mxu0 %v7424_v3  ;;  %7393 = vmatpush3.bf16.msra.mxu1 %v7392_v29  ;;  %v7448_v3 = vpack.c.bf16 %v5138_v42, %v5137_v43  ;;  %v5851_v29 = vld [vmem:[%s10150_s24 + $0x150] sm:$0xff] }
 0xfcc   :  { %7427 = vmatprep.subr.bf16.mxu0 %v7426_v49  ;;  %7395 = vmatprep.subr.bf16.mxu1 %v7394_v40  ;;  %v5852_v49 = vld [vmem:[%s10150_s24 + $0x158] sm:$0xff]  ;;  %v5869_v40 = vld [vmem:[%s10150_s24 + $0x1e0] sm:$0xff]  ;;  %v5911_v28 = vld [vmem:[%s10150_s24 + $0x330] sm:$0xff] }
 0xfcd   :  { %5827 = vmatmul.mubr.msk.f32.gmra.mrb[52].mxu0 %vm1489_vm2, %v4900_v41  ;;  %5835 = vmatmul.mubr.msk.f32.gmra.mrb[62].mxu1 %vm1489_vm2, %v4908_v58  ;;  %v7408_v51 = vpack.c.bf16 %v5852_v49, %v5851_v29  ;;  %v7410_v53 = vpack.c.bf16 %v5870_v55, %v5869_v40  ;;  %v5871_v41 = vld [vmem:[%s10150_s24 + $0x1f0] sm:$0xff]  ;;  %v5872_v58 = vld [vmem:[%s10150_s24 + $0x1f8] sm:$0xff]  ;;  %v7496_v43 = vpack.c.bf16 %v5912_v31, %v5911_v28  ;;  %v5914_v29 = vld [vmem:[%s10150_s24 + $0x348] sm:$0xff] }
 0xfce   :  { %5044 = vmatprep.mubr.f32.mxu0 %v7717_v0  ;;  %5092 = vmatprep.mubr.f32.mxu1 %v7717_v0  ;;  %v5931_v40 = vld [vmem:[%s10150_s24 + $0x3d0] sm:$0xff]  ;;  %v5932_v55 = vld [vmem:[%s10150_s24 + $0x3d8] sm:$0xff]  ;;  %v5897_v28 = vld [vmem:[%s10150_s24 + $0x2c0] sm:$0xff] }
 0xfcf   :  { %7429 = vmatpush3.bf16.msra.mxu0 %v7428_v44  ;;  %7397 = vmatpush3.bf16.msra.mxu1 %v7396_v60  ;;  %v7414_v44 = vpack.c.bf16 %v5872_v58, %v5871_v41  ;;  %v7416_v60 = vpack.c.bf16 %v5856_v46, %v5855_v59  ;;  %v5893_v46 = vld [vmem:[%s10150_s24 + $0x2a0] sm:$0xff] }
 0xfd0   :  { %7431 = vmatprep.subr.bf16.mxu0 %v7430_v54  ;;  %7399 = vmatprep.subr.bf16.mxu1 %v7398_v61  ;;  %v5889_v54 = vld [vmem:[%s10150_s24 + $0x280] sm:$0xff] }
 0xfd1   :  { %5828 = vmatmul.mubr.msk.f32.gmra.mrb[54].mxu0 %vm1489_vm2, %v4901_v52  ;;  %5836 = vmatmul.mubr.msk.f32.gmra.mrb[64].mxu1 %vm1489_vm2, %v4909_v50  ;;  %v5921_v61 = vld [vmem:[%s10150_s24 + $0x380] sm:$0xff]  ;;  %v7450_v62 = vpack.c.bf16 %v5890_v38, %v5889_v54  ;;  %v5923_v52 = vld [vmem:[%s10150_s24 + $0x390] sm:$0xff]  ;;  %v5924_v50 = vld [vmem:[%s10150_s24 + $0x398] sm:$0xff] }
 0xfd2   :  { %5050 = vmatprep.mubr.f32.mxu0 %v7717_v0  ;;  %5098 = vmatprep.mubr.f32.mxu1 %v7717_v0  ;;  %v7482_v63 = vpack.c.bf16 %v5922_v9, %v5921_v61  ;;  %v7486_v4 = vpack.c.bf16 %v5924_v50, %v5923_v52  ;;  %v5915_v54 = vld [vmem:[%s10150_s24 + $0x350] sm:$0xff]  ;;  %v5916_v38 = vld [vmem:[%s10150_s24 + $0x358] sm:$0xff]  ;;  %v5933_v9 = vld [vmem:[%s10150_s24 + $0x3e0] sm:$0xff] }
 0xfd3   :  { %7433 = vmatpush3.bf16.msra.mxu0 %v7432_v47  ;;  %7401 = vmatpush3.bf16.msra.mxu1 %v7400_v18  ;;  %v5877_v52 = vld [vmem:[%s10150_s24 + $0x220] sm:$0xff]  ;;  %v5878_v50 = vld [vmem:[%s10150_s24 + $0x228] sm:$0xff] }
 0xfd4   :  { %7435 = vmatprep.subr.bf16.mxu0 %v7434_v20  ;;  %7403 = vmatprep.subr.bf16.mxu1 %v7402_v8  ;;  %v5907_v8 = vld [vmem:[%s10150_s24 + $0x310] sm:$0xff] }
 0xfd5   :  { %5829 = vmatmul.mubr.msk.f32.gmra.mrb[56].mxu0 %vm1489_vm2, %v4902_v12  ;;  %5837 = vmatmul.mubr.msk.f32.gmra.mrb[66].mxu1 %vm1489_vm2, %v4910_v13  ;;  %v7488_v13 = vpack.c.bf16 %v5908_v6, %v5907_v8  ;;  %v5895_v8 = vld [vmem:[%s10150_s24 + $0x2b0] sm:$0xff] }
 0xfd6   :  { %5056 = vmatprep.mubr.f32.mxu0 %v7717_v0  ;;  %5104 = vmatprep.mubr.f32.mxu1 %v7717_v0 }
 0xfd7   :  { %7437 = vmatpush3.bf16.msra.mxu0 %v7436_v14  ;;  %7405 = vmatpush3.bf16.msra.mxu1 %v7404_v30 }
 0xfd8   :  { %7439 = vmatprep.subr.bf16.mxu0 %v7438_v34  ;;  %v7490_v34 = vpack.c.bf16 %v5926_v11, %v5925_v10  ;;  %v5917_v10 = vld [vmem:[%s10150_s24 + $0x360] sm:$0xff]  ;;  %v5918_v11 = vld [vmem:[%s10150_s24 + $0x368] sm:$0xff] }
 0xfd9   :  { %5830 = vmatmul.mubr.msk.f32.gmra.mrb[58].mxu0 %vm1489_vm2, %v4903_v21  ;;  %5838 = vmatmul.mubr.msk.f32.gmra.mrb[68].mxu1 %vm1489_vm2, %v4911_v22  ;;  %v5928_v21 = vld [vmem:[%s10150_s24 + $0x3b8] sm:$0xff] }
 0xfda   :  { %5062 = vmatprep.mubr.f32.mxu0 %v7717_v0  ;;  %5110 = vmatprep.mubr.f32.mxu1 %v7717_v0  ;;  %v7494_v27 = vpack.c.bf16 %v5928_v21, %v5927_v19  ;;  %v7508_v19 = vpack.c.bf16 %v5918_v11, %v5917_v10 }
 0xfdb   :  { %7441 = vmatpush3.bf16.msra.mxu0 %v7440_v23  ;;  %v7492_v23 = vpack.c.bf16 %v5910_v16, %v5909_v15  ;;  %v7460_v16 = vpack.c.bf16 %v5878_v50, %v5877_v52 }
 0xfdc   :  { %7443 = vmatprep.subr.bf16.mxu0 %v7442_v24 }
 0xfdd   :  { %5831 = vmatmul.mubr.msk.f32.gmra.mrb[60].mxu0 %vm1489_vm2, %v4904_v32  ;;  %5839 = vmatmul.mubr.msk.f32.gmra.mrb[70].mxu1 %vm1489_vm2, %v4912_v33  ;;  %v5929_v33 = vld [vmem:[%s10150_s24 + $0x3c0] sm:$0xff] }
 0xfde   :  { %5068 = vmatprep.mubr.f32.mxu0 %v7717_v0  ;;  %5116 = vmatprep.mubr.f32.mxu1 %v7717_v0  ;;  %v5867_v0 = vld [vmem:[%s10150_s24 + $0x1d0] sm:$0xff] }
 0xfdf   :  { %7445 = vmatpush3.bf16.msra.mxu0 %v7444_v35  ;;  %v7406_v48 = vpack.c.bf16 %v5868_v45, %v5867_v0  ;;  %v5930_v35 = vld [vmem:[%s10150_s24 + $0x3c8] sm:$0xff]  ;;  %v5891_v0 = vld [vmem:[%s10150_s24 + $0x290] sm:$0xff] }
 0xfe0   :  { %7447 = vmatprep.subr.bf16.mxu0 %v7446_v37  ;;  %v7498_v45 = vpack.c.bf16 %v5930_v35, %v5929_v33  ;;  %v5898_v35 = vld [vmem:[%s10150_s24 + $0x2c8] sm:$0xff] }
 0xfe1   :  { %5832 = vmatmul.mubr.msk.f32.gmra.mrb[62].mxu0 %vm1489_vm2, %v4905_v5  ;;  %5840 = vmatmul.mubr.msk.f32.gmra.mrb[72].mxu1 %vm1489_vm2, %v4913_v39  ;;  %v5873_v5 = vld [vmem:[%s10150_s24 + $0x200] sm:$0xff]  ;;  %v5874_v39 = vld [vmem:[%s10150_s24 + $0x208] sm:$0xff] }
 0xfe2   :  { %7407 = vmatprep.subr.bf16.mxu1 %v7406_v48  ;;  %v5913_v48 = vld [vmem:[%s10150_s24 + $0x340] sm:$0xff]  ;;  %v7452_v26 = vpack.c.bf16 %v5874_v39, %v5873_v5  ;;  %v5920_v5 = vld [vmem:[%s10150_s24 + $0x378] sm:$0xff] }
 0xfe3   :  { %7449 = vmatpush3.bf16.msra.mxu0 %v7448_v3  ;;  %7409 = vmatpush3.bf16.msra.mxu1 %v7408_v51  ;;  %v5892_v51 = vld [vmem:[%s10150_s24 + $0x298] sm:$0xff]  ;;  %v7500_v41 = vpack.c.bf16 %v5914_v29, %v5913_v48  ;;  %v5881_v48 = vld [vmem:[%s10150_s24 + $0x240] sm:$0xff]  ;;  %v5882_v29 = vld [vmem:[%s10150_s24 + $0x248] sm:$0xff] }
 0xfe4   :  { %7411 = vmatprep.subr.bf16.mxu1 %v7410_v53  ;;  %7483 = vmatprep.subr.bf16.mxu0 %v7482_v63  ;;  %v7454_v59 = vpack.c.bf16 %v5892_v51, %v5891_v0  ;;  %v5934_v63 = vld [vmem:[%s10150_s24 + $0x3e8] sm:$0xff] }
 0xfe5   :  { %v7506_v6 = vpack.c.bf16 %v5934_v63, %v5933_v9  ;;  %v5887_v9 = vld [vmem:[%s10150_s24 + $0x270] sm:$0xff]  ;;  %v5888_v63 = vld [vmem:[%s10150_s24 + $0x278] sm:$0xff] }
 0xfe7   :  { %7413 = vmatpush3.bf16.msra.mxu1 %v7412_v57  ;;  %v5876_v57 = vld [vmem:[%s10150_s24 + $0x218] sm:$0xff] }
 0xfe8   :  { %7415 = vmatprep.subr.bf16.mxu1 %v7414_v44  ;;  %v7456_v1 = vpack.c.bf16 %v5876_v57, %v5875_v56  ;;  %v5883_v57 = vld [vmem:[%s10150_s24 + $0x250] sm:$0xff] }
 0xfeb   :  { %7417 = vmatpush3.bf16.msra.mxu1 %v7416_v60  ;;  %v7502_v60 = vpack.c.bf16 %v5932_v55, %v5931_v40  ;;  %v5899_v55 = vld [vmem:[%s10150_s24 + $0x2d0] sm:$0xff] }
 0xfec   :  { %7451 = vmatprep.subr.bf16.mxu1 %v7450_v62  ;;  %v5894_v62 = vld [vmem:[%s10150_s24 + $0x2a8] sm:$0xff] }
0x1098   :  { %v5028_v47 = vpop.f32.mrb[48].mxu0  ;;  %v9885_v18 = vpop.f32.mrb[58].mxu1 }
0x1099   :  { %v5030_v20 = vpop.f32.mrb[49].mxu0  ;;  %v9893_v7 = vpop.f32.mrb[59].mxu1 }
0x109a   :  { %5337 = vmatprep.mubr.f32.mxu0 %v5030_v20 }
0x109b   :  { %5338 = vmatmul.mubr.f32.vlgmr.msra.gmra.mrb[64].mxu0 %v5028_v47  ;;  %v7504_v47 = vpack.c.bf16 %v5916_v38, %v5915_v54  ;;  %v5886_v54 = vld [vmem:[%s10150_s24 + $0x268] sm:$0xff]  ;;  %v5903_v38 = vld [vmem:[%s10150_s24 + $0x2f0] sm:$0xff] }
0x109c   :  { %v5034_v12 = vpop.f32.mrb[50].mxu0  ;;  %7485 = vmatpush3.bf16.msra.mxu0 %v7484_v2  ;;  %v9901_v14 = vpop.f32.mrb[60].mxu1 }
0x109d   :  { %v5036_v30 = vpop.f32.mrb[51].mxu0  ;;  %7487 = vmatprep.subr.bf16.mxu0 %v7486_v4  ;;  %v9909_v17 = vpop.f32.mrb[61].mxu1  ;;  %v7458_v4 = vpack.c.bf16 %v5894_v62, %v5893_v46 }
0x109e   :  { %5342 = vmatprep.mubr.f32.mxu0 %v5036_v30  ;;  %v5935_v30 = vld [vmem:[%s10150_s24 + $0x3f0] sm:$0xff] }
0x109f   :  { %5343 = vmatmul.mubr.f32.gmra.mrb[66].mxu0 %v5034_v12 }
0x10a0   :  { %v5040_v22 = vpop.f32.mrb[52].mxu0  ;;  %7489 = vmatpush3.bf16.msra.mxu0 %v7488_v13  ;;  %v9917_v24 = vpop.f32.mrb[62].mxu1  ;;  %v5896_v13 = vld [vmem:[%s10150_s24 + $0x2b8] sm:$0xff] }
0x10a1   :  { %v5042_v25 = vpop.f32.mrb[53].mxu0  ;;  %7491 = vmatprep.subr.bf16.mxu0 %v7490_v34  ;;  %v9925_v32 = vpop.f32.mrb[63].mxu1  ;;  %v5936_v34 = vld [vmem:[%s10150_s24 + $0x3f8] sm:$0xff] }
0x10a2   :  { %5347 = vmatprep.mubr.f32.mxu0 %v5042_v25  ;;  %v5879_v25 = vld [vmem:[%s10150_s24 + $0x230] sm:$0xff]  ;;  %v7510_v31 = vpack.c.bf16 %v5936_v34, %v5935_v30 }
0x10a3   :  { %5348 = vmatmul.mubr.f32.gmra.mrb[68].mxu0 %v5040_v22 }
0x10a4   :  { %v5046_v37 = vpop.f32.mrb[54].mxu0  ;;  %7493 = vmatpush3.bf16.msra.mxu0 %v7492_v23  ;;  %v9939_v42 = vpop.f32.mrb[64].mxu1  ;;  %v7462_v23 = vpack.c.bf16 %v5896_v13, %v5895_v8 }
0x10a5   :  { %v5048_v3 = vpop.f32.mrb[55].mxu0  ;;  %7495 = vmatprep.subr.bf16.mxu0 %v7494_v27  ;;  %v9950_v49 = vpop.f32.mrb[65].mxu1  ;;  %v5880_v27 = vld [vmem:[%s10150_s24 + $0x238] sm:$0xff] }
0x10a6   :  { %5352 = vmatprep.mubr.f32.mxu0 %v5048_v3 }
0x10a7   :  { %5353 = vmatmul.mubr.f32.gmra.mrb[70].mxu0 %v5046_v37  ;;  %v5919_v37 = vld [vmem:[%s10150_s24 + $0x370] sm:$0xff] }
0x10a8   :  { %v5052_v53 = vpop.f32.mrb[56].mxu0  ;;  %7497 = vmatpush3.bf16.msra.mxu0 %v7496_v43  ;;  %v9967_v58 = vpop.f32.mrb[66].mxu1  ;;  %v7464_v43 = vpack.c.bf16 %v5880_v27, %v5879_v25  ;;  %v7512_v51 = vpack.c.bf16 %v5920_v5, %v5919_v37 }
0x10a9   :  { %v5054_v44 = vpop.f32.mrb[57].mxu0  ;;  %7499 = vmatprep.subr.bf16.mxu0 %v7498_v45  ;;  %v5102_v61 = vpop.f32.mrb[67].mxu1  ;;  %v7466_v45 = vpack.c.bf16 %v5898_v35, %v5897_v28 }
0x10aa   :  { %5252 = vmatprep.mubr.f32.mxu1 %v5054_v44  ;;  %5577 = vmatprep.mubr.f32.mxu0 %v5102_v61  ;;  %v5901_v44 = vld [vmem:[%s10150_s24 + $0x2e0] sm:$0xff]  ;;  %v5904_v61 = vld [vmem:[%s10150_s24 + $0x2f8] sm:$0xff] }
0x10ab   :  { %5253 = vmatmul.mubr.f32.vlgmr.msra.gmra.mrb[74].mxu1 %v5052_v53  ;;  %v5900_v53 = vld [vmem:[%s10150_s24 + $0x2d8] sm:$0xff]  ;;  %v7478_v62 = vpack.c.bf16 %v5904_v61, %v5903_v38 }
0x10ac   :  { %7453 = vmatpush3.bf16.msra.mxu1 %v7452_v26  ;;  %v5058_v36 = vpop.f32.mrb[58].mxu0  ;;  %7501 = vmatpush3.bf16.msra.mxu0 %v7500_v41  ;;  %v9993_v2 = vpop.f32.mrb[68].mxu1  ;;  %v7468_v26 = vpack.c.bf16 %v5882_v29, %v5881_v48  ;;  %v7470_v56 = vpack.c.bf16 %v5900_v53, %v5899_v55  ;;  %v5884_v41 = vld [vmem:[%s10150_s24 + $0x258] sm:$0xff] }
0x10ad   :  { %v5060_v20 = vpop.f32.mrb[59].mxu0  ;;  %7455 = vmatprep.subr.bf16.mxu1 %v7454_v59  ;;  %7503 = vmatprep.subr.bf16.mxu0 %v7502_v60  ;;  %v5108_v12 = vpop.f32.mrb[69].mxu1  ;;  %v5902_v59 = vld [vmem:[%s10150_s24 + $0x2e8] sm:$0xff]  ;;  %v5885_v60 = vld [vmem:[%s10150_s24 + $0x260] sm:$0xff]  ;;  %s7718_s24 = smov [#allocation8]  }
0x10ae   :  { %5257 = vmatprep.mubr.f32.mxu1 %v5060_v20  ;;  %v7474_v46 = vpack.c.bf16 %v5902_v59, %v5901_v44  ;;  %s5652_s30 = sshll.u32 %s7718_s24, 4  ;;  %s5653_s30 = int_to_ptr.vmem [resolvable:$true] %s5652_s30 }
0x10af   :  { %5258 = vmatmul.mubr.f32.gmra.mrb[76].mxu1 %v5058_v36  ;;  %v7480_v36 = vpack.c.bf16 %v5888_v63, %v5887_v9  ;;  %s7658_s15 = scalar_lea.vmem %s5653_s30, 32  ;;  %p7663_p11 = scmp.lt.s32.totalorder %s5653_s30, %s5653_s30 }
0x10b0   :  { %7457 = vmatpush3.bf16.msra.mxu1 %v7456_v1  ;;  %v5064_v15 = vpop.f32.mrb[60].mxu0  ;;  %7505 = vmatpush3.bf16.msra.mxu0 %v7504_v47  ;;  %v5112_v21 = vpop.f32.mrb[70].mxu1  ;;  %p7659_p10 = scmp.ne.s32.totalorder %s5653_s30, %s7658_s15  ;;  %p7664_p12 = scmp.lt.s32.totalorder %s7658_s15, %s7658_s15 }
0x10b1   :  { %v5066_v22 = vpop.f32.mrb[61].mxu0  ;;  %7459 = vmatprep.subr.bf16.mxu1 %v7458_v4  ;;  %7507 = vmatprep.subr.bf16.mxu0 %v7506_v6  ;;  %v5114_v33 = vpop.f32.mrb[71].mxu1 }
0x10b2   :  { %5262 = vmatprep.mubr.f32.mxu1 %v5066_v22  ;;  %p7665_p13 = por %p7664_p12, %p7663_p11 }
0x10b3   :  { %5263 = vmatmul.mubr.f32.gmra.mrb[78].mxu1 %v5064_v15 }
0x10b4   :  { %7461 = vmatpush3.bf16.msra.mxu1 %v7460_v16  ;;  %v5070_v39 = vpop.f32.mrb[62].mxu0  ;;  %7509 = vmatpush3.bf16.msra.mxu0 %v7508_v19  ;;  %v5118_v3 = vpop.f32.mrb[72].mxu1  ;;  %p7666_p0 = pnand %p7665_p13, %p7659_p10 }
0x10b5   :  { %v5072_v0 = vpop.f32.mrb[63].mxu0  ;;  %7463 = vmatprep.subr.bf16.mxu1 %v7462_v23  ;;  %7511 = vmatprep.subr.bf16.mxu0 %v7510_v31  ;;  %v5120_v40 = vpop.f32.mrb[73].mxu1 }
0x10b6   :  { %5267 = vmatprep.mubr.f32.mxu1 %v5072_v0 }
0x10b7   :  { %5268 = vmatmul.mubr.f32.gmra.mrb[80].mxu1 %v5070_v39 }
0x10b8   :  { %7465 = vmatpush3.bf16.msra.mxu1 %v7464_v43  ;;  %5455 = vmatprep.mubr.f32.mxu1 %v9893_v7  ;;  %v7472_v7 = vpack.c.bf16 %v5884_v41, %v5883_v57 }
0x10b9   :  { %7467 = vmatprep.subr.bf16.mxu1 %v7466_v45  ;;  %7513 = vmatpush3.bf16.msra.mxu0 %v7512_v51 }
0x10bc   :  { %7469 = vmatpush3.bf16.msra.mxu1 %v7468_v26  ;;  %5578 = vmatmul.mubr.f32.vlgmr.msra.gmra.mrb[72].mxu0 %v9967_v58  ;;  %v7476_v58 = vpack.c.bf16 %v5886_v54, %v5885_v60 }
0x10bd   :  { %7471 = vmatprep.subr.bf16.mxu1 %v7470_v56  ;;  %5582 = vmatprep.mubr.f32.mxu0 %v5108_v12 }
0x10c0   :  { %7473 = vmatpush3.bf16.msra.mxu1 %v7472_v7  ;;  %5583 = vmatmul.mubr.f32.gmra.mrb[74].mxu0 %v9993_v2 }
0x10c1   :  { %7475 = vmatprep.subr.bf16.mxu1 %v7474_v46  ;;  %5587 = vmatprep.mubr.f32.mxu0 %v5114_v33 }
0x10c4   :  { %7477 = vmatpush3.bf16.msra.mxu1 %v7476_v58  ;;  %5588 = vmatmul.mubr.f32.gmra.mrb[76].mxu0 %v5112_v21 }
0x10c5   :  { %7479 = vmatprep.subr.bf16.mxu1 %v7478_v62  ;;  %5592 = vmatprep.mubr.f32.mxu0 %v5120_v40 }
0x10c8   :  { %7481 = vmatpush3.bf16.msra.mxu1 %v7480_v36  ;;  %5593 = vmatmul.mubr.f32.gmra.mrb[78].mxu0 %v5118_v3 }
0x10cb   :  { %5456 = vmatmul.mubr.f32.vlgmr.msra.gmra.mrb[82].mxu1 %v9885_v18 }
0x10cc   :  { %5460 = vmatprep.mubr.f32.mxu1 %v9909_v17 }
0x10cf   :  { %5461 = vmatmul.mubr.f32.gmra.mrb[84].mxu1 %v9901_v14 }
0x10d0   :  { %5465 = vmatprep.mubr.f32.mxu1 %v9925_v32 }
0x10d3   :  { %5466 = vmatmul.mubr.f32.gmra.mrb[86].mxu1 %v9917_v24 }
0x10d4   :  { %5470 = vmatprep.mubr.f32.mxu1 %v9950_v49 }
0x10d7   :  { %5471 = vmatmul.mubr.f32.gmra.mrb[88].mxu1 %v9939_v42 }
0x10d8   :  { %7669 = shalt.err (!%p7666_p0)
}
0x10d9   :  { %s7670_s12 = scalar_lea.hbm %s10153_s27, 32 }
0x10da   :  { %p7671_p1 = scmp.ne.s32.totalorder %s10153_s27, %s7670_s12  ;;  %p7674_p2 = scmp.lt.u32.totalorder %s7670_s12, %s10153_s27 }
0x10dc   :  { %p7676_p3 = pnand %p7674_p2, %p7671_p1 }
0x10de   :  { %7679 = shalt.err (!%p7676_p3)
}
0x10df   :  { %5655 = dma.vmem_to_hbm [thread:$0]  %s5653_s30, 32, %s10153_s27, [#allocation4]  }
0x10e0   :  { %s7680_s10 = scalar_lea.vmem %s5663_s20, 32  ;;  %p7685_p5 = scmp.lt.s32.totalorder %s5663_s20, %s5663_s20 }
0x10e1   :  { %p7681_p4 = scmp.ne.s32.totalorder %s5663_s20, %s7680_s10  ;;  %p7686_p6 = scmp.lt.s32.totalorder %s7680_s10, %s7680_s10 }
0x10e3   :  { %p7687_p7 = por %p7686_p6, %p7685_p5 }
0x10e5   :  { %p7688_p8 = pnand %p7687_p7, %p7681_p4 }
0x10e7   :  { %7691 = shalt.err (!%p7688_p8)
}
0x10e8   :  { %s7692_s6 = scalar_lea.hbm %s10154_s28, 32 }
0x10e9   :  { %p7693_p9 = scmp.ne.s32.totalorder %s10154_s28, %s7692_s6  ;;  %p7696_p10 = scmp.lt.u32.totalorder %s7692_s6, %s10154_s28 }
0x10eb   :  { %p7698_p11 = pnand %p7696_p10, %p7693_p9 }
0x10ed   :  { %7701 = shalt.err (!%p7698_p11)
}
0x10ee   :  { %5665 = dma.vmem_to_hbm [thread:$0]  %s5663_s20, 32, %s10154_s28, [#allocation10]   ;;  %v5937_v55 = vld [vmem:[%s10151_s25] ss:$0 sm:$0xff] }
0x10ef   :  { %s10194_s5 = sld [smem:[#allocation28_spill]] }
0x116e   :  { %v6018_v18 = vpop.f32.mrb[64].mxu0 }
0x116f   :  { %v6019_v14 = vpop.f32.mrb[65].mxu0 }
0x1170   :  { %v6020_v17 = vadd.f32 %v6019_v14, %v6018_v18 }
0x1172   :  { %v6021_v24 = vpop.f32.mrb[66].mxu0 }
0x1173   :  { %v6022_v32 = vpop.f32.mrb[67].mxu0 }
0x1174   :  { %v6023_v42 = vadd.f32 %v6022_v32, %v6021_v24 }
0x1176   :  { %v6024_v49 = vpop.f32.mrb[68].mxu0 }
0x1177   :  { %v6025_v1 = vpop.f32.mrb[69].mxu0 }
0x1178   :  { %v6026_v52 = vadd.f32 %v6025_v1, %v6024_v49 }
0x117a   :  { %v6027_v50 = vpop.f32.mrb[70].mxu0 }
0x117b   :  { %v6028_v47 = vpop.f32.mrb[71].mxu0 }
0x117c   :  { %v6029_v2 = vadd.f32 %v6028_v47, %v6027_v50 }
0x117e   :  { %v5974_v20 = vpop.f32.mrb[74].mxu1 }
0x117f   :  { %v5975_v4 = vpop.f32.mrb[75].mxu1 }
0x1180   :  { %v5976_v8 = vadd.f32 %v5975_v4, %v5974_v20 }
0x1182   :  { %v5340_v6 = vadd.f32 %v6020_v17, %v5976_v8  ;;  %v5977_v10 = vpop.f32.mrb[76].mxu1 }
0x1183   :  { %v5978_v11 = vpop.f32.mrb[77].mxu1 }
0x1184   :  { %v5979_v12 = vadd.f32 %v5978_v11, %v5977_v10 }
0x1186   :  { %v5345_v13 = vadd.f32 %v6023_v42, %v5979_v12  ;;  %v5980_v30 = vpop.f32.mrb[78].mxu1 }
0x1187   :  { %v5981_v34 = vpop.f32.mrb[79].mxu1 }
0x1188   :  { %v5982_v15 = vadd.f32 %v5981_v34, %v5980_v30 }
0x118a   :  { %v5350_v16 = vadd.f32 %v6026_v52, %v5982_v15  ;;  %v5983_v19 = vpop.f32.mrb[80].mxu1 }
0x118b   :  { %v5984_v21 = vpop.f32.mrb[81].mxu1 }
0x118c   :  { %v5985_v22 = vadd.f32 %v5984_v21, %v5983_v19 }
0x118e   :  { %v5355_v23 = vadd.f32 %v6029_v2, %v5985_v22 }
0x118f   :  { %v6106_v25 = vpop.f32.mrb[72].mxu0 }
0x1190   :  { %v6107_v27 = vpop.f32.mrb[73].mxu0 }
0x1191   :  { %v6108_v28 = vadd.f32 %v6107_v27, %v6106_v25 }
0x1193   :  { %v6109_v31 = vpop.f32.mrb[74].mxu0 }
0x1194   :  { %v6110_v33 = vpop.f32.mrb[75].mxu0 }
0x1195   :  { %v6111_v35 = vadd.f32 %v6110_v33, %v6109_v31 }
0x1197   :  { %v6112_v37 = vpop.f32.mrb[76].mxu0 }
0x1198   :  { %v6113_v5 = vpop.f32.mrb[77].mxu0 }
0x1199   :  { %v6114_v39 = vadd.f32 %v6113_v5, %v6112_v37 }
0x119b   :  { %v6115_v43 = vpop.f32.mrb[78].mxu0 }
0x119c   :  { %v6116_v3 = vpop.f32.mrb[79].mxu0 }
0x119d   :  { %v6117_v0 = vadd.f32 %v6116_v3, %v6115_v43 }
0x119e   :  { %v6062_v45 = vpop.f32.mrb[82].mxu1 }
0x119f   :  { %v6063_v48 = vpop.f32.mrb[83].mxu1 }
0x11a0   :  { %v6064_v29 = vadd.f32 %v6063_v48, %v6062_v45 }
0x11a2   :  { %v5476_v51 = vadd.f32 %v6064_v29, %v5340_v6  ;;  %v6065_v40 = vpop.f32.mrb[84].mxu1 }
0x11a3   :  { %v6066_v53 = vpop.f32.mrb[85].mxu1 }
0x11a4   :  { %v5598_v26 = vadd.f32 %v6108_v28, %v5476_v51  ;;  %v6067_v56 = vadd.f32 %v6066_v53, %v6065_v40 }
0x11a6   :  { %v5609_v57 = vadd.f32 %v5937_v55, %v5598_v26  ;;  %v5477_v41 = vadd.f32 %v6067_v56, %v5345_v13  ;;  %v6068_v44 = vpop.f32.mrb[86].mxu1 }
0x11a7   :  { %v6069_v59 = vpop.f32.mrb[87].mxu1 }
0x11a8   :  { %v5938_v7 = vmul.f32 -1.442695, %v5609_v57  ;;  %v5599_v46 = vadd.f32 %v6111_v35, %v5477_v41  ;;  %v6070_v60 = vadd.f32 %v6069_v59, %v6068_v44 }
0x11aa   :  { %7576 = vpow2.f32 %v5938_v7  ;;  %v5610_v54 = vadd.f32 %v5937_v55, %v5599_v46  ;;  %v5478_v38 = vadd.f32 %v6070_v60, %v5350_v16  ;;  %v6071_v61 = vpop.f32.mrb[88].mxu1 }
0x11ab   :  { %v6072_v58 = vpop.f32.mrb[89].mxu1 }
0x11ac   :  { %v5939_v62 = vmul.f32 -1.442695, %v5610_v54  ;;  %v5600_v9 = vadd.f32 %v6114_v39, %v5478_v38  ;;  %v6073_v63 = vadd.f32 %v6072_v58, %v6071_v61 }
0x11ae   :  { %7578 = vpow2.f32 %v5939_v62  ;;  %v5611_v36 = vadd.f32 %v5937_v55, %v5600_v9  ;;  %v5479_v18 = vadd.f32 %v6073_v63, %v5355_v23 }
0x11b0   :  { %v5940_v14 = vmul.f32 -1.442695, %v5611_v36  ;;  %v5601_v17 = vadd.f32 %v6117_v0, %v5479_v18 }
0x11b2   :  { %7580 = vpow2.f32 %v5940_v14  ;;  %v5612_v24 = vadd.f32 %v5937_v55, %v5601_v17 }
0x11b4   :  { %v7577_v32 = vpop.eup %7576  ;;  %v5941_v42 = vmul.f32 -1.442695, %v5612_v24 }
0x11b5   :  { %v5625_v49 = vadd.f32 1.0, %v7577_v32 }
0x11b6   :  { %7582 = vpow2.f32 %v5941_v42 }
0x11b7   :  { %7584 = vrcp.f32 %v5625_v49 }
0x11b8   :  { %v7579_v1 = vpop.eup %7578 }
0x11b9   :  { %v5626_v52 = vadd.f32 1.0, %v7579_v1 }
0x11bb   :  { %7586 = vrcp.f32 %v5626_v52 }
0x11bc   :  { %v7581_v50 = vpop.eup %7580 }
0x11bd   :  { %v5627_v47 = vadd.f32 1.0, %v7581_v50 }
0x11bf   :  { %7588 = vrcp.f32 %v5627_v47 }
0x11c0   :  { %v7583_v2 = vpop.eup %7582 }
0x11c1   :  { %v7585_v20 = vpop.eup %7584  ;;  %v5628_v4 = vadd.f32 1.0, %v7583_v2 }
0x11c2   :  { %5637 = vst.msk [vmem:[%s10194_s5] sm:$0xff] %vm181_vm0, %v7585_v20 }
0x11c3   :  { %7590 = vrcp.f32 %v5628_v4 }
0x11c5   :  { %v7587_v8 = vpop.eup %7586 }
0x11c6   :  { %5638 = vst.msk [vmem:[%s10194_s5 + $0x8] sm:$0xff] %vm181_vm0, %v7587_v8 }
0x11c9   :  { %v7589_v6 = vpop.eup %7588 }
0x11ca   :  { %5639 = vst.msk [vmem:[%s10194_s5 + $0x10] sm:$0xff] %vm181_vm0, %v7589_v6 }
0x11cd   :  { %v7591_v10 = vpop.eup %7590 }
0x11ce   :  { %5640 = vst.msk [vmem:[%s10194_s5 + $0x18] sm:$0xff] %vm181_vm0, %v7591_v10 }
0x11cf   :  { %7706 = dma.done.wait [#allocation4], 32  }
0x11d0   :  { %7707 = vsyncadd [#allocation4], 4294967264 }
0x11d1   :  { %7708 = dma.done.wait [#allocation10], 32  }
0x11d2   :  { %7709 = vsyncadd [#allocation10], 4294967264 }
0x11d3   :  { %5674 = vsyncpa [#allocation3], 1 }
0x11d4   :  { %5675 = vsyncpa [#allocation6], 1 }
0x11d5   :  { %5676 = vsyncpa [#allocation4], 1 }
0x11d6   :  { %5677 = vsyncpa [#allocation10], 1 }

</bundles_post_ra>
